<compile_context>
chip_gen: v6e
topology: v6e:2x2x1
jax: 0.10.0
libtpu: 0.0.40
codegen_flags: <defaults>
</compile_context>

<pallas_src>
import jax
import jax.numpy as jnp
from jax.experimental import pallas as pl
from jax.experimental.pallas import tpu as pltpu

NUM_LAYERS = 2  # fixed, as in the PyTorch module


# ---------------------------------------------------------------------------
# Batched matmul + bias kernel (used for the hoisted input projection and the
# fc head). Whole operands are VMEM-resident; fine for the small test shapes.
# ---------------------------------------------------------------------------
def _matmul_bias_kernel(x_ref, w_ref, b_ref, o_ref):
    o_ref[...] = (jnp.dot(x_ref[...], w_ref[...],
                          preferred_element_type=jnp.float32)
                  + b_ref[...]).astype(o_ref.dtype)


def _matmul_bias(x2d, w, b, out_dtype):
    M, _ = x2d.shape
    N = w.shape[1]
    vmem = pl.BlockSpec(memory_space=pltpu.MemorySpace.VMEM)
    return pl.pallas_call(
        _matmul_bias_kernel,
        out_shape=jax.ShapeDtypeStruct((M, N), out_dtype),
        in_specs=[vmem, vmem, vmem],
        out_specs=vmem,
    )(x2d, w, b)


# ---------------------------------------------------------------------------
# Recurrence kernel: 2-layer LSTM over T timesteps in one kernel invocation.
#   gx_ref   : (T, B, 4H)  precomputed layer-0 input projection (+ bias), f32
#   whh0_ref : (H, 4H)     layer-0 recurrent weights (transposed, gate-permuted)
#   w1_ref   : (2H, 4H)    layer-1 fused [Wih1; Whh1] (transposed, gate-permuted)
#   b1_ref   : (1, 4H)     layer-1 combined bias
#   h0_ref/c0_ref : (2, B, H) initial states
# Outputs: out_ref (T, B, H) top-layer hidden per step, hn/cn (2, B, H).
# ---------------------------------------------------------------------------
def _lstm_recurrence_kernel(gx_ref, whh0_ref, w1_ref, b1_ref, h0_ref, c0_ref,
                            out_ref, hn_ref, cn_ref, h_sc, c_sc):
    T = gx_ref.shape[0]
    H = whh0_ref.shape[0]

    h_sc[...] = h0_ref[...].astype(jnp.float32)
    c_sc[...] = c0_ref[...].astype(jnp.float32)

    def gates_to_hc(gates, c_prev):
        # Gate layout (i, f, o, g): one sigmoid over a contiguous (B, 3H) slice
        # and one tanh over (B, H) instead of 3 separate sigmoid launches.
        ifo = jax.nn.sigmoid(gates[:, :3 * H])
        g = jnp.tanh(gates[:, 3 * H:])
        c = ifo[:, H:2 * H] * c_prev + ifo[:, :H] * g
        h = ifo[:, 2 * H:3 * H] * jnp.tanh(c)
        return h, c

    def step(t, carry):
        # Layer 0: x-projection hoisted out of the loop; only the recurrent
        # matmul remains on the sequential critical path.
        gates0 = gx_ref[t] + jnp.dot(h_sc[0], whh0_ref[...],
                                     preferred_element_type=jnp.float32)
        h0n, c0n = gates_to_hc(gates0, c_sc[0])

        # TODO(synk): nn.LSTM's inter-layer dropout(p=0.1) is training-mode
        # only; eval-mode (identity) semantics are implemented here.

        # Layer 1: single fused matmul on concat([h0_t, h1_{t-1}]).
        xh = jnp.concatenate([h0n, h_sc[1]], axis=-1)            # (B, 2H)
        gates1 = (jnp.dot(xh, w1_ref[...],
                          preferred_element_type=jnp.float32) + b1_ref[...])
        h1n, c1n = gates_to_hc(gates1, c_sc[1])

        h_sc[0] = h0n
        c_sc[0] = c0n
        h_sc[1] = h1n
        c_sc[1] = c1n
        out_ref[t] = h1n.astype(out_ref.dtype)
        return carry

    jax.lax.fori_loop(0, T, step, 0, unroll=True)

    hn_ref[...] = h_sc[...].astype(hn_ref.dtype)
    cn_ref[...] = c_sc[...].astype(cn_ref.dtype)


# ---------------------------------------------------------------------------
# Wrapper: full Decoder forward.
# ---------------------------------------------------------------------------
def decoder_forward(params, x, hidden):
    """x: (B, T, input_size); hidden = (h0, c0) each (num_layers, B, H)."""
    h0, c0 = hidden
    B, T, I = x.shape
    H = params["whh0"].shape[0]
    O = params["wfc"].shape[1]
    vmem = pl.BlockSpec(memory_space=pltpu.MemorySpace.VMEM)

    x_tm = jnp.transpose(x, (1, 0, 2))                      # (T, B, I)

    # Hoisted layer-0 input projection over ALL timesteps: one big MXU matmul.
    gx = _matmul_bias(x_tm.reshape(T * B, I), params["wih0"], params["b0"],
                      jnp.float32).reshape(T, B, 4 * H)

    out_h, h_n, c_n = pl.pallas_call(
        _lstm_recurrence_kernel,
        out_shape=(
            jax.ShapeDtypeStruct((T, B, H), x.dtype),
            jax.ShapeDtypeStruct((NUM_LAYERS, B, H), x.dtype),
            jax.ShapeDtypeStruct((NUM_LAYERS, B, H), x.dtype),
        ),
        in_specs=[vmem] * 6,
        out_specs=(vmem, vmem, vmem),
        scratch_shapes=[
            pltpu.VMEM((NUM_LAYERS, B, H), jnp.float32),    # h carry
            pltpu.VMEM((NUM_LAYERS, B, H), jnp.float32),    # c carry
        ],
    )(gx, params["whh0"], params["w1"], params["b1"], h0, c0)

    # Hoisted fc head over ALL timesteps: one (T*B, H) @ (H, O) MXU matmul.
    pred = _matmul_bias(out_h.reshape(T * B, H), params["wfc"], params["bfc"],
                        x.dtype).reshape(T, B, O)
    pred = jnp.transpose(pred, (1, 0, 2))                   # batch_first
    return pred, (h_n, c_n)


# ---------------------------------------------------------------------------
# Parameter construction: PyTorch-shaped raw params + kernel layout
# (gate order permuted (i,f,g,o)->(i,f,o,g), weights transposed, layer-1
#  input/recurrent weights stacked, biases combined).
# ---------------------------------------------------------------------------
def init_params(key, input_size, hidden_size, output_size):
    H = hidden_size
    bound = 1.0 / jnp.sqrt(jnp.float32(H))
    keys = jax.random.split(key, 10)
    u = lambda kk, shape: jax.random.uniform(kk, shape, jnp.float32, -bound, bound)

    raw = {
        "wih_l0": u(keys[0], (4 * H, input_size)),
        "whh_l0": u(keys[1], (4 * H, H)),
        "bih_l0": u(keys[2], (4 * H,)),
        "bhh_l0": u(keys[3], (4 * H,)),
        "wih_l1": u(keys[4], (4 * H, H)),
        "whh_l1": u(keys[5], (4 * H, H)),
        "bih_l1": u(keys[6], (4 * H,)),
        "bhh_l1": u(keys[7], (4 * H,)),
        "w_fc": u(keys[8], (output_size, H)),
        "b_fc": u(keys[9], (output_size,)),
    }

    def reorder(w):  # permute gate blocks (i, f, g, o) -> (i, f, o, g) on axis 0
        return jnp.concatenate([w[:H], w[H:2 * H], w[3 * H:4 * H],
                                w[2 * H:3 * H]], axis=0)

    params = {
        "wih0": reorder(raw["wih_l0"]).T,                               # (I, 4H)
        "whh0": reorder(raw["whh_l0"]).T,                               # (H, 4H)
        "b0": reorder(raw["bih_l0"] + raw["bhh_l0"])[None, :],          # (1, 4H)
        "w1": jnp.concatenate([reorder(raw["wih_l1"]).T,
                               reorder(raw["whh_l1"]).T], axis=0),      # (2H, 4H)
        "b1": reorder(raw["bih_l1"] + raw["bhh_l1"])[None, :],          # (1, 4H)
        "wfc": raw["w_fc"].T,                                           # (H, O)
        "bfc": raw["b_fc"][None, :],                                    # (1, O)
    }
    return params, raw


# ---------------------------------------------------------------------------
# Pure-JAX reference using the RAW PyTorch-layout weights (gate order i,f,g,o),
# so the kernel's gate permutation / weight fusion is checked against the
# original nn.LSTM + nn.Linear semantics.
# ---------------------------------------------------------------------------
def decoder_ref(raw, x, hidden):
    h0, c0 = hidden

    def cell(x_t, h_prev, c_prev, wih, whh, b):
        gates = x_t @ wih.T + h_prev @ whh.T + b
        i, f, g, o = jnp.split(gates, 4, axis=-1)
        c = jax.nn.sigmoid(f) * c_prev + jax.nn.sigmoid(i) * jnp.tanh(g)
        h = jax.nn.sigmoid(o) * jnp.tanh(c)
        return h, c

    b0 = raw["bih_l0"] + raw["bhh_l0"]
    b1 = raw["bih_l1"] + raw["bhh_l1"]

    def step(carry, x_t):
        h0_, c0_, h1_, c1_ = carry
        h0n, c0n = cell(x_t, h0_, c0_, raw["wih_l0"], raw["whh_l0"], b0)
        h1n, c1n = cell(h0n, h1_, c1_, raw["wih_l1"], raw["whh_l1"], b1)
        return (h0n, c0n, h1n, c1n), h1n

    x_tm = jnp.transpose(x, (1, 0, 2))
    carry, outs = jax.lax.scan(step, (h0[0], c0[0], h0[1], c0[1]), x_tm)
    out = jnp.transpose(outs, (1, 0, 2))
    pred = out @ raw["w_fc"].T + raw["b_fc"]
    h_n = jnp.stack([carry[0], carry[2]])
    c_n = jnp.stack([carry[1], carry[3]])
    return pred, (h_n, c_n)


if __name__ == "__main__":
    # Small shapes consistent with the module's forward (lane-aligned to 128).
    B, T = 2, 8
    INPUT_SIZE, HIDDEN_SIZE, OUTPUT_SIZE = 128, 128, 128

    key = jax.random.PRNGKey(0)
    kp, kx, kh, kc = jax.random.split(key, 4)
    params, raw = init_params(kp, INPUT_SIZE, HIDDEN_SIZE, OUTPUT_SIZE)
    x = jax.random.normal(kx, (B, T, INPUT_SIZE), jnp.float32)
    h0 = jax.random.normal(kh, (NUM_LAYERS, B, HIDDEN_SIZE), jnp.float32)
    c0 = jax.random.normal(kc, (NUM_LAYERS, B, HIDDEN_SIZE), jnp.float32)

    pred, (h_n, c_n) = jax.jit(decoder_forward)(params, x, (h0, c0))
    jax.block_until_ready((pred, h_n, c_n))

    pred_r, (h_r, c_r) = decoder_ref(raw, x, (h0, c0))
    assert pred.shape == (B, T, OUTPUT_SIZE)
    assert h_n.shape == (NUM_LAYERS, B, HIDDEN_SIZE)
    assert c_n.shape == (NUM_LAYERS, B, HIDDEN_SIZE)
    assert jnp.allclose(pred, pred_r, atol=1e-4, rtol=1e-4)
    assert jnp.allclose(h_n, h_r, atol=1e-4, rtol=1e-4)
    assert jnp.allclose(c_n, c_r, atol=1e-4, rtol=1e-4)

    print("KERNEL_OK")
</pallas_src>

<mosaic_0001>
module attributes {stable_mosaic.version = 11 : i64} {
  func.func @_matmul_bias_kernel(%arg0: memref<16x128xf32, #tpu.memory_space<vmem>>, %arg1: memref<128x512xf32, #tpu.memory_space<vmem>>, %arg2: memref<1x512xf32, #tpu.memory_space<vmem>>, %arg3: memref<16x512xf32, #tpu.memory_space<vmem>>) attributes {dimension_semantics = [], scalar_prefetch = 0 : i64, scratch_operands = 0 : i64, tpu.core_type = #tpu.core_type<tc>} {
    %c0 = arith.constant 0 : index
    %c0_0 = arith.constant 0 : index
    %0 = vector.load %arg0[%c0, %c0_0] : memref<16x128xf32, #tpu.memory_space<vmem>>, vector<16x128xf32>
    %c0_1 = arith.constant 0 : index
    %c0_2 = arith.constant 0 : index
    %1 = vector.load %arg1[%c0_1, %c0_2] : memref<128x512xf32, #tpu.memory_space<vmem>>, vector<128x512xf32>
    %cst = arith.constant dense<0.000000e+00> : vector<16x512xf32>
    %2 = tpu.matmul %0, %1, %cst {dimension_numbers = #tpu.dot_dimension_numbers<[1], [0], [0], [1], [0, 0, 1, 1], [], []>} : vector<16x128xf32>, vector<128x512xf32>, vector<16x512xf32> -> vector<16x512xf32>
    %c0_3 = arith.constant 0 : index
    %c0_4 = arith.constant 0 : index
    %3 = vector.load %arg2[%c0_3, %c0_4] : memref<1x512xf32, #tpu.memory_space<vmem>>, vector<1x512xf32>
    %4 = vector.broadcast %3 : vector<1x512xf32> to vector<16x512xf32>
    %5 = arith.addf %2, %4 : vector<16x512xf32>
    %c0_5 = arith.constant 0 : index
    %c0_6 = arith.constant 0 : index
    %6 = vector.load %arg3[%c0_5, %c0_6] : memref<16x512xf32, #tpu.memory_space<vmem>>, vector<16x512xf32>
    tpu.vector_store %arg3[%c0_5, %c0_6], %5 {strides = array<i32>} : memref<16x512xf32, #tpu.memory_space<vmem>>, vector<16x512xf32>,
    return
  }
}

module attributes {stable_mosaic.version = 11 : i64} {
  func.func @_lstm_recurrence_kernel(%arg0: memref<8x2x512xf32, #tpu.memory_space<vmem>>, %arg1: memref<128x512xf32, #tpu.memory_space<vmem>>, %arg2: memref<256x512xf32, #tpu.memory_space<vmem>>, %arg3: memref<1x512xf32, #tpu.memory_space<vmem>>, %arg4: memref<2x2x128xf32, #tpu.memory_space<vmem>>, %arg5: memref<2x2x128xf32, #tpu.memory_space<vmem>>, %arg6: memref<8x2x128xf32, #tpu.memory_space<vmem>>, %arg7: memref<2x2x128xf32, #tpu.memory_space<vmem>>, %arg8: memref<2x2x128xf32, #tpu.memory_space<vmem>>, %arg9: memref<2x2x128xf32, #tpu.memory_space<vmem>>, %arg10: memref<2x2x128xf32, #tpu.memory_space<vmem>>) attributes {dimension_semantics = [], scalar_prefetch = 0 : i64, scratch_operands = 2 : i64, tpu.core_type = #tpu.core_type<tc>} {
    %c0 = arith.constant 0 : index
    %c0_0 = arith.constant 0 : index
    %c0_1 = arith.constant 0 : index
    %0 = vector.load %arg4[%c0, %c0_0, %c0_1] : memref<2x2x128xf32, #tpu.memory_space<vmem>>, vector<2x2x128xf32>
    %c0_2 = arith.constant 0 : index
    %c0_3 = arith.constant 0 : index
    %c0_4 = arith.constant 0 : index
    %1 = vector.load %arg9[%c0_2, %c0_3, %c0_4] : memref<2x2x128xf32, #tpu.memory_space<vmem>>, vector<2x2x128xf32>
    tpu.vector_store %arg9[%c0_2, %c0_3, %c0_4], %0 {strides = array<i32>} : memref<2x2x128xf32, #tpu.memory_space<vmem>>, vector<2x2x128xf32>,
    %c0_5 = arith.constant 0 : index
    %c0_6 = arith.constant 0 : index
    %c0_7 = arith.constant 0 : index
    %2 = vector.load %arg5[%c0_5, %c0_6, %c0_7] : memref<2x2x128xf32, #tpu.memory_space<vmem>>, vector<2x2x128xf32>
    %c0_8 = arith.constant 0 : index
    %c0_9 = arith.constant 0 : index
    %c0_10 = arith.constant 0 : index
    %3 = vector.load %arg10[%c0_8, %c0_9, %c0_10] : memref<2x2x128xf32, #tpu.memory_space<vmem>>, vector<2x2x128xf32>
    tpu.vector_store %arg10[%c0_8, %c0_9, %c0_10], %2 {strides = array<i32>} : memref<2x2x128xf32, #tpu.memory_space<vmem>>, vector<2x2x128xf32>,
    %c0_i32 = arith.constant 0 : i32
    %4 = arith.index_cast %c0_i32 : i32 to index
    %c0_11 = arith.constant 0 : index
    %c0_12 = arith.constant 0 : index
    %5 = vector.load %arg0[%4, %c0_11, %c0_12] : memref<8x2x512xf32, #tpu.memory_space<vmem>>, vector<1x2x512xf32>
    %6 = vector.shape_cast %5 : vector<1x2x512xf32> to vector<2x512xf32>
    %c0_13 = arith.constant 0 : index
    %c0_14 = arith.constant 0 : index
    %c0_15 = arith.constant 0 : index
    %7 = vector.load %arg9[%c0_13, %c0_14, %c0_15] : memref<2x2x128xf32, #tpu.memory_space<vmem>>, vector<1x2x128xf32>
    %8 = vector.shape_cast %7 : vector<1x2x128xf32> to vector<2x128xf32>
    %c0_16 = arith.constant 0 : index
    %c0_17 = arith.constant 0 : index
    %9 = vector.load %arg1[%c0_16, %c0_17] : memref<128x512xf32, #tpu.memory_space<vmem>>, vector<128x512xf32>
    %cst = arith.constant dense<0.000000e+00> : vector<2x512xf32>
    %10 = tpu.matmul %8, %9, %cst {dimension_numbers = #tpu.dot_dimension_numbers<[1], [0], [0], [1], [0, 0, 1, 1], [], []>} : vector<2x128xf32>, vector<128x512xf32>, vector<2x512xf32> -> vector<2x512xf32>
    %11 = arith.addf %6, %10 : vector<2x512xf32>
    %c0_18 = arith.constant 0 : index
    %c0_19 = arith.constant 0 : index
    %c0_20 = arith.constant 0 : index
    %12 = vector.load %arg10[%c0_18, %c0_19, %c0_20] : memref<2x2x128xf32, #tpu.memory_space<vmem>>, vector<1x2x128xf32>
    %13 = vector.shape_cast %12 : vector<1x2x128xf32> to vector<2x128xf32>
    %14 = vector.extract_strided_slice %11 {offsets = [0, 0], sizes = [2, 384], strides = [1, 1]} : vector<2x512xf32> to vector<2x384xf32>
    %15 = arith.negf %14 : vector<2x384xf32>
    %16 = math.exp %15 : vector<2x384xf32>
    %cst_21 = arith.constant 1.000000e+00 : f32
    %17 = vector.broadcast %cst_21 : f32 to vector<2x384xf32>
    %18 = arith.addf %17, %16 : vector<2x384xf32>
    %19 = arith.divf %17, %18 : vector<2x384xf32>
    %20 = vector.extract_strided_slice %11 {offsets = [0, 384], sizes = [2, 128], strides = [1, 1]} : vector<2x512xf32> to vector<2x128xf32>
    %21 = math.tanh %20 : vector<2x128xf32>
    %22 = vector.extract_strided_slice %19 {offsets = [0, 128], sizes = [2, 128], strides = [1, 1]} : vector<2x384xf32> to vector<2x128xf32>
    %23 = arith.mulf %22, %13 : vector<2x128xf32>
    %24 = vector.extract_strided_slice %19 {offsets = [0, 0], sizes = [2, 128], strides = [1, 1]} : vector<2x384xf32> to vector<2x128xf32>
    %25 = arith.mulf %24, %21 : vector<2x128xf32>
    %26 = arith.addf %23, %25 : vector<2x128xf32>
    %27 = vector.extract_strided_slice %19 {offsets = [0, 256], sizes = [2, 128], strides = [1, 1]} : vector<2x384xf32> to vector<2x128xf32>
    %28 = math.tanh %26 : vector<2x128xf32>
    %29 = arith.mulf %27, %28 : vector<2x128xf32>
    %c1 = arith.constant 1 : index
    %c0_22 = arith.constant 0 : index
    %c0_23 = arith.constant 0 : index
    %30 = vector.load %arg9[%c1, %c0_22, %c0_23] : memref<2x2x128xf32, #tpu.memory_space<vmem>>, vector<1x2x128xf32>
    %31 = vector.shape_cast %30 : vector<1x2x128xf32> to vector<2x128xf32>
    %32 = tpu.concatenate %29, %31 in 1 : vector<2x128xf32>, vector<2x128xf32> -> vector<2x256xf32>
    %c0_24 = arith.constant 0 : index
    %c0_25 = arith.constant 0 : index
    %33 = vector.load %arg2[%c0_24, %c0_25] : memref<256x512xf32, #tpu.memory_space<vmem>>, vector<256x512xf32>
    %cst_26 = arith.constant dense<0.000000e+00> : vector<2x512xf32>
    %34 = tpu.matmul %32, %33, %cst_26 {dimension_numbers = #tpu.dot_dimension_numbers<[1], [0], [0], [1], [0, 0, 1, 1], [], []>} : vector<2x256xf32>, vector<256x512xf32>, vector<2x512xf32> -> vector<2x512xf32>
    %c0_27 = arith.constant 0 : index
    %c0_28 = arith.constant 0 : index
    %35 = vector.load %arg3[%c0_27, %c0_28] : memref<1x512xf32, #tpu.memory_space<vmem>>, vector<1x512xf32>
    %36 = vector.broadcast %35 : vector<1x512xf32> to vector<2x512xf32>
    %37 = arith.addf %34, %36 : vector<2x512xf32>
    %c1_29 = arith.constant 1 : index
    %c0_30 = arith.constant 0 : index
    %c0_31 = arith.constant 0 : index
    %38 = vector.load %arg10[%c1_29, %c0_30, %c0_31] : memref<2x2x128xf32, #tpu.memory_space<vmem>>, vector<1x2x128xf32>
    %39 = vector.shape_cast %38 : vector<1x2x128xf32> to vector<2x128xf32>
    %40 = vector.extract_strided_slice %37 {offsets = [0, 0], sizes = [2, 384], strides = [1, 1]} : vector<2x512xf32> to vector<2x384xf32>
    %41 = arith.negf %40 : vector<2x384xf32>
    %42 = math.exp %41 : vector<2x384xf32>
    %cst_32 = arith.constant 1.000000e+00 : f32
    %43 = vector.broadcast %cst_32 : f32 to vector<2x384xf32>
    %44 = arith.addf %43, %42 : vector<2x384xf32>
    %45 = arith.divf %43, %44 : vector<2x384xf32>
    %46 = vector.extract_strided_slice %37 {offsets = [0, 384], sizes = [2, 128], strides = [1, 1]} : vector<2x512xf32> to vector<2x128xf32>
    %47 = math.tanh %46 : vector<2x128xf32>
    %48 = vector.extract_strided_slice %45 {offsets = [0, 128], sizes = [2, 128], strides = [1, 1]} : vector<2x384xf32> to vector<2x128xf32>
    %49 = arith.mulf %48, %39 : vector<2x128xf32>
    %50 = vector.extract_strided_slice %45 {offsets = [0, 0], sizes = [2, 128], strides = [1, 1]} : vector<2x384xf32> to vector<2x128xf32>
    %51 = arith.mulf %50, %47 : vector<2x128xf32>
    %52 = arith.addf %49, %51 : vector<2x128xf32>
    %53 = vector.extract_strided_slice %45 {offsets = [0, 256], sizes = [2, 128], strides = [1, 1]} : vector<2x384xf32> to vector<2x128xf32>
    %54 = math.tanh %52 : vector<2x128xf32>
    %55 = arith.mulf %53, %54 : vector<2x128xf32>
    %c0_33 = arith.constant 0 : index
    %c0_34 = arith.constant 0 : index
    %c0_35 = arith.constant 0 : index
    %56 = vector.load %arg9[%c0_33, %c0_34, %c0_35] : memref<2x2x128xf32, #tpu.memory_space<vmem>>, vector<1x2x128xf32>
    %57 = vector.shape_cast %56 : vector<1x2x128xf32> to vector<2x128xf32>
    %58 = vector.shape_cast %29 : vector<2x128xf32> to vector<1x2x128xf32>
    tpu.vector_store %arg9[%c0_33, %c0_34, %c0_35], %58 {strides = array<i32>} : memref<2x2x128xf32, #tpu.memory_space<vmem>>, vector<1x2x128xf32>,
    %c0_36 = arith.constant 0 : index
    %c0_37 = arith.constant 0 : index
    %c0_38 = arith.constant 0 : index
    %59 = vector.load %arg10[%c0_36, %c0_37, %c0_38] : memref<2x2x128xf32, #tpu.memory_space<vmem>>, vector<1x2x128xf32>
    %60 = vector.shape_cast %59 : vector<1x2x128xf32> to vector<2x128xf32>
    %61 = vector.shape_cast %26 : vector<2x128xf32> to vector<1x2x128xf32>
    tpu.vector_store %arg10[%c0_36, %c0_37, %c0_38], %61 {strides = array<i32>} : memref<2x2x128xf32, #tpu.memory_space<vmem>>, vector<1x2x128xf32>,
    %c1_39 = arith.constant 1 : index
    %c0_40 = arith.constant 0 : index
    %c0_41 = arith.constant 0 : index
    %62 = vector.load %arg9[%c1_39, %c0_40, %c0_41] : memref<2x2x128xf32, #tpu.memory_space<vmem>>, vector<1x2x128xf32>
    %63 = vector.shape_cast %62 : vector<1x2x128xf32> to vector<2x128xf32>
    %64 = vector.shape_cast %55 : vector<2x128xf32> to vector<1x2x128xf32>
    tpu.vector_store %arg9[%c1_39, %c0_40, %c0_41], %64 {strides = array<i32>} : memref<2x2x128xf32, #tpu.memory_space<vmem>>, vector<1x2x128xf32>,
    %c1_42 = arith.constant 1 : index
    %c0_43 = arith.constant 0 : index
    %c0_44 = arith.constant 0 : index
    %65 = vector.load %arg10[%c1_42, %c0_43, %c0_44] : memref<2x2x128xf32, #tpu.memory_space<vmem>>, vector<1x2x128xf32>
    %66 = vector.shape_cast %65 : vector<1x2x128xf32> to vector<2x128xf32>
    %67 = vector.shape_cast %52 : vector<2x128xf32> to vector<1x2x128xf32>
    tpu.vector_store %arg10[%c1_42, %c0_43, %c0_44], %67 {strides = array<i32>} : memref<2x2x128xf32, #tpu.memory_space<vmem>>, vector<1x2x128xf32>,
    %68 = arith.index_cast %c0_i32 : i32 to index
    %c0_45 = arith.constant 0 : index
    %c0_46 = arith.constant 0 : index
    %69 = vector.load %arg6[%68, %c0_45, %c0_46] : memref<8x2x128xf32, #tpu.memory_space<vmem>>, vector<1x2x128xf32>
    %70 = vector.shape_cast %69 : vector<1x2x128xf32> to vector<2x128xf32>
    %71 = vector.shape_cast %55 : vector<2x128xf32> to vector<1x2x128xf32>
    tpu.vector_store %arg6[%68, %c0_45, %c0_46], %71 {strides = array<i32>} : memref<8x2x128xf32, #tpu.memory_space<vmem>>, vector<1x2x128xf32>,
    %c1_i32 = arith.constant 1 : i32
    %72 = arith.index_cast %c1_i32 : i32 to index
    %c0_47 = arith.constant 0 : index
    %c0_48 = arith.constant 0 : index
    %73 = vector.load %arg0[%72, %c0_47, %c0_48] : memref<8x2x512xf32, #tpu.memory_space<vmem>>, vector<1x2x512xf32>
    %74 = vector.shape_cast %73 : vector<1x2x512xf32> to vector<2x512xf32>
    %c0_49 = arith.constant 0 : index
    %c0_50 = arith.constant 0 : index
    %c0_51 = arith.constant 0 : index
    %75 = vector.load %arg9[%c0_49, %c0_50, %c0_51] : memref<2x2x128xf32, #tpu.memory_space<vmem>>, vector<1x2x128xf32>
    %76 = vector.shape_cast %75 : vector<1x2x128xf32> to vector<2x128xf32>
    %c0_52 = arith.constant 0 : index
    %c0_53 = arith.constant 0 : index
    %77 = vector.load %arg1[%c0_52, %c0_53] : memref<128x512xf32, #tpu.memory_space<vmem>>, vector<128x512xf32>
    %cst_54 = arith.constant dense<0.000000e+00> : vector<2x512xf32>
    %78 = tpu.matmul %76, %77, %cst_54 {dimension_numbers = #tpu.dot_dimension_numbers<[1], [0], [0], [1], [0, 0, 1, 1], [], []>} : vector<2x128xf32>, vector<128x512xf32>, vector<2x512xf32> -> vector<2x512xf32>
    %79 = arith.addf %74, %78 : vector<2x512xf32>
    %c0_55 = arith.constant 0 : index
    %c0_56 = arith.constant 0 : index
    %c0_57 = arith.constant 0 : index
    %80 = vector.load %arg10[%c0_55, %c0_56, %c0_57] : memref<2x2x128xf32, #tpu.memory_space<vmem>>, vector<1x2x128xf32>
    %81 = vector.shape_cast %80 : vector<1x2x128xf32> to vector<2x128xf32>
    %82 = vector.extract_strided_slice %79 {offsets = [0, 0], sizes = [2, 384], strides = [1, 1]} : vector<2x512xf32> to vector<2x384xf32>
    %83 = arith.negf %82 : vector<2x384xf32>
    %84 = math.exp %83 : vector<2x384xf32>
    %cst_58 = arith.constant 1.000000e+00 : f32
    %85 = vector.broadcast %cst_58 : f32 to vector<2x384xf32>
    %86 = arith.addf %85, %84 : vector<2x384xf32>
    %87 = arith.divf %85, %86 : vector<2x384xf32>
    %88 = vector.extract_strided_slice %79 {offsets = [0, 384], sizes = [2, 128], strides = [1, 1]} : vector<2x512xf32> to vector<2x128xf32>
    %89 = math.tanh %88 : vector<2x128xf32>
    %90 = vector.extract_strided_slice %87 {offsets = [0, 128], sizes = [2, 128], strides = [1, 1]} : vector<2x384xf32> to vector<2x128xf32>
    %91 = arith.mulf %90, %81 : vector<2x128xf32>
    %92 = vector.extract_strided_slice %87 {offsets = [0, 0], sizes = [2, 128], strides = [1, 1]} : vector<2x384xf32> to vector<2x128xf32>
    %93 = arith.mulf %92, %89 : vector<2x128xf32>
    %94 = arith.addf %91, %93 : vector<2x128xf32>
    %95 = vector.extract_strided_slice %87 {offsets = [0, 256], sizes = [2, 128], strides = [1, 1]} : vector<2x384xf32> to vector<2x128xf32>
    %96 = math.tanh %94 : vector<2x128xf32>
    %97 = arith.mulf %95, %96 : vector<2x128xf32>
    %c1_59 = arith.constant 1 : index
    %c0_60 = arith.constant 0 : index
    %c0_61 = arith.constant 0 : index
    %98 = vector.load %arg9[%c1_59, %c0_60, %c0_61] : memref<2x2x128xf32, #tpu.memory_space<vmem>>, vector<1x2x128xf32>
    %99 = vector.shape_cast %98 : vector<1x2x128xf32> to vector<2x128xf32>
    %100 = tpu.concatenate %97, %99 in 1 : vector<2x128xf32>, vector<2x128xf32> -> vector<2x256xf32>
    %c0_62 = arith.constant 0 : index
    %c0_63 = arith.constant 0 : index
    %101 = vector.load %arg2[%c0_62, %c0_63] : memref<256x512xf32, #tpu.memory_space<vmem>>, vector<256x512xf32>
    %cst_64 = arith.constant dense<0.000000e+00> : vector<2x512xf32>
    %102 = tpu.matmul %100, %101, %cst_64 {dimension_numbers = #tpu.dot_dimension_numbers<[1], [0], [0], [1], [0, 0, 1, 1], [], []>} : vector<2x256xf32>, vector<256x512xf32>, vector<2x512xf32> -> vector<2x512xf32>
    %c0_65 = arith.constant 0 : index
    %c0_66 = arith.constant 0 : index
    %103 = vector.load %arg3[%c0_65, %c0_66] : memref<1x512xf32, #tpu.memory_space<vmem>>, vector<1x512xf32>
    %104 = vector.broadcast %103 : vector<1x512xf32> to vector<2x512xf32>
    %105 = arith.addf %102, %104 : vector<2x512xf32>
    %c1_67 = arith.constant 1 : index
    %c0_68 = arith.constant 0 : index
    %c0_69 = arith.constant 0 : index
    %106 = vector.load %arg10[%c1_67, %c0_68, %c0_69] : memref<2x2x128xf32, #tpu.memory_space<vmem>>, vector<1x2x128xf32>
    %107 = vector.shape_cast %106 : vector<1x2x128xf32> to vector<2x128xf32>
    %108 = vector.extract_strided_slice %105 {offsets = [0, 0], sizes = [2, 384], strides = [1, 1]} : vector<2x512xf32> to vector<2x384xf32>
    %109 = arith.negf %108 : vector<2x384xf32>
    %110 = math.exp %109 : vector<2x384xf32>
    %cst_70 = arith.constant 1.000000e+00 : f32
    %111 = vector.broadcast %cst_70 : f32 to vector<2x384xf32>
    %112 = arith.addf %111, %110 : vector<2x384xf32>
    %113 = arith.divf %111, %112 : vector<2x384xf32>
    %114 = vector.extract_strided_slice %105 {offsets = [0, 384], sizes = [2, 128], strides = [1, 1]} : vector<2x512xf32> to vector<2x128xf32>
    %115 = math.tanh %114 : vector<2x128xf32>
    %116 = vector.extract_strided_slice %113 {offsets = [0, 128], sizes = [2, 128], strides = [1, 1]} : vector<2x384xf32> to vector<2x128xf32>
    %117 = arith.mulf %116, %107 : vector<2x128xf32>
    %118 = vector.extract_strided_slice %113 {offsets = [0, 0], sizes = [2, 128], strides = [1, 1]} : vector<2x384xf32> to vector<2x128xf32>
    %119 = arith.mulf %118, %115 : vector<2x128xf32>
    %120 = arith.addf %117, %119 : vector<2x128xf32>
    %121 = vector.extract_strided_slice %113 {offsets = [0, 256], sizes = [2, 128], strides = [1, 1]} : vector<2x384xf32> to vector<2x128xf32>
    %122 = math.tanh %120 : vector<2x128xf32>
    %123 = arith.mulf %121, %122 : vector<2x128xf32>
    %c0_71 = arith.constant 0 : index
    %c0_72 = arith.constant 0 : index
    %c0_73 = arith.constant 0 : index
    %124 = vector.load %arg9[%c0_71, %c0_72, %c0_73] : memref<2x2x128xf32, #tpu.memory_space<vmem>>, vector<1x2x128xf32>
    %125 = vector.shape_cast %124 : vector<1x2x128xf32> to vector<2x128xf32>
    %126 = vector.shape_cast %97 : vector<2x128xf32> to vector<1x2x128xf32>
    tpu.vector_store %arg9[%c0_71, %c0_72, %c0_73], %126 {strides = array<i32>} : memref<2x2x128xf32, #tpu.memory_space<vmem>>, vector<1x2x128xf32>,
    %c0_74 = arith.constant 0 : index
    %c0_75 = arith.constant 0 : index
    %c0_76 = arith.constant 0 : index
    %127 = vector.load %arg10[%c0_74, %c0_75, %c0_76] : memref<2x2x128xf32, #tpu.memory_space<vmem>>, vector<1x2x128xf32>
    %128 = vector.shape_cast %127 : vector<1x2x128xf32> to vector<2x128xf32>
    %129 = vector.shape_cast %94 : vector<2x128xf32> to vector<1x2x128xf32>
    tpu.vector_store %arg10[%c0_74, %c0_75, %c0_76], %129 {strides = array<i32>} : memref<2x2x128xf32, #tpu.memory_space<vmem>>, vector<1x2x128xf32>,
    %c1_77 = arith.constant 1 : index
    %c0_78 = arith.constant 0 : index
    %c0_79 = arith.constant 0 : index
    %130 = vector.load %arg9[%c1_77, %c0_78, %c0_79] : memref<2x2x128xf32, #tpu.memory_space<vmem>>, vector<1x2x128xf32>
    %131 = vector.shape_cast %130 : vector<1x2x128xf32> to vector<2x128xf32>
    %132 = vector.shape_cast %123 : vector<2x128xf32> to vector<1x2x128xf32>
    tpu.vector_store %arg9[%c1_77, %c0_78, %c0_79], %132 {strides = array<i32>} : memref<2x2x128xf32, #tpu.memory_space<vmem>>, vector<1x2x128xf32>,
    %c1_80 = arith.constant 1 : index
    %c0_81 = arith.constant 0 : index
    %c0_82 = arith.constant 0 : index
    %133 = vector.load %arg10[%c1_80, %c0_81, %c0_82] : memref<2x2x128xf32, #tpu.memory_space<vmem>>, vector<1x2x128xf32>
    %134 = vector.shape_cast %133 : vector<1x2x128xf32> to vector<2x128xf32>
    %135 = vector.shape_cast %120 : vector<2x128xf32> to vector<1x2x128xf32>
    tpu.vector_store %arg10[%c1_80, %c0_81, %c0_82], %135 {strides = array<i32>} : memref<2x2x128xf32, #tpu.memory_space<vmem>>, vector<1x2x128xf32>,
    %136 = arith.index_cast %c1_i32 : i32 to index
    %c0_83 = arith.constant 0 : index
    %c0_84 = arith.constant 0 : index
    %137 = vector.load %arg6[%136, %c0_83, %c0_84] : memref<8x2x128xf32, #tpu.memory_space<vmem>>, vector<1x2x128xf32>
    %138 = vector.shape_cast %137 : vector<1x2x128xf32> to vector<2x128xf32>
    %139 = vector.shape_cast %123 : vector<2x128xf32> to vector<1x2x128xf32>
    tpu.vector_store %arg6[%136, %c0_83, %c0_84], %139 {strides = array<i32>} : memref<8x2x128xf32, #tpu.memory_space<vmem>>, vector<1x2x128xf32>,
    %c2_i32 = arith.constant 2 : i32
    %140 = arith.index_cast %c2_i32 : i32 to index
    %c0_85 = arith.constant 0 : index
    %c0_86 = arith.constant 0 : index
    %141 = vector.load %arg0[%140, %c0_85, %c0_86] : memref<8x2x512xf32, #tpu.memory_space<vmem>>, vector<1x2x512xf32>
    %142 = vector.shape_cast %141 : vector<1x2x512xf32> to vector<2x512xf32>
    %c0_87 = arith.constant 0 : index
    %c0_88 = arith.constant 0 : index
    %c0_89 = arith.constant 0 : index
    %143 = vector.load %arg9[%c0_87, %c0_88, %c0_89] : memref<2x2x128xf32, #tpu.memory_space<vmem>>, vector<1x2x128xf32>
    %144 = vector.shape_cast %143 : vector<1x2x128xf32> to vector<2x128xf32>
    %c0_90 = arith.constant 0 : index
    %c0_91 = arith.constant 0 : index
    %145 = vector.load %arg1[%c0_90, %c0_91] : memref<128x512xf32, #tpu.memory_space<vmem>>, vector<128x512xf32>
    %cst_92 = arith.constant dense<0.000000e+00> : vector<2x512xf32>
    %146 = tpu.matmul %144, %145, %cst_92 {dimension_numbers = #tpu.dot_dimension_numbers<[1], [0], [0], [1], [0, 0, 1, 1], [], []>} : vector<2x128xf32>, vector<128x512xf32>, vector<2x512xf32> -> vector<2x512xf32>
    %147 = arith.addf %142, %146 : vector<2x512xf32>
    %c0_93 = arith.constant 0 : index
    %c0_94 = arith.constant 0 : index
    %c0_95 = arith.constant 0 : index
    %148 = vector.load %arg10[%c0_93, %c0_94, %c0_95] : memref<2x2x128xf32, #tpu.memory_space<vmem>>, vector<1x2x128xf32>
    %149 = vector.shape_cast %148 : vector<1x2x128xf32> to vector<2x128xf32>
    %150 = vector.extract_strided_slice %147 {offsets = [0, 0], sizes = [2, 384], strides = [1, 1]} : vector<2x512xf32> to vector<2x384xf32>
    %151 = arith.negf %150 : vector<2x384xf32>
    %152 = math.exp %151 : vector<2x384xf32>
    %cst_96 = arith.constant 1.000000e+00 : f32
    %153 = vector.broadcast %cst_96 : f32 to vector<2x384xf32>
    %154 = arith.addf %153, %152 : vector<2x384xf32>
    %155 = arith.divf %153, %154 : vector<2x384xf32>
    %156 = vector.extract_strided_slice %147 {offsets = [0, 384], sizes = [2, 128], strides = [1, 1]} : vector<2x512xf32> to vector<2x128xf32>
    %157 = math.tanh %156 : vector<2x128xf32>
    %158 = vector.extract_strided_slice %155 {offsets = [0, 128], sizes = [2, 128], strides = [1, 1]} : vector<2x384xf32> to vector<2x128xf32>
    %159 = arith.mulf %158, %149 : vector<2x128xf32>
    %160 = vector.extract_strided_slice %155 {offsets = [0, 0], sizes = [2, 128], strides = [1, 1]} : vector<2x384xf32> to vector<2x128xf32>
    %161 = arith.mulf %160, %157 : vector<2x128xf32>
    %162 = arith.addf %159, %161 : vector<2x128xf32>
    %163 = vector.extract_strided_slice %155 {offsets = [0, 256], sizes = [2, 128], strides = [1, 1]} : vector<2x384xf32> to vector<2x128xf32>
    %164 = math.tanh %162 : vector<2x128xf32>
    %165 = arith.mulf %163, %164 : vector<2x128xf32>
    %c1_97 = arith.constant 1 : index
    %c0_98 = arith.constant 0 : index
    %c0_99 = arith.constant 0 : index
    %166 = vector.load %arg9[%c1_97, %c0_98, %c0_99] : memref<2x2x128xf32, #tpu.memory_space<vmem>>, vector<1x2x128xf32>
    %167 = vector.shape_cast %166 : vector<1x2x128xf32> to vector<2x128xf32>
    %168 = tpu.concatenate %165, %167 in 1 : vector<2x128xf32>, vector<2x128xf32> -> vector<2x256xf32>
    %c0_100 = arith.constant 0 : index
    %c0_101 = arith.constant 0 : index
    %169 = vector.load %arg2[%c0_100, %c0_101] : memref<256x512xf32, #tpu.memory_space<vmem>>, vector<256x512xf32>
    %cst_102 = arith.constant dense<0.000000e+00> : vector<2x512xf32>
    %170 = tpu.matmul %168, %169, %cst_102 {dimension_numbers = #tpu.dot_dimension_numbers<[1], [0], [0], [1], [0, 0, 1, 1], [], []>} : vector<2x256xf32>, vector<256x512xf32>, vector<2x512xf32> -> vector<2x512xf32>
    %c0_103 = arith.constant 0 : index
    %c0_104 = arith.constant 0 : index
    %171 = vector.load %arg3[%c0_103, %c0_104] : memref<1x512xf32, #tpu.memory_space<vmem>>, vector<1x512xf32>
    %172 = vector.broadcast %171 : vector<1x512xf32> to vector<2x512xf32>
    %173 = arith.addf %170, %172 : vector<2x512xf32>
    %c1_105 = arith.constant 1 : index
    %c0_106 = arith.constant 0 : index
    %c0_107 = arith.constant 0 : index
    %174 = vector.load %arg10[%c1_105, %c0_106, %c0_107] : memref<2x2x128xf32, #tpu.memory_space<vmem>>, vector<1x2x128xf32>
    %175 = vector.shape_cast %174 : vector<1x2x128xf32> to vector<2x128xf32>
    %176 = vector.extract_strided_slice %173 {offsets = [0, 0], sizes = [2, 384], strides = [1, 1]} : vector<2x512xf32> to vector<2x384xf32>
    %177 = arith.negf %176 : vector<2x384xf32>
    %178 = math.exp %177 : vector<2x384xf32>
    %cst_108 = arith.constant 1.000000e+00 : f32
    %179 = vector.broadcast %cst_108 : f32 to vector<2x384xf32>
    %180 = arith.addf %179, %178 : vector<2x384xf32>
    %181 = arith.divf %179, %180 : vector<2x384xf32>
    %182 = vector.extract_strided_slice %173 {offsets = [0, 384], sizes = [2, 128], strides = [1, 1]} : vector<2x512xf32> to vector<2x128xf32>
    %183 = math.tanh %182 : vector<2x128xf32>
    %184 = vector.extract_strided_slice %181 {offsets = [0, 128], sizes = [2, 128], strides = [1, 1]} : vector<2x384xf32> to vector<2x128xf32>
    %185 = arith.mulf %184, %175 : vector<2x128xf32>
    %186 = vector.extract_strided_slice %181 {offsets = [0, 0], sizes = [2, 128], strides = [1, 1]} : vector<2x384xf32> to vector<2x128xf32>
    %187 = arith.mulf %186, %183 : vector<2x128xf32>
    %188 = arith.addf %185, %187 : vector<2x128xf32>
    %189 = vector.extract_strided_slice %181 {offsets = [0, 256], sizes = [2, 128], strides = [1, 1]} : vector<2x384xf32> to vector<2x128xf32>
    %190 = math.tanh %188 : vector<2x128xf32>
    %191 = arith.mulf %189, %190 : vector<2x128xf32>
    %c0_109 = arith.constant 0 : index
    %c0_110 = arith.constant 0 : index
    %c0_111 = arith.constant 0 : index
    %192 = vector.load %arg9[%c0_109, %c0_110, %c0_111] : memref<2x2x128xf32, #tpu.memory_space<vmem>>, vector<1x2x128xf32>
    %193 = vector.shape_cast %192 : vector<1x2x128xf32> to vector<2x128xf32>
    %194 = vector.shape_cast %165 : vector<2x128xf32> to vector<1x2x128xf32>
    tpu.vector_store %arg9[%c0_109, %c0_110, %c0_111], %194 {strides = array<i32>} : memref<2x2x128xf32, #tpu.memory_space<vmem>>, vector<1x2x128xf32>,
    %c0_112 = arith.constant 0 : index
    %c0_113 = arith.constant 0 : index
    %c0_114 = arith.constant 0 : index
    %195 = vector.load %arg10[%c0_112, %c0_113, %c0_114] : memref<2x2x128xf32, #tpu.memory_space<vmem>>, vector<1x2x128xf32>
    %196 = vector.shape_cast %195 : vector<1x2x128xf32> to vector<2x128xf32>
    %197 = vector.shape_cast %162 : vector<2x128xf32> to vector<1x2x128xf32>
    tpu.vector_store %arg10[%c0_112, %c0_113, %c0_114], %197 {strides = array<i32>} : memref<2x2x128xf32, #tpu.memory_space<vmem>>, vector<1x2x128xf32>,
    %c1_115 = arith.constant 1 : index
    %c0_116 = arith.constant 0 : index
    %c0_117 = arith.constant 0 : index
    %198 = vector.load %arg9[%c1_115, %c0_116, %c0_117] : memref<2x2x128xf32, #tpu.memory_space<vmem>>, vector<1x2x128xf32>
    %199 = vector.shape_cast %198 : vector<1x2x128xf32> to vector<2x128xf32>
    %200 = vector.shape_cast %191 : vector<2x128xf32> to vector<1x2x128xf32>
    tpu.vector_store %arg9[%c1_115, %c0_116, %c0_117], %200 {strides = array<i32>} : memref<2x2x128xf32, #tpu.memory_space<vmem>>, vector<1x2x128xf32>,
    %c1_118 = arith.constant 1 : index
    %c0_119 = arith.constant 0 : index
    %c0_120 = arith.constant 0 : index
    %201 = vector.load %arg10[%c1_118, %c0_119, %c0_120] : memref<2x2x128xf32, #tpu.memory_space<vmem>>, vector<1x2x128xf32>
    %202 = vector.shape_cast %201 : vector<1x2x128xf32> to vector<2x128xf32>
    %203 = vector.shape_cast %188 : vector<2x128xf32> to vector<1x2x128xf32>
    tpu.vector_store %arg10[%c1_118, %c0_119, %c0_120], %203 {strides = array<i32>} : memref<2x2x128xf32, #tpu.memory_space<vmem>>, vector<1x2x128xf32>,
    %204 = arith.index_cast %c2_i32 : i32 to index
    %c0_121 = arith.constant 0 : index
    %c0_122 = arith.constant 0 : index
    %205 = vector.load %arg6[%204, %c0_121, %c0_122] : memref<8x2x128xf32, #tpu.memory_space<vmem>>, vector<1x2x128xf32>
    %206 = vector.shape_cast %205 : vector<1x2x128xf32> to vector<2x128xf32>
    %207 = vector.shape_cast %191 : vector<2x128xf32> to vector<1x2x128xf32>
    tpu.vector_store %arg6[%204, %c0_121, %c0_122], %207 {strides = array<i32>} : memref<8x2x128xf32, #tpu.memory_space<vmem>>, vector<1x2x128xf32>,
    %c3_i32 = arith.constant 3 : i32
    %208 = arith.index_cast %c3_i32 : i32 to index
    %c0_123 = arith.constant 0 : index
    %c0_124 = arith.constant 0 : index
    %209 = vector.load %arg0[%208, %c0_123, %c0_124] : memref<8x2x512xf32, #tpu.memory_space<vmem>>, vector<1x2x512xf32>
    %210 = vector.shape_cast %209 : vector<1x2x512xf32> to vector<2x512xf32>
    %c0_125 = arith.constant 0 : index
    %c0_126 = arith.constant 0 : index
    %c0_127 = arith.constant 0 : index
    %211 = vector.load %arg9[%c0_125, %c0_126, %c0_127] : memref<2x2x128xf32, #tpu.memory_space<vmem>>, vector<1x2x128xf32>
    %212 = vector.shape_cast %211 : vector<1x2x128xf32> to vector<2x128xf32>
    %c0_128 = arith.constant 0 : index
    %c0_129 = arith.constant 0 : index
    %213 = vector.load %arg1[%c0_128, %c0_129] : memref<128x512xf32, #tpu.memory_space<vmem>>, vector<128x512xf32>
    %cst_130 = arith.constant dense<0.000000e+00> : vector<2x512xf32>
    %214 = tpu.matmul %212, %213, %cst_130 {dimension_numbers = #tpu.dot_dimension_numbers<[1], [0], [0], [1], [0, 0, 1, 1], [], []>} : vector<2x128xf32>, vector<128x512xf32>, vector<2x512xf32> -> vector<2x512xf32>
    %215 = arith.addf %210, %214 : vector<2x512xf32>
    %c0_131 = arith.constant 0 : index
    %c0_132 = arith.constant 0 : index
    %c0_133 = arith.constant 0 : index
    %216 = vector.load %arg10[%c0_131, %c0_132, %c0_133] : memref<2x2x128xf32, #tpu.memory_space<vmem>>, vector<1x2x128xf32>
    %217 = vector.shape_cast %216 : vector<1x2x128xf32> to vector<2x128xf32>
    %218 = vector.extract_strided_slice %215 {offsets = [0, 0], sizes = [2, 384], strides = [1, 1]} : vector<2x512xf32> to vector<2x384xf32>
    %219 = arith.negf %218 : vector<2x384xf32>
    %220 = math.exp %219 : vector<2x384xf32>
    %cst_134 = arith.constant 1.000000e+00 : f32
    %221 = vector.broadcast %cst_134 : f32 to vector<2x384xf32>
    %222 = arith.addf %221, %220 : vector<2x384xf32>
    %223 = arith.divf %221, %222 : vector<2x384xf32>
    %224 = vector.extract_strided_slice %215 {offsets = [0, 384], sizes = [2, 128], strides = [1, 1]} : vector<2x512xf32> to vector<2x128xf32>
    %225 = math.tanh %224 : vector<2x128xf32>
    %226 = vector.extract_strided_slice %223 {offsets = [0, 128], sizes = [2, 128], strides = [1, 1]} : vector<2x384xf32> to vector<2x128xf32>
    %227 = arith.mulf %226, %217 : vector<2x128xf32>
    %228 = vector.extract_strided_slice %223 {offsets = [0, 0], sizes = [2, 128], strides = [1, 1]} : vector<2x384xf32> to vector<2x128xf32>
    %229 = arith.mulf %228, %225 : vector<2x128xf32>
    %230 = arith.addf %227, %229 : vector<2x128xf32>
    %231 = vector.extract_strided_slice %223 {offsets = [0, 256], sizes = [2, 128], strides = [1, 1]} : vector<2x384xf32> to vector<2x128xf32>
    %232 = math.tanh %230 : vector<2x128xf32>
    %233 = arith.mulf %231, %232 : vector<2x128xf32>
    %c1_135 = arith.constant 1 : index
    %c0_136 = arith.constant 0 : index
    %c0_137 = arith.constant 0 : index
    %234 = vector.load %arg9[%c1_135, %c0_136, %c0_137] : memref<2x2x128xf32, #tpu.memory_space<vmem>>, vector<1x2x128xf32>
    %235 = vector.shape_cast %234 : vector<1x2x128xf32> to vector<2x128xf32>
    %236 = tpu.concatenate %233, %235 in 1 : vector<2x128xf32>, vector<2x128xf32> -> vector<2x256xf32>
    %c0_138 = arith.constant 0 : index
    %c0_139 = arith.constant 0 : index
    %237 = vector.load %arg2[%c0_138, %c0_139] : memref<256x512xf32, #tpu.memory_space<vmem>>, vector<256x512xf32>
    %cst_140 = arith.constant dense<0.000000e+00> : vector<2x512xf32>
    %238 = tpu.matmul %236, %237, %cst_140 {dimension_numbers = #tpu.dot_dimension_numbers<[1], [0], [0], [1], [0, 0, 1, 1], [], []>} : vector<2x256xf32>, vector<256x512xf32>, vector<2x512xf32> -> vector<2x512xf32>
    %c0_141 = arith.constant 0 : index
    %c0_142 = arith.constant 0 : index
    %239 = vector.load %arg3[%c0_141, %c0_142] : memref<1x512xf32, #tpu.memory_space<vmem>>, vector<1x512xf32>
    %240 = vector.broadcast %239 : vector<1x512xf32> to vector<2x512xf32>
    %241 = arith.addf %238, %240 : vector<2x512xf32>
    %c1_143 = arith.constant 1 : index
    %c0_144 = arith.constant 0 : index
    %c0_145 = arith.constant 0 : index
    %242 = vector.load %arg10[%c1_143, %c0_144, %c0_145] : memref<2x2x128xf32, #tpu.memory_space<vmem>>, vector<1x2x128xf32>
    %243 = vector.shape_cast %242 : vector<1x2x128xf32> to vector<2x128xf32>
    %244 = vector.extract_strided_slice %241 {offsets = [0, 0], sizes = [2, 384], strides = [1, 1]} : vector<2x512xf32> to vector<2x384xf32>
    %245 = arith.negf %244 : vector<2x384xf32>
    %246 = math.exp %245 : vector<2x384xf32>
    %cst_146 = arith.constant 1.000000e+00 : f32
    %247 = vector.broadcast %cst_146 : f32 to vector<2x384xf32>
    %248 = arith.addf %247, %246 : vector<2x384xf32>
    %249 = arith.divf %247, %248 : vector<2x384xf32>
    %250 = vector.extract_strided_slice %241 {offsets = [0, 384], sizes = [2, 128], strides = [1, 1]} : vector<2x512xf32> to vector<2x128xf32>
    %251 = math.tanh %250 : vector<2x128xf32>
    %252 = vector.extract_strided_slice %249 {offsets = [0, 128], sizes = [2, 128], strides = [1, 1]} : vector<2x384xf32> to vector<2x128xf32>
    %253 = arith.mulf %252, %243 : vector<2x128xf32>
    %254 = vector.extract_strided_slice %249 {offsets = [0, 0], sizes = [2, 128], strides = [1, 1]} : vector<2x384xf32> to vector<2x128xf32>
    %255 = arith.mulf %254, %251 : vector<2x128xf32>
    %256 = arith.addf %253, %255 : vector<2x128xf32>
    %257 = vector.extract_strided_slice %249 {offsets = [0, 256], sizes = [2, 128], strides = [1, 1]} : vector<2x384xf32> to vector<2x128xf32>
    %258 = math.tanh %256 : vector<2x128xf32>
    %259 = arith.mulf %257, %258 : vector<2x128xf32>
    %c0_147 = arith.constant 0 : index
    %c0_148 = arith.constant 0 : index
    %c0_149 = arith.constant 0 : index
    %260 = vector.load %arg9[%c0_147, %c0_148, %c0_149] : memref<2x2x128xf32, #tpu.memory_space<vmem>>, vector<1x2x128xf32>
    %261 = vector.shape_cast %260 : vector<1x2x128xf32> to vector<2x128xf32>
    %262 = vector.shape_cast %233 : vector<2x128xf32> to vector<1x2x128xf32>
    tpu.vector_store %arg9[%c0_147, %c0_148, %c0_149], %262 {strides = array<i32>} : memref<2x2x128xf32, #tpu.memory_space<vmem>>, vector<1x2x128xf32>,
    %c0_150 = arith.constant 0 : index
    %c0_151 = arith.constant 0 : index
    %c0_152 = arith.constant 0 : index
    %263 = vector.load %arg10[%c0_150, %c0_151, %c0_152] : memref<2x2x128xf32, #tpu.memory_space<vmem>>, vector<1x2x128xf32>
    %264 = vector.shape_cast %263 : vector<1x2x128xf32> to vector<2x128xf32>
    %265 = vector.shape_cast %230 : vector<2x128xf32> to vector<1x2x128xf32>
    tpu.vector_store %arg10[%c0_150, %c0_151, %c0_152], %265 {strides = array<i32>} : memref<2x2x128xf32, #tpu.memory_space<vmem>>, vector<1x2x128xf32>,
    %c1_153 = arith.constant 1 : index
    %c0_154 = arith.constant 0 : index
    %c0_155 = arith.constant 0 : index
    %266 = vector.load %arg9[%c1_153, %c0_154, %c0_155] : memref<2x2x128xf32, #tpu.memory_space<vmem>>, vector<1x2x128xf32>
    %267 = vector.shape_cast %266 : vector<1x2x128xf32> to vector<2x128xf32>
    %268 = vector.shape_cast %259 : vector<2x128xf32> to vector<1x2x128xf32>
    tpu.vector_store %arg9[%c1_153, %c0_154, %c0_155], %268 {strides = array<i32>} : memref<2x2x128xf32, #tpu.memory_space<vmem>>, vector<1x2x128xf32>,
    %c1_156 = arith.constant 1 : index
    %c0_157 = arith.constant 0 : index
    %c0_158 = arith.constant 0 : index
    %269 = vector.load %arg10[%c1_156, %c0_157, %c0_158] : memref<2x2x128xf32, #tpu.memory_space<vmem>>, vector<1x2x128xf32>
    %270 = vector.shape_cast %269 : vector<1x2x128xf32> to vector<2x128xf32>
    %271 = vector.shape_cast %256 : vector<2x128xf32> to vector<1x2x128xf32>
    tpu.vector_store %arg10[%c1_156, %c0_157, %c0_158], %271 {strides = array<i32>} : memref<2x2x128xf32, #tpu.memory_space<vmem>>, vector<1x2x128xf32>,
    %272 = arith.index_cast %c3_i32 : i32 to index
    %c0_159 = arith.constant 0 : index
    %c0_160 = arith.constant 0 : index
    %273 = vector.load %arg6[%272, %c0_159, %c0_160] : memref<8x2x128xf32, #tpu.memory_space<vmem>>, vector<1x2x128xf32>
    %274 = vector.shape_cast %273 : vector<1x2x128xf32> to vector<2x128xf32>
    %275 = vector.shape_cast %259 : vector<2x128xf32> to vector<1x2x128xf32>
    tpu.vector_store %arg6[%272, %c0_159, %c0_160], %275 {strides = array<i32>} : memref<8x2x128xf32, #tpu.memory_space<vmem>>, vector<1x2x128xf32>,
    %c4_i32 = arith.constant 4 : i32
    %276 = arith.index_cast %c4_i32 : i32 to index
    %c0_161 = arith.constant 0 : index
    %c0_162 = arith.constant 0 : index
    %277 = vector.load %arg0[%276, %c0_161, %c0_162] : memref<8x2x512xf32, #tpu.memory_space<vmem>>, vector<1x2x512xf32>
    %278 = vector.shape_cast %277 : vector<1x2x512xf32> to vector<2x512xf32>
    %c0_163 = arith.constant 0 : index
    %c0_164 = arith.constant 0 : index
    %c0_165 = arith.constant 0 : index
    %279 = vector.load %arg9[%c0_163, %c0_164, %c0_165] : memref<2x2x128xf32, #tpu.memory_space<vmem>>, vector<1x2x128xf32>
    %280 = vector.shape_cast %279 : vector<1x2x128xf32> to vector<2x128xf32>
    %c0_166 = arith.constant 0 : index
    %c0_167 = arith.constant 0 : index
    %281 = vector.load %arg1[%c0_166, %c0_167] : memref<128x512xf32, #tpu.memory_space<vmem>>, vector<128x512xf32>
    %cst_168 = arith.constant dense<0.000000e+00> : vector<2x512xf32>
    %282 = tpu.matmul %280, %281, %cst_168 {dimension_numbers = #tpu.dot_dimension_numbers<[1], [0], [0], [1], [0, 0, 1, 1], [], []>} : vector<2x128xf32>, vector<128x512xf32>, vector<2x512xf32> -> vector<2x512xf32>
    %283 = arith.addf %278, %282 : vector<2x512xf32>
    %c0_169 = arith.constant 0 : index
    %c0_170 = arith.constant 0 : index
    %c0_171 = arith.constant 0 : index
    %284 = vector.load %arg10[%c0_169, %c0_170, %c0_171] : memref<2x2x128xf32, #tpu.memory_space<vmem>>, vector<1x2x128xf32>
    %285 = vector.shape_cast %284 : vector<1x2x128xf32> to vector<2x128xf32>
    %286 = vector.extract_strided_slice %283 {offsets = [0, 0], sizes = [2, 384], strides = [1, 1]} : vector<2x512xf32> to vector<2x384xf32>
    %287 = arith.negf %286 : vector<2x384xf32>
    %288 = math.exp %287 : vector<2x384xf32>
    %cst_172 = arith.constant 1.000000e+00 : f32
    %289 = vector.broadcast %cst_172 : f32 to vector<2x384xf32>
    %290 = arith.addf %289, %288 : vector<2x384xf32>
    %291 = arith.divf %289, %290 : vector<2x384xf32>
    %292 = vector.extract_strided_slice %283 {offsets = [0, 384], sizes = [2, 128], strides = [1, 1]} : vector<2x512xf32> to vector<2x128xf32>
    %293 = math.tanh %292 : vector<2x128xf32>
    %294 = vector.extract_strided_slice %291 {offsets = [0, 128], sizes = [2, 128], strides = [1, 1]} : vector<2x384xf32> to vector<2x128xf32>
    %295 = arith.mulf %294, %285 : vector<2x128xf32>
    %296 = vector.extract_strided_slice %291 {offsets = [0, 0], sizes = [2, 128], strides = [1, 1]} : vector<2x384xf32> to vector<2x128xf32>
    %297 = arith.mulf %296, %293 : vector<2x128xf32>
    %298 = arith.addf %295, %297 : vector<2x128xf32>
    %299 = vector.extract_strided_slice %291 {offsets = [0, 256], sizes = [2, 128], strides = [1, 1]} : vector<2x384xf32> to vector<2x128xf32>
    %300 = math.tanh %298 : vector<2x128xf32>
    %301 = arith.mulf %299, %300 : vector<2x128xf32>
    %c1_173 = arith.constant 1 : index
    %c0_174 = arith.constant 0 : index
    %c0_175 = arith.constant 0 : index
    %302 = vector.load %arg9[%c1_173, %c0_174, %c0_175] : memref<2x2x128xf32, #tpu.memory_space<vmem>>, vector<1x2x128xf32>
    %303 = vector.shape_cast %302 : vector<1x2x128xf32> to vector<2x128xf32>
    %304 = tpu.concatenate %301, %303 in 1 : vector<2x128xf32>, vector<2x128xf32> -> vector<2x256xf32>
    %c0_176 = arith.constant 0 : index
    %c0_177 = arith.constant 0 : index
    %305 = vector.load %arg2[%c0_176, %c0_177] : memref<256x512xf32, #tpu.memory_space<vmem>>, vector<256x512xf32>
    %cst_178 = arith.constant dense<0.000000e+00> : vector<2x512xf32>
    %306 = tpu.matmul %304, %305, %cst_178 {dimension_numbers = #tpu.dot_dimension_numbers<[1], [0], [0], [1], [0, 0, 1, 1], [], []>} : vector<2x256xf32>, vector<256x512xf32>, vector<2x512xf32> -> vector<2x512xf32>
    %c0_179 = arith.constant 0 : index
    %c0_180 = arith.constant 0 : index
    %307 = vector.load %arg3[%c0_179, %c0_180] : memref<1x512xf32, #tpu.memory_space<vmem>>, vector<1x512xf32>
    %308 = vector.broadcast %307 : vector<1x512xf32> to vector<2x512xf32>
    %309 = arith.addf %306, %308 : vector<2x512xf32>
    %c1_181 = arith.constant 1 : index
    %c0_182 = arith.constant 0 : index
    %c0_183 = arith.constant 0 : index
    %310 = vector.load %arg10[%c1_181, %c0_182, %c0_183] : memref<2x2x128xf32, #tpu.memory_space<vmem>>, vector<1x2x128xf32>
    %311 = vector.shape_cast %310 : vector<1x2x128xf32> to vector<2x128xf32>
    %312 = vector.extract_strided_slice %309 {offsets = [0, 0], sizes = [2, 384], strides = [1, 1]} : vector<2x512xf32> to vector<2x384xf32>
    %313 = arith.negf %312 : vector<2x384xf32>
    %314 = math.exp %313 : vector<2x384xf32>
    %cst_184 = arith.constant 1.000000e+00 : f32
    %315 = vector.broadcast %cst_184 : f32 to vector<2x384xf32>
    %316 = arith.addf %315, %314 : vector<2x384xf32>
    %317 = arith.divf %315, %316 : vector<2x384xf32>
    %318 = vector.extract_strided_slice %309 {offsets = [0, 384], sizes = [2, 128], strides = [1, 1]} : vector<2x512xf32> to vector<2x128xf32>
    %319 = math.tanh %318 : vector<2x128xf32>
    %320 = vector.extract_strided_slice %317 {offsets = [0, 128], sizes = [2, 128], strides = [1, 1]} : vector<2x384xf32> to vector<2x128xf32>
    %321 = arith.mulf %320, %311 : vector<2x128xf32>
    %322 = vector.extract_strided_slice %317 {offsets = [0, 0], sizes = [2, 128], strides = [1, 1]} : vector<2x384xf32> to vector<2x128xf32>
    %323 = arith.mulf %322, %319 : vector<2x128xf32>
    %324 = arith.addf %321, %323 : vector<2x128xf32>
    %325 = vector.extract_strided_slice %317 {offsets = [0, 256], sizes = [2, 128], strides = [1, 1]} : vector<2x384xf32> to vector<2x128xf32>
    %326 = math.tanh %324 : vector<2x128xf32>
    %327 = arith.mulf %325, %326 : vector<2x128xf32>
    %c0_185 = arith.constant 0 : index
    %c0_186 = arith.constant 0 : index
    %c0_187 = arith.constant 0 : index
    %328 = vector.load %arg9[%c0_185, %c0_186, %c0_187] : memref<2x2x128xf32, #tpu.memory_space<vmem>>, vector<1x2x128xf32>
    %329 = vector.shape_cast %328 : vector<1x2x128xf32> to vector<2x128xf32>
    %330 = vector.shape_cast %301 : vector<2x128xf32> to vector<1x2x128xf32>
    tpu.vector_store %arg9[%c0_185, %c0_186, %c0_187], %330 {strides = array<i32>} : memref<2x2x128xf32, #tpu.memory_space<vmem>>, vector<1x2x128xf32>,
    %c0_188 = arith.constant 0 : index
    %c0_189 = arith.constant 0 : index
    %c0_190 = arith.constant 0 : index
    %331 = vector.load %arg10[%c0_188, %c0_189, %c0_190] : memref<2x2x128xf32, #tpu.memory_space<vmem>>, vector<1x2x128xf32>
    %332 = vector.shape_cast %331 : vector<1x2x128xf32> to vector<2x128xf32>
    %333 = vector.shape_cast %298 : vector<2x128xf32> to vector<1x2x128xf32>
    tpu.vector_store %arg10[%c0_188, %c0_189, %c0_190], %333 {strides = array<i32>} : memref<2x2x128xf32, #tpu.memory_space<vmem>>, vector<1x2x128xf32>,
    %c1_191 = arith.constant 1 : index
    %c0_192 = arith.constant 0 : index
    %c0_193 = arith.constant 0 : index
    %334 = vector.load %arg9[%c1_191, %c0_192, %c0_193] : memref<2x2x128xf32, #tpu.memory_space<vmem>>, vector<1x2x128xf32>
    %335 = vector.shape_cast %334 : vector<1x2x128xf32> to vector<2x128xf32>
    %336 = vector.shape_cast %327 : vector<2x128xf32> to vector<1x2x128xf32>
    tpu.vector_store %arg9[%c1_191, %c0_192, %c0_193], %336 {strides = array<i32>} : memref<2x2x128xf32, #tpu.memory_space<vmem>>, vector<1x2x128xf32>,
    %c1_194 = arith.constant 1 : index
    %c0_195 = arith.constant 0 : index
    %c0_196 = arith.constant 0 : index
    %337 = vector.load %arg10[%c1_194, %c0_195, %c0_196] : memref<2x2x128xf32, #tpu.memory_space<vmem>>, vector<1x2x128xf32>
    %338 = vector.shape_cast %337 : vector<1x2x128xf32> to vector<2x128xf32>
    %339 = vector.shape_cast %324 : vector<2x128xf32> to vector<1x2x128xf32>
    tpu.vector_store %arg10[%c1_194, %c0_195, %c0_196], %339 {strides = array<i32>} : memref<2x2x128xf32, #tpu.memory_space<vmem>>, vector<1x2x128xf32>,
    %340 = arith.index_cast %c4_i32 : i32 to index
    %c0_197 = arith.constant 0 : index
    %c0_198 = arith.constant 0 : index
    %341 = vector.load %arg6[%340, %c0_197, %c0_198] : memref<8x2x128xf32, #tpu.memory_space<vmem>>, vector<1x2x128xf32>
    %342 = vector.shape_cast %341 : vector<1x2x128xf32> to vector<2x128xf32>
    %343 = vector.shape_cast %327 : vector<2x128xf32> to vector<1x2x128xf32>
    tpu.vector_store %arg6[%340, %c0_197, %c0_198], %343 {strides = array<i32>} : memref<8x2x128xf32, #tpu.memory_space<vmem>>, vector<1x2x128xf32>,
    %c5_i32 = arith.constant 5 : i32
    %344 = arith.index_cast %c5_i32 : i32 to index
    %c0_199 = arith.constant 0 : index
    %c0_200 = arith.constant 0 : index
    %345 = vector.load %arg0[%344, %c0_199, %c0_200] : memref<8x2x512xf32, #tpu.memory_space<vmem>>, vector<1x2x512xf32>
    %346 = vector.shape_cast %345 : vector<1x2x512xf32> to vector<2x512xf32>
    %c0_201 = arith.constant 0 : index
    %c0_202 = arith.constant 0 : index
    %c0_203 = arith.constant 0 : index
    %347 = vector.load %arg9[%c0_201, %c0_202, %c0_203] : memref<2x2x128xf32, #tpu.memory_space<vmem>>, vector<1x2x128xf32>
    %348 = vector.shape_cast %347 : vector<1x2x128xf32> to vector<2x128xf32>
    %c0_204 = arith.constant 0 : index
    %c0_205 = arith.constant 0 : index
    %349 = vector.load %arg1[%c0_204, %c0_205] : memref<128x512xf32, #tpu.memory_space<vmem>>, vector<128x512xf32>
    %cst_206 = arith.constant dense<0.000000e+00> : vector<2x512xf32>
    %350 = tpu.matmul %348, %349, %cst_206 {dimension_numbers = #tpu.dot_dimension_numbers<[1], [0], [0], [1], [0, 0, 1, 1], [], []>} : vector<2x128xf32>, vector<128x512xf32>, vector<2x512xf32> -> vector<2x512xf32>
    %351 = arith.addf %346, %350 : vector<2x512xf32>
    %c0_207 = arith.constant 0 : index
    %c0_208 = arith.constant 0 : index
    %c0_209 = arith.constant 0 : index
    %352 = vector.load %arg10[%c0_207, %c0_208, %c0_209] : memref<2x2x128xf32, #tpu.memory_space<vmem>>, vector<1x2x128xf32>
    %353 = vector.shape_cast %352 : vector<1x2x128xf32> to vector<2x128xf32>
    %354 = vector.extract_strided_slice %351 {offsets = [0, 0], sizes = [2, 384], strides = [1, 1]} : vector<2x512xf32> to vector<2x384xf32>
    %355 = arith.negf %354 : vector<2x384xf32>
    %356 = math.exp %355 : vector<2x384xf32>
    %cst_210 = arith.constant 1.000000e+00 : f32
    %357 = vector.broadcast %cst_210 : f32 to vector<2x384xf32>
    %358 = arith.addf %357, %356 : vector<2x384xf32>
    %359 = arith.divf %357, %358 : vector<2x384xf32>
    %360 = vector.extract_strided_slice %351 {offsets = [0, 384], sizes = [2, 128], strides = [1, 1]} : vector<2x512xf32> to vector<2x128xf32>
    %361 = math.tanh %360 : vector<2x128xf32>
    %362 = vector.extract_strided_slice %359 {offsets = [0, 128], sizes = [2, 128], strides = [1, 1]} : vector<2x384xf32> to vector<2x128xf32>
    %363 = arith.mulf %362, %353 : vector<2x128xf32>
    %364 = vector.extract_strided_slice %359 {offsets = [0, 0], sizes = [2, 128], strides = [1, 1]} : vector<2x384xf32> to vector<2x128xf32>
    %365 = arith.mulf %364, %361 : vector<2x128xf32>
    %366 = arith.addf %363, %365 : vector<2x128xf32>
    %367 = vector.extract_strided_slice %359 {offsets = [0, 256], sizes = [2, 128], strides = [1, 1]} : vector<2x384xf32> to vector<2x128xf32>
    %368 = math.tanh %366 : vector<2x128xf32>
    %369 = arith.mulf %367, %368 : vector<2x128xf32>
    %c1_211 = arith.constant 1 : index
    %c0_212 = arith.constant 0 : index
    %c0_213 = arith.constant 0 : index
    %370 = vector.load %arg9[%c1_211, %c0_212, %c0_213] : memref<2x2x128xf32, #tpu.memory_space<vmem>>, vector<1x2x128xf32>
    %371 = vector.shape_cast %370 : vector<1x2x128xf32> to vector<2x128xf32>
    %372 = tpu.concatenate %369, %371 in 1 : vector<2x128xf32>, vector<2x128xf32> -> vector<2x256xf32>
    %c0_214 = arith.constant 0 : index
    %c0_215 = arith.constant 0 : index
    %373 = vector.load %arg2[%c0_214, %c0_215] : memref<256x512xf32, #tpu.memory_space<vmem>>, vector<256x512xf32>
    %cst_216 = arith.constant dense<0.000000e+00> : vector<2x512xf32>
    %374 = tpu.matmul %372, %373, %cst_216 {dimension_numbers = #tpu.dot_dimension_numbers<[1], [0], [0], [1], [0, 0, 1, 1], [], []>} : vector<2x256xf32>, vector<256x512xf32>, vector<2x512xf32> -> vector<2x512xf32>
    %c0_217 = arith.constant 0 : index
    %c0_218 = arith.constant 0 : index
    %375 = vector.load %arg3[%c0_217, %c0_218] : memref<1x512xf32, #tpu.memory_space<vmem>>, vector<1x512xf32>
    %376 = vector.broadcast %375 : vector<1x512xf32> to vector<2x512xf32>
    %377 = arith.addf %374, %376 : vector<2x512xf32>
    %c1_219 = arith.constant 1 : index
    %c0_220 = arith.constant 0 : index
    %c0_221 = arith.constant 0 : index
    %378 = vector.load %arg10[%c1_219, %c0_220, %c0_221] : memref<2x2x128xf32, #tpu.memory_space<vmem>>, vector<1x2x128xf32>
    %379 = vector.shape_cast %378 : vector<1x2x128xf32> to vector<2x128xf32>
    %380 = vector.extract_strided_slice %377 {offsets = [0, 0], sizes = [2, 384], strides = [1, 1]} : vector<2x512xf32> to vector<2x384xf32>
    %381 = arith.negf %380 : vector<2x384xf32>
    %382 = math.exp %381 : vector<2x384xf32>
    %cst_222 = arith.constant 1.000000e+00 : f32
    %383 = vector.broadcast %cst_222 : f32 to vector<2x384xf32>
    %384 = arith.addf %383, %382 : vector<2x384xf32>
    %385 = arith.divf %383, %384 : vector<2x384xf32>
    %386 = vector.extract_strided_slice %377 {offsets = [0, 384], sizes = [2, 128], strides = [1, 1]} : vector<2x512xf32> to vector<2x128xf32>
    %387 = math.tanh %386 : vector<2x128xf32>
    %388 = vector.extract_strided_slice %385 {offsets = [0, 128], sizes = [2, 128], strides = [1, 1]} : vector<2x384xf32> to vector<2x128xf32>
    %389 = arith.mulf %388, %379 : vector<2x128xf32>
    %390 = vector.extract_strided_slice %385 {offsets = [0, 0], sizes = [2, 128], strides = [1, 1]} : vector<2x384xf32> to vector<2x128xf32>
    %391 = arith.mulf %390, %387 : vector<2x128xf32>
    %392 = arith.addf %389, %391 : vector<2x128xf32>
    %393 = vector.extract_strided_slice %385 {offsets = [0, 256], sizes = [2, 128], strides = [1, 1]} : vector<2x384xf32> to vector<2x128xf32>
    %394 = math.tanh %392 : vector<2x128xf32>
    %395 = arith.mulf %393, %394 : vector<2x128xf32>
    %c0_223 = arith.constant 0 : index
    %c0_224 = arith.constant 0 : index
    %c0_225 = arith.constant 0 : index
    %396 = vector.load %arg9[%c0_223, %c0_224, %c0_225] : memref<2x2x128xf32, #tpu.memory_space<vmem>>, vector<1x2x128xf32>
    %397 = vector.shape_cast %396 : vector<1x2x128xf32> to vector<2x128xf32>
    %398 = vector.shape_cast %369 : vector<2x128xf32> to vector<1x2x128xf32>
    tpu.vector_store %arg9[%c0_223, %c0_224, %c0_225], %398 {strides = array<i32>} : memref<2x2x128xf32, #tpu.memory_space<vmem>>, vector<1x2x128xf32>,
    %c0_226 = arith.constant 0 : index
    %c0_227 = arith.constant 0 : index
    %c0_228 = arith.constant 0 : index
    %399 = vector.load %arg10[%c0_226, %c0_227, %c0_228] : memref<2x2x128xf32, #tpu.memory_space<vmem>>, vector<1x2x128xf32>
    %400 = vector.shape_cast %399 : vector<1x2x128xf32> to vector<2x128xf32>
    %401 = vector.shape_cast %366 : vector<2x128xf32> to vector<1x2x128xf32>
    tpu.vector_store %arg10[%c0_226, %c0_227, %c0_228], %401 {strides = array<i32>} : memref<2x2x128xf32, #tpu.memory_space<vmem>>, vector<1x2x128xf32>,
    %c1_229 = arith.constant 1 : index
    %c0_230 = arith.constant 0 : index
    %c0_231 = arith.constant 0 : index
    %402 = vector.load %arg9[%c1_229, %c0_230, %c0_231] : memref<2x2x128xf32, #tpu.memory_space<vmem>>, vector<1x2x128xf32>
    %403 = vector.shape_cast %402 : vector<1x2x128xf32> to vector<2x128xf32>
    %404 = vector.shape_cast %395 : vector<2x128xf32> to vector<1x2x128xf32>
    tpu.vector_store %arg9[%c1_229, %c0_230, %c0_231], %404 {strides = array<i32>} : memref<2x2x128xf32, #tpu.memory_space<vmem>>, vector<1x2x128xf32>,
    %c1_232 = arith.constant 1 : index
    %c0_233 = arith.constant 0 : index
    %c0_234 = arith.constant 0 : index
    %405 = vector.load %arg10[%c1_232, %c0_233, %c0_234] : memref<2x2x128xf32, #tpu.memory_space<vmem>>, vector<1x2x128xf32>
    %406 = vector.shape_cast %405 : vector<1x2x128xf32> to vector<2x128xf32>
    %407 = vector.shape_cast %392 : vector<2x128xf32> to vector<1x2x128xf32>
    tpu.vector_store %arg10[%c1_232, %c0_233, %c0_234], %407 {strides = array<i32>} : memref<2x2x128xf32, #tpu.memory_space<vmem>>, vector<1x2x128xf32>,
    %408 = arith.index_cast %c5_i32 : i32 to index
    %c0_235 = arith.constant 0 : index
    %c0_236 = arith.constant 0 : index
    %409 = vector.load %arg6[%408, %c0_235, %c0_236] : memref<8x2x128xf32, #tpu.memory_space<vmem>>, vector<1x2x128xf32>
    %410 = vector.shape_cast %409 : vector<1x2x128xf32> to vector<2x128xf32>
    %411 = vector.shape_cast %395 : vector<2x128xf32> to vector<1x2x128xf32>
    tpu.vector_store %arg6[%408, %c0_235, %c0_236], %411 {strides = array<i32>} : memref<8x2x128xf32, #tpu.memory_space<vmem>>, vector<1x2x128xf32>,
    %c6_i32 = arith.constant 6 : i32
    %412 = arith.index_cast %c6_i32 : i32 to index
    %c0_237 = arith.constant 0 : index
    %c0_238 = arith.constant 0 : index
    %413 = vector.load %arg0[%412, %c0_237, %c0_238] : memref<8x2x512xf32, #tpu.memory_space<vmem>>, vector<1x2x512xf32>
    %414 = vector.shape_cast %413 : vector<1x2x512xf32> to vector<2x512xf32>
    %c0_239 = arith.constant 0 : index
    %c0_240 = arith.constant 0 : index
    %c0_241 = arith.constant 0 : index
    %415 = vector.load %arg9[%c0_239, %c0_240, %c0_241] : memref<2x2x128xf32, #tpu.memory_space<vmem>>, vector<1x2x128xf32>
    %416 = vector.shape_cast %415 : vector<1x2x128xf32> to vector<2x128xf32>
    %c0_242 = arith.constant 0 : index
    %c0_243 = arith.constant 0 : index
    %417 = vector.load %arg1[%c0_242, %c0_243] : memref<128x512xf32, #tpu.memory_space<vmem>>, vector<128x512xf32>
    %cst_244 = arith.constant dense<0.000000e+00> : vector<2x512xf32>
    %418 = tpu.matmul %416, %417, %cst_244 {dimension_numbers = #tpu.dot_dimension_numbers<[1], [0], [0], [1], [0, 0, 1, 1], [], []>} : vector<2x128xf32>, vector<128x512xf32>, vector<2x512xf32> -> vector<2x512xf32>
    %419 = arith.addf %414, %418 : vector<2x512xf32>
    %c0_245 = arith.constant 0 : index
    %c0_246 = arith.constant 0 : index
    %c0_247 = arith.constant 0 : index
    %420 = vector.load %arg10[%c0_245, %c0_246, %c0_247] : memref<2x2x128xf32, #tpu.memory_space<vmem>>, vector<1x2x128xf32>
    %421 = vector.shape_cast %420 : vector<1x2x128xf32> to vector<2x128xf32>
    %422 = vector.extract_strided_slice %419 {offsets = [0, 0], sizes = [2, 384], strides = [1, 1]} : vector<2x512xf32> to vector<2x384xf32>
    %423 = arith.negf %422 : vector<2x384xf32>
    %424 = math.exp %423 : vector<2x384xf32>
    %cst_248 = arith.constant 1.000000e+00 : f32
    %425 = vector.broadcast %cst_248 : f32 to vector<2x384xf32>
    %426 = arith.addf %425, %424 : vector<2x384xf32>
    %427 = arith.divf %425, %426 : vector<2x384xf32>
    %428 = vector.extract_strided_slice %419 {offsets = [0, 384], sizes = [2, 128], strides = [1, 1]} : vector<2x512xf32> to vector<2x128xf32>
    %429 = math.tanh %428 : vector<2x128xf32>
    %430 = vector.extract_strided_slice %427 {offsets = [0, 128], sizes = [2, 128], strides = [1, 1]} : vector<2x384xf32> to vector<2x128xf32>
    %431 = arith.mulf %430, %421 : vector<2x128xf32>
    %432 = vector.extract_strided_slice %427 {offsets = [0, 0], sizes = [2, 128], strides = [1, 1]} : vector<2x384xf32> to vector<2x128xf32>
    %433 = arith.mulf %432, %429 : vector<2x128xf32>
    %434 = arith.addf %431, %433 : vector<2x128xf32>
    %435 = vector.extract_strided_slice %427 {offsets = [0, 256], sizes = [2, 128], strides = [1, 1]} : vector<2x384xf32> to vector<2x128xf32>
    %436 = math.tanh %434 : vector<2x128xf32>
    %437 = arith.mulf %435, %436 : vector<2x128xf32>
    %c1_249 = arith.constant 1 : index
    %c0_250 = arith.constant 0 : index
    %c0_251 = arith.constant 0 : index
    %438 = vector.load %arg9[%c1_249, %c0_250, %c0_251] : memref<2x2x128xf32, #tpu.memory_space<vmem>>, vector<1x2x128xf32>
    %439 = vector.shape_cast %438 : vector<1x2x128xf32> to vector<2x128xf32>
    %440 = tpu.concatenate %437, %439 in 1 : vector<2x128xf32>, vector<2x128xf32> -> vector<2x256xf32>
    %c0_252 = arith.constant 0 : index
    %c0_253 = arith.constant 0 : index
    %441 = vector.load %arg2[%c0_252, %c0_253] : memref<256x512xf32, #tpu.memory_space<vmem>>, vector<256x512xf32>
    %cst_254 = arith.constant dense<0.000000e+00> : vector<2x512xf32>
    %442 = tpu.matmul %440, %441, %cst_254 {dimension_numbers = #tpu.dot_dimension_numbers<[1], [0], [0], [1], [0, 0, 1, 1], [], []>} : vector<2x256xf32>, vector<256x512xf32>, vector<2x512xf32> -> vector<2x512xf32>
    %c0_255 = arith.constant 0 : index
    %c0_256 = arith.constant 0 : index
    %443 = vector.load %arg3[%c0_255, %c0_256] : memref<1x512xf32, #tpu.memory_space<vmem>>, vector<1x512xf32>
    %444 = vector.broadcast %443 : vector<1x512xf32> to vector<2x512xf32>
    %445 = arith.addf %442, %444 : vector<2x512xf32>
    %c1_257 = arith.constant 1 : index
    %c0_258 = arith.constant 0 : index
    %c0_259 = arith.constant 0 : index
    %446 = vector.load %arg10[%c1_257, %c0_258, %c0_259] : memref<2x2x128xf32, #tpu.memory_space<vmem>>, vector<1x2x128xf32>
    %447 = vector.shape_cast %446 : vector<1x2x128xf32> to vector<2x128xf32>
    %448 = vector.extract_strided_slice %445 {offsets = [0, 0], sizes = [2, 384], strides = [1, 1]} : vector<2x512xf32> to vector<2x384xf32>
    %449 = arith.negf %448 : vector<2x384xf32>
    %450 = math.exp %449 : vector<2x384xf32>
    %cst_260 = arith.constant 1.000000e+00 : f32
    %451 = vector.broadcast %cst_260 : f32 to vector<2x384xf32>
    %452 = arith.addf %451, %450 : vector<2x384xf32>
    %453 = arith.divf %451, %452 : vector<2x384xf32>
    %454 = vector.extract_strided_slice %445 {offsets = [0, 384], sizes = [2, 128], strides = [1, 1]} : vector<2x512xf32> to vector<2x128xf32>
    %455 = math.tanh %454 : vector<2x128xf32>
    %456 = vector.extract_strided_slice %453 {offsets = [0, 128], sizes = [2, 128], strides = [1, 1]} : vector<2x384xf32> to vector<2x128xf32>
    %457 = arith.mulf %456, %447 : vector<2x128xf32>
    %458 = vector.extract_strided_slice %453 {offsets = [0, 0], sizes = [2, 128], strides = [1, 1]} : vector<2x384xf32> to vector<2x128xf32>
    %459 = arith.mulf %458, %455 : vector<2x128xf32>
    %460 = arith.addf %457, %459 : vector<2x128xf32>
    %461 = vector.extract_strided_slice %453 {offsets = [0, 256], sizes = [2, 128], strides = [1, 1]} : vector<2x384xf32> to vector<2x128xf32>
    %462 = math.tanh %460 : vector<2x128xf32>
    %463 = arith.mulf %461, %462 : vector<2x128xf32>
    %c0_261 = arith.constant 0 : index
    %c0_262 = arith.constant 0 : index
    %c0_263 = arith.constant 0 : index
    %464 = vector.load %arg9[%c0_261, %c0_262, %c0_263] : memref<2x2x128xf32, #tpu.memory_space<vmem>>, vector<1x2x128xf32>
    %465 = vector.shape_cast %464 : vector<1x2x128xf32> to vector<2x128xf32>
    %466 = vector.shape_cast %437 : vector<2x128xf32> to vector<1x2x128xf32>
    tpu.vector_store %arg9[%c0_261, %c0_262, %c0_263], %466 {strides = array<i32>} : memref<2x2x128xf32, #tpu.memory_space<vmem>>, vector<1x2x128xf32>,
    %c0_264 = arith.constant 0 : index
    %c0_265 = arith.constant 0 : index
    %c0_266 = arith.constant 0 : index
    %467 = vector.load %arg10[%c0_264, %c0_265, %c0_266] : memref<2x2x128xf32, #tpu.memory_space<vmem>>, vector<1x2x128xf32>
    %468 = vector.shape_cast %467 : vector<1x2x128xf32> to vector<2x128xf32>
    %469 = vector.shape_cast %434 : vector<2x128xf32> to vector<1x2x128xf32>
    tpu.vector_store %arg10[%c0_264, %c0_265, %c0_266], %469 {strides = array<i32>} : memref<2x2x128xf32, #tpu.memory_space<vmem>>, vector<1x2x128xf32>,
    %c1_267 = arith.constant 1 : index
    %c0_268 = arith.constant 0 : index
    %c0_269 = arith.constant 0 : index
    %470 = vector.load %arg9[%c1_267, %c0_268, %c0_269] : memref<2x2x128xf32, #tpu.memory_space<vmem>>, vector<1x2x128xf32>
    %471 = vector.shape_cast %470 : vector<1x2x128xf32> to vector<2x128xf32>
    %472 = vector.shape_cast %463 : vector<2x128xf32> to vector<1x2x128xf32>
    tpu.vector_store %arg9[%c1_267, %c0_268, %c0_269], %472 {strides = array<i32>} : memref<2x2x128xf32, #tpu.memory_space<vmem>>, vector<1x2x128xf32>,
    %c1_270 = arith.constant 1 : index
    %c0_271 = arith.constant 0 : index
    %c0_272 = arith.constant 0 : index
    %473 = vector.load %arg10[%c1_270, %c0_271, %c0_272] : memref<2x2x128xf32, #tpu.memory_space<vmem>>, vector<1x2x128xf32>
    %474 = vector.shape_cast %473 : vector<1x2x128xf32> to vector<2x128xf32>
    %475 = vector.shape_cast %460 : vector<2x128xf32> to vector<1x2x128xf32>
    tpu.vector_store %arg10[%c1_270, %c0_271, %c0_272], %475 {strides = array<i32>} : memref<2x2x128xf32, #tpu.memory_space<vmem>>, vector<1x2x128xf32>,
    %476 = arith.index_cast %c6_i32 : i32 to index
    %c0_273 = arith.constant 0 : index
    %c0_274 = arith.constant 0 : index
    %477 = vector.load %arg6[%476, %c0_273, %c0_274] : memref<8x2x128xf32, #tpu.memory_space<vmem>>, vector<1x2x128xf32>
    %478 = vector.shape_cast %477 : vector<1x2x128xf32> to vector<2x128xf32>
    %479 = vector.shape_cast %463 : vector<2x128xf32> to vector<1x2x128xf32>
    tpu.vector_store %arg6[%476, %c0_273, %c0_274], %479 {strides = array<i32>} : memref<8x2x128xf32, #tpu.memory_space<vmem>>, vector<1x2x128xf32>,
    %c7_i32 = arith.constant 7 : i32
    %480 = arith.index_cast %c7_i32 : i32 to index
    %c0_275 = arith.constant 0 : index
    %c0_276 = arith.constant 0 : index
    %481 = vector.load %arg0[%480, %c0_275, %c0_276] : memref<8x2x512xf32, #tpu.memory_space<vmem>>, vector<1x2x512xf32>
    %482 = vector.shape_cast %481 : vector<1x2x512xf32> to vector<2x512xf32>
    %c0_277 = arith.constant 0 : index
    %c0_278 = arith.constant 0 : index
    %c0_279 = arith.constant 0 : index
    %483 = vector.load %arg9[%c0_277, %c0_278, %c0_279] : memref<2x2x128xf32, #tpu.memory_space<vmem>>, vector<1x2x128xf32>
    %484 = vector.shape_cast %483 : vector<1x2x128xf32> to vector<2x128xf32>
    %c0_280 = arith.constant 0 : index
    %c0_281 = arith.constant 0 : index
    %485 = vector.load %arg1[%c0_280, %c0_281] : memref<128x512xf32, #tpu.memory_space<vmem>>, vector<128x512xf32>
    %cst_282 = arith.constant dense<0.000000e+00> : vector<2x512xf32>
    %486 = tpu.matmul %484, %485, %cst_282 {dimension_numbers = #tpu.dot_dimension_numbers<[1], [0], [0], [1], [0, 0, 1, 1], [], []>} : vector<2x128xf32>, vector<128x512xf32>, vector<2x512xf32> -> vector<2x512xf32>
    %487 = arith.addf %482, %486 : vector<2x512xf32>
    %c0_283 = arith.constant 0 : index
    %c0_284 = arith.constant 0 : index
    %c0_285 = arith.constant 0 : index
    %488 = vector.load %arg10[%c0_283, %c0_284, %c0_285] : memref<2x2x128xf32, #tpu.memory_space<vmem>>, vector<1x2x128xf32>
    %489 = vector.shape_cast %488 : vector<1x2x128xf32> to vector<2x128xf32>
    %490 = vector.extract_strided_slice %487 {offsets = [0, 0], sizes = [2, 384], strides = [1, 1]} : vector<2x512xf32> to vector<2x384xf32>
    %491 = arith.negf %490 : vector<2x384xf32>
    %492 = math.exp %491 : vector<2x384xf32>
    %cst_286 = arith.constant 1.000000e+00 : f32
    %493 = vector.broadcast %cst_286 : f32 to vector<2x384xf32>
    %494 = arith.addf %493, %492 : vector<2x384xf32>
    %495 = arith.divf %493, %494 : vector<2x384xf32>
    %496 = vector.extract_strided_slice %487 {offsets = [0, 384], sizes = [2, 128], strides = [1, 1]} : vector<2x512xf32> to vector<2x128xf32>
    %497 = math.tanh %496 : vector<2x128xf32>
    %498 = vector.extract_strided_slice %495 {offsets = [0, 128], sizes = [2, 128], strides = [1, 1]} : vector<2x384xf32> to vector<2x128xf32>
    %499 = arith.mulf %498, %489 : vector<2x128xf32>
    %500 = vector.extract_strided_slice %495 {offsets = [0, 0], sizes = [2, 128], strides = [1, 1]} : vector<2x384xf32> to vector<2x128xf32>
    %501 = arith.mulf %500, %497 : vector<2x128xf32>
    %502 = arith.addf %499, %501 : vector<2x128xf32>
    %503 = vector.extract_strided_slice %495 {offsets = [0, 256], sizes = [2, 128], strides = [1, 1]} : vector<2x384xf32> to vector<2x128xf32>
    %504 = math.tanh %502 : vector<2x128xf32>
    %505 = arith.mulf %503, %504 : vector<2x128xf32>
    %c1_287 = arith.constant 1 : index
    %c0_288 = arith.constant 0 : index
    %c0_289 = arith.constant 0 : index
    %506 = vector.load %arg9[%c1_287, %c0_288, %c0_289] : memref<2x2x128xf32, #tpu.memory_space<vmem>>, vector<1x2x128xf32>
    %507 = vector.shape_cast %506 : vector<1x2x128xf32> to vector<2x128xf32>
    %508 = tpu.concatenate %505, %507 in 1 : vector<2x128xf32>, vector<2x128xf32> -> vector<2x256xf32>
    %c0_290 = arith.constant 0 : index
    %c0_291 = arith.constant 0 : index
    %509 = vector.load %arg2[%c0_290, %c0_291] : memref<256x512xf32, #tpu.memory_space<vmem>>, vector<256x512xf32>
    %cst_292 = arith.constant dense<0.000000e+00> : vector<2x512xf32>
    %510 = tpu.matmul %508, %509, %cst_292 {dimension_numbers = #tpu.dot_dimension_numbers<[1], [0], [0], [1], [0, 0, 1, 1], [], []>} : vector<2x256xf32>, vector<256x512xf32>, vector<2x512xf32> -> vector<2x512xf32>
    %c0_293 = arith.constant 0 : index
    %c0_294 = arith.constant 0 : index
    %511 = vector.load %arg3[%c0_293, %c0_294] : memref<1x512xf32, #tpu.memory_space<vmem>>, vector<1x512xf32>
    %512 = vector.broadcast %511 : vector<1x512xf32> to vector<2x512xf32>
    %513 = arith.addf %510, %512 : vector<2x512xf32>
    %c1_295 = arith.constant 1 : index
    %c0_296 = arith.constant 0 : index
    %c0_297 = arith.constant 0 : index
    %514 = vector.load %arg10[%c1_295, %c0_296, %c0_297] : memref<2x2x128xf32, #tpu.memory_space<vmem>>, vector<1x2x128xf32>
    %515 = vector.shape_cast %514 : vector<1x2x128xf32> to vector<2x128xf32>
    %516 = vector.extract_strided_slice %513 {offsets = [0, 0], sizes = [2, 384], strides = [1, 1]} : vector<2x512xf32> to vector<2x384xf32>
    %517 = arith.negf %516 : vector<2x384xf32>
    %518 = math.exp %517 : vector<2x384xf32>
    %cst_298 = arith.constant 1.000000e+00 : f32
    %519 = vector.broadcast %cst_298 : f32 to vector<2x384xf32>
    %520 = arith.addf %519, %518 : vector<2x384xf32>
    %521 = arith.divf %519, %520 : vector<2x384xf32>
    %522 = vector.extract_strided_slice %513 {offsets = [0, 384], sizes = [2, 128], strides = [1, 1]} : vector<2x512xf32> to vector<2x128xf32>
    %523 = math.tanh %522 : vector<2x128xf32>
    %524 = vector.extract_strided_slice %521 {offsets = [0, 128], sizes = [2, 128], strides = [1, 1]} : vector<2x384xf32> to vector<2x128xf32>
    %525 = arith.mulf %524, %515 : vector<2x128xf32>
    %526 = vector.extract_strided_slice %521 {offsets = [0, 0], sizes = [2, 128], strides = [1, 1]} : vector<2x384xf32> to vector<2x128xf32>
    %527 = arith.mulf %526, %523 : vector<2x128xf32>
    %528 = arith.addf %525, %527 : vector<2x128xf32>
    %529 = vector.extract_strided_slice %521 {offsets = [0, 256], sizes = [2, 128], strides = [1, 1]} : vector<2x384xf32> to vector<2x128xf32>
    %530 = math.tanh %528 : vector<2x128xf32>
    %531 = arith.mulf %529, %530 : vector<2x128xf32>
    %c0_299 = arith.constant 0 : index
    %c0_300 = arith.constant 0 : index
    %c0_301 = arith.constant 0 : index
    %532 = vector.load %arg9[%c0_299, %c0_300, %c0_301] : memref<2x2x128xf32, #tpu.memory_space<vmem>>, vector<1x2x128xf32>
    %533 = vector.shape_cast %532 : vector<1x2x128xf32> to vector<2x128xf32>
    %534 = vector.shape_cast %505 : vector<2x128xf32> to vector<1x2x128xf32>
    tpu.vector_store %arg9[%c0_299, %c0_300, %c0_301], %534 {strides = array<i32>} : memref<2x2x128xf32, #tpu.memory_space<vmem>>, vector<1x2x128xf32>,
    %c0_302 = arith.constant 0 : index
    %c0_303 = arith.constant 0 : index
    %c0_304 = arith.constant 0 : index
    %535 = vector.load %arg10[%c0_302, %c0_303, %c0_304] : memref<2x2x128xf32, #tpu.memory_space<vmem>>, vector<1x2x128xf32>
    %536 = vector.shape_cast %535 : vector<1x2x128xf32> to vector<2x128xf32>
    %537 = vector.shape_cast %502 : vector<2x128xf32> to vector<1x2x128xf32>
    tpu.vector_store %arg10[%c0_302, %c0_303, %c0_304], %537 {strides = array<i32>} : memref<2x2x128xf32, #tpu.memory_space<vmem>>, vector<1x2x128xf32>,
    %c1_305 = arith.constant 1 : index
    %c0_306 = arith.constant 0 : index
    %c0_307 = arith.constant 0 : index
    %538 = vector.load %arg9[%c1_305, %c0_306, %c0_307] : memref<2x2x128xf32, #tpu.memory_space<vmem>>, vector<1x2x128xf32>
    %539 = vector.shape_cast %538 : vector<1x2x128xf32> to vector<2x128xf32>
    %540 = vector.shape_cast %531 : vector<2x128xf32> to vector<1x2x128xf32>
    tpu.vector_store %arg9[%c1_305, %c0_306, %c0_307], %540 {strides = array<i32>} : memref<2x2x128xf32, #tpu.memory_space<vmem>>, vector<1x2x128xf32>,
    %c1_308 = arith.constant 1 : index
    %c0_309 = arith.constant 0 : index
    %c0_310 = arith.constant 0 : index
    %541 = vector.load %arg10[%c1_308, %c0_309, %c0_310] : memref<2x2x128xf32, #tpu.memory_space<vmem>>, vector<1x2x128xf32>
    %542 = vector.shape_cast %541 : vector<1x2x128xf32> to vector<2x128xf32>
    %543 = vector.shape_cast %528 : vector<2x128xf32> to vector<1x2x128xf32>
    tpu.vector_store %arg10[%c1_308, %c0_309, %c0_310], %543 {strides = array<i32>} : memref<2x2x128xf32, #tpu.memory_space<vmem>>, vector<1x2x128xf32>,
    %544 = arith.index_cast %c7_i32 : i32 to index
    %c0_311 = arith.constant 0 : index
    %c0_312 = arith.constant 0 : index
    %545 = vector.load %arg6[%544, %c0_311, %c0_312] : memref<8x2x128xf32, #tpu.memory_space<vmem>>, vector<1x2x128xf32>
    %546 = vector.shape_cast %545 : vector<1x2x128xf32> to vector<2x128xf32>
    %547 = vector.shape_cast %531 : vector<2x128xf32> to vector<1x2x128xf32>
    tpu.vector_store %arg6[%544, %c0_311, %c0_312], %547 {strides = array<i32>} : memref<8x2x128xf32, #tpu.memory_space<vmem>>, vector<1x2x128xf32>,
    %c8_i32 = arith.constant 8 : i32
    %c0_313 = arith.constant 0 : index
    %c0_314 = arith.constant 0 : index
    %c0_315 = arith.constant 0 : index
    %548 = vector.load %arg9[%c0_313, %c0_314, %c0_315] : memref<2x2x128xf32, #tpu.memory_space<vmem>>, vector<2x2x128xf32>
    %c0_316 = arith.constant 0 : index
    %c0_317 = arith.constant 0 : index
    %c0_318 = arith.constant 0 : index
    %549 = vector.load %arg7[%c0_316, %c0_317, %c0_318] : memref<2x2x128xf32, #tpu.memory_space<vmem>>, vector<2x2x128xf32>
    tpu.vector_store %arg7[%c0_316, %c0_317, %c0_318], %548 {strides = array<i32>} : memref<2x2x128xf32, #tpu.memory_space<vmem>>, vector<2x2x128xf32>,
    %c0_319 = arith.constant 0 : index
    %c0_320 = arith.constant 0 : index
    %c0_321 = arith.constant 0 : index
    %550 = vector.load %arg10[%c0_319, %c0_320, %c0_321] : memref<2x2x128xf32, #tpu.memory_space<vmem>>, vector<2x2x128xf32>
    %c0_322 = arith.constant 0 : index
    %c0_323 = arith.constant 0 : index
    %c0_324 = arith.constant 0 : index
    %551 = vector.load %arg8[%c0_322, %c0_323, %c0_324] : memref<2x2x128xf32, #tpu.memory_space<vmem>>, vector<2x2x128xf32>
    tpu.vector_store %arg8[%c0_322, %c0_323, %c0_324], %550 {strides = array<i32>} : memref<2x2x128xf32, #tpu.memory_space<vmem>>, vector<2x2x128xf32>,
    return
  }
}

module attributes {stable_mosaic.version = 11 : i64} {
  func.func @_matmul_bias_kernel(%arg0: memref<16x128xf32, #tpu.memory_space<vmem>>, %arg1: memref<128x128xf32, #tpu.memory_space<vmem>>, %arg2: memref<1x128xf32, #tpu.memory_space<vmem>>, %arg3: memref<16x128xf32, #tpu.memory_space<vmem>>) attributes {dimension_semantics = [], scalar_prefetch = 0 : i64, scratch_operands = 0 : i64, tpu.core_type = #tpu.core_type<tc>} {
    %c0 = arith.constant 0 : index
    %c0_0 = arith.constant 0 : index
    %0 = vector.load %arg0[%c0, %c0_0] : memref<16x128xf32, #tpu.memory_space<vmem>>, vector<16x128xf32>
    %c0_1 = arith.constant 0 : index
    %c0_2 = arith.constant 0 : index
    %1 = vector.load %arg1[%c0_1, %c0_2] : memref<128x128xf32, #tpu.memory_space<vmem>>, vector<128x128xf32>
    %cst = arith.constant dense<0.000000e+00> : vector<16x128xf32>
    %2 = tpu.matmul %0, %1, %cst {dimension_numbers = #tpu.dot_dimension_numbers<[1], [0], [0], [1], [0, 0, 1, 1], [], []>} : vector<16x128xf32>, vector<128x128xf32>, vector<16x128xf32> -> vector<16x128xf32>
    %c0_3 = arith.constant 0 : index
    %c0_4 = arith.constant 0 : index
    %3 = vector.load %arg2[%c0_3, %c0_4] : memref<1x128xf32, #tpu.memory_space<vmem>>, vector<1x128xf32>
    %4 = vector.broadcast %3 : vector<1x128xf32> to vector<16x128xf32>
    %5 = arith.addf %2, %4 : vector<16x128xf32>
    %c0_5 = arith.constant 0 : index
    %c0_6 = arith.constant 0 : index
    %6 = vector.load %arg3[%c0_5, %c0_6] : memref<16x128xf32, #tpu.memory_space<vmem>>, vector<16x128xf32>
    tpu.vector_store %arg3[%c0_5, %c0_6], %5 {strides = array<i32>} : memref<16x128xf32, #tpu.memory_space<vmem>>, vector<16x128xf32>,
    return
  }
}

</mosaic_0001>

<bundles_post_ra>
// kernel: decoder_forward.3
= control target key start
LH: loop header
LB: loop body
LE: loop exit
PB: predicated region body
PF: predicated region fallthrough
CT: control target
= control target key end

     0   :  { %8 = vsyncpa [#allocation3], 0  ;;  %s410_s0 = inlined_call_operand.vmem [shape: f32[16,128], index: 0, kind: input, shape index: {}]   ;;  %s411_s1 = inlined_call_operand.hbm [shape: f32[128,512], index: 1, kind: input, shape index: {}]   ;;  %s412_s2 = inlined_call_operand.hbm [shape: f32[1,512], index: 2, kind: input, shape index: {}]   ;;  %s413_s3 = inlined_call_operand.vmem [shape: f32[16,512], index: 3, kind: output, shape index: {}]  }
   0x1   :  { %9 = vsyncpa [#allocation5], 0  ;;  %s345_s12 = smov [#allocation2]  }
   0x2   :  { %s17_s13 = sshll.u32 %s345_s12, 4  ;;  %s18_s13 = int_to_ptr.vmem [resolvable:$true] %s17_s13 }
   0x3   :  { %s309_s14 = scalar_lea.vmem %s18_s13, 8192  ;;  %p314_p1 = scmp.lt.s32.totalorder %s18_s13, %s18_s13 }
   0x4   :  { %p310_p0 = scmp.ne.s32.totalorder %s18_s13, %s309_s14  ;;  %p315_p2 = scmp.lt.s32.totalorder %s309_s14, %s309_s14 }
   0x6   :  { %p316_p3 = por %p315_p2, %p314_p1 }
   0x8   :  { %p317_p4 = pnand %p316_p3, %p310_p0 }
   0xa   :  { %320 = shalt.err (!%p317_p4)
}
   0xb   :  { %s346_s15 = smov 512   ;;  %s347_s16 = smov 32  }
   0xc   :  { %23 = dma.hbm_to_vmem [thread:$0]  %s411_s1, 8192, %s18_s13, [#allocation3], %s346_s15, %s346_s15, %s347_s16  }
   0xd   :  { %s348_s19 = smov [#allocation4]  }
   0xe   :  { %s30_s20 = sshll.u32 %s348_s19, 4  ;;  %s31_s20 = int_to_ptr.vmem [resolvable:$true] %s30_s20 }
   0xf   :  { %s329_s21 = scalar_lea.vmem %s31_s20, 64  ;;  %p334_p6 = scmp.lt.s32.totalorder %s31_s20, %s31_s20 }
  0x10   :  { %p330_p5 = scmp.ne.s32.totalorder %s31_s20, %s329_s21  ;;  %p335_p7 = scmp.lt.s32.totalorder %s329_s21, %s329_s21 }
  0x12   :  { %p336_p8 = por %p335_p7, %p334_p6 }
  0x14   :  { %p337_p9 = pnand %p336_p8, %p330_p5 }
  0x16   :  { %340 = shalt.err (!%p337_p9)
}
  0x17   :  { %33 = dma.hbm_to_vmem [thread:$0]  %s412_s2, 64, %s31_s20, [#allocation5]  }
  0x18   :  { %341 = dma.done.wait [#allocation3], 8192  }
  0x19   :  { %342 = vsyncadd [#allocation3], 4294959104 }
  0x1a   :  { %343 = dma.done.wait [#allocation5], 64  }
  0x1b   :  { %344 = vsyncadd [#allocation5], 4294967232  ;;  %v349_v0 = vmov 0.0   ;;  %v103_v1 = vld [vmem:[#allocation2 + $0x1e8] sm:$0xff]  ;;  %v105_v2 = vld [vmem:[#allocation2 + $0x1f8] sm:$0xff] }
  0x1c   :  { %192 = vmatprep.mubr.f32.mxu0 %v349_v0  ;;  %269 = vmatprep.mubr.f32.mxu1 %v349_v0  ;;  %v102_v3 = vld [vmem:[#allocation2 + $0x1e0] sm:$0xff]  ;;  %v104_v4 = vld [vmem:[#allocation2 + $0x1f0] sm:$0xff]  ;;  %v99_v5 = vld [vmem:[#allocation2 + $0x1c8] sm:$0xff] }
  0x1d   :  { %128 = vmatprep.subr.mxu0 %v103_v1  ;;  %205 = vmatprep.subr.mxu1 %v105_v2  ;;  %v101_v6 = vld [vmem:[#allocation2 + $0x1d8] sm:$0xff]  ;;  %v98_v7 = vld [vmem:[#allocation2 + $0x1c0] sm:$0xff]  ;;  %v100_v8 = vld [vmem:[#allocation2 + $0x1d0] sm:$0xff] }
  0x1e   :  { %129 = vmatpush1.msra.mxu0 %v102_v3  ;;  %206 = vmatpush1.msra.mxu1 %v104_v4  ;;  %v95_v9 = vld [vmem:[#allocation2 + $0x1a8] sm:$0xff]  ;;  %v97_v10 = vld [vmem:[#allocation2 + $0x1b8] sm:$0xff]  ;;  %v94_v11 = vld [vmem:[#allocation2 + $0x1a0] sm:$0xff]  ;;  %v108_v4 = vlaneseq }
  0x1f   :  { %130 = vmatprep.subr.mxu0 %v99_v5  ;;  %207 = vmatprep.subr.mxu1 %v101_v6  ;;  %v96_v12 = vld [vmem:[#allocation2 + $0x1b0] sm:$0xff]  ;;  %v91_v13 = vld [vmem:[#allocation2 + $0x188] sm:$0xff]  ;;  %v93_v14 = vld [vmem:[#allocation2 + $0x198] sm:$0xff] }
  0x20   :  { %131 = vmatpush1.msra.mxu0 %v98_v7  ;;  %208 = vmatpush1.msra.mxu1 %v100_v8  ;;  %v90_v15 = vld [vmem:[#allocation2 + $0x180] sm:$0xff]  ;;  %v92_v16 = vld [vmem:[#allocation2 + $0x190] sm:$0xff]  ;;  %v87_v17 = vld [vmem:[#allocation2 + $0x168] sm:$0xff]  ;;  %v109_v5 = vshrl.u32 %v108_v4, 7 }
  0x21   :  { %132 = vmatprep.subr.mxu0 %v95_v9  ;;  %209 = vmatprep.subr.mxu1 %v97_v10  ;;  %v89_v18 = vld [vmem:[#allocation2 + $0x178] sm:$0xff]  ;;  %v86_v19 = vld [vmem:[#allocation2 + $0x160] sm:$0xff]  ;;  %v88_v20 = vld [vmem:[#allocation2 + $0x170] sm:$0xff] }
  0x22   :  { %133 = vmatpush1.msra.mxu0 %v94_v11  ;;  %210 = vmatpush1.msra.mxu1 %v96_v12  ;;  %v83_v21 = vld [vmem:[#allocation2 + $0x148] sm:$0xff]  ;;  %v85_v22 = vld [vmem:[#allocation2 + $0x158] sm:$0xff]  ;;  %v82_v23 = vld [vmem:[#allocation2 + $0x140] sm:$0xff]  ;;  %v110_v6 = vsub.s32 0, %v109_v5  ;;  %v118_v7 = vsub.s32 2, %v109_v5  ;;  %v114_v9 = vsub.s32 1, %v109_v5 }
  0x23   :  { %134 = vmatprep.subr.mxu0 %v91_v13  ;;  %211 = vmatprep.subr.mxu1 %v93_v14  ;;  %v84_v24 = vld [vmem:[#allocation2 + $0x150] sm:$0xff]  ;;  %v79_v25 = vld [vmem:[#allocation2 + $0x128] sm:$0xff]  ;;  %v81_v26 = vld [vmem:[#allocation2 + $0x138] sm:$0xff]  ;;  %v122_v10 = vsub.s32 3, %v109_v5 }
  0x24   :  { %135 = vmatpush1.msra.mxu0 %v90_v15  ;;  %212 = vmatpush1.msra.mxu1 %v92_v16  ;;  %v78_v27 = vld [vmem:[#allocation2 + $0x120] sm:$0xff]  ;;  %v80_v28 = vld [vmem:[#allocation2 + $0x130] sm:$0xff]  ;;  %v75_v29 = vld [vmem:[#allocation2 + $0x108] sm:$0xff] }
  0x25   :  { %136 = vmatprep.subr.mxu0 %v87_v17  ;;  %213 = vmatprep.subr.mxu1 %v89_v18  ;;  %v77_v30 = vld [vmem:[#allocation2 + $0x118] sm:$0xff]  ;;  %v74_v31 = vld [vmem:[#allocation2 + $0x100] sm:$0xff]  ;;  %v76_v32 = vld [vmem:[#allocation2 + $0x110] sm:$0xff] }
  0x26   :  { %137 = vmatpush1.msra.mxu0 %v86_v19  ;;  %214 = vmatpush1.msra.mxu1 %v88_v20  ;;  %v71_v33 = vld [vmem:[#allocation2 + $0xe8] sm:$0xff]  ;;  %v73_v34 = vld [vmem:[#allocation2 + $0xf8] sm:$0xff]  ;;  %v70_v35 = vld [vmem:[#allocation2 + $0xe0] sm:$0xff] }
  0x27   :  { %138 = vmatprep.subr.mxu0 %v83_v21  ;;  %215 = vmatprep.subr.mxu1 %v85_v22  ;;  %v72_v36 = vld [vmem:[#allocation2 + $0xf0] sm:$0xff]  ;;  %v67_v37 = vld [vmem:[#allocation2 + $0xc8] sm:$0xff]  ;;  %v69_v38 = vld [vmem:[#allocation2 + $0xd8] sm:$0xff] }
  0x28   :  { %139 = vmatpush1.msra.mxu0 %v82_v23  ;;  %216 = vmatpush1.msra.mxu1 %v84_v24  ;;  %v66_v39 = vld [vmem:[#allocation2 + $0xc0] sm:$0xff]  ;;  %v68_v40 = vld [vmem:[#allocation2 + $0xd0] sm:$0xff]  ;;  %v63_v41 = vld [vmem:[#allocation2 + $0xa8] sm:$0xff] }
  0x29   :  { %140 = vmatprep.subr.mxu0 %v79_v25  ;;  %217 = vmatprep.subr.mxu1 %v81_v26  ;;  %v65_v42 = vld [vmem:[#allocation2 + $0xb8] sm:$0xff]  ;;  %v62_v43 = vld [vmem:[#allocation2 + $0xa0] sm:$0xff]  ;;  %v64_v44 = vld [vmem:[#allocation2 + $0xb0] sm:$0xff] }
  0x2a   :  { %141 = vmatpush1.msra.mxu0 %v78_v27  ;;  %218 = vmatpush1.msra.mxu1 %v80_v28  ;;  %v59_v45 = vld [vmem:[#allocation2 + $0x88] sm:$0xff]  ;;  %v61_v46 = vld [vmem:[#allocation2 + $0x98] sm:$0xff]  ;;  %v58_v47 = vld [vmem:[#allocation2 + $0x80] sm:$0xff] }
  0x2b   :  { %142 = vmatprep.subr.mxu0 %v75_v29  ;;  %219 = vmatprep.subr.mxu1 %v77_v30  ;;  %v60_v48 = vld [vmem:[#allocation2 + $0x90] sm:$0xff]  ;;  %v55_v49 = vld [vmem:[#allocation2 + $0x68] sm:$0xff]  ;;  %v57_v50 = vld [vmem:[#allocation2 + $0x78] sm:$0xff] }
  0x2c   :  { %143 = vmatpush1.msra.mxu0 %v74_v31  ;;  %220 = vmatpush1.msra.mxu1 %v76_v32  ;;  %v54_v51 = vld [vmem:[#allocation2 + $0x60] sm:$0xff]  ;;  %v56_v52 = vld [vmem:[#allocation2 + $0x70] sm:$0xff]  ;;  %v51_v53 = vld [vmem:[#allocation2 + $0x48] sm:$0xff] }
  0x2d   :  { %144 = vmatprep.subr.mxu0 %v71_v33  ;;  %221 = vmatprep.subr.mxu1 %v73_v34  ;;  %v53_v54 = vld [vmem:[#allocation2 + $0x58] sm:$0xff]  ;;  %v50_v55 = vld [vmem:[#allocation2 + $0x40] sm:$0xff]  ;;  %v52_v56 = vld [vmem:[#allocation2 + $0x50] sm:$0xff] }
  0x2e   :  { %145 = vmatpush1.msra.mxu0 %v70_v35  ;;  %222 = vmatpush1.msra.mxu1 %v72_v36  ;;  %v47_v57 = vld [vmem:[#allocation2 + $0x28] sm:$0xff]  ;;  %v49_v58 = vld [vmem:[#allocation2 + $0x38] sm:$0xff]  ;;  %v46_v59 = vld [vmem:[#allocation2 + $0x20] sm:$0xff] }
  0x2f   :  { %146 = vmatprep.subr.mxu0 %v67_v37  ;;  %223 = vmatprep.subr.mxu1 %v69_v38  ;;  %v48_v60 = vld [vmem:[#allocation2 + $0x30] sm:$0xff]  ;;  %v43_v61 = vld [vmem:[#allocation2 + $0x8] sm:$0xff]  ;;  %v45_v62 = vld [vmem:[#allocation2 + $0x18] sm:$0xff] }
  0x30   :  { %147 = vmatpush1.msra.mxu0 %v66_v39  ;;  %224 = vmatpush1.msra.mxu1 %v68_v40  ;;  %v42_v63 = vld [vmem:[#allocation2] sm:$0xff]  ;;  %v44_v1 = vld [vmem:[#allocation2 + $0x10] sm:$0xff]  ;;  %v41_v3 = vld [vmem:[%s410_s0 + $0x8] sm:$0xff] }
  0x31   :  { %148 = vmatprep.subr.mxu0 %v63_v41  ;;  %225 = vmatprep.subr.mxu1 %v65_v42  ;;  %v40_v2 = vld [vmem:[%s410_s0] sm:$0xff] }
  0x32   :  { %149 = vmatpush1.msra.mxu0 %v62_v43  ;;  %226 = vmatpush1.msra.mxu1 %v64_v44  ;;  %v106_v8 = vld [vmem:[#allocation4] sm:$0xf] }
  0x33   :  { %150 = vmatprep.subr.mxu0 %v59_v45  ;;  %227 = vmatprep.subr.mxu1 %v61_v46  ;;  %v111_v11 = vrot.slane %v106_v8, %v110_v6  ;;  %v119_v12 = vrot.slane %v106_v8, %v118_v7  ;;  %v115_v13 = vrot.slane %v106_v8, %v114_v9 }
  0x34   :  { %151 = vmatpush1.msra.mxu0 %v58_v47  ;;  %228 = vmatpush1.msra.mxu1 %v60_v48  ;;  %v123_v14 = vrot.slane %v106_v8, %v122_v10 }
  0x35   :  { %152 = vmatprep.subr.mxu0 %v55_v49  ;;  %229 = vmatprep.subr.mxu1 %v57_v50 }
  0x36   :  { %153 = vmatpush1.msra.mxu0 %v54_v51  ;;  %230 = vmatpush1.msra.mxu1 %v56_v52 }
  0x37   :  { %154 = vmatprep.subr.mxu0 %v51_v53  ;;  %231 = vmatprep.subr.mxu1 %v53_v54 }
  0x38   :  { %155 = vmatpush1.msra.mxu0 %v50_v55  ;;  %232 = vmatpush1.msra.mxu1 %v52_v56 }
  0x39   :  { %156 = vmatprep.subr.mxu0 %v47_v57  ;;  %233 = vmatprep.subr.mxu1 %v49_v58 }
  0x3a   :  { %157 = vmatpush1.msra.mxu0 %v46_v59  ;;  %234 = vmatpush1.msra.mxu1 %v48_v60 }
  0x3b   :  { %158 = vmatprep.subr.mxu0 %v43_v61  ;;  %235 = vmatprep.subr.mxu1 %v45_v62 }
  0x3c   :  { %159 = vmatpush1.msra.mxu0 %v42_v63  ;;  %236 = vmatpush1.msra.mxu1 %v44_v1 }
  0x3d   :  { %193 = vmatmul.mubr.f32.vlgmr.msra.gmra.mxu0 %v40_v2  ;;  %270 = vmatmul.mubr.f32.vlgmr.msra.gmra.mxu1 %v40_v2 }
  0x3e   :  { %198 = vmatprep.mubr.f32.mxu0 %v349_v0  ;;  %275 = vmatprep.mubr.f32.mxu1 %v349_v0 }
  0x41   :  { %199 = vmatmul.mubr.f32.gmra.mxu0 %v41_v3  ;;  %276 = vmatmul.mubr.f32.gmra.mxu1 %v41_v3 }
  0xfd   :  { %v194_v15 = vpop.f32.mrf.mxu0  ;;  %v271_v16 = vpop.f32.mrf.mxu1 }
  0xfe   :  { %v195_v0 = vadd.f32 %v194_v15, %v111_v11  ;;  %v272_v17 = vadd.f32 %v271_v16, %v119_v12 }
  0xff   :  { %v196_v18 = vpop.f32.mrf.mxu0  ;;  %v273_v19 = vpop.f32.mrf.mxu1 }
 0x100   :  { %282 = vst [vmem:[%s413_s3] sm:$0xff] %v195_v0  ;;  %284 = vst [vmem:[%s413_s3 + $0x10] sm:$0xff] %v272_v17  ;;  %v197_v20 = vadd.f32 %v196_v18, %v115_v13  ;;  %v274_v21 = vadd.f32 %v273_v19, %v123_v14 }
 0x101   :  { %v200_v22 = vpop.f32.mrf.mxu0  ;;  %v277_v23 = vpop.f32.mrf.mxu1 }
 0x102   :  { %283 = vst [vmem:[%s413_s3 + $0x8] sm:$0xff] %v197_v20  ;;  %285 = vst [vmem:[%s413_s3 + $0x18] sm:$0xff] %v274_v21  ;;  %v201_v24 = vadd.f32 %v200_v22, %v111_v11  ;;  %v278_v25 = vadd.f32 %v277_v23, %v119_v12 }
 0x103   :  { %v202_v26 = vpop.f32.mrf.mxu0  ;;  %v279_v27 = vpop.f32.mrf.mxu1 }
 0x104   :  { %286 = vst [vmem:[%s413_s3 + $0x20] sm:$0xff] %v201_v24  ;;  %288 = vst [vmem:[%s413_s3 + $0x30] sm:$0xff] %v278_v25  ;;  %v203_v28 = vadd.f32 %v202_v26, %v115_v13  ;;  %v280_v29 = vadd.f32 %v279_v27, %v123_v14 }
 0x106   :  { %287 = vst [vmem:[%s413_s3 + $0x28] sm:$0xff] %v203_v28  ;;  %289 = vst [vmem:[%s413_s3 + $0x38] sm:$0xff] %v280_v29 }
 0x107   :  { %294 = vsyncpa [#allocation3], 1 }
 0x108   :  { %295 = vsyncpa [#allocation5], 1 }

// kernel: decoder_forward.5
= control target key start
LH: loop header
LB: loop body
LE: loop exit
PB: predicated region body
PF: predicated region fallthrough
CT: control target
= control target key end

     0   :  { %s257_s1 = inlined_call_operand.vmem [shape: f32[128,128], index: 1, kind: input, shape index: {}]   ;;  %s258_s0 = inlined_call_operand.vmem [shape: f32[16,128], index: 0, kind: input, shape index: {}]   ;;  %s259_s2 = inlined_call_operand.vmem [shape: f32[1,128], index: 2, kind: input, shape index: {}]   ;;  %s260_s3 = inlined_call_operand.vmem [shape: f32[16,128], index: 3, kind: output, shape index: {}]  }
   0x1   :  { %v31_v0 = vld [vmem:[%s257_s1 + $0x78] sm:$0xff]  ;;  %v30_v1 = vld [vmem:[%s257_s1 + $0x70] sm:$0xff]  ;;  %v29_v2 = vld [vmem:[%s257_s1 + $0x68] sm:$0xff] }
   0x2   :  { %139 = vmatprep.subr.mxu0 %v31_v0  ;;  %v28_v3 = vld [vmem:[%s257_s1 + $0x60] sm:$0xff]  ;;  %v27_v5 = vld [vmem:[%s257_s1 + $0x58] sm:$0xff]  ;;  %v26_v6 = vld [vmem:[%s257_s1 + $0x50] sm:$0xff] }
   0x3   :  { %140 = vmatpush3.msra.mxu0 %v31_v0  ;;  %v14_v4 = vld [vmem:[%s258_s0] sm:$0xff]  ;;  %v25_v7 = vld [vmem:[%s257_s1 + $0x48] sm:$0xff]  ;;  %v23_v9 = vld [vmem:[%s257_s1 + $0x38] sm:$0xff] }
   0x4   :  { %141 = vmatprep.subr.mxu0 %v30_v1  ;;  %171 = vmatprep.mubr.f32.mxu0 %v14_v4  ;;  %v24_v8 = vld [vmem:[%s257_s1 + $0x40] sm:$0xff]  ;;  %v22_v10 = vld [vmem:[%s257_s1 + $0x30] sm:$0xff]  ;;  %v21_v11 = vld [vmem:[%s257_s1 + $0x28] sm:$0xff] }
   0x5   :  { %142 = vmatpush3.msra.mxu0 %v30_v1  ;;  %v20_v12 = vld [vmem:[%s257_s1 + $0x20] sm:$0xff]  ;;  %v19_v13 = vld [vmem:[%s257_s1 + $0x18] sm:$0xff]  ;;  %v18_v14 = vld [vmem:[%s257_s1 + $0x10] sm:$0xff] }
   0x6   :  { %143 = vmatprep.subr.mxu0 %v29_v2  ;;  %v17_v15 = vld [vmem:[%s257_s1 + $0x8] sm:$0xff]  ;;  %v16_v16 = vld [vmem:[%s257_s1] sm:$0xff] }
   0x7   :  { %144 = vmatpush3.msra.mxu0 %v29_v2  ;;  %v15_v17 = vld [vmem:[%s258_s0 + $0x8] sm:$0xff]  ;;  %v120_v18 = vld [vmem:[%s259_s2] ss:$0 sm:$0xff] }
   0x8   :  { %145 = vmatprep.subr.mxu0 %v28_v3 }
   0x9   :  { %146 = vmatpush3.msra.mxu0 %v28_v3 }
   0xa   :  { %147 = vmatprep.subr.mxu0 %v27_v5 }
   0xb   :  { %148 = vmatpush3.msra.mxu0 %v27_v5 }
   0xc   :  { %149 = vmatprep.subr.mxu0 %v26_v6 }
   0xd   :  { %150 = vmatpush3.msra.mxu0 %v26_v6 }
   0xe   :  { %151 = vmatprep.subr.mxu0 %v25_v7 }
   0xf   :  { %152 = vmatpush3.msra.mxu0 %v25_v7 }
  0x10   :  { %153 = vmatprep.subr.mxu0 %v24_v8 }
  0x11   :  { %154 = vmatpush3.msra.mxu0 %v24_v8 }
  0x12   :  { %155 = vmatprep.subr.mxu0 %v23_v9 }
  0x13   :  { %156 = vmatpush3.msra.mxu0 %v23_v9 }
  0x14   :  { %157 = vmatprep.subr.mxu0 %v22_v10 }
  0x15   :  { %158 = vmatpush3.msra.mxu0 %v22_v10 }
  0x16   :  { %159 = vmatprep.subr.mxu0 %v21_v11 }
  0x17   :  { %160 = vmatpush3.msra.mxu0 %v21_v11 }
  0x18   :  { %161 = vmatprep.subr.mxu0 %v20_v12 }
  0x19   :  { %162 = vmatpush3.msra.mxu0 %v20_v12 }
  0x1a   :  { %163 = vmatprep.subr.mxu0 %v19_v13 }
  0x1b   :  { %164 = vmatpush3.msra.mxu0 %v19_v13 }
  0x1c   :  { %165 = vmatprep.subr.mxu0 %v18_v14 }
  0x1d   :  { %166 = vmatpush3.msra.mxu0 %v18_v14 }
  0x1e   :  { %167 = vmatprep.subr.mxu0 %v17_v15 }
  0x1f   :  { %168 = vmatpush3.msra.mxu0 %v17_v15 }
  0x20   :  { %169 = vmatprep.subr.mxu0 %v16_v16 }
  0x21   :  { %170 = vmatpush3.msra.mxu0 %v16_v16 }
  0x22   :  { %172 = vmatmul.mubr.f32.vlgmr.msra.gmra.mxu0 %v15_v17 }
  0xe2   :  { %v173_v19 = vpop.f32.mrf.mxu0 }
  0xe3   :  { %v111_v20 = vadd.f32 %v173_v19, %v120_v18 }
  0xe4   :  { %v105_v21 = vpop.f32.mrf.mxu0 }
  0xe5   :  { %115 = vst [vmem:[%s260_s3 + $0x8] sm:$0xff] %v111_v20  ;;  %v106_v22 = vadd.f32 %v120_v18, %v105_v21 }
  0xe7   :  { %114 = vst [vmem:[%s260_s3] sm:$0xff] %v106_v22 }

// kernel: decoder_forward.4
= control target key start
LH: loop header
LB: loop body
LE: loop exit
PB: predicated region body
PF: predicated region fallthrough
CT: control target
= control target key end

     0   :  { %14 = vsyncpa [#allocation5], 0  ;;  %s9092_s0 = inlined_call_operand.vmem [shape: f32[8,2,512], index: 0, kind: input, shape index: {}]   ;;  %s9093_s1 = inlined_call_operand.vmem [shape: f32[128,512], index: 1, kind: input, shape index: {}]   ;;  %s9094_s2 = inlined_call_operand.hbm [shape: f32[256,512], index: 2, kind: input, shape index: {}]   ;;  %s9095_s3 = inlined_call_operand.vmem [shape: f32[1,512], index: 3, kind: input, shape index: {}]   ;;  %s9096_s4 = inlined_call_operand.vmem [shape: f32[2,2,128], index: 4, kind: input, shape index: {}]   ;;  %s9097_s5 = inlined_call_operand.vmem [shape: f32[2,2,128], index: 5, kind: input, shape index: {}]   ;;  %s9098_s6 = inlined_call_operand.vmem [shape: f32[8,2,128], index: 6, kind: output, shape index: {0}]   ;;  %s9099_s7 = inlined_call_operand.hbm [shape: f32[2,2,128], index: 7, kind: output, shape index: {1}]   ;;  %s9100_s8 = inlined_call_operand.hbm [shape: f32[2,2,128], index: 8, kind: output, shape index: {2}]  }
   0x1   :  { %15 = vsyncpa [#allocation6], 0 }
   0x2   :  { %16 = vsyncpa [#allocation9], 0  ;;  %s5023_s27 = smov [#allocation4]  }
   0x3   :  { %s26_s28 = sshll.u32 %s5023_s27, 4  ;;  %s27_s28 = int_to_ptr.vmem [resolvable:$true] %s26_s28 }
   0x4   :  { %s4965_s29 = scalar_lea.vmem %s27_s28, 16384  ;;  %p4970_p1 = scmp.lt.s32.totalorder %s27_s28, %s27_s28 }
   0x5   :  { %p4966_p0 = scmp.ne.s32.totalorder %s27_s28, %s4965_s29  ;;  %p4971_p2 = scmp.lt.s32.totalorder %s4965_s29, %s4965_s29 }
   0x7   :  { %p4972_p3 = por %p4971_p2, %p4970_p1 }
   0x9   :  { %p4973_p4 = pnand %p4972_p3, %p4966_p0 }
   0xb   :  { %4976 = shalt.err (!%p4973_p4)
}
   0xc   :  { %s5024_s30 = smov 512   ;;  %s5025_s9 = smov 32  }
   0xd   :  { %32 = dma.hbm_to_vmem [thread:$0]  %s9094_s2, 16384, %s27_s28, [#allocation5], %s5024_s30, %s5024_s30, %s5025_s9  }
   0xe   :  { %5017 = dma.done.wait [#allocation5], 16384  }
   0xf   :  { %5018 = vsyncadd [#allocation5], 4294950912  ;;  %v9101_v0 = vmov 0.0   ;;  %v5085_v1 = vld [vmem:[%s9093_s1 + $0x1e8] sm:$0xff]  ;;  %v5090_v2 = vld [vmem:[%s9093_s1 + $0x1f8] sm:$0xff] }
  0x10   :  { %180 = vmatprep.mubr.f32.mxu0 %v9101_v0  ;;  %251 = vmatprep.mubr.f32.mxu1 %v9101_v0  ;;  %v5095_v3 = vld [vmem:[%s9093_s1 + $0x1e0] sm:$0xff]  ;;  %v5102_v4 = vld [vmem:[%s9093_s1 + $0x1f0] sm:$0xff]  ;;  %v5107_v5 = vld [vmem:[%s9093_s1 + $0x1c8] sm:$0xff] }
  0x11   :  { %116 = vmatprep.subr.mxu0 %v5085_v1  ;;  %187 = vmatprep.subr.mxu1 %v5090_v2  ;;  %v5112_v6 = vld [vmem:[%s9093_s1 + $0x1d8] sm:$0xff]  ;;  %v5119_v7 = vld [vmem:[%s9093_s1 + $0x1c0] sm:$0xff]  ;;  %v5124_v8 = vld [vmem:[%s9093_s1 + $0x1d0] sm:$0xff] }
  0x12   :  { %117 = vmatpush1.msra.mxu0 %v5095_v3  ;;  %188 = vmatpush1.msra.mxu1 %v5102_v4  ;;  %v5129_v9 = vld [vmem:[%s9093_s1 + $0x1a8] sm:$0xff]  ;;  %v5136_v10 = vld [vmem:[%s9093_s1 + $0x1b8] sm:$0xff]  ;;  %v5141_v11 = vld [vmem:[%s9093_s1 + $0x1a0] sm:$0xff] }
  0x13   :  { %118 = vmatprep.subr.mxu0 %v5107_v5  ;;  %189 = vmatprep.subr.mxu1 %v5112_v6  ;;  %v5146_v12 = vld [vmem:[%s9093_s1 + $0x1b0] sm:$0xff]  ;;  %v5153_v13 = vld [vmem:[%s9093_s1 + $0x188] sm:$0xff]  ;;  %v5158_v14 = vld [vmem:[%s9093_s1 + $0x198] sm:$0xff] }
  0x14   :  { %119 = vmatpush1.msra.mxu0 %v5119_v7  ;;  %190 = vmatpush1.msra.mxu1 %v5124_v8  ;;  %v5165_v15 = vld [vmem:[%s9093_s1 + $0x180] sm:$0xff]  ;;  %v5170_v16 = vld [vmem:[%s9093_s1 + $0x190] sm:$0xff]  ;;  %v5177_v17 = vld [vmem:[%s9093_s1 + $0x168] sm:$0xff] }
  0x15   :  { %120 = vmatprep.subr.mxu0 %v5129_v9  ;;  %191 = vmatprep.subr.mxu1 %v5136_v10  ;;  %v5182_v18 = vld [vmem:[%s9093_s1 + $0x178] sm:$0xff]  ;;  %v5189_v19 = vld [vmem:[%s9093_s1 + $0x160] sm:$0xff]  ;;  %v5194_v20 = vld [vmem:[%s9093_s1 + $0x170] sm:$0xff] }
  0x16   :  { %121 = vmatpush1.msra.mxu0 %v5141_v11  ;;  %192 = vmatpush1.msra.mxu1 %v5146_v12  ;;  %v5201_v21 = vld [vmem:[%s9093_s1 + $0x148] sm:$0xff]  ;;  %v5206_v22 = vld [vmem:[%s9093_s1 + $0x158] sm:$0xff]  ;;  %v5213_v23 = vld [vmem:[%s9093_s1 + $0x140] sm:$0xff] }
  0x17   :  { %122 = vmatprep.subr.mxu0 %v5153_v13  ;;  %193 = vmatprep.subr.mxu1 %v5158_v14  ;;  %v5218_v24 = vld [vmem:[%s9093_s1 + $0x150] sm:$0xff]  ;;  %v5225_v25 = vld [vmem:[%s9093_s1 + $0x128] sm:$0xff]  ;;  %v5230_v26 = vld [vmem:[%s9093_s1 + $0x138] sm:$0xff] }
  0x18   :  { %123 = vmatpush1.msra.mxu0 %v5165_v15  ;;  %194 = vmatpush1.msra.mxu1 %v5170_v16  ;;  %v5237_v27 = vld [vmem:[%s9093_s1 + $0x120] sm:$0xff]  ;;  %v5242_v28 = vld [vmem:[%s9093_s1 + $0x130] sm:$0xff]  ;;  %v5249_v29 = vld [vmem:[%s9093_s1 + $0x108] sm:$0xff] }
  0x19   :  { %124 = vmatprep.subr.mxu0 %v5177_v17  ;;  %195 = vmatprep.subr.mxu1 %v5182_v18  ;;  %v5254_v30 = vld [vmem:[%s9093_s1 + $0x118] sm:$0xff]  ;;  %v5261_v31 = vld [vmem:[%s9093_s1 + $0x100] sm:$0xff]  ;;  %v5266_v32 = vld [vmem:[%s9093_s1 + $0x110] sm:$0xff] }
  0x1a   :  { %125 = vmatpush1.msra.mxu0 %v5189_v19  ;;  %196 = vmatpush1.msra.mxu1 %v5194_v20  ;;  %v5273_v33 = vld [vmem:[%s9093_s1 + $0xe8] sm:$0xff]  ;;  %v5278_v34 = vld [vmem:[%s9093_s1 + $0xf8] sm:$0xff]  ;;  %v5285_v35 = vld [vmem:[%s9093_s1 + $0xe0] sm:$0xff] }
  0x1b   :  { %126 = vmatprep.subr.mxu0 %v5201_v21  ;;  %197 = vmatprep.subr.mxu1 %v5206_v22  ;;  %v5290_v36 = vld [vmem:[%s9093_s1 + $0xf0] sm:$0xff]  ;;  %v5297_v37 = vld [vmem:[%s9093_s1 + $0xc8] sm:$0xff]  ;;  %v5302_v38 = vld [vmem:[%s9093_s1 + $0xd8] sm:$0xff] }
  0x1c   :  { %127 = vmatpush1.msra.mxu0 %v5213_v23  ;;  %198 = vmatpush1.msra.mxu1 %v5218_v24  ;;  %v5309_v39 = vld [vmem:[%s9093_s1 + $0xc0] sm:$0xff]  ;;  %v5314_v40 = vld [vmem:[%s9093_s1 + $0xd0] sm:$0xff]  ;;  %v5321_v41 = vld [vmem:[%s9093_s1 + $0xa8] sm:$0xff] }
  0x1d   :  { %128 = vmatprep.subr.mxu0 %v5225_v25  ;;  %199 = vmatprep.subr.mxu1 %v5230_v26  ;;  %v5326_v42 = vld [vmem:[%s9093_s1 + $0xb8] sm:$0xff]  ;;  %v5333_v43 = vld [vmem:[%s9093_s1 + $0xa0] sm:$0xff]  ;;  %v5338_v44 = vld [vmem:[%s9093_s1 + $0xb0] sm:$0xff] }
  0x1e   :  { %129 = vmatpush1.msra.mxu0 %v5237_v27  ;;  %200 = vmatpush1.msra.mxu1 %v5242_v28  ;;  %v5345_v45 = vld [vmem:[%s9093_s1 + $0x88] sm:$0xff]  ;;  %v5350_v46 = vld [vmem:[%s9093_s1 + $0x98] sm:$0xff]  ;;  %v5357_v47 = vld [vmem:[%s9093_s1 + $0x80] sm:$0xff] }
  0x1f   :  { %130 = vmatprep.subr.mxu0 %v5249_v29  ;;  %201 = vmatprep.subr.mxu1 %v5254_v30  ;;  %v5362_v48 = vld [vmem:[%s9093_s1 + $0x90] sm:$0xff]  ;;  %v42_v49 = vld [vmem:[%s9096_s4] sm:$0x3]  ;;  %v5372_v50 = vld [vmem:[%s9093_s1 + $0x68] sm:$0xff] }
  0x20   :  { %131 = vmatpush1.msra.mxu0 %v5261_v31  ;;  %202 = vmatpush1.msra.mxu1 %v5266_v32  ;;  %9710 = vst [vmem:[#allocation13_spill] sm:$0xff] %v5372_v50  ;;  %v5377_v51 = vld [vmem:[%s9093_s1 + $0x78] sm:$0xff]  ;;  %44 = vst [vmem:[#allocation2] sm:$0x3] %v42_v49  ;;  %v5384_v52 = vld [vmem:[%s9093_s1 + $0x60] sm:$0xff] }
  0x21   :  { %132 = vmatprep.subr.mxu0 %v5273_v33  ;;  %203 = vmatprep.subr.mxu1 %v5278_v34  ;;  %9711 = vst [vmem:[#allocation14_spill] sm:$0xff] %v5377_v51  ;;  %9712 = vst [vmem:[#allocation15_spill] sm:$0xff] %v5384_v52  ;;  %v5389_v53 = vld [vmem:[%s9093_s1 + $0x70] sm:$0xff]  ;;  %v5396_v54 = vld [vmem:[%s9093_s1 + $0x48] sm:$0xff] }
  0x22   :  { %133 = vmatpush1.msra.mxu0 %v5285_v35  ;;  %204 = vmatpush1.msra.mxu1 %v5290_v36  ;;  %9713 = vst [vmem:[#allocation16_spill] sm:$0xff] %v5389_v53  ;;  %9714 = vst [vmem:[#allocation17_spill] sm:$0xff] %v5396_v54  ;;  %v5401_v55 = vld [vmem:[%s9093_s1 + $0x58] sm:$0xff]  ;;  %v5408_v56 = vld [vmem:[%s9093_s1 + $0x40] sm:$0xff] }
  0x23   :  { %134 = vmatprep.subr.mxu0 %v5297_v37  ;;  %205 = vmatprep.subr.mxu1 %v5302_v38  ;;  %9715 = vst [vmem:[#allocation18_spill] sm:$0xff] %v5401_v55  ;;  %9716 = vst [vmem:[#allocation19_spill] sm:$0xff] %v5408_v56  ;;  %v5413_v57 = vld [vmem:[%s9093_s1 + $0x50] sm:$0xff]  ;;  %v5420_v58 = vld [vmem:[%s9093_s1 + $0x28] sm:$0xff] }
  0x24   :  { %135 = vmatpush1.msra.mxu0 %v5309_v39  ;;  %206 = vmatpush1.msra.mxu1 %v5314_v40  ;;  %9717 = vst [vmem:[#allocation20_spill] sm:$0xff] %v5413_v57  ;;  %9718 = vst [vmem:[#allocation21_spill] sm:$0xff] %v5420_v58  ;;  %v5425_v59 = vld [vmem:[%s9093_s1 + $0x38] sm:$0xff]  ;;  %v5432_v60 = vld [vmem:[%s9093_s1 + $0x20] sm:$0xff] }
  0x25   :  { %136 = vmatprep.subr.mxu0 %v5321_v41  ;;  %207 = vmatprep.subr.mxu1 %v5326_v42  ;;  %9719 = vst [vmem:[#allocation22_spill] sm:$0xff] %v5425_v59  ;;  %9720 = vst [vmem:[#allocation23_spill] sm:$0xff] %v5432_v60  ;;  %v5437_v61 = vld [vmem:[%s9093_s1 + $0x30] sm:$0xff]  ;;  %v5444_v62 = vld [vmem:[%s9093_s1 + $0x8] sm:$0xff] }
  0x26   :  { %137 = vmatpush1.msra.mxu0 %v5333_v43  ;;  %208 = vmatpush1.msra.mxu1 %v5338_v44  ;;  %9721 = vst [vmem:[#allocation24_spill] sm:$0xff] %v5437_v61  ;;  %9722 = vst [vmem:[#allocation25_spill] sm:$0xff] %v5444_v62  ;;  %v5449_v63 = vld [vmem:[%s9093_s1 + $0x18] sm:$0xff]  ;;  %v5456_v49 = vld [vmem:[%s9093_s1] sm:$0xff] }
  0x27   :  { %138 = vmatprep.subr.mxu0 %v5345_v45  ;;  %209 = vmatprep.subr.mxu1 %v5350_v46  ;;  %9723 = vst [vmem:[#allocation26_spill] sm:$0xff] %v5449_v63  ;;  %9724 = vst [vmem:[#allocation27_spill] sm:$0xff] %v5456_v49  ;;  %v5461_v0 = vld [vmem:[%s9093_s1 + $0x10] sm:$0xff] }
  0x28   :  { %139 = vmatpush1.msra.mxu0 %v5357_v47  ;;  %210 = vmatpush1.msra.mxu1 %v5362_v48  ;;  %9725 = vst [vmem:[#allocation28_spill] sm:$0xff] %v5461_v0 }
  0x29   :  { %140 = vmatprep.subr.mxu0 %v5372_v50  ;;  %211 = vmatprep.subr.mxu1 %v5377_v51 }
  0x2a   :  { %141 = vmatpush1.msra.mxu0 %v5384_v52  ;;  %212 = vmatpush1.msra.mxu1 %v5389_v53 }
  0x2b   :  { %142 = vmatprep.subr.mxu0 %v5396_v54  ;;  %213 = vmatprep.subr.mxu1 %v5401_v55  ;;  %v5774_v55 = vld [vmem:[#allocation4 + $0x2c0] sm:$0xff] }
  0x2c   :  { %143 = vmatpush1.msra.mxu0 %v5408_v56  ;;  %214 = vmatpush1.msra.mxu1 %v5413_v57  ;;  %v51_v57 = vld [vmem:[#allocation2] sm:$0x3]  ;;  %9828 = vst [vmem:[#allocation131_spill] sm:$0xff] %v5774_v55 }
  0x2d   :  { %144 = vmatprep.subr.mxu0 %v5420_v58  ;;  %215 = vmatprep.subr.mxu1 %v5425_v59  ;;  %v5469_v59 = vld [vmem:[#allocation4 + $0x1e8] sm:$0xff]  ;;  %v5471_v58 = vld [vmem:[#allocation4 + $0x1f8] sm:$0xff] }
  0x2e   :  { %145 = vmatpush1.msra.mxu0 %v5432_v60  ;;  %216 = vmatpush1.msra.mxu1 %v5437_v61  ;;  %9726 = vst [vmem:[#allocation29_spill] sm:$0xff] %v5469_v59  ;;  %9727 = vst [vmem:[#allocation30_spill] sm:$0xff] %v5471_v58  ;;  %v5475_v61 = vld [vmem:[#allocation4 + $0x1e0] sm:$0xff]  ;;  %v5477_v60 = vld [vmem:[#allocation4 + $0x1f0] sm:$0xff] }
  0x2f   :  { %146 = vmatprep.subr.mxu0 %v5444_v62  ;;  %217 = vmatprep.subr.mxu1 %v5449_v63  ;;  %9728 = vst [vmem:[#allocation31_spill] sm:$0xff] %v5475_v61  ;;  %9729 = vst [vmem:[#allocation32_spill] sm:$0xff] %v5477_v60  ;;  %v5742_v63 = vld [vmem:[#allocation4 + $0x330] sm:$0xff]  ;;  %v5750_v62 = vld [vmem:[#allocation4 + $0x300] sm:$0xff] }
  0x30   :  { %147 = vmatpush1.msra.mxu0 %v5456_v49  ;;  %218 = vmatpush1.msra.mxu1 %v5461_v0  ;;  %v5481_v49 = vld [vmem:[#allocation4 + $0x1c8] sm:$0xff]  ;;  %v5483_v0 = vld [vmem:[#allocation4 + $0x1d8] sm:$0xff]  ;;  %9817 = vst [vmem:[#allocation120_spill] sm:$0xff] %v5742_v63  ;;  %9820 = vst [vmem:[#allocation123_spill] sm:$0xff] %v5750_v62 }
  0x31   :  { %181 = vmatmul.mubr.f32.vlgmr.msra.gmra.mxu0 %v51_v57  ;;  %252 = vmatmul.mubr.f32.vlgmr.msra.gmra.mxu1 %v51_v57  ;;  %9730 = vst [vmem:[#allocation33_spill] sm:$0xff] %v5481_v49  ;;  %9731 = vst [vmem:[#allocation34_spill] sm:$0xff] %v5483_v0  ;;  %v5487_v57 = vld [vmem:[#allocation4 + $0x1c0] sm:$0xff]  ;;  %v5758_v56 = vld [vmem:[#allocation4 + $0x2f8] sm:$0xff] }
  0x32   :  { %454 = vmatprep.subr.mxu0 %v5469_v59  ;;  %525 = vmatprep.subr.mxu1 %v5471_v58  ;;  %9732 = vst [vmem:[#allocation35_spill] sm:$0xff] %v5487_v57  ;;  %v5489_v59 = vld [vmem:[#allocation4 + $0x1d0] sm:$0xff]  ;;  %v5493_v58 = vld [vmem:[#allocation4 + $0x1a8] sm:$0xff]  ;;  %9823 = vst [vmem:[#allocation126_spill] sm:$0xff] %v5758_v56 }
  0x33   :  { %455 = vmatpush1.msra.mxu0 %v5475_v61  ;;  %526 = vmatpush1.msra.mxu1 %v5477_v60  ;;  %9733 = vst [vmem:[#allocation36_spill] sm:$0xff] %v5489_v59  ;;  %9734 = vst [vmem:[#allocation37_spill] sm:$0xff] %v5493_v58  ;;  %v5495_v61 = vld [vmem:[#allocation4 + $0x1b8] sm:$0xff]  ;;  %v5499_v60 = vld [vmem:[#allocation4 + $0x1a0] sm:$0xff] }
  0x34   :  { %456 = vmatprep.subr.mxu0 %v5481_v49  ;;  %527 = vmatprep.subr.mxu1 %v5483_v0  ;;  %9735 = vst [vmem:[#allocation38_spill] sm:$0xff] %v5495_v61  ;;  %9736 = vst [vmem:[#allocation39_spill] sm:$0xff] %v5499_v60  ;;  %v5501_v49 = vld [vmem:[#allocation4 + $0x1b0] sm:$0xff]  ;;  %v5505_v0 = vld [vmem:[#allocation4 + $0x188] sm:$0xff] }
  0x35   :  { %457 = vmatpush1.msra.mxu0 %v5487_v57  ;;  %528 = vmatpush1.msra.mxu1 %v5489_v59  ;;  %9737 = vst [vmem:[#allocation40_spill] sm:$0xff] %v5501_v49  ;;  %9738 = vst [vmem:[#allocation41_spill] sm:$0xff] %v5505_v0  ;;  %v5507_v57 = vld [vmem:[#allocation4 + $0x198] sm:$0xff]  ;;  %v5511_v59 = vld [vmem:[#allocation4 + $0x180] sm:$0xff] }
  0x36   :  { %458 = vmatprep.subr.mxu0 %v5493_v58  ;;  %529 = vmatprep.subr.mxu1 %v5495_v61  ;;  %9739 = vst [vmem:[#allocation42_spill] sm:$0xff] %v5507_v57  ;;  %9740 = vst [vmem:[#allocation43_spill] sm:$0xff] %v5511_v59  ;;  %v5513_v58 = vld [vmem:[#allocation4 + $0x190] sm:$0xff]  ;;  %v5517_v61 = vld [vmem:[#allocation4 + $0x168] sm:$0xff] }
  0x37   :  { %459 = vmatpush1.msra.mxu0 %v5499_v60  ;;  %530 = vmatpush1.msra.mxu1 %v5501_v49  ;;  %9741 = vst [vmem:[#allocation44_spill] sm:$0xff] %v5513_v58  ;;  %9742 = vst [vmem:[#allocation45_spill] sm:$0xff] %v5517_v61  ;;  %v5519_v60 = vld [vmem:[#allocation4 + $0x178] sm:$0xff]  ;;  %v5523_v49 = vld [vmem:[#allocation4 + $0x160] sm:$0xff] }
  0x38   :  { %460 = vmatprep.subr.mxu0 %v5505_v0  ;;  %531 = vmatprep.subr.mxu1 %v5507_v57  ;;  %9743 = vst [vmem:[#allocation46_spill] sm:$0xff] %v5519_v60  ;;  %9744 = vst [vmem:[#allocation47_spill] sm:$0xff] %v5523_v49  ;;  %v5525_v0 = vld [vmem:[#allocation4 + $0x170] sm:$0xff]  ;;  %v5529_v57 = vld [vmem:[#allocation4 + $0x148] sm:$0xff] }
  0x39   :  { %461 = vmatpush1.msra.mxu0 %v5511_v59  ;;  %532 = vmatpush1.msra.mxu1 %v5513_v58  ;;  %9745 = vst [vmem:[#allocation48_spill] sm:$0xff] %v5525_v0  ;;  %9746 = vst [vmem:[#allocation49_spill] sm:$0xff] %v5529_v57  ;;  %v5531_v59 = vld [vmem:[#allocation4 + $0x158] sm:$0xff]  ;;  %v5535_v58 = vld [vmem:[#allocation4 + $0x140] sm:$0xff] }
  0x3a   :  { %462 = vmatprep.subr.mxu0 %v5517_v61  ;;  %533 = vmatprep.subr.mxu1 %v5519_v60  ;;  %9747 = vst [vmem:[#allocation50_spill] sm:$0xff] %v5531_v59  ;;  %9748 = vst [vmem:[#allocation51_spill] sm:$0xff] %v5535_v58  ;;  %v5537_v61 = vld [vmem:[#allocation4 + $0x150] sm:$0xff]  ;;  %v5541_v60 = vld [vmem:[#allocation4 + $0x128] sm:$0xff] }
  0x3b   :  { %463 = vmatpush1.msra.mxu0 %v5523_v49  ;;  %534 = vmatpush1.msra.mxu1 %v5525_v0  ;;  %9749 = vst [vmem:[#allocation52_spill] sm:$0xff] %v5537_v61  ;;  %9750 = vst [vmem:[#allocation53_spill] sm:$0xff] %v5541_v60  ;;  %v5543_v49 = vld [vmem:[#allocation4 + $0x138] sm:$0xff]  ;;  %v5547_v0 = vld [vmem:[#allocation4 + $0x120] sm:$0xff] }
  0x3c   :  { %464 = vmatprep.subr.mxu0 %v5529_v57  ;;  %535 = vmatprep.subr.mxu1 %v5531_v59  ;;  %9751 = vst [vmem:[#allocation54_spill] sm:$0xff] %v5543_v49  ;;  %9752 = vst [vmem:[#allocation55_spill] sm:$0xff] %v5547_v0  ;;  %v5549_v57 = vld [vmem:[#allocation4 + $0x130] sm:$0xff]  ;;  %v5553_v59 = vld [vmem:[#allocation4 + $0x108] sm:$0xff] }
  0x3d   :  { %465 = vmatpush1.msra.mxu0 %v5535_v58  ;;  %536 = vmatpush1.msra.mxu1 %v5537_v61  ;;  %9753 = vst [vmem:[#allocation56_spill] sm:$0xff] %v5549_v57  ;;  %9754 = vst [vmem:[#allocation57_spill] sm:$0xff] %v5553_v59  ;;  %v5555_v58 = vld [vmem:[#allocation4 + $0x118] sm:$0xff]  ;;  %v5559_v61 = vld [vmem:[#allocation4 + $0x100] sm:$0xff] }
  0x3e   :  { %466 = vmatprep.subr.mxu0 %v5541_v60  ;;  %537 = vmatprep.subr.mxu1 %v5543_v49  ;;  %9755 = vst [vmem:[#allocation58_spill] sm:$0xff] %v5555_v58  ;;  %9756 = vst [vmem:[#allocation59_spill] sm:$0xff] %v5559_v61  ;;  %v5561_v60 = vld [vmem:[#allocation4 + $0x110] sm:$0xff]  ;;  %v5565_v49 = vld [vmem:[#allocation4 + $0xe8] sm:$0xff] }
  0x3f   :  { %467 = vmatpush1.msra.mxu0 %v5547_v0  ;;  %538 = vmatpush1.msra.mxu1 %v5549_v57  ;;  %9757 = vst [vmem:[#allocation60_spill] sm:$0xff] %v5561_v60  ;;  %9758 = vst [vmem:[#allocation61_spill] sm:$0xff] %v5565_v49  ;;  %v5567_v0 = vld [vmem:[#allocation4 + $0xf8] sm:$0xff]  ;;  %v5571_v57 = vld [vmem:[#allocation4 + $0xe0] sm:$0xff] }
  0x40   :  { %468 = vmatprep.subr.mxu0 %v5553_v59  ;;  %539 = vmatprep.subr.mxu1 %v5555_v58  ;;  %9759 = vst [vmem:[#allocation62_spill] sm:$0xff] %v5567_v0  ;;  %9760 = vst [vmem:[#allocation63_spill] sm:$0xff] %v5571_v57  ;;  %v5573_v59 = vld [vmem:[#allocation4 + $0xf0] sm:$0xff]  ;;  %v5577_v58 = vld [vmem:[#allocation4 + $0xc8] sm:$0xff] }
  0x41   :  { %469 = vmatpush1.msra.mxu0 %v5559_v61  ;;  %540 = vmatpush1.msra.mxu1 %v5561_v60  ;;  %9761 = vst [vmem:[#allocation64_spill] sm:$0xff] %v5573_v59  ;;  %9762 = vst [vmem:[#allocation65_spill] sm:$0xff] %v5577_v58  ;;  %v5579_v61 = vld [vmem:[#allocation4 + $0xd8] sm:$0xff]  ;;  %v5583_v60 = vld [vmem:[#allocation4 + $0xc0] sm:$0xff] }
  0x42   :  { %470 = vmatprep.subr.mxu0 %v5565_v49  ;;  %541 = vmatprep.subr.mxu1 %v5567_v0  ;;  %9763 = vst [vmem:[#allocation66_spill] sm:$0xff] %v5579_v61  ;;  %9764 = vst [vmem:[#allocation67_spill] sm:$0xff] %v5583_v60  ;;  %v5585_v49 = vld [vmem:[#allocation4 + $0xd0] sm:$0xff]  ;;  %v5589_v0 = vld [vmem:[#allocation4 + $0xa8] sm:$0xff] }
  0x43   :  { %471 = vmatpush1.msra.mxu0 %v5571_v57  ;;  %542 = vmatpush1.msra.mxu1 %v5573_v59  ;;  %9765 = vst [vmem:[#allocation68_spill] sm:$0xff] %v5585_v49  ;;  %9766 = vst [vmem:[#allocation69_spill] sm:$0xff] %v5589_v0  ;;  %v5591_v57 = vld [vmem:[#allocation4 + $0xb8] sm:$0xff]  ;;  %v5595_v59 = vld [vmem:[#allocation4 + $0xa0] sm:$0xff] }
  0x44   :  { %472 = vmatprep.subr.mxu0 %v5577_v58  ;;  %543 = vmatprep.subr.mxu1 %v5579_v61  ;;  %9767 = vst [vmem:[#allocation70_spill] sm:$0xff] %v5591_v57  ;;  %9768 = vst [vmem:[#allocation71_spill] sm:$0xff] %v5595_v59  ;;  %v5597_v58 = vld [vmem:[#allocation4 + $0xb0] sm:$0xff]  ;;  %v5601_v61 = vld [vmem:[#allocation4 + $0x88] sm:$0xff] }
  0x45   :  { %473 = vmatpush1.msra.mxu0 %v5583_v60  ;;  %544 = vmatpush1.msra.mxu1 %v5585_v49  ;;  %9769 = vst [vmem:[#allocation72_spill] sm:$0xff] %v5597_v58  ;;  %9770 = vst [vmem:[#allocation73_spill] sm:$0xff] %v5601_v61  ;;  %v5603_v60 = vld [vmem:[#allocation4 + $0x98] sm:$0xff]  ;;  %v5607_v49 = vld [vmem:[#allocation4 + $0x80] sm:$0xff] }
  0x46   :  { %474 = vmatprep.subr.mxu0 %v5589_v0  ;;  %545 = vmatprep.subr.mxu1 %v5591_v57  ;;  %9771 = vst [vmem:[#allocation74_spill] sm:$0xff] %v5603_v60  ;;  %9772 = vst [vmem:[#allocation75_spill] sm:$0xff] %v5607_v49  ;;  %v5609_v0 = vld [vmem:[#allocation4 + $0x90] sm:$0xff]  ;;  %v5613_v57 = vld [vmem:[#allocation4 + $0x68] sm:$0xff] }
  0x47   :  { %475 = vmatpush1.msra.mxu0 %v5595_v59  ;;  %546 = vmatpush1.msra.mxu1 %v5597_v58  ;;  %9773 = vst [vmem:[#allocation76_spill] sm:$0xff] %v5609_v0  ;;  %9774 = vst [vmem:[#allocation77_spill] sm:$0xff] %v5613_v57  ;;  %v5615_v59 = vld [vmem:[#allocation4 + $0x78] sm:$0xff]  ;;  %v5619_v58 = vld [vmem:[#allocation4 + $0x60] sm:$0xff] }
  0x48   :  { %476 = vmatprep.subr.mxu0 %v5601_v61  ;;  %547 = vmatprep.subr.mxu1 %v5603_v60  ;;  %9775 = vst [vmem:[#allocation78_spill] sm:$0xff] %v5615_v59  ;;  %9776 = vst [vmem:[#allocation79_spill] sm:$0xff] %v5619_v58  ;;  %v5621_v61 = vld [vmem:[#allocation4 + $0x70] sm:$0xff]  ;;  %v5625_v60 = vld [vmem:[#allocation4 + $0x48] sm:$0xff] }
  0x49   :  { %477 = vmatpush1.msra.mxu0 %v5607_v49  ;;  %548 = vmatpush1.msra.mxu1 %v5609_v0  ;;  %9777 = vst [vmem:[#allocation80_spill] sm:$0xff] %v5621_v61  ;;  %9778 = vst [vmem:[#allocation81_spill] sm:$0xff] %v5625_v60  ;;  %v5627_v49 = vld [vmem:[#allocation4 + $0x58] sm:$0xff]  ;;  %v5631_v0 = vld [vmem:[#allocation4 + $0x40] sm:$0xff] }
  0x4a   :  { %478 = vmatprep.subr.mxu0 %v5613_v57  ;;  %549 = vmatprep.subr.mxu1 %v5615_v59  ;;  %9779 = vst [vmem:[#allocation82_spill] sm:$0xff] %v5627_v49  ;;  %9780 = vst [vmem:[#allocation83_spill] sm:$0xff] %v5631_v0  ;;  %v5633_v57 = vld [vmem:[#allocation4 + $0x50] sm:$0xff]  ;;  %v5637_v59 = vld [vmem:[#allocation4 + $0x28] sm:$0xff] }
  0x4b   :  { %479 = vmatpush1.msra.mxu0 %v5619_v58  ;;  %550 = vmatpush1.msra.mxu1 %v5621_v61  ;;  %9781 = vst [vmem:[#allocation84_spill] sm:$0xff] %v5633_v57  ;;  %9782 = vst [vmem:[#allocation85_spill] sm:$0xff] %v5637_v59  ;;  %v5639_v58 = vld [vmem:[#allocation4 + $0x38] sm:$0xff]  ;;  %v5643_v61 = vld [vmem:[#allocation4 + $0x20] sm:$0xff] }
  0x4c   :  { %480 = vmatprep.subr.mxu0 %v5625_v60  ;;  %551 = vmatprep.subr.mxu1 %v5627_v49  ;;  %9783 = vst [vmem:[#allocation86_spill] sm:$0xff] %v5639_v58  ;;  %9784 = vst [vmem:[#allocation87_spill] sm:$0xff] %v5643_v61  ;;  %v5645_v60 = vld [vmem:[#allocation4 + $0x30] sm:$0xff]  ;;  %v5649_v49 = vld [vmem:[#allocation4 + $0x8] sm:$0xff] }
  0x4d   :  { %481 = vmatpush1.msra.mxu0 %v5631_v0  ;;  %552 = vmatpush1.msra.mxu1 %v5633_v57  ;;  %9785 = vst [vmem:[#allocation88_spill] sm:$0xff] %v5645_v60  ;;  %9786 = vst [vmem:[#allocation89_spill] sm:$0xff] %v5649_v49  ;;  %v5651_v0 = vld [vmem:[#allocation4 + $0x18] sm:$0xff]  ;;  %v5655_v57 = vld [vmem:[#allocation4] sm:$0xff] }
  0x4e   :  { %482 = vmatprep.subr.mxu0 %v5637_v59  ;;  %553 = vmatprep.subr.mxu1 %v5639_v58  ;;  %9787 = vst [vmem:[#allocation90_spill] sm:$0xff] %v5651_v0  ;;  %9788 = vst [vmem:[#allocation91_spill] sm:$0xff] %v5655_v57  ;;  %v5657_v59 = vld [vmem:[#allocation4 + $0x10] sm:$0xff]  ;;  %v5661_v58 = vld [vmem:[#allocation4 + $0x3e8] sm:$0xff] }
  0x4f   :  { %483 = vmatpush1.msra.mxu0 %v5643_v61  ;;  %554 = vmatpush1.msra.mxu1 %v5645_v60  ;;  %9789 = vst [vmem:[#allocation92_spill] sm:$0xff] %v5657_v59  ;;  %9790 = vst [vmem:[#allocation93_spill] sm:$0xff] %v5661_v58  ;;  %v5663_v61 = vld [vmem:[#allocation4 + $0x3f8] sm:$0xff]  ;;  %v5667_v60 = vld [vmem:[#allocation4 + $0x3e0] sm:$0xff] }
  0x50   :  { %484 = vmatprep.subr.mxu0 %v5649_v49  ;;  %555 = vmatprep.subr.mxu1 %v5651_v0  ;;  %9791 = vst [vmem:[#allocation94_spill] sm:$0xff] %v5663_v61  ;;  %9792 = vst [vmem:[#allocation95_spill] sm:$0xff] %v5667_v60  ;;  %v5669_v49 = vld [vmem:[#allocation4 + $0x3f0] sm:$0xff]  ;;  %v5673_v0 = vld [vmem:[#allocation4 + $0x3c8] sm:$0xff] }
  0x51   :  { %485 = vmatpush1.msra.mxu0 %v5655_v57  ;;  %556 = vmatpush1.msra.mxu1 %v5657_v59  ;;  %9793 = vst [vmem:[#allocation96_spill] sm:$0xff] %v5669_v49  ;;  %9794 = vst [vmem:[#allocation97_spill] sm:$0xff] %v5673_v0  ;;  %v5675_v57 = vld [vmem:[#allocation4 + $0x3d8] sm:$0xff]  ;;  %v5679_v59 = vld [vmem:[#allocation4 + $0x3c0] sm:$0xff] }
  0x52   :  { %486 = vmatprep.subr.mxu0 %v5661_v58  ;;  %557 = vmatprep.subr.mxu1 %v5663_v61  ;;  %9795 = vst [vmem:[#allocation98_spill] sm:$0xff] %v5675_v57  ;;  %9796 = vst [vmem:[#allocation99_spill] sm:$0xff] %v5679_v59  ;;  %v5681_v58 = vld [vmem:[#allocation4 + $0x3d0] sm:$0xff]  ;;  %v5685_v61 = vld [vmem:[#allocation4 + $0x3a8] sm:$0xff] }
  0x53   :  { %487 = vmatpush2.msra.mxu0 %v5667_v60  ;;  %558 = vmatpush2.msra.mxu1 %v5669_v49  ;;  %9797 = vst [vmem:[#allocation100_spill] sm:$0xff] %v5681_v58  ;;  %9798 = vst [vmem:[#allocation101_spill] sm:$0xff] %v5685_v61  ;;  %v5687_v60 = vld [vmem:[#allocation4 + $0x3b8] sm:$0xff]  ;;  %v5691_v49 = vld [vmem:[#allocation4 + $0x3a0] sm:$0xff] }
  0x54   :  { %488 = vmatprep.subr.mxu0 %v5673_v0  ;;  %559 = vmatprep.subr.mxu1 %v5675_v57  ;;  %9799 = vst [vmem:[#allocation102_spill] sm:$0xff] %v5687_v60  ;;  %9800 = vst [vmem:[#allocation103_spill] sm:$0xff] %v5691_v49  ;;  %v5693_v0 = vld [vmem:[#allocation4 + $0x3b0] sm:$0xff]  ;;  %v46_v57 = vld [vmem:[%s9097_s5] sm:$0xf]  }
  0x55   :  { %489 = vmatpush2.msra.mxu0 %v5679_v59  ;;  %560 = vmatpush2.msra.mxu1 %v5681_v58  ;;  %9801 = vst [vmem:[#allocation104_spill] sm:$0xff] %v5693_v0  ;;  %v5700_v58 = vld [vmem:[#allocation4 + $0x388] sm:$0xff]  ;;  %v5702_v59 = vld [vmem:[#allocation4 + $0x398] sm:$0xff]  ;;  %48 = vst [vmem:[#allocation3] sm:$0xf] %v46_v57  }
  0x56   :  { %490 = vmatprep.subr.mxu0 %v5685_v61  ;;  %561 = vmatprep.subr.mxu1 %v5687_v60  ;;  %9802 = vst [vmem:[#allocation105_spill] sm:$0xff] %v5700_v58  ;;  %9803 = vst [vmem:[#allocation106_spill] sm:$0xff] %v5702_v59  ;;  %v5706_v60 = vld [vmem:[#allocation4 + $0x380] sm:$0xff]  ;;  %v5708_v61 = vld [vmem:[#allocation4 + $0x390] sm:$0xff] }
  0x57   :  { %491 = vmatpush2.msra.mxu0 %v5691_v49  ;;  %562 = vmatpush2.msra.mxu1 %v5693_v0  ;;  %9804 = vst [vmem:[#allocation107_spill] sm:$0xff] %v5706_v60  ;;  %9805 = vst [vmem:[#allocation108_spill] sm:$0xff] %v5708_v61  ;;  %v5712_v49 = vld [vmem:[#allocation4 + $0x368] sm:$0xff]  ;;  %v5714_v0 = vld [vmem:[#allocation4 + $0x378] sm:$0xff] }
  0x58   :  { %492 = vmatprep.subr.mxu0 %v5700_v58  ;;  %563 = vmatprep.subr.mxu1 %v5702_v59  ;;  %9806 = vst [vmem:[#allocation109_spill] sm:$0xff] %v5712_v49  ;;  %9807 = vst [vmem:[#allocation110_spill] sm:$0xff] %v5714_v0  ;;  %v5718_v57 = vld [vmem:[#allocation4 + $0x360] sm:$0xff]  ;;  %v5720_v58 = vld [vmem:[#allocation4 + $0x370] sm:$0xff] }
  0x59   :  { %493 = vmatpush2.msra.mxu0 %v5706_v60  ;;  %564 = vmatpush2.msra.mxu1 %v5708_v61  ;;  %9808 = vst [vmem:[#allocation111_spill] sm:$0xff] %v5718_v57  ;;  %9809 = vst [vmem:[#allocation112_spill] sm:$0xff] %v5720_v58  ;;  %v5724_v59 = vld [vmem:[#allocation4 + $0x348] sm:$0xff]  ;;  %v5726_v60 = vld [vmem:[#allocation4 + $0x358] sm:$0xff] }
  0x5a   :  { %494 = vmatprep.subr.mxu0 %v5712_v49  ;;  %565 = vmatprep.subr.mxu1 %v5714_v0  ;;  %9810 = vst [vmem:[#allocation113_spill] sm:$0xff] %v5724_v59  ;;  %9811 = vst [vmem:[#allocation114_spill] sm:$0xff] %v5726_v60  ;;  %v5730_v61 = vld [vmem:[#allocation4 + $0x340] sm:$0xff]  ;;  %v5732_v49 = vld [vmem:[#allocation4 + $0x350] sm:$0xff] }
  0x5b   :  { %495 = vmatpush2.msra.mxu0 %v5718_v57  ;;  %566 = vmatpush2.msra.mxu1 %v5720_v58  ;;  %9812 = vst [vmem:[#allocation115_spill] sm:$0xff] %v5730_v61  ;;  %9813 = vst [vmem:[#allocation116_spill] sm:$0xff] %v5732_v49  ;;  %v5734_v0 = vld [vmem:[#allocation4 + $0x328] sm:$0xff]  ;;  %v5738_v57 = vld [vmem:[#allocation4 + $0x338] sm:$0xff] }
  0x5c   :  { %496 = vmatprep.subr.mxu0 %v5724_v59  ;;  %567 = vmatprep.subr.mxu1 %v5726_v60  ;;  %9814 = vst [vmem:[#allocation117_spill] sm:$0xff] %v5734_v0  ;;  %9815 = vst [vmem:[#allocation118_spill] sm:$0xff] %v5738_v57  ;;  %v5740_v58 = vld [vmem:[#allocation4 + $0x320] sm:$0xff]  ;;  %v5746_v60 = vld [vmem:[#allocation4 + $0x308] sm:$0xff] }
  0x5d   :  { %497 = vmatpush2.msra.mxu0 %v5730_v61  ;;  %568 = vmatpush2.msra.mxu1 %v5732_v49  ;;  %9816 = vst [vmem:[#allocation119_spill] sm:$0xff] %v5740_v58  ;;  %9818 = vst [vmem:[#allocation121_spill] sm:$0xff] %v5746_v60  ;;  %v5748_v59 = vld [vmem:[#allocation4 + $0x318] sm:$0xff]  ;;  %v5754_v49 = vld [vmem:[#allocation4 + $0x310] sm:$0xff] }
  0x5e   :  { %498 = vmatprep.subr.mxu0 %v5734_v0  ;;  %569 = vmatprep.subr.mxu1 %v5738_v57  ;;  %9819 = vst [vmem:[#allocation122_spill] sm:$0xff] %v5748_v59  ;;  %9821 = vst [vmem:[#allocation124_spill] sm:$0xff] %v5754_v49  ;;  %v5756_v61 = vld [vmem:[#allocation4 + $0x2e8] sm:$0xff]  ;;  %v5762_v57 = vld [vmem:[#allocation4 + $0x2e0] sm:$0xff] }
  0x5f   :  { %499 = vmatpush2.msra.mxu0 %v5740_v58  ;;  %570 = vmatpush2.msra.mxu1 %v5742_v63  ;;  %9822 = vst [vmem:[#allocation125_spill] sm:$0xff] %v5756_v61  ;;  %9824 = vst [vmem:[#allocation127_spill] sm:$0xff] %v5762_v57  ;;  %v5764_v0 = vld [vmem:[#allocation4 + $0x2f0] sm:$0xff]  ;;  %v5768_v58 = vld [vmem:[#allocation4 + $0x2c8] sm:$0xff] }
  0x60   :  { %500 = vmatprep.subr.mxu0 %v5746_v60  ;;  %571 = vmatprep.subr.mxu1 %v5748_v59  ;;  %9825 = vst [vmem:[#allocation128_spill] sm:$0xff] %v5764_v0  ;;  %9826 = vst [vmem:[#allocation129_spill] sm:$0xff] %v5768_v58  ;;  %v5770_v63 = vld [vmem:[#allocation4 + $0x2d8] sm:$0xff]  ;;  %v5776_v60 = vld [vmem:[#allocation4 + $0x2d0] sm:$0xff] }
  0x61   :  { %501 = vmatpush2.msra.mxu0 %v5750_v62  ;;  %572 = vmatpush2.msra.mxu1 %v5754_v49  ;;  %9827 = vst [vmem:[#allocation130_spill] sm:$0xff] %v5770_v63  ;;  %9829 = vst [vmem:[#allocation132_spill] sm:$0xff] %v5776_v60  ;;  %v5780_v59 = vld [vmem:[#allocation4 + $0x2a8] sm:$0xff]  ;;  %v5782_v62 = vld [vmem:[#allocation4 + $0x2b8] sm:$0xff] }
  0x62   :  { %502 = vmatprep.subr.mxu0 %v5756_v61  ;;  %573 = vmatprep.subr.mxu1 %v5758_v56  ;;  %9830 = vst [vmem:[#allocation133_spill] sm:$0xff] %v5780_v59  ;;  %9831 = vst [vmem:[#allocation134_spill] sm:$0xff] %v5782_v62  ;;  %v5786_v49 = vld [vmem:[#allocation4 + $0x2a0] sm:$0xff]  ;;  %v5788_v61 = vld [vmem:[#allocation4 + $0x2b0] sm:$0xff] }
  0x63   :  { %503 = vmatpush2.msra.mxu0 %v5762_v57  ;;  %574 = vmatpush2.msra.mxu1 %v5764_v0  ;;  %9832 = vst [vmem:[#allocation135_spill] sm:$0xff] %v5786_v49  ;;  %9833 = vst [vmem:[#allocation136_spill] sm:$0xff] %v5788_v61  ;;  %v5792_v56 = vld [vmem:[#allocation4 + $0x288] sm:$0xff]  ;;  %v5794_v57 = vld [vmem:[#allocation4 + $0x298] sm:$0xff] }
  0x64   :  { %504 = vmatprep.subr.mxu0 %v5768_v58  ;;  %575 = vmatprep.subr.mxu1 %v5770_v63  ;;  %9834 = vst [vmem:[#allocation137_spill] sm:$0xff] %v5792_v56  ;;  %9835 = vst [vmem:[#allocation138_spill] sm:$0xff] %v5794_v57  ;;  %v5798_v0 = vld [vmem:[#allocation4 + $0x280] sm:$0xff]  ;;  %v5800_v58 = vld [vmem:[#allocation4 + $0x290] sm:$0xff] }
  0x65   :  { %505 = vmatpush2.msra.mxu0 %v5774_v55  ;;  %576 = vmatpush2.msra.mxu1 %v5776_v60  ;;  %9836 = vst [vmem:[#allocation139_spill] sm:$0xff] %v5798_v0  ;;  %9837 = vst [vmem:[#allocation140_spill] sm:$0xff] %v5800_v58  ;;  %v5804_v63 = vld [vmem:[#allocation4 + $0x268] sm:$0xff]  ;;  %v5806_v55 = vld [vmem:[#allocation4 + $0x278] sm:$0xff] }
  0x66   :  { %506 = vmatprep.subr.mxu0 %v5780_v59  ;;  %577 = vmatprep.subr.mxu1 %v5782_v62  ;;  %9838 = vst [vmem:[#allocation141_spill] sm:$0xff] %v5804_v63  ;;  %9839 = vst [vmem:[#allocation142_spill] sm:$0xff] %v5806_v55  ;;  %v5810_v60 = vld [vmem:[#allocation4 + $0x260] sm:$0xff]  ;;  %v5812_v59 = vld [vmem:[#allocation4 + $0x270] sm:$0xff] }
  0x67   :  { %507 = vmatpush2.msra.mxu0 %v5786_v49  ;;  %578 = vmatpush2.msra.mxu1 %v5788_v61  ;;  %9840 = vst [vmem:[#allocation143_spill] sm:$0xff] %v5810_v60  ;;  %9841 = vst [vmem:[#allocation144_spill] sm:$0xff] %v5812_v59  ;;  %v5816_v62 = vld [vmem:[#allocation4 + $0x248] sm:$0xff]  ;;  %v5818_v49 = vld [vmem:[#allocation4 + $0x258] sm:$0xff] }
  0x68   :  { %508 = vmatprep.subr.mxu0 %v5792_v56  ;;  %579 = vmatprep.subr.mxu1 %v5794_v57  ;;  %9842 = vst [vmem:[#allocation145_spill] sm:$0xff] %v5816_v62  ;;  %9843 = vst [vmem:[#allocation146_spill] sm:$0xff] %v5818_v49  ;;  %v5822_v61 = vld [vmem:[#allocation4 + $0x240] sm:$0xff]  ;;  %v5824_v56 = vld [vmem:[#allocation4 + $0x250] sm:$0xff] }
  0x69   :  { %509 = vmatpush2.msra.mxu0 %v5798_v0  ;;  %580 = vmatpush2.msra.mxu1 %v5800_v58  ;;  %9844 = vst [vmem:[#allocation147_spill] sm:$0xff] %v5822_v61  ;;  %9845 = vst [vmem:[#allocation148_spill] sm:$0xff] %v5824_v56  ;;  %v43_v57 = vld [vmem:[%s9096_s4 + $0x2] sm:$0x3]  ;;  %v5831_v58 = vld [vmem:[#allocation4 + $0x228] sm:$0xff] }
  0x6a   :  { %510 = vmatprep.subr.mxu0 %v5804_v63  ;;  %581 = vmatprep.subr.mxu1 %v5806_v55  ;;  %9846 = vst [vmem:[#allocation149_spill] sm:$0xff] %v5831_v58  ;;  %v5833_v0 = vld [vmem:[#allocation4 + $0x238] sm:$0xff]  ;;  %45 = vst [vmem:[#allocation2 + $0x2] sm:$0x3] %v43_v57  ;;  %v5837_v55 = vld [vmem:[#allocation4 + $0x220] sm:$0xff] }
  0x6b   :  { %511 = vmatpush2.msra.mxu0 %v5810_v60  ;;  %582 = vmatpush2.msra.mxu1 %v5812_v59  ;;  %9847 = vst [vmem:[#allocation150_spill] sm:$0xff] %v5833_v0  ;;  %9848 = vst [vmem:[#allocation151_spill] sm:$0xff] %v5837_v55  ;;  %v5839_v63 = vld [vmem:[#allocation4 + $0x230] sm:$0xff]  ;;  %v5843_v60 = vld [vmem:[#allocation4 + $0x208] sm:$0xff] }
  0x6c   :  { %512 = vmatprep.subr.mxu0 %v5816_v62  ;;  %583 = vmatprep.subr.mxu1 %v5818_v49  ;;  %9849 = vst [vmem:[#allocation152_spill] sm:$0xff] %v5839_v63  ;;  %9850 = vst [vmem:[#allocation153_spill] sm:$0xff] %v5843_v60  ;;  %v5845_v59 = vld [vmem:[#allocation4 + $0x218] sm:$0xff]  ;;  %v5849_v57 = vld [vmem:[#allocation4 + $0x200] sm:$0xff] }
  0x6d   :  { %513 = vmatpush2.msra.mxu0 %v5822_v61  ;;  %584 = vmatpush2.msra.mxu1 %v5824_v56  ;;  %9851 = vst [vmem:[#allocation154_spill] sm:$0xff] %v5845_v59  ;;  %9852 = vst [vmem:[#allocation155_spill] sm:$0xff] %v5849_v57  ;;  %v5851_v62 = vld [vmem:[#allocation4 + $0x210] sm:$0xff] }
  0x6e   :  { %514 = vmatprep.subr.mxu0 %v5831_v58  ;;  %585 = vmatprep.subr.mxu1 %v5833_v0  ;;  %9853 = vst [vmem:[#allocation156_spill] sm:$0xff] %v5851_v62  ;;  %v5027_v0 = vmov 1983009808  }
  0x6f   :  { %515 = vmatpush2.msra.mxu0 %v5837_v55  ;;  %586 = vmatpush2.msra.mxu1 %v5839_v63  ;;  %v265_v58 = vunpack.c.l.s4 %v5027_v0  ;;  %v267_v55 = vlaneseq  ;;  %v50_v0 = vld [vmem:[%s9092_s0] sm:$0xff] }
  0x70   :  { %516 = vmatprep.subr.mxu0 %v5843_v60  ;;  %587 = vmatprep.subr.mxu1 %v5845_v59 }
  0x71   :  { %517 = vmatpush2.msra.mxu0 %v5849_v57  ;;  %588 = vmatpush2.msra.mxu1 %v5851_v62  ;;  %v303_v56 = vld [vmem:[#allocation2 + $0x2] sm:$0x3]  ;;  %v266_v61 = vunpack.c.0.s8 %v265_v58  ;;  %v5861_v63 = vshrl.u32 %v267_v55, 7 }
  0x72   :  { %694 = vmatprep.subr.mxu0 %v5085_v1  ;;  %765 = vmatprep.subr.mxu1 %v5090_v2 }
  0x73   :  { %518 = vmatprep.mubr.f32.mxu0 %v303_v56  ;;  %589 = vmatprep.mubr.f32.mxu1 %v303_v56  ;;  %9854 = vst [vmem:[#allocation157_spill] sm:$0xff] %v5861_v63  ;;  %v5864_v59 = vsub.s32 %v266_v61, %v5861_v63 }
  0x75   :  { %9855 = vst [vmem:[#allocation158_spill] sm:$0xff] %v5864_v59 }
  0xf1   :  { %v182_v60 = vpop.f32.mrf.mxu0  ;;  %v253_v49 = vpop.f32.mrf.mxu1 }
  0xf3   :  { %v184_v57 = vpop.f32.mrf.mxu0  ;;  %v255_v62 = vpop.f32.mrf.mxu1 }
  0xf4   :  { %v262_v54 = vcombine.low %v182_v60, %v184_v57  ;;  %v263_v53 = vcombine.low %v253_v49, %v255_v62  ;;  %v281_v60 = vld [vmem:[#allocation3] sm:$0x3] }
  0xf6   :  { %v270_v1 = vrot.slane %v262_v54, %v5864_v59  ;;  %v277_v2 = vrot.slane %v263_v53, %v5864_v59 }
  0xf8   :  { %v278_v56 = vcombine.low %v270_v1, %v277_v2  ;;  %v9906_v2 = vld [vmem:[#allocation62_spill] sm:$0xff] }
  0xfa   :  { %v280_v55 = vadd.f32 %v278_v56, %v50_v0  ;;  %v9907_v0 = vld [vmem:[#allocation63_spill] sm:$0xff]  ;;  %v9908_v56 = vld [vmem:[#allocation64_spill] sm:$0xff] }
  0xfc   :  { %v4711_v58 = vmul.f32 -1.442695, %v280_v55  ;;  %v289_v61 = vrot.slane %v280_v55, 6  ;;  %v9909_v55 = vld [vmem:[#allocation65_spill] sm:$0xff] }
  0xfe   :  { %4765 = vpow2.f32 %v4711_v58  ;;  %v9910_v58 = vld [vmem:[#allocation66_spill] sm:$0xff] }
 0x10b   :  { %v4766_v52 = vpop.eup %4765 }
 0x10c   :  { %v285_v51 = vadd.f32 1.0, %v4766_v52  ;;  %v9903_v52 = vld [vmem:[#allocation59_spill] sm:$0xff] }
 0x10e   :  { %4767 = vrcp.f32 %v285_v51  ;;  %v9902_v51 = vld [vmem:[#allocation58_spill] sm:$0xff] }
 0x10f   :  { %4769 = vtanh.f32 %v289_v61  ;;  %v9911_v61 = vld [vmem:[#allocation67_spill] sm:$0xff] }
 0x11b   :  { %v4768_v63 = vpop.eup %4767 }
 0x11c   :  { %v293_v62 = vrot.slane %v4768_v63, 2  ;;  %v4770_v49 = vpop.eup %4769  ;;  %v299_v59 = vrot.slane %v4768_v63, 4 }
 0x11d   :  { %v296_v54 = vmul.f32 %v4770_v49, %v4768_v63  ;;  %v9905_v63 = vld [vmem:[#allocation61_spill] sm:$0xff]  ;;  %v9914_v49 = vld [vmem:[#allocation70_spill] sm:$0xff] }
 0x11e   :  { %v295_v57 = vmul.f32 %v293_v62, %v281_v60  ;;  %v9912_v60 = vld [vmem:[#allocation68_spill] sm:$0xff]  ;;  %v9913_v62 = vld [vmem:[#allocation69_spill] sm:$0xff] }
 0x120   :  { %v297_v53 = vadd.f32 %v296_v54, %v295_v57  ;;  %v9915_v54 = vld [vmem:[#allocation71_spill] sm:$0xff]  ;;  %v9916_v57 = vld [vmem:[#allocation72_spill] sm:$0xff] }
 0x122   :  { %4771 = vtanh.f32 %v297_v53  ;;  %623 = vst [vmem:[#allocation3] sm:$0x3] %v297_v53  ;;  %v9917_v53 = vld [vmem:[#allocation73_spill] sm:$0xff] }
 0x12f   :  { %v4772_v50 = vpop.eup %4771 }
 0x130   :  { %v301_v1 = vmul.f32 %v4772_v50, %v299_v59  ;;  %v9901_v50 = vld [vmem:[#allocation57_spill] sm:$0xff]  ;;  %v9904_v59 = vld [vmem:[#allocation60_spill] sm:$0xff] }
 0x132   :  { %519 = vmatmul.mubr.f32.vlgmr.msra.gmra.mxu0 %v301_v1  ;;  %622 = vst [vmem:[#allocation2] sm:$0x3] %v301_v1  ;;  %590 = vmatmul.mubr.f32.vlgmr.msra.gmra.mxu1 %v301_v1  ;;  %v9918_v1 = vld [vmem:[#allocation74_spill] sm:$0xff] }
 0x133   :  { %695 = vmatpush1.msra.mxu0 %v5095_v3  ;;  %766 = vmatpush1.msra.mxu1 %v5102_v4  ;;  %v9856_v3 = vld [vmem:[#allocation13_spill] sm:$0xff]  ;;  %v9857_v4 = vld [vmem:[#allocation14_spill] sm:$0xff] }
 0x134   :  { %696 = vmatprep.subr.mxu0 %v5107_v5  ;;  %767 = vmatprep.subr.mxu1 %v5112_v6  ;;  %v9858_v5 = vld [vmem:[#allocation15_spill] sm:$0xff]  ;;  %v9859_v6 = vld [vmem:[#allocation16_spill] sm:$0xff] }
 0x135   :  { %697 = vmatpush1.msra.mxu0 %v5119_v7  ;;  %768 = vmatpush1.msra.mxu1 %v5124_v8  ;;  %v9860_v7 = vld [vmem:[#allocation17_spill] sm:$0xff]  ;;  %v9861_v8 = vld [vmem:[#allocation18_spill] sm:$0xff] }
 0x136   :  { %698 = vmatprep.subr.mxu0 %v5129_v9  ;;  %769 = vmatprep.subr.mxu1 %v5136_v10  ;;  %v9862_v9 = vld [vmem:[#allocation19_spill] sm:$0xff]  ;;  %v9863_v10 = vld [vmem:[#allocation20_spill] sm:$0xff] }
 0x137   :  { %699 = vmatpush1.msra.mxu0 %v5141_v11  ;;  %770 = vmatpush1.msra.mxu1 %v5146_v12  ;;  %v9864_v11 = vld [vmem:[#allocation21_spill] sm:$0xff]  ;;  %v9865_v12 = vld [vmem:[#allocation22_spill] sm:$0xff] }
 0x138   :  { %700 = vmatprep.subr.mxu0 %v5153_v13  ;;  %771 = vmatprep.subr.mxu1 %v5158_v14  ;;  %v9866_v13 = vld [vmem:[#allocation23_spill] sm:$0xff]  ;;  %v9867_v14 = vld [vmem:[#allocation24_spill] sm:$0xff] }
 0x139   :  { %701 = vmatpush1.msra.mxu0 %v5165_v15  ;;  %772 = vmatpush1.msra.mxu1 %v5170_v16  ;;  %v9868_v15 = vld [vmem:[#allocation25_spill] sm:$0xff]  ;;  %v9869_v16 = vld [vmem:[#allocation26_spill] sm:$0xff] }
 0x13a   :  { %702 = vmatprep.subr.mxu0 %v5177_v17  ;;  %773 = vmatprep.subr.mxu1 %v5182_v18  ;;  %v9870_v17 = vld [vmem:[#allocation27_spill] sm:$0xff]  ;;  %v9871_v18 = vmov 0.0  }
 0x13b   :  { %703 = vmatpush1.msra.mxu0 %v5189_v19  ;;  %774 = vmatpush1.msra.mxu1 %v5194_v20  ;;  %v9872_v19 = vld [vmem:[#allocation28_spill] sm:$0xff]  ;;  %v629_v20 = vld [vmem:[#allocation2] sm:$0x3] }
 0x13c   :  { %704 = vmatprep.subr.mxu0 %v5201_v21  ;;  %775 = vmatprep.subr.mxu1 %v5206_v22  ;;  %v9873_v21 = vld [vmem:[#allocation29_spill] sm:$0xff]  ;;  %v9874_v22 = vld [vmem:[#allocation30_spill] sm:$0xff] }
 0x13d   :  { %705 = vmatpush1.msra.mxu0 %v5213_v23  ;;  %776 = vmatpush1.msra.mxu1 %v5218_v24  ;;  %v9875_v23 = vld [vmem:[#allocation31_spill] sm:$0xff]  ;;  %v9876_v24 = vld [vmem:[#allocation32_spill] sm:$0xff] }
 0x13e   :  { %706 = vmatprep.subr.mxu0 %v5225_v25  ;;  %777 = vmatprep.subr.mxu1 %v5230_v26  ;;  %v9877_v25 = vld [vmem:[#allocation33_spill] sm:$0xff]  ;;  %v9878_v26 = vld [vmem:[#allocation34_spill] sm:$0xff] }
 0x13f   :  { %707 = vmatpush1.msra.mxu0 %v5237_v27  ;;  %778 = vmatpush1.msra.mxu1 %v5242_v28  ;;  %v9879_v27 = vld [vmem:[#allocation35_spill] sm:$0xff]  ;;  %v9880_v28 = vld [vmem:[#allocation36_spill] sm:$0xff] }
 0x140   :  { %708 = vmatprep.subr.mxu0 %v5249_v29  ;;  %779 = vmatprep.subr.mxu1 %v5254_v30  ;;  %v9881_v29 = vld [vmem:[#allocation37_spill] sm:$0xff]  ;;  %v9882_v30 = vld [vmem:[#allocation38_spill] sm:$0xff] }
 0x141   :  { %709 = vmatpush1.msra.mxu0 %v5261_v31  ;;  %780 = vmatpush1.msra.mxu1 %v5266_v32  ;;  %v9883_v31 = vld [vmem:[#allocation39_spill] sm:$0xff]  ;;  %v9884_v32 = vld [vmem:[#allocation40_spill] sm:$0xff] }
 0x142   :  { %710 = vmatprep.subr.mxu0 %v5273_v33  ;;  %781 = vmatprep.subr.mxu1 %v5278_v34  ;;  %v9885_v33 = vld [vmem:[#allocation41_spill] sm:$0xff]  ;;  %v9886_v34 = vld [vmem:[#allocation42_spill] sm:$0xff] }
 0x143   :  { %711 = vmatpush1.msra.mxu0 %v5285_v35  ;;  %782 = vmatpush1.msra.mxu1 %v5290_v36  ;;  %v9887_v35 = vld [vmem:[#allocation43_spill] sm:$0xff]  ;;  %v9888_v36 = vld [vmem:[#allocation44_spill] sm:$0xff] }
 0x144   :  { %712 = vmatprep.subr.mxu0 %v5297_v37  ;;  %783 = vmatprep.subr.mxu1 %v5302_v38  ;;  %v9889_v37 = vld [vmem:[#allocation45_spill] sm:$0xff]  ;;  %v9890_v38 = vld [vmem:[#allocation46_spill] sm:$0xff] }
 0x145   :  { %713 = vmatpush1.msra.mxu0 %v5309_v39  ;;  %784 = vmatpush1.msra.mxu1 %v5314_v40  ;;  %v9891_v39 = vld [vmem:[#allocation47_spill] sm:$0xff]  ;;  %v9892_v40 = vld [vmem:[#allocation48_spill] sm:$0xff] }
 0x146   :  { %714 = vmatprep.subr.mxu0 %v5321_v41  ;;  %785 = vmatprep.subr.mxu1 %v5326_v42  ;;  %v9893_v41 = vld [vmem:[#allocation49_spill] sm:$0xff]  ;;  %v9894_v42 = vld [vmem:[#allocation50_spill] sm:$0xff] }
 0x147   :  { %715 = vmatpush1.msra.mxu0 %v5333_v43  ;;  %786 = vmatpush1.msra.mxu1 %v5338_v44  ;;  %v9895_v43 = vld [vmem:[#allocation51_spill] sm:$0xff]  ;;  %v9896_v44 = vld [vmem:[#allocation52_spill] sm:$0xff] }
 0x148   :  { %716 = vmatprep.subr.mxu0 %v5345_v45  ;;  %787 = vmatprep.subr.mxu1 %v5350_v46  ;;  %v9897_v45 = vld [vmem:[#allocation53_spill] sm:$0xff]  ;;  %v9898_v46 = vld [vmem:[#allocation54_spill] sm:$0xff] }
 0x149   :  { %717 = vmatpush1.msra.mxu0 %v5357_v47  ;;  %788 = vmatpush1.msra.mxu1 %v5362_v48  ;;  %v9899_v47 = vld [vmem:[#allocation55_spill] sm:$0xff]  ;;  %v9900_v48 = vld [vmem:[#allocation56_spill] sm:$0xff] }
 0x14a   :  { %718 = vmatprep.subr.mxu0 %v9856_v3  ;;  %789 = vmatprep.subr.mxu1 %v9857_v4  ;;  %v9919_v3 = vld [vmem:[#allocation75_spill] sm:$0xff]  ;;  %v9920_v4 = vld [vmem:[#allocation76_spill] sm:$0xff] }
 0x14b   :  { %719 = vmatpush1.msra.mxu0 %v9858_v5  ;;  %790 = vmatpush1.msra.mxu1 %v9859_v6  ;;  %v9921_v5 = vld [vmem:[#allocation77_spill] sm:$0xff]  ;;  %v9922_v6 = vld [vmem:[#allocation78_spill] sm:$0xff] }
 0x14c   :  { %720 = vmatprep.subr.mxu0 %v9860_v7  ;;  %791 = vmatprep.subr.mxu1 %v9861_v8  ;;  %v9923_v7 = vld [vmem:[#allocation79_spill] sm:$0xff]  ;;  %v9924_v8 = vld [vmem:[#allocation80_spill] sm:$0xff] }
 0x14d   :  { %721 = vmatpush1.msra.mxu0 %v9862_v9  ;;  %792 = vmatpush1.msra.mxu1 %v9863_v10  ;;  %v9925_v9 = vld [vmem:[#allocation81_spill] sm:$0xff]  ;;  %v9926_v10 = vld [vmem:[#allocation82_spill] sm:$0xff] }
 0x14e   :  { %722 = vmatprep.subr.mxu0 %v9864_v11  ;;  %793 = vmatprep.subr.mxu1 %v9865_v12  ;;  %v9927_v11 = vld [vmem:[#allocation83_spill] sm:$0xff]  ;;  %v9928_v12 = vld [vmem:[#allocation84_spill] sm:$0xff] }
 0x14f   :  { %723 = vmatpush1.msra.mxu0 %v9866_v13  ;;  %794 = vmatpush1.msra.mxu1 %v9867_v14  ;;  %v9929_v13 = vld [vmem:[#allocation85_spill] sm:$0xff]  ;;  %v9930_v14 = vld [vmem:[#allocation86_spill] sm:$0xff] }
 0x150   :  { %724 = vmatprep.subr.mxu0 %v9868_v15  ;;  %795 = vmatprep.subr.mxu1 %v9869_v16  ;;  %v9931_v15 = vld [vmem:[#allocation87_spill] sm:$0xff]  ;;  %v9932_v16 = vld [vmem:[#allocation88_spill] sm:$0xff] }
 0x151   :  { %725 = vmatpush1.msra.mxu0 %v9870_v17  ;;  %758 = vmatprep.mubr.f32.mxu0 %v9871_v18  ;;  %v9933_v17 = vld [vmem:[#allocation89_spill] sm:$0xff] }
 0x152   :  { %796 = vmatpush1.msra.mxu1 %v9872_v19  ;;  %829 = vmatprep.mubr.f32.mxu1 %v9871_v18  ;;  %v9934_v19 = vld [vmem:[#allocation90_spill] sm:$0xff] }
 0x153   :  { %759 = vmatmul.mubr.f32.vlgmr.msra.gmra.mxu0 %v629_v20  ;;  %830 = vmatmul.mubr.f32.vlgmr.msra.gmra.mxu1 %v629_v20  ;;  %v9935_v20 = vld [vmem:[#allocation91_spill] sm:$0xff] }
 0x154   :  { %1031 = vmatprep.subr.mxu0 %v9873_v21  ;;  %1102 = vmatprep.subr.mxu1 %v9874_v22  ;;  %v9936_v21 = vld [vmem:[#allocation92_spill] sm:$0xff]  ;;  %v9937_v22 = vld [vmem:[#allocation93_spill] sm:$0xff] }
 0x155   :  { %1032 = vmatpush1.msra.mxu0 %v9875_v23  ;;  %1103 = vmatpush1.msra.mxu1 %v9876_v24  ;;  %v9938_v23 = vld [vmem:[#allocation94_spill] sm:$0xff]  ;;  %v9939_v24 = vld [vmem:[#allocation95_spill] sm:$0xff] }
 0x156   :  { %1033 = vmatprep.subr.mxu0 %v9877_v25  ;;  %1104 = vmatprep.subr.mxu1 %v9878_v26  ;;  %v9940_v25 = vld [vmem:[#allocation96_spill] sm:$0xff]  ;;  %v9941_v26 = vld [vmem:[#allocation97_spill] sm:$0xff] }
 0x157   :  { %1034 = vmatpush1.msra.mxu0 %v9879_v27  ;;  %1105 = vmatpush1.msra.mxu1 %v9880_v28  ;;  %v9942_v27 = vld [vmem:[#allocation98_spill] sm:$0xff]  ;;  %v9943_v28 = vld [vmem:[#allocation99_spill] sm:$0xff] }
 0x158   :  { %1035 = vmatprep.subr.mxu0 %v9881_v29  ;;  %1106 = vmatprep.subr.mxu1 %v9882_v30  ;;  %v9944_v29 = vld [vmem:[#allocation100_spill] sm:$0xff]  ;;  %v9945_v30 = vld [vmem:[#allocation101_spill] sm:$0xff] }
 0x159   :  { %1036 = vmatpush1.msra.mxu0 %v9883_v31  ;;  %1107 = vmatpush1.msra.mxu1 %v9884_v32  ;;  %v9946_v31 = vld [vmem:[#allocation102_spill] sm:$0xff]  ;;  %v9947_v32 = vld [vmem:[#allocation103_spill] sm:$0xff] }
 0x15a   :  { %1037 = vmatprep.subr.mxu0 %v9885_v33  ;;  %1108 = vmatprep.subr.mxu1 %v9886_v34  ;;  %v9948_v33 = vld [vmem:[#allocation104_spill] sm:$0xff]  ;;  %v9949_v34 = vld [vmem:[#allocation105_spill] sm:$0xff] }
 0x15b   :  { %1038 = vmatpush1.msra.mxu0 %v9887_v35  ;;  %1109 = vmatpush1.msra.mxu1 %v9888_v36  ;;  %v9950_v35 = vld [vmem:[#allocation106_spill] sm:$0xff]  ;;  %v9951_v36 = vld [vmem:[#allocation107_spill] sm:$0xff] }
 0x15c   :  { %1039 = vmatprep.subr.mxu0 %v9889_v37  ;;  %1110 = vmatprep.subr.mxu1 %v9890_v38  ;;  %v9952_v37 = vld [vmem:[#allocation108_spill] sm:$0xff]  ;;  %v9953_v38 = vld [vmem:[#allocation109_spill] sm:$0xff] }
 0x15d   :  { %1040 = vmatpush1.msra.mxu0 %v9891_v39  ;;  %1111 = vmatpush1.msra.mxu1 %v9892_v40  ;;  %v9954_v39 = vld [vmem:[#allocation110_spill] sm:$0xff]  ;;  %v9955_v40 = vld [vmem:[#allocation111_spill] sm:$0xff] }
 0x15e   :  { %1041 = vmatprep.subr.mxu0 %v9893_v41  ;;  %1112 = vmatprep.subr.mxu1 %v9894_v42  ;;  %v9956_v41 = vld [vmem:[#allocation112_spill] sm:$0xff]  ;;  %v9957_v42 = vld [vmem:[#allocation113_spill] sm:$0xff] }
 0x15f   :  { %1042 = vmatpush1.msra.mxu0 %v9895_v43  ;;  %1113 = vmatpush1.msra.mxu1 %v9896_v44  ;;  %v9958_v43 = vld [vmem:[#allocation114_spill] sm:$0xff]  ;;  %v9959_v44 = vld [vmem:[#allocation115_spill] sm:$0xff] }
 0x160   :  { %1043 = vmatprep.subr.mxu0 %v9897_v45  ;;  %1114 = vmatprep.subr.mxu1 %v9898_v46  ;;  %v9960_v45 = vld [vmem:[#allocation116_spill] sm:$0xff]  ;;  %v9961_v46 = vld [vmem:[#allocation117_spill] sm:$0xff] }
 0x161   :  { %1044 = vmatpush1.msra.mxu0 %v9899_v47  ;;  %1115 = vmatpush1.msra.mxu1 %v9900_v48  ;;  %v9962_v47 = vld [vmem:[#allocation118_spill] sm:$0xff]  ;;  %v9963_v48 = vld [vmem:[#allocation119_spill] sm:$0xff] }
 0x162   :  { %1045 = vmatprep.subr.mxu0 %v9901_v50  ;;  %1116 = vmatprep.subr.mxu1 %v9902_v51  ;;  %v9964_v50 = vld [vmem:[#allocation120_spill] sm:$0xff]  ;;  %v9965_v51 = vld [vmem:[#allocation121_spill] sm:$0xff] }
 0x163   :  { %1046 = vmatpush1.msra.mxu0 %v9903_v52  ;;  %1117 = vmatpush1.msra.mxu1 %v9904_v59  ;;  %v9966_v52 = vld [vmem:[#allocation122_spill] sm:$0xff]  ;;  %v9967_v59 = vld [vmem:[#allocation123_spill] sm:$0xff] }
 0x164   :  { %1047 = vmatprep.subr.mxu0 %v9905_v63  ;;  %1118 = vmatprep.subr.mxu1 %v9906_v2  ;;  %v9968_v63 = vld [vmem:[#allocation124_spill] sm:$0xff]  ;;  %v9969_v2 = vld [vmem:[#allocation125_spill] sm:$0xff] }
 0x165   :  { %1048 = vmatpush1.msra.mxu0 %v9907_v0  ;;  %1119 = vmatpush1.msra.mxu1 %v9908_v56  ;;  %v9970_v0 = vld [vmem:[#allocation126_spill] sm:$0xff]  ;;  %v9971_v56 = vld [vmem:[#allocation127_spill] sm:$0xff] }
 0x166   :  { %1049 = vmatprep.subr.mxu0 %v9909_v55  ;;  %1120 = vmatprep.subr.mxu1 %v9910_v58  ;;  %v9972_v55 = vld [vmem:[#allocation128_spill] sm:$0xff]  ;;  %v9973_v58 = vld [vmem:[#allocation129_spill] sm:$0xff] }
 0x167   :  { %1050 = vmatpush1.msra.mxu0 %v9911_v61  ;;  %1121 = vmatpush1.msra.mxu1 %v9912_v60  ;;  %v9974_v61 = vld [vmem:[#allocation130_spill] sm:$0xff]  ;;  %v9975_v60 = vld [vmem:[#allocation131_spill] sm:$0xff] }
 0x168   :  { %1051 = vmatprep.subr.mxu0 %v9913_v62  ;;  %1122 = vmatprep.subr.mxu1 %v9914_v49  ;;  %v9976_v62 = vld [vmem:[#allocation132_spill] sm:$0xff]  ;;  %v9977_v49 = vld [vmem:[#allocation133_spill] sm:$0xff] }
 0x169   :  { %1052 = vmatpush1.msra.mxu0 %v9915_v54  ;;  %1123 = vmatpush1.msra.mxu1 %v9916_v57  ;;  %v9978_v54 = vld [vmem:[#allocation134_spill] sm:$0xff]  ;;  %v9979_v57 = vld [vmem:[#allocation135_spill] sm:$0xff] }
 0x16a   :  { %1053 = vmatprep.subr.mxu0 %v9917_v53  ;;  %1124 = vmatprep.subr.mxu1 %v9918_v1  ;;  %v9980_v53 = vld [vmem:[#allocation136_spill] sm:$0xff]  ;;  %v9981_v1 = vld [vmem:[#allocation137_spill] sm:$0xff] }
 0x16b   :  { %1054 = vmatpush1.msra.mxu0 %v9919_v3  ;;  %1125 = vmatpush1.msra.mxu1 %v9920_v4  ;;  %v9982_v3 = vld [vmem:[#allocation138_spill] sm:$0xff]  ;;  %v9983_v4 = vld [vmem:[#allocation139_spill] sm:$0xff] }
 0x16c   :  { %1055 = vmatprep.subr.mxu0 %v9921_v5  ;;  %1126 = vmatprep.subr.mxu1 %v9922_v6  ;;  %v9984_v5 = vld [vmem:[#allocation140_spill] sm:$0xff]  ;;  %v9985_v6 = vld [vmem:[#allocation141_spill] sm:$0xff] }
 0x16d   :  { %1056 = vmatpush1.msra.mxu0 %v9923_v7  ;;  %1127 = vmatpush1.msra.mxu1 %v9924_v8  ;;  %v9986_v7 = vld [vmem:[#allocation142_spill] sm:$0xff]  ;;  %v9987_v8 = vld [vmem:[#allocation143_spill] sm:$0xff] }
 0x16e   :  { %1057 = vmatprep.subr.mxu0 %v9925_v9  ;;  %1128 = vmatprep.subr.mxu1 %v9926_v10  ;;  %v9988_v9 = vld [vmem:[#allocation144_spill] sm:$0xff]  ;;  %v9989_v10 = vld [vmem:[#allocation145_spill] sm:$0xff] }
 0x16f   :  { %1058 = vmatpush1.msra.mxu0 %v9927_v11  ;;  %1129 = vmatpush1.msra.mxu1 %v9928_v12  ;;  %v9990_v11 = vld [vmem:[#allocation146_spill] sm:$0xff]  ;;  %v9991_v12 = vld [vmem:[#allocation147_spill] sm:$0xff] }
 0x170   :  { %1059 = vmatprep.subr.mxu0 %v9929_v13  ;;  %1130 = vmatprep.subr.mxu1 %v9930_v14  ;;  %v9992_v13 = vld [vmem:[#allocation148_spill] sm:$0xff]  ;;  %v9993_v14 = vld [vmem:[#allocation149_spill] sm:$0xff] }
 0x171   :  { %1060 = vmatpush1.msra.mxu0 %v9931_v15  ;;  %1131 = vmatpush1.msra.mxu1 %v9932_v16  ;;  %v9994_v15 = vld [vmem:[#allocation150_spill] sm:$0xff]  ;;  %v9995_v16 = vld [vmem:[#allocation151_spill] sm:$0xff] }
 0x172   :  { %1061 = vmatprep.subr.mxu0 %v9933_v17  ;;  %1132 = vmatprep.subr.mxu1 %v9934_v19  ;;  %v9996_v17 = vld [vmem:[#allocation152_spill] sm:$0xff]  ;;  %v9997_v19 = vld [vmem:[#allocation153_spill] sm:$0xff] }
 0x173   :  { %1062 = vmatpush1.msra.mxu0 %v9935_v20  ;;  %1133 = vmatpush1.msra.mxu1 %v9936_v21  ;;  %v9998_v20 = vld [vmem:[#allocation154_spill] sm:$0xff]  ;;  %v9999_v21 = vld [vmem:[#allocation155_spill] sm:$0xff] }
 0x174   :  { %1063 = vmatprep.subr.mxu0 %v9937_v22  ;;  %1134 = vmatprep.subr.mxu1 %v9938_v23  ;;  %v10000_v22 = vld [vmem:[#allocation156_spill] sm:$0xff] }
 0x175   :  { %1064 = vmatpush2.msra.mxu0 %v9939_v24  ;;  %1135 = vmatpush2.msra.mxu1 %v9940_v25  ;;  %v6066_v23 = vld [vmem:[%s9093_s1 + $0x1e8] sm:$0xff]  ;;  %v6071_v24 = vld [vmem:[%s9093_s1 + $0x1f8] sm:$0xff]  ;;  %v10001_v25 = vld [vmem:[#allocation157_spill] sm:$0xff] }
 0x176   :  { %1065 = vmatprep.subr.mxu0 %v9941_v26  ;;  %1136 = vmatprep.subr.mxu1 %v9942_v27  ;;  %v6076_v26 = vsub.s32 0, %v10001_v25  ;;  %v432_v27 = vld [vmem:[%s9095_s3] sm:$0xf] }
 0x177   :  { %1066 = vmatpush2.msra.mxu0 %v9943_v28  ;;  %1137 = vmatpush2.msra.mxu1 %v9944_v29  ;;  %v6082_v28 = vsub.s32 1, %v10001_v25 }
 0x178   :  { %1067 = vmatprep.subr.mxu0 %v9945_v30  ;;  %1138 = vmatprep.subr.mxu1 %v9946_v31  ;;  %10002 = vst [vmem:[#allocation13_spill] sm:$0xff] %v6076_v26  ;;  %v437_v29 = vrot.slane %v432_v27, %v6076_v26 }
 0x179   :  { %1068 = vmatpush2.msra.mxu0 %v9947_v32  ;;  %1139 = vmatpush2.msra.mxu1 %v9948_v33  ;;  %10003 = vst [vmem:[#allocation14_spill] sm:$0xff] %v6082_v28  ;;  %v441_v30 = vrot.slane %v432_v27, %v6082_v28 }
 0x17a   :  { %1069 = vmatprep.subr.mxu0 %v9949_v34  ;;  %1140 = vmatprep.subr.mxu1 %v9950_v35 }
 0x17b   :  { %1070 = vmatpush2.msra.mxu0 %v9951_v36  ;;  %1141 = vmatpush2.msra.mxu1 %v9952_v37  ;;  %v6087_v36 = vsub.s32 2, %v10001_v25 }
 0x17c   :  { %1071 = vmatprep.subr.mxu0 %v9953_v38  ;;  %1142 = vmatprep.subr.mxu1 %v9954_v39 }
 0x17d   :  { %1072 = vmatpush2.msra.mxu0 %v9955_v40  ;;  %1143 = vmatpush2.msra.mxu1 %v9956_v41  ;;  %v445_v38 = vrot.slane %v432_v27, %v6087_v36  ;;  %v6091_v40 = vsub.s32 3, %v10001_v25 }
 0x17e   :  { %1073 = vmatprep.subr.mxu0 %v9957_v42  ;;  %1144 = vmatprep.subr.mxu1 %v9958_v43 }
 0x17f   :  { %1074 = vmatpush2.msra.mxu0 %v9959_v44  ;;  %1145 = vmatpush2.msra.mxu1 %v9960_v45  ;;  %10004 = vst [vmem:[#allocation15_spill] sm:$0xff] %v6091_v40  ;;  %v449_v42 = vrot.slane %v432_v27, %v6091_v40 }
 0x180   :  { %1075 = vmatprep.subr.mxu0 %v9961_v46  ;;  %1146 = vmatprep.subr.mxu1 %v9962_v47 }
 0x181   :  { %1076 = vmatpush2.msra.mxu0 %v9963_v48  ;;  %1147 = vmatpush2.msra.mxu1 %v9964_v50 }
 0x182   :  { %1077 = vmatprep.subr.mxu0 %v9965_v51  ;;  %1148 = vmatprep.subr.mxu1 %v9966_v52 }
 0x183   :  { %1078 = vmatpush2.msra.mxu0 %v9967_v59  ;;  %1149 = vmatpush2.msra.mxu1 %v9968_v63 }
 0x184   :  { %1079 = vmatprep.subr.mxu0 %v9969_v2  ;;  %1150 = vmatprep.subr.mxu1 %v9970_v0  ;;  %v597_v2 = vld [vmem:[#allocation3 + $0x2] sm:$0x3] }
 0x185   :  { %1080 = vmatpush2.msra.mxu0 %v9971_v56  ;;  %1151 = vmatpush2.msra.mxu1 %v9972_v55 }
 0x186   :  { %1081 = vmatprep.subr.mxu0 %v9973_v58  ;;  %1152 = vmatprep.subr.mxu1 %v9974_v61 }
 0x187   :  { %1082 = vmatpush2.msra.mxu0 %v9975_v60  ;;  %1153 = vmatpush2.msra.mxu1 %v9976_v62 }
 0x188   :  { %1083 = vmatprep.subr.mxu0 %v9977_v49  ;;  %1154 = vmatprep.subr.mxu1 %v9978_v54 }
 0x189   :  { %1084 = vmatpush2.msra.mxu0 %v9979_v57  ;;  %1155 = vmatpush2.msra.mxu1 %v9980_v53  ;;  %v10005_v57 = vld [vmem:[#allocation158_spill] sm:$0xff] }
 0x18a   :  { %1085 = vmatprep.subr.mxu0 %v9981_v1  ;;  %1156 = vmatprep.subr.mxu1 %v9982_v3 }
 0x18b   :  { %1086 = vmatpush2.msra.mxu0 %v9983_v4  ;;  %1157 = vmatpush2.msra.mxu1 %v9984_v5  ;;  %v4715_v4 = vld [vmem:[%s9092_s0 + $0x8] sm:$0xff] }
 0x18c   :  { %1087 = vmatprep.subr.mxu0 %v9985_v6  ;;  %1158 = vmatprep.subr.mxu1 %v9986_v7 }
 0x18d   :  { %1088 = vmatpush2.msra.mxu0 %v9987_v8  ;;  %1159 = vmatpush2.msra.mxu1 %v9988_v9 }
 0x18e   :  { %1089 = vmatprep.subr.mxu0 %v9989_v10  ;;  %1160 = vmatprep.subr.mxu1 %v9990_v11 }
 0x18f   :  { %1090 = vmatpush2.msra.mxu0 %v9991_v12  ;;  %1161 = vmatpush2.msra.mxu1 %v9992_v13 }
 0x190   :  { %1091 = vmatprep.subr.mxu0 %v9993_v14  ;;  %1162 = vmatprep.subr.mxu1 %v9994_v15 }
 0x191   :  { %1092 = vmatpush2.msra.mxu0 %v9995_v16  ;;  %1163 = vmatpush2.msra.mxu1 %v9996_v17 }
 0x192   :  { %1093 = vmatprep.subr.mxu0 %v9997_v19  ;;  %1164 = vmatprep.subr.mxu1 %v9998_v20  ;;  %v859_v19 = vld [vmem:[#allocation3] sm:$0x3] }
 0x193   :  { %1094 = vmatpush2.msra.mxu0 %v9999_v21  ;;  %1165 = vmatpush2.msra.mxu1 %v10000_v22 }
 0x194   :  { %1271 = vmatprep.subr.mxu0 %v6066_v23  ;;  %1342 = vmatprep.subr.mxu1 %v6071_v24 }
 0x1f2   :  { %v520_v31 = vpop.f32.mrf.mxu0  ;;  %v591_v39 = vpop.f32.mrf.mxu1 }
 0x1f3   :  { %v521_v32 = vadd.f32 %v520_v31, %v437_v29  ;;  %v592_v41 = vadd.f32 %v591_v39, %v445_v38  ;;  %v6110_v31 = vld [vmem:[%s9093_s1 + $0x1f0] sm:$0xff]  ;;  %v6142_v38 = vld [vmem:[%s9093_s1 + $0x1b8] sm:$0xff]  ;;  %v6149_v39 = vld [vmem:[%s9093_s1 + $0x1a0] sm:$0xff] }
 0x1f4   :  { %v522_v33 = vpop.f32.mrf.mxu0  ;;  %v593_v43 = vpop.f32.mrf.mxu1 }
 0x1f5   :  { %v4712_v34 = vmul.f32 -1.442695, %v521_v32  ;;  %v523_v35 = vadd.f32 %v522_v33, %v441_v30  ;;  %v4714_v44 = vmul.f32 -1.442695, %v592_v41  ;;  %v594_v46 = vadd.f32 %v593_v43, %v449_v42  ;;  %v6105_v30 = vld [vmem:[%s9093_s1 + $0x1e0] sm:$0xff]  ;;  %v6115_v32 = vld [vmem:[%s9093_s1 + $0x1c8] sm:$0xff] }
 0x1f6   :  { %v6120_v33 = vld [vmem:[%s9093_s1 + $0x1d8] sm:$0xff]  ;;  %v6154_v41 = vld [vmem:[%s9093_s1 + $0x1b0] sm:$0xff]  ;;  %v6161_v42 = vld [vmem:[%s9093_s1 + $0x188] sm:$0xff] }
 0x1f7   :  { %4773 = vpow2.f32 %v4712_v34  ;;  %v4713_v37 = vmul.f32 -1.442695, %v523_v35  ;;  %v6125_v34 = vld [vmem:[%s9093_s1 + $0x1c0] sm:$0xff]  ;;  %v6130_v35 = vld [vmem:[%s9093_s1 + $0x1d0] sm:$0xff]  ;;  %v6166_v43 = vld [vmem:[%s9093_s1 + $0x198] sm:$0xff] }
 0x1f9   :  { %4775 = vpow2.f32 %v4713_v37  ;;  %v6137_v37 = vld [vmem:[%s9093_s1 + $0x1a8] sm:$0xff] }
 0x1fa   :  { %4777 = vpow2.f32 %v4714_v44  ;;  %v6173_v44 = vld [vmem:[%s9093_s1 + $0x180] sm:$0xff] }
 0x204   :  { %v4774_v45 = vpop.eup %4773 }
 0x205   :  { %v607_v47 = vadd.f32 1.0, %v4774_v45  ;;  %v6178_v45 = vld [vmem:[%s9093_s1 + $0x190] sm:$0xff] }
 0x206   :  { %v4776_v48 = vpop.eup %4775 }
 0x207   :  { %4779 = vrcp.f32 %v607_v47  ;;  %v608_v50 = vadd.f32 1.0, %v4776_v48  ;;  %v4778_v51 = vpop.eup %4777  ;;  %v6190_v47 = vld [vmem:[%s9093_s1 + $0x178] sm:$0xff]  ;;  %v6197_v48 = vld [vmem:[%s9093_s1 + $0x160] sm:$0xff] }
 0x208   :  { %4781 = vtanh.f32 %v594_v46  ;;  %v609_v61 = vadd.f32 1.0, %v4778_v51  ;;  %v6185_v46 = vld [vmem:[%s9093_s1 + $0x168] sm:$0xff] }
 0x209   :  { %4783 = vrcp.f32 %v608_v50  ;;  %v6202_v50 = vld [vmem:[%s9093_s1 + $0x170] sm:$0xff]  ;;  %v6209_v51 = vld [vmem:[%s9093_s1 + $0x148] sm:$0xff] }
 0x20a   :  { %4785 = vrcp.f32 %v609_v61  ;;  %v6262_v61 = vld [vmem:[%s9093_s1 + $0x118] sm:$0xff] }
 0x213   :  { %v760_v52 = vpop.f32.mrf.mxu0  ;;  %v831_v59 = vpop.f32.mrf.mxu1 }
 0x214   :  { %v4780_v63 = vpop.eup %4779 }
 0x215   :  { %v4782_v0 = vpop.eup %4781  ;;  %v762_v56 = vpop.f32.mrf.mxu0 }
 0x216   :  { %v833_v55 = vpop.f32.mrf.mxu1  ;;  %v4784_v58 = vpop.eup %4783  ;;  %v840_v60 = vcombine.low %v760_v52, %v762_v56  ;;  %v618_v54 = vmul.f32 %v4782_v0, %v4780_v63  ;;  %v6214_v52 = vld [vmem:[%s9093_s1 + $0x158] sm:$0xff]  ;;  %v6226_v63 = vld [vmem:[%s9093_s1 + $0x150] sm:$0xff]  ;;  %v6245_v56 = vld [vmem:[%s9093_s1 + $0x120] sm:$0xff] }
 0x217   :  { %v841_v62 = vcombine.low %v831_v59, %v833_v55  ;;  %v617_v49 = vmul.f32 %v4784_v58, %v597_v2  ;;  %v4786_v8 = vpop.eup %4785  ;;  %v6221_v59 = vld [vmem:[%s9093_s1 + $0x140] sm:$0xff]  ;;  %v6233_v2 = vld [vmem:[%s9093_s1 + $0x128] sm:$0xff]  ;;  %v6238_v0 = vld [vmem:[%s9093_s1 + $0x138] sm:$0xff] }
 0x218   :  { %v848_v53 = vrot.slane %v840_v60, %v10005_v57  ;;  %v6250_v55 = vld [vmem:[%s9093_s1 + $0x130] sm:$0xff]  ;;  %v6257_v58 = vld [vmem:[%s9093_s1 + $0x108] sm:$0xff]  ;;  %v6269_v60 = vld [vmem:[%s9093_s1 + $0x100] sm:$0xff] }
 0x219   :  { %v855_v1 = vrot.slane %v841_v62, %v10005_v57  ;;  %v619_v3 = vadd.f32 %v618_v54, %v617_v49  ;;  %v6274_v62 = vld [vmem:[%s9093_s1 + $0x110] sm:$0xff]  ;;  %v6281_v49 = vld [vmem:[%s9093_s1 + $0xe8] sm:$0xff]  ;;  %v6286_v54 = vld [vmem:[%s9093_s1 + $0xf8] sm:$0xff] }
 0x21b   :  { %v856_v5 = vcombine.low %v848_v53, %v855_v1  ;;  %4787 = vtanh.f32 %v619_v3  ;;  %625 = vst [vmem:[#allocation3 + $0x2] sm:$0x3] %v619_v3  ;;  %v6293_v53 = vld [vmem:[%s9093_s1 + $0xe0] sm:$0xff]  ;;  %v6298_v1 = vld [vmem:[%s9093_s1 + $0xf0] sm:$0xff]  ;;  %v6305_v3 = vld [vmem:[%s9093_s1 + $0xc8] sm:$0xff] }
 0x21d   :  { %v858_v6 = vadd.f32 %v4715_v4, %v856_v5  ;;  %v6310_v4 = vld [vmem:[%s9093_s1 + $0xd8] sm:$0xff]  ;;  %v6317_v5 = vld [vmem:[%s9093_s1 + $0xc0] sm:$0xff] }
 0x21f   :  { %v4716_v7 = vmul.f32 -1.442695, %v858_v6  ;;  %v867_v13 = vrot.slane %v858_v6, 6  ;;  %v6322_v6 = vld [vmem:[%s9093_s1 + $0xd0] sm:$0xff] }
 0x221   :  { %4789 = vpow2.f32 %v4716_v7  ;;  %v6329_v7 = vld [vmem:[%s9093_s1 + $0xa8] sm:$0xff] }
 0x228   :  { %v4788_v9 = vpop.eup %4787 }
 0x229   :  { %v621_v10 = vmul.f32 %v4788_v9, %v4786_v8  ;;  %v6334_v8 = vld [vmem:[%s9093_s1 + $0xb8] sm:$0xff]  ;;  %v6341_v9 = vld [vmem:[%s9093_s1 + $0xa0] sm:$0xff] }
 0x22b   :  { %624 = vst [vmem:[#allocation2 + $0x2] sm:$0x3] %v621_v10  ;;  %626 = vst [vmem:[%s9098_s6] sm:$0x3] %v621_v10  ;;  %v6346_v10 = vld [vmem:[%s9093_s1 + $0xb0] sm:$0xff] }
 0x22e   :  { %v4790_v11 = vpop.eup %4789 }
 0x22f   :  { %v863_v12 = vadd.f32 1.0, %v4790_v11  ;;  %v6353_v11 = vld [vmem:[%s9093_s1 + $0x88] sm:$0xff] }
 0x230   :  { %10006 = vst [vmem:[#allocation16_spill] sm:$0xff] %v6353_v11 }
 0x231   :  { %4791 = vrcp.f32 %v863_v12  ;;  %v6358_v12 = vld [vmem:[%s9093_s1 + $0x98] sm:$0xff] }
 0x232   :  { %4793 = vtanh.f32 %v867_v13  ;;  %v880_v14 = vld [vmem:[#allocation2 + $0x2] sm:$0x3]  ;;  %10007 = vst [vmem:[#allocation17_spill] sm:$0xff] %v6358_v12 }
 0x233   :  { %1095 = vmatprep.mubr.f32.mxu0 %v880_v14  ;;  %1166 = vmatprep.mubr.f32.mxu1 %v880_v14  ;;  %v6365_v13 = vld [vmem:[%s9093_s1 + $0x80] sm:$0xff]  ;;  %v6370_v14 = vld [vmem:[%s9093_s1 + $0x90] sm:$0xff] }
 0x234   :  { %10008 = vst [vmem:[#allocation18_spill] sm:$0xff] %v6365_v13  ;;  %10009 = vst [vmem:[#allocation19_spill] sm:$0xff] %v6370_v14 }
 0x23e   :  { %v4792_v15 = vpop.eup %4791 }
 0x23f   :  { %v871_v16 = vrot.slane %v4792_v15, 2  ;;  %v4794_v17 = vpop.eup %4793  ;;  %v877_v25 = vrot.slane %v4792_v15, 4 }
 0x240   :  { %v874_v20 = vmul.f32 %v4794_v17, %v4792_v15  ;;  %v6377_v15 = vld [vmem:[%s9093_s1 + $0x68] sm:$0xff]  ;;  %v6389_v17 = vld [vmem:[%s9093_s1 + $0x60] sm:$0xff] }
 0x241   :  { %v873_v21 = vmul.f32 %v871_v16, %v859_v19  ;;  %10010 = vst [vmem:[#allocation20_spill] sm:$0xff] %v6377_v15  ;;  %v6382_v16 = vld [vmem:[%s9093_s1 + $0x78] sm:$0xff]  ;;  %10012 = vst [vmem:[#allocation22_spill] sm:$0xff] %v6389_v17  ;;  %v6394_v19 = vld [vmem:[%s9093_s1 + $0x70] sm:$0xff] }
 0x242   :  { %10011 = vst [vmem:[#allocation21_spill] sm:$0xff] %v6382_v16  ;;  %10013 = vst [vmem:[#allocation23_spill] sm:$0xff] %v6394_v19 }
 0x243   :  { %v875_v22 = vadd.f32 %v874_v20, %v873_v21  ;;  %v6401_v20 = vld [vmem:[%s9093_s1 + $0x48] sm:$0xff]  ;;  %v6406_v21 = vld [vmem:[%s9093_s1 + $0x58] sm:$0xff] }
 0x244   :  { %10014 = vst [vmem:[#allocation24_spill] sm:$0xff] %v6401_v20  ;;  %10015 = vst [vmem:[#allocation25_spill] sm:$0xff] %v6406_v21 }
 0x245   :  { %4795 = vtanh.f32 %v875_v22  ;;  %1199 = vst [vmem:[#allocation3] sm:$0x3] %v875_v22  ;;  %v6413_v22 = vld [vmem:[%s9093_s1 + $0x40] sm:$0xff] }
 0x246   :  { %10016 = vst [vmem:[#allocation26_spill] sm:$0xff] %v6413_v22 }
 0x252   :  { %v4796_v27 = vpop.eup %4795 }
 0x253   :  { %v879_v29 = vmul.f32 %v4796_v27, %v877_v25  ;;  %v6418_v25 = vld [vmem:[%s9093_s1 + $0x50] sm:$0xff]  ;;  %v6425_v27 = vld [vmem:[%s9093_s1 + $0x28] sm:$0xff] }
 0x254   :  { %10017 = vst [vmem:[#allocation27_spill] sm:$0xff] %v6418_v25  ;;  %10018 = vst [vmem:[#allocation28_spill] sm:$0xff] %v6425_v27 }
 0x255   :  { %1096 = vmatmul.mubr.f32.vlgmr.msra.gmra.mxu0 %v879_v29  ;;  %1198 = vst [vmem:[#allocation2] sm:$0x3] %v879_v29  ;;  %1167 = vmatmul.mubr.f32.vlgmr.msra.gmra.mxu1 %v879_v29  ;;  %v6430_v29 = vld [vmem:[%s9093_s1 + $0x38] sm:$0xff] }
 0x256   :  { %1272 = vmatpush1.msra.mxu0 %v6105_v30  ;;  %1343 = vmatpush1.msra.mxu1 %v6110_v31  ;;  %10019 = vst [vmem:[#allocation29_spill] sm:$0xff] %v6430_v29 }
 0x257   :  { %1273 = vmatprep.subr.mxu0 %v6115_v32  ;;  %1344 = vmatprep.subr.mxu1 %v6120_v33 }
 0x258   :  { %1274 = vmatpush1.msra.mxu0 %v6125_v34  ;;  %1345 = vmatpush1.msra.mxu1 %v6130_v35 }
 0x259   :  { %1275 = vmatprep.subr.mxu0 %v6137_v37  ;;  %1346 = vmatprep.subr.mxu1 %v6142_v38 }
 0x25a   :  { %1276 = vmatpush1.msra.mxu0 %v6149_v39  ;;  %1347 = vmatpush1.msra.mxu1 %v6154_v41 }
 0x25b   :  { %1277 = vmatprep.subr.mxu0 %v6161_v42  ;;  %1348 = vmatprep.subr.mxu1 %v6166_v43 }
 0x25c   :  { %1278 = vmatpush1.msra.mxu0 %v6173_v44  ;;  %1349 = vmatpush1.msra.mxu1 %v6178_v45 }
 0x25d   :  { %1279 = vmatprep.subr.mxu0 %v6185_v46  ;;  %1350 = vmatprep.subr.mxu1 %v6190_v47 }
 0x25e   :  { %1280 = vmatpush1.msra.mxu0 %v6197_v48  ;;  %1351 = vmatpush1.msra.mxu1 %v6202_v50 }
 0x25f   :  { %1281 = vmatprep.subr.mxu0 %v6209_v51  ;;  %1352 = vmatprep.subr.mxu1 %v6214_v52 }
 0x260   :  { %1282 = vmatpush1.msra.mxu0 %v6221_v59  ;;  %1353 = vmatpush1.msra.mxu1 %v6226_v63 }
 0x261   :  { %1283 = vmatprep.subr.mxu0 %v6233_v2  ;;  %1354 = vmatprep.subr.mxu1 %v6238_v0 }
 0x262   :  { %1284 = vmatpush1.msra.mxu0 %v6245_v56  ;;  %1355 = vmatpush1.msra.mxu1 %v6250_v55 }
 0x263   :  { %1285 = vmatprep.subr.mxu0 %v6257_v58  ;;  %1356 = vmatprep.subr.mxu1 %v6262_v61 }
 0x264   :  { %1286 = vmatpush1.msra.mxu0 %v6269_v60  ;;  %1357 = vmatpush1.msra.mxu1 %v6274_v62 }
 0x265   :  { %1287 = vmatprep.subr.mxu0 %v6281_v49  ;;  %1358 = vmatprep.subr.mxu1 %v6286_v54 }
 0x266   :  { %1288 = vmatpush1.msra.mxu0 %v6293_v53  ;;  %1359 = vmatpush1.msra.mxu1 %v6298_v1 }
 0x267   :  { %1289 = vmatprep.subr.mxu0 %v6305_v3  ;;  %1360 = vmatprep.subr.mxu1 %v6310_v4 }
 0x268   :  { %1290 = vmatpush1.msra.mxu0 %v6317_v5  ;;  %1361 = vmatpush1.msra.mxu1 %v6322_v6 }
 0x269   :  { %1291 = vmatprep.subr.mxu0 %v6329_v7  ;;  %1362 = vmatprep.subr.mxu1 %v6334_v8 }
 0x26a   :  { %1292 = vmatpush1.msra.mxu0 %v6341_v9  ;;  %1363 = vmatpush1.msra.mxu1 %v6346_v10 }
 0x26b   :  { %1293 = vmatprep.subr.mxu0 %v6353_v11  ;;  %1364 = vmatprep.subr.mxu1 %v6358_v12 }
 0x26c   :  { %1294 = vmatpush1.msra.mxu0 %v6365_v13  ;;  %1365 = vmatpush1.msra.mxu1 %v6370_v14 }
 0x26d   :  { %1295 = vmatprep.subr.mxu0 %v6377_v15  ;;  %1366 = vmatprep.subr.mxu1 %v6382_v16  ;;  %v6762_v16 = vld [vmem:[#allocation4 + $0x2f8] sm:$0xff]  ;;  %v6778_v15 = vld [vmem:[#allocation4 + $0x2c0] sm:$0xff] }
 0x26e   :  { %1296 = vmatpush1.msra.mxu0 %v6389_v17  ;;  %1367 = vmatpush1.msra.mxu1 %v6394_v19  ;;  %v6437_v17 = vld [vmem:[%s9093_s1 + $0x20] sm:$0xff]  ;;  %v6442_v19 = vld [vmem:[%s9093_s1 + $0x30] sm:$0xff]  ;;  %10123 = vst [vmem:[#allocation133_spill] sm:$0xff] %v6762_v16  ;;  %10128 = vst [vmem:[#allocation138_spill] sm:$0xff] %v6778_v15 }
 0x26f   :  { %1297 = vmatprep.subr.mxu0 %v6401_v20  ;;  %1368 = vmatprep.subr.mxu1 %v6406_v21  ;;  %10020 = vst [vmem:[#allocation30_spill] sm:$0xff] %v6437_v17  ;;  %10021 = vst [vmem:[#allocation31_spill] sm:$0xff] %v6442_v19  ;;  %v6449_v20 = vld [vmem:[%s9093_s1 + $0x8] sm:$0xff]  ;;  %v6454_v21 = vld [vmem:[%s9093_s1 + $0x18] sm:$0xff] }
 0x270   :  { %1298 = vmatpush1.msra.mxu0 %v6413_v22  ;;  %1369 = vmatpush1.msra.mxu1 %v6418_v25  ;;  %10022 = vst [vmem:[#allocation32_spill] sm:$0xff] %v6449_v20  ;;  %10023 = vst [vmem:[#allocation33_spill] sm:$0xff] %v6454_v21  ;;  %v6461_v22 = vld [vmem:[%s9093_s1] sm:$0xff]  ;;  %v6468_v25 = vld [vmem:[%s9093_s1 + $0x10] sm:$0xff] }
 0x271   :  { %1299 = vmatprep.subr.mxu0 %v6425_v27  ;;  %1370 = vmatprep.subr.mxu1 %v6430_v29  ;;  %10024 = vst [vmem:[#allocation34_spill] sm:$0xff] %v6461_v22  ;;  %10025 = vst [vmem:[#allocation35_spill] sm:$0xff] %v6468_v25  ;;  %v6478_v29 = vld [vmem:[#allocation4 + $0x1f8] sm:$0xff]  ;;  %v6754_v27 = vld [vmem:[#allocation4 + $0x300] sm:$0xff] }
 0x272   :  { %1300 = vmatpush1.msra.mxu0 %v6437_v17  ;;  %1371 = vmatpush1.msra.mxu1 %v6442_v19  ;;  %v1206_v17 = vld [vmem:[#allocation2] sm:$0x3]  ;;  %v6476_v19 = vld [vmem:[#allocation4 + $0x1e8] sm:$0xff]  ;;  %10027 = vst [vmem:[#allocation37_spill] sm:$0xff] %v6478_v29  ;;  %10120 = vst [vmem:[#allocation130_spill] sm:$0xff] %v6754_v27 }
 0x273   :  { %1301 = vmatprep.subr.mxu0 %v6449_v20  ;;  %1372 = vmatprep.subr.mxu1 %v6454_v21  ;;  %10026 = vst [vmem:[#allocation36_spill] sm:$0xff] %v6476_v19  ;;  %v6482_v21 = vld [vmem:[#allocation4 + $0x1e0] sm:$0xff]  ;;  %v6746_v20 = vld [vmem:[#allocation4 + $0x330] sm:$0xff] }
 0x274   :  { %1302 = vmatpush1.msra.mxu0 %v6461_v22  ;;  %1335 = vmatprep.mubr.f32.mxu0 %v9871_v18  ;;  %10028 = vst [vmem:[#allocation38_spill] sm:$0xff] %v6482_v21  ;;  %v6484_v22 = vld [vmem:[#allocation4 + $0x1f0] sm:$0xff]  ;;  %10117 = vst [vmem:[#allocation127_spill] sm:$0xff] %v6746_v20 }
 0x275   :  { %1373 = vmatpush1.msra.mxu1 %v6468_v25  ;;  %1406 = vmatprep.mubr.f32.mxu1 %v9871_v18  ;;  %10029 = vst [vmem:[#allocation39_spill] sm:$0xff] %v6484_v22  ;;  %v6488_v25 = vld [vmem:[#allocation4 + $0x1c8] sm:$0xff]  ;;  %v6490_v18 = vld [vmem:[#allocation4 + $0x1d8] sm:$0xff] }
 0x276   :  { %1336 = vmatmul.mubr.f32.vlgmr.msra.gmra.mxu0 %v1206_v17  ;;  %1407 = vmatmul.mubr.f32.vlgmr.msra.gmra.mxu1 %v1206_v17  ;;  %10030 = vst [vmem:[#allocation40_spill] sm:$0xff] %v6488_v25  ;;  %10031 = vst [vmem:[#allocation41_spill] sm:$0xff] %v6490_v18  ;;  %v6494_v17 = vld [vmem:[#allocation4 + $0x1c0] sm:$0xff] }
 0x277   :  { %1608 = vmatprep.subr.mxu0 %v6476_v19  ;;  %1679 = vmatprep.subr.mxu1 %v6478_v29  ;;  %10032 = vst [vmem:[#allocation42_spill] sm:$0xff] %v6494_v17  ;;  %v6496_v19 = vld [vmem:[#allocation4 + $0x1d0] sm:$0xff]  ;;  %v6500_v29 = vld [vmem:[#allocation4 + $0x1a8] sm:$0xff] }
 0x278   :  { %1609 = vmatpush1.msra.mxu0 %v6482_v21  ;;  %1680 = vmatpush1.msra.mxu1 %v6484_v22  ;;  %10033 = vst [vmem:[#allocation43_spill] sm:$0xff] %v6496_v19  ;;  %10034 = vst [vmem:[#allocation44_spill] sm:$0xff] %v6500_v29  ;;  %v6502_v21 = vld [vmem:[#allocation4 + $0x1b8] sm:$0xff]  ;;  %v6506_v22 = vld [vmem:[#allocation4 + $0x1a0] sm:$0xff] }
 0x279   :  { %1610 = vmatprep.subr.mxu0 %v6488_v25  ;;  %1681 = vmatprep.subr.mxu1 %v6490_v18  ;;  %10035 = vst [vmem:[#allocation45_spill] sm:$0xff] %v6502_v21  ;;  %10036 = vst [vmem:[#allocation46_spill] sm:$0xff] %v6506_v22  ;;  %v6508_v25 = vld [vmem:[#allocation4 + $0x1b0] sm:$0xff]  ;;  %v6512_v18 = vld [vmem:[#allocation4 + $0x188] sm:$0xff] }
 0x27a   :  { %1611 = vmatpush1.msra.mxu0 %v6494_v17  ;;  %1682 = vmatpush1.msra.mxu1 %v6496_v19  ;;  %10037 = vst [vmem:[#allocation47_spill] sm:$0xff] %v6508_v25  ;;  %10038 = vst [vmem:[#allocation48_spill] sm:$0xff] %v6512_v18  ;;  %v6514_v17 = vld [vmem:[#allocation4 + $0x198] sm:$0xff]  ;;  %v6518_v19 = vld [vmem:[#allocation4 + $0x180] sm:$0xff] }
 0x27b   :  { %1612 = vmatprep.subr.mxu0 %v6500_v29  ;;  %1683 = vmatprep.subr.mxu1 %v6502_v21  ;;  %10039 = vst [vmem:[#allocation49_spill] sm:$0xff] %v6514_v17  ;;  %10040 = vst [vmem:[#allocation50_spill] sm:$0xff] %v6518_v19  ;;  %v6520_v29 = vld [vmem:[#allocation4 + $0x190] sm:$0xff]  ;;  %v6524_v21 = vld [vmem:[#allocation4 + $0x168] sm:$0xff] }
 0x27c   :  { %1613 = vmatpush1.msra.mxu0 %v6506_v22  ;;  %1684 = vmatpush1.msra.mxu1 %v6508_v25  ;;  %10041 = vst [vmem:[#allocation51_spill] sm:$0xff] %v6520_v29  ;;  %10042 = vst [vmem:[#allocation52_spill] sm:$0xff] %v6524_v21  ;;  %v6526_v22 = vld [vmem:[#allocation4 + $0x178] sm:$0xff]  ;;  %v6530_v25 = vld [vmem:[#allocation4 + $0x160] sm:$0xff] }
 0x27d   :  { %1614 = vmatprep.subr.mxu0 %v6512_v18  ;;  %1685 = vmatprep.subr.mxu1 %v6514_v17  ;;  %10043 = vst [vmem:[#allocation53_spill] sm:$0xff] %v6526_v22  ;;  %10044 = vst [vmem:[#allocation54_spill] sm:$0xff] %v6530_v25  ;;  %v6532_v18 = vld [vmem:[#allocation4 + $0x170] sm:$0xff]  ;;  %v6536_v17 = vld [vmem:[#allocation4 + $0x148] sm:$0xff] }
 0x27e   :  { %1615 = vmatpush1.msra.mxu0 %v6518_v19  ;;  %1686 = vmatpush1.msra.mxu1 %v6520_v29  ;;  %10045 = vst [vmem:[#allocation55_spill] sm:$0xff] %v6532_v18  ;;  %10046 = vst [vmem:[#allocation56_spill] sm:$0xff] %v6536_v17  ;;  %v6538_v19 = vld [vmem:[#allocation4 + $0x158] sm:$0xff]  ;;  %v6542_v29 = vld [vmem:[#allocation4 + $0x140] sm:$0xff] }
 0x27f   :  { %1616 = vmatprep.subr.mxu0 %v6524_v21  ;;  %1687 = vmatprep.subr.mxu1 %v6526_v22  ;;  %10047 = vst [vmem:[#allocation57_spill] sm:$0xff] %v6538_v19  ;;  %10048 = vst [vmem:[#allocation58_spill] sm:$0xff] %v6542_v29  ;;  %v6544_v21 = vld [vmem:[#allocation4 + $0x150] sm:$0xff]  ;;  %v6548_v22 = vld [vmem:[#allocation4 + $0x128] sm:$0xff] }
 0x280   :  { %1617 = vmatpush1.msra.mxu0 %v6530_v25  ;;  %1688 = vmatpush1.msra.mxu1 %v6532_v18  ;;  %10049 = vst [vmem:[#allocation59_spill] sm:$0xff] %v6544_v21  ;;  %10050 = vst [vmem:[#allocation60_spill] sm:$0xff] %v6548_v22  ;;  %v6550_v25 = vld [vmem:[#allocation4 + $0x138] sm:$0xff]  ;;  %v6554_v18 = vld [vmem:[#allocation4 + $0x120] sm:$0xff] }
 0x281   :  { %1618 = vmatprep.subr.mxu0 %v6536_v17  ;;  %1689 = vmatprep.subr.mxu1 %v6538_v19  ;;  %10051 = vst [vmem:[#allocation61_spill] sm:$0xff] %v6550_v25  ;;  %10052 = vst [vmem:[#allocation62_spill] sm:$0xff] %v6554_v18  ;;  %v6556_v17 = vld [vmem:[#allocation4 + $0x130] sm:$0xff]  ;;  %v6560_v19 = vld [vmem:[#allocation4 + $0x108] sm:$0xff] }
 0x282   :  { %1619 = vmatpush1.msra.mxu0 %v6542_v29  ;;  %1690 = vmatpush1.msra.mxu1 %v6544_v21  ;;  %10053 = vst [vmem:[#allocation63_spill] sm:$0xff] %v6556_v17  ;;  %10054 = vst [vmem:[#allocation64_spill] sm:$0xff] %v6560_v19  ;;  %v6562_v29 = vld [vmem:[#allocation4 + $0x118] sm:$0xff]  ;;  %v6566_v21 = vld [vmem:[#allocation4 + $0x100] sm:$0xff] }
 0x283   :  { %1620 = vmatprep.subr.mxu0 %v6548_v22  ;;  %1691 = vmatprep.subr.mxu1 %v6550_v25  ;;  %10055 = vst [vmem:[#allocation65_spill] sm:$0xff] %v6562_v29  ;;  %10056 = vst [vmem:[#allocation66_spill] sm:$0xff] %v6566_v21  ;;  %v6568_v22 = vld [vmem:[#allocation4 + $0x110] sm:$0xff]  ;;  %v6572_v25 = vld [vmem:[#allocation4 + $0xe8] sm:$0xff] }
 0x284   :  { %1621 = vmatpush1.msra.mxu0 %v6554_v18  ;;  %1692 = vmatpush1.msra.mxu1 %v6556_v17  ;;  %10057 = vst [vmem:[#allocation67_spill] sm:$0xff] %v6568_v22  ;;  %10058 = vst [vmem:[#allocation68_spill] sm:$0xff] %v6572_v25  ;;  %v6574_v18 = vld [vmem:[#allocation4 + $0xf8] sm:$0xff]  ;;  %v6578_v17 = vld [vmem:[#allocation4 + $0xe0] sm:$0xff] }
 0x285   :  { %1622 = vmatprep.subr.mxu0 %v6560_v19  ;;  %1693 = vmatprep.subr.mxu1 %v6562_v29  ;;  %10059 = vst [vmem:[#allocation69_spill] sm:$0xff] %v6574_v18  ;;  %10060 = vst [vmem:[#allocation70_spill] sm:$0xff] %v6578_v17  ;;  %v6580_v19 = vld [vmem:[#allocation4 + $0xf0] sm:$0xff]  ;;  %v6584_v29 = vld [vmem:[#allocation4 + $0xc8] sm:$0xff] }
 0x286   :  { %1623 = vmatpush1.msra.mxu0 %v6566_v21  ;;  %1694 = vmatpush1.msra.mxu1 %v6568_v22  ;;  %10061 = vst [vmem:[#allocation71_spill] sm:$0xff] %v6580_v19  ;;  %10062 = vst [vmem:[#allocation72_spill] sm:$0xff] %v6584_v29  ;;  %v6586_v21 = vld [vmem:[#allocation4 + $0xd8] sm:$0xff]  ;;  %v6590_v22 = vld [vmem:[#allocation4 + $0xc0] sm:$0xff] }
 0x287   :  { %1624 = vmatprep.subr.mxu0 %v6572_v25  ;;  %1695 = vmatprep.subr.mxu1 %v6574_v18  ;;  %10063 = vst [vmem:[#allocation73_spill] sm:$0xff] %v6586_v21  ;;  %10064 = vst [vmem:[#allocation74_spill] sm:$0xff] %v6590_v22  ;;  %v6592_v25 = vld [vmem:[#allocation4 + $0xd0] sm:$0xff]  ;;  %v6596_v18 = vld [vmem:[#allocation4 + $0xa8] sm:$0xff] }
 0x288   :  { %1625 = vmatpush1.msra.mxu0 %v6578_v17  ;;  %1696 = vmatpush1.msra.mxu1 %v6580_v19  ;;  %10065 = vst [vmem:[#allocation75_spill] sm:$0xff] %v6592_v25  ;;  %10066 = vst [vmem:[#allocation76_spill] sm:$0xff] %v6596_v18  ;;  %v6598_v17 = vld [vmem:[#allocation4 + $0xb8] sm:$0xff]  ;;  %v6602_v19 = vld [vmem:[#allocation4 + $0xa0] sm:$0xff] }
 0x289   :  { %1626 = vmatprep.subr.mxu0 %v6584_v29  ;;  %1697 = vmatprep.subr.mxu1 %v6586_v21  ;;  %10067 = vst [vmem:[#allocation77_spill] sm:$0xff] %v6598_v17  ;;  %10068 = vst [vmem:[#allocation78_spill] sm:$0xff] %v6602_v19  ;;  %v6604_v29 = vld [vmem:[#allocation4 + $0xb0] sm:$0xff]  ;;  %v6608_v21 = vld [vmem:[#allocation4 + $0x88] sm:$0xff] }
 0x28a   :  { %1627 = vmatpush1.msra.mxu0 %v6590_v22  ;;  %1698 = vmatpush1.msra.mxu1 %v6592_v25  ;;  %10069 = vst [vmem:[#allocation79_spill] sm:$0xff] %v6604_v29  ;;  %10070 = vst [vmem:[#allocation80_spill] sm:$0xff] %v6608_v21  ;;  %v6610_v22 = vld [vmem:[#allocation4 + $0x98] sm:$0xff]  ;;  %v6614_v25 = vld [vmem:[#allocation4 + $0x80] sm:$0xff] }
 0x28b   :  { %1628 = vmatprep.subr.mxu0 %v6596_v18  ;;  %1699 = vmatprep.subr.mxu1 %v6598_v17  ;;  %10071 = vst [vmem:[#allocation81_spill] sm:$0xff] %v6610_v22  ;;  %10072 = vst [vmem:[#allocation82_spill] sm:$0xff] %v6614_v25  ;;  %v6616_v18 = vld [vmem:[#allocation4 + $0x90] sm:$0xff]  ;;  %v6620_v17 = vld [vmem:[#allocation4 + $0x68] sm:$0xff] }
 0x28c   :  { %1629 = vmatpush1.msra.mxu0 %v6602_v19  ;;  %1700 = vmatpush1.msra.mxu1 %v6604_v29  ;;  %10073 = vst [vmem:[#allocation83_spill] sm:$0xff] %v6616_v18  ;;  %10074 = vst [vmem:[#allocation84_spill] sm:$0xff] %v6620_v17  ;;  %v6622_v19 = vld [vmem:[#allocation4 + $0x78] sm:$0xff]  ;;  %v6626_v29 = vld [vmem:[#allocation4 + $0x60] sm:$0xff] }
 0x28d   :  { %1630 = vmatprep.subr.mxu0 %v6608_v21  ;;  %1701 = vmatprep.subr.mxu1 %v6610_v22  ;;  %10075 = vst [vmem:[#allocation85_spill] sm:$0xff] %v6622_v19  ;;  %10076 = vst [vmem:[#allocation86_spill] sm:$0xff] %v6626_v29  ;;  %v6628_v21 = vld [vmem:[#allocation4 + $0x70] sm:$0xff]  ;;  %v6632_v22 = vld [vmem:[#allocation4 + $0x48] sm:$0xff] }
 0x28e   :  { %1631 = vmatpush1.msra.mxu0 %v6614_v25  ;;  %1702 = vmatpush1.msra.mxu1 %v6616_v18  ;;  %10077 = vst [vmem:[#allocation87_spill] sm:$0xff] %v6628_v21  ;;  %10078 = vst [vmem:[#allocation88_spill] sm:$0xff] %v6632_v22  ;;  %v6634_v25 = vld [vmem:[#allocation4 + $0x58] sm:$0xff]  ;;  %v6638_v18 = vld [vmem:[#allocation4 + $0x40] sm:$0xff] }
 0x28f   :  { %1632 = vmatprep.subr.mxu0 %v6620_v17  ;;  %1703 = vmatprep.subr.mxu1 %v6622_v19  ;;  %10079 = vst [vmem:[#allocation89_spill] sm:$0xff] %v6634_v25  ;;  %10080 = vst [vmem:[#allocation90_spill] sm:$0xff] %v6638_v18  ;;  %v6640_v17 = vld [vmem:[#allocation4 + $0x50] sm:$0xff]  ;;  %v6644_v19 = vld [vmem:[#allocation4 + $0x28] sm:$0xff] }
 0x290   :  { %1633 = vmatpush1.msra.mxu0 %v6626_v29  ;;  %1704 = vmatpush1.msra.mxu1 %v6628_v21  ;;  %10081 = vst [vmem:[#allocation91_spill] sm:$0xff] %v6640_v17  ;;  %10082 = vst [vmem:[#allocation92_spill] sm:$0xff] %v6644_v19  ;;  %v6646_v29 = vld [vmem:[#allocation4 + $0x38] sm:$0xff]  ;;  %v6650_v21 = vld [vmem:[#allocation4 + $0x20] sm:$0xff] }
 0x291   :  { %1634 = vmatprep.subr.mxu0 %v6632_v22  ;;  %1705 = vmatprep.subr.mxu1 %v6634_v25  ;;  %10083 = vst [vmem:[#allocation93_spill] sm:$0xff] %v6646_v29  ;;  %10084 = vst [vmem:[#allocation94_spill] sm:$0xff] %v6650_v21  ;;  %v6652_v22 = vld [vmem:[#allocation4 + $0x30] sm:$0xff]  ;;  %v6656_v25 = vld [vmem:[#allocation4 + $0x8] sm:$0xff] }
 0x292   :  { %1635 = vmatpush1.msra.mxu0 %v6638_v18  ;;  %1706 = vmatpush1.msra.mxu1 %v6640_v17  ;;  %10085 = vst [vmem:[#allocation95_spill] sm:$0xff] %v6652_v22  ;;  %10086 = vst [vmem:[#allocation96_spill] sm:$0xff] %v6656_v25  ;;  %v6658_v18 = vld [vmem:[#allocation4 + $0x18] sm:$0xff]  ;;  %v6662_v17 = vld [vmem:[#allocation4] sm:$0xff] }
 0x293   :  { %1636 = vmatprep.subr.mxu0 %v6644_v19  ;;  %1707 = vmatprep.subr.mxu1 %v6646_v29  ;;  %10087 = vst [vmem:[#allocation97_spill] sm:$0xff] %v6658_v18  ;;  %10088 = vst [vmem:[#allocation98_spill] sm:$0xff] %v6662_v17  ;;  %v6664_v19 = vld [vmem:[#allocation4 + $0x10] sm:$0xff]  ;;  %v6668_v29 = vld [vmem:[#allocation4 + $0x3e8] sm:$0xff] }
 0x294   :  { %1637 = vmatpush1.msra.mxu0 %v6650_v21  ;;  %1708 = vmatpush1.msra.mxu1 %v6652_v22  ;;  %10089 = vst [vmem:[#allocation99_spill] sm:$0xff] %v6664_v19  ;;  %10090 = vst [vmem:[#allocation100_spill] sm:$0xff] %v6668_v29  ;;  %v6670_v21 = vld [vmem:[#allocation4 + $0x3f8] sm:$0xff]  ;;  %v6674_v22 = vld [vmem:[#allocation4 + $0x3e0] sm:$0xff] }
 0x295   :  { %1638 = vmatprep.subr.mxu0 %v6656_v25  ;;  %1709 = vmatprep.subr.mxu1 %v6658_v18  ;;  %10091 = vst [vmem:[#allocation101_spill] sm:$0xff] %v6670_v21  ;;  %10092 = vst [vmem:[#allocation102_spill] sm:$0xff] %v6674_v22  ;;  %v6676_v25 = vld [vmem:[#allocation4 + $0x3f0] sm:$0xff]  ;;  %v6680_v18 = vld [vmem:[#allocation4 + $0x3c8] sm:$0xff] }
 0x296   :  { %1639 = vmatpush1.msra.mxu0 %v6662_v17  ;;  %1710 = vmatpush1.msra.mxu1 %v6664_v19  ;;  %10093 = vst [vmem:[#allocation103_spill] sm:$0xff] %v6676_v25  ;;  %10094 = vst [vmem:[#allocation104_spill] sm:$0xff] %v6680_v18  ;;  %v6682_v17 = vld [vmem:[#allocation4 + $0x3d8] sm:$0xff]  ;;  %v6686_v19 = vld [vmem:[#allocation4 + $0x3c0] sm:$0xff] }
 0x297   :  { %1640 = vmatprep.subr.mxu0 %v6668_v29  ;;  %1711 = vmatprep.subr.mxu1 %v6670_v21  ;;  %10095 = vst [vmem:[#allocation105_spill] sm:$0xff] %v6682_v17  ;;  %10096 = vst [vmem:[#allocation106_spill] sm:$0xff] %v6686_v19  ;;  %v6688_v29 = vld [vmem:[#allocation4 + $0x3d0] sm:$0xff]  ;;  %v6692_v21 = vld [vmem:[#allocation4 + $0x3a8] sm:$0xff] }
 0x298   :  { %1641 = vmatpush2.msra.mxu0 %v6674_v22  ;;  %1712 = vmatpush2.msra.mxu1 %v6676_v25  ;;  %10097 = vst [vmem:[#allocation107_spill] sm:$0xff] %v6688_v29  ;;  %10098 = vst [vmem:[#allocation108_spill] sm:$0xff] %v6692_v21  ;;  %v6694_v22 = vld [vmem:[#allocation4 + $0x3b8] sm:$0xff]  ;;  %v6698_v25 = vld [vmem:[#allocation4 + $0x3a0] sm:$0xff] }
 0x299   :  { %1642 = vmatprep.subr.mxu0 %v6680_v18  ;;  %1713 = vmatprep.subr.mxu1 %v6682_v17  ;;  %10099 = vst [vmem:[#allocation109_spill] sm:$0xff] %v6694_v22  ;;  %10100 = vst [vmem:[#allocation110_spill] sm:$0xff] %v6698_v25  ;;  %v6700_v18 = vld [vmem:[#allocation4 + $0x3b0] sm:$0xff]  ;;  %v6704_v17 = vld [vmem:[#allocation4 + $0x388] sm:$0xff] }
 0x29a   :  { %1643 = vmatpush2.msra.mxu0 %v6686_v19  ;;  %1714 = vmatpush2.msra.mxu1 %v6688_v29  ;;  %10101 = vst [vmem:[#allocation111_spill] sm:$0xff] %v6700_v18  ;;  %10102 = vst [vmem:[#allocation112_spill] sm:$0xff] %v6704_v17  ;;  %v6706_v19 = vld [vmem:[#allocation4 + $0x398] sm:$0xff]  ;;  %v6710_v29 = vld [vmem:[#allocation4 + $0x380] sm:$0xff] }
 0x29b   :  { %1644 = vmatprep.subr.mxu0 %v6692_v21  ;;  %1715 = vmatprep.subr.mxu1 %v6694_v22  ;;  %10103 = vst [vmem:[#allocation113_spill] sm:$0xff] %v6706_v19  ;;  %10104 = vst [vmem:[#allocation114_spill] sm:$0xff] %v6710_v29  ;;  %v6712_v21 = vld [vmem:[#allocation4 + $0x390] sm:$0xff]  ;;  %v6716_v22 = vld [vmem:[#allocation4 + $0x368] sm:$0xff] }
 0x29c   :  { %1645 = vmatpush2.msra.mxu0 %v6698_v25  ;;  %1716 = vmatpush2.msra.mxu1 %v6700_v18  ;;  %10105 = vst [vmem:[#allocation115_spill] sm:$0xff] %v6712_v21  ;;  %10106 = vst [vmem:[#allocation116_spill] sm:$0xff] %v6716_v22  ;;  %v6718_v25 = vld [vmem:[#allocation4 + $0x378] sm:$0xff]  ;;  %v6722_v18 = vld [vmem:[#allocation4 + $0x360] sm:$0xff] }
 0x29d   :  { %1646 = vmatprep.subr.mxu0 %v6704_v17  ;;  %1717 = vmatprep.subr.mxu1 %v6706_v19  ;;  %10107 = vst [vmem:[#allocation117_spill] sm:$0xff] %v6718_v25  ;;  %10108 = vst [vmem:[#allocation118_spill] sm:$0xff] %v6722_v18  ;;  %v6724_v17 = vld [vmem:[#allocation4 + $0x370] sm:$0xff]  ;;  %v6728_v19 = vld [vmem:[#allocation4 + $0x348] sm:$0xff] }
 0x29e   :  { %1647 = vmatpush2.msra.mxu0 %v6710_v29  ;;  %1718 = vmatpush2.msra.mxu1 %v6712_v21  ;;  %10109 = vst [vmem:[#allocation119_spill] sm:$0xff] %v6724_v17  ;;  %10110 = vst [vmem:[#allocation120_spill] sm:$0xff] %v6728_v19  ;;  %v6730_v29 = vld [vmem:[#allocation4 + $0x358] sm:$0xff]  ;;  %v6734_v21 = vld [vmem:[#allocation4 + $0x340] sm:$0xff] }
 0x29f   :  { %1648 = vmatprep.subr.mxu0 %v6716_v22  ;;  %1719 = vmatprep.subr.mxu1 %v6718_v25  ;;  %10111 = vst [vmem:[#allocation121_spill] sm:$0xff] %v6730_v29  ;;  %10112 = vst [vmem:[#allocation122_spill] sm:$0xff] %v6734_v21  ;;  %v6736_v22 = vld [vmem:[#allocation4 + $0x350] sm:$0xff]  ;;  %v6738_v25 = vld [vmem:[#allocation4 + $0x328] sm:$0xff] }
 0x2a0   :  { %1649 = vmatpush2.msra.mxu0 %v6722_v18  ;;  %1720 = vmatpush2.msra.mxu1 %v6724_v17  ;;  %10113 = vst [vmem:[#allocation123_spill] sm:$0xff] %v6736_v22  ;;  %10114 = vst [vmem:[#allocation124_spill] sm:$0xff] %v6738_v25  ;;  %v6742_v18 = vld [vmem:[#allocation4 + $0x338] sm:$0xff]  ;;  %v6744_v17 = vld [vmem:[#allocation4 + $0x320] sm:$0xff] }
 0x2a1   :  { %1650 = vmatprep.subr.mxu0 %v6728_v19  ;;  %1721 = vmatprep.subr.mxu1 %v6730_v29  ;;  %10115 = vst [vmem:[#allocation125_spill] sm:$0xff] %v6742_v18  ;;  %10116 = vst [vmem:[#allocation126_spill] sm:$0xff] %v6744_v17  ;;  %v6750_v29 = vld [vmem:[#allocation4 + $0x308] sm:$0xff]  ;;  %v6752_v19 = vld [vmem:[#allocation4 + $0x318] sm:$0xff] }
 0x2a2   :  { %1651 = vmatpush2.msra.mxu0 %v6734_v21  ;;  %1722 = vmatpush2.msra.mxu1 %v6736_v22  ;;  %10118 = vst [vmem:[#allocation128_spill] sm:$0xff] %v6750_v29  ;;  %10119 = vst [vmem:[#allocation129_spill] sm:$0xff] %v6752_v19  ;;  %v6758_v22 = vld [vmem:[#allocation4 + $0x310] sm:$0xff]  ;;  %v6760_v21 = vld [vmem:[#allocation4 + $0x2e8] sm:$0xff] }
 0x2a3   :  { %1652 = vmatprep.subr.mxu0 %v6738_v25  ;;  %1723 = vmatprep.subr.mxu1 %v6742_v18  ;;  %10121 = vst [vmem:[#allocation131_spill] sm:$0xff] %v6758_v22  ;;  %10122 = vst [vmem:[#allocation132_spill] sm:$0xff] %v6760_v21  ;;  %v6766_v18 = vld [vmem:[#allocation4 + $0x2e0] sm:$0xff]  ;;  %v6768_v25 = vld [vmem:[#allocation4 + $0x2f0] sm:$0xff] }
 0x2a4   :  { %1653 = vmatpush2.msra.mxu0 %v6744_v17  ;;  %1724 = vmatpush2.msra.mxu1 %v6746_v20  ;;  %10124 = vst [vmem:[#allocation134_spill] sm:$0xff] %v6766_v18  ;;  %10125 = vst [vmem:[#allocation135_spill] sm:$0xff] %v6768_v25  ;;  %v6772_v17 = vld [vmem:[#allocation4 + $0x2c8] sm:$0xff]  ;;  %v6774_v20 = vld [vmem:[#allocation4 + $0x2d8] sm:$0xff] }
 0x2a5   :  { %1654 = vmatprep.subr.mxu0 %v6750_v29  ;;  %1725 = vmatprep.subr.mxu1 %v6752_v19  ;;  %10126 = vst [vmem:[#allocation136_spill] sm:$0xff] %v6772_v17  ;;  %10127 = vst [vmem:[#allocation137_spill] sm:$0xff] %v6774_v20  ;;  %v6780_v29 = vld [vmem:[#allocation4 + $0x2d0] sm:$0xff]  ;;  %v6784_v19 = vld [vmem:[#allocation4 + $0x2a8] sm:$0xff] }
 0x2a6   :  { %1655 = vmatpush2.msra.mxu0 %v6754_v27  ;;  %1726 = vmatpush2.msra.mxu1 %v6758_v22  ;;  %10129 = vst [vmem:[#allocation139_spill] sm:$0xff] %v6780_v29  ;;  %10130 = vst [vmem:[#allocation140_spill] sm:$0xff] %v6784_v19  ;;  %v6786_v27 = vld [vmem:[#allocation4 + $0x2b8] sm:$0xff]  ;;  %v6790_v22 = vld [vmem:[#allocation4 + $0x2a0] sm:$0xff] }
 0x2a7   :  { %1656 = vmatprep.subr.mxu0 %v6760_v21  ;;  %1727 = vmatprep.subr.mxu1 %v6762_v16  ;;  %10131 = vst [vmem:[#allocation141_spill] sm:$0xff] %v6786_v27  ;;  %10132 = vst [vmem:[#allocation142_spill] sm:$0xff] %v6790_v22  ;;  %v6792_v21 = vld [vmem:[#allocation4 + $0x2b0] sm:$0xff]  ;;  %v6796_v16 = vld [vmem:[#allocation4 + $0x288] sm:$0xff] }
 0x2a8   :  { %1657 = vmatpush2.msra.mxu0 %v6766_v18  ;;  %1728 = vmatpush2.msra.mxu1 %v6768_v25  ;;  %10133 = vst [vmem:[#allocation143_spill] sm:$0xff] %v6792_v21  ;;  %10134 = vst [vmem:[#allocation144_spill] sm:$0xff] %v6796_v16  ;;  %v6798_v18 = vld [vmem:[#allocation4 + $0x298] sm:$0xff]  ;;  %v6802_v25 = vld [vmem:[#allocation4 + $0x280] sm:$0xff] }
 0x2a9   :  { %1658 = vmatprep.subr.mxu0 %v6772_v17  ;;  %1729 = vmatprep.subr.mxu1 %v6774_v20  ;;  %10135 = vst [vmem:[#allocation145_spill] sm:$0xff] %v6798_v18  ;;  %10136 = vst [vmem:[#allocation146_spill] sm:$0xff] %v6802_v25  ;;  %v6804_v17 = vld [vmem:[#allocation4 + $0x290] sm:$0xff]  ;;  %v6808_v20 = vld [vmem:[#allocation4 + $0x268] sm:$0xff] }
 0x2aa   :  { %1659 = vmatpush2.msra.mxu0 %v6778_v15  ;;  %1730 = vmatpush2.msra.mxu1 %v6780_v29  ;;  %10137 = vst [vmem:[#allocation147_spill] sm:$0xff] %v6804_v17  ;;  %10138 = vst [vmem:[#allocation148_spill] sm:$0xff] %v6808_v20  ;;  %v6810_v15 = vld [vmem:[#allocation4 + $0x278] sm:$0xff]  ;;  %v6814_v29 = vld [vmem:[#allocation4 + $0x260] sm:$0xff] }
 0x2ab   :  { %1660 = vmatprep.subr.mxu0 %v6784_v19  ;;  %1731 = vmatprep.subr.mxu1 %v6786_v27  ;;  %10139 = vst [vmem:[#allocation149_spill] sm:$0xff] %v6810_v15  ;;  %10140 = vst [vmem:[#allocation150_spill] sm:$0xff] %v6814_v29  ;;  %v6816_v19 = vld [vmem:[#allocation4 + $0x270] sm:$0xff]  ;;  %v6820_v27 = vld [vmem:[#allocation4 + $0x248] sm:$0xff] }
 0x2ac   :  { %1661 = vmatpush2.msra.mxu0 %v6790_v22  ;;  %1732 = vmatpush2.msra.mxu1 %v6792_v21  ;;  %10141 = vst [vmem:[#allocation151_spill] sm:$0xff] %v6816_v19  ;;  %10142 = vst [vmem:[#allocation152_spill] sm:$0xff] %v6820_v27  ;;  %v6822_v22 = vld [vmem:[#allocation4 + $0x258] sm:$0xff]  ;;  %v6826_v21 = vld [vmem:[#allocation4 + $0x240] sm:$0xff] }
 0x2ad   :  { %1662 = vmatprep.subr.mxu0 %v6796_v16  ;;  %1733 = vmatprep.subr.mxu1 %v6798_v18  ;;  %10143 = vst [vmem:[#allocation153_spill] sm:$0xff] %v6822_v22  ;;  %10144 = vst [vmem:[#allocation154_spill] sm:$0xff] %v6826_v21  ;;  %v6828_v16 = vld [vmem:[#allocation4 + $0x250] sm:$0xff]  ;;  %v6832_v18 = vld [vmem:[#allocation4 + $0x228] sm:$0xff] }
 0x2ae   :  { %1663 = vmatpush2.msra.mxu0 %v6802_v25  ;;  %1734 = vmatpush2.msra.mxu1 %v6804_v17  ;;  %10145 = vst [vmem:[#allocation155_spill] sm:$0xff] %v6828_v16  ;;  %10146 = vst [vmem:[#allocation156_spill] sm:$0xff] %v6832_v18  ;;  %v6834_v25 = vld [vmem:[#allocation4 + $0x238] sm:$0xff]  ;;  %v6838_v17 = vld [vmem:[#allocation4 + $0x220] sm:$0xff] }
 0x2af   :  { %1664 = vmatprep.subr.mxu0 %v6808_v20  ;;  %1735 = vmatprep.subr.mxu1 %v6810_v15  ;;  %10147 = vst [vmem:[#allocation157_spill] sm:$0xff] %v6834_v25  ;;  %10148 = vst [vmem:[#allocation158_spill] sm:$0xff] %v6838_v17  ;;  %v6840_v20 = vld [vmem:[#allocation4 + $0x230] sm:$0xff]  ;;  %v6844_v15 = vld [vmem:[#allocation4 + $0x208] sm:$0xff] }
 0x2b0   :  { %1665 = vmatpush2.msra.mxu0 %v6814_v29  ;;  %1736 = vmatpush2.msra.mxu1 %v6816_v19  ;;  %10149 = vst [vmem:[#allocation159_spill] sm:$0xff] %v6840_v20  ;;  %10150 = vst [vmem:[#allocation160_spill] sm:$0xff] %v6844_v15  ;;  %v6846_v29 = vld [vmem:[#allocation4 + $0x218] sm:$0xff]  ;;  %v6850_v19 = vld [vmem:[#allocation4 + $0x200] sm:$0xff] }
 0x2b1   :  { %1666 = vmatprep.subr.mxu0 %v6820_v27  ;;  %1737 = vmatprep.subr.mxu1 %v6822_v22  ;;  %10151 = vst [vmem:[#allocation161_spill] sm:$0xff] %v6846_v29  ;;  %10152 = vst [vmem:[#allocation162_spill] sm:$0xff] %v6850_v19  ;;  %v6852_v27 = vld [vmem:[#allocation4 + $0x210] sm:$0xff] }
 0x2b2   :  { %1667 = vmatpush2.msra.mxu0 %v6826_v21  ;;  %1738 = vmatpush2.msra.mxu1 %v6828_v16  ;;  %10153 = vst [vmem:[#allocation163_spill] sm:$0xff] %v6852_v27 }
 0x2b3   :  { %1668 = vmatprep.subr.mxu0 %v6832_v18  ;;  %1739 = vmatprep.subr.mxu1 %v6834_v25  ;;  %v1009_v25 = vld [vmem:[%s9095_s3] sm:$0xf] }
 0x2b4   :  { %1669 = vmatpush2.msra.mxu0 %v6838_v17  ;;  %1740 = vmatpush2.msra.mxu1 %v6840_v20  ;;  %v1014_v17 = vrot.slane %v1009_v25, %v6076_v26  ;;  %v1018_v20 = vrot.slane %v1009_v25, %v6082_v28  ;;  %v1026_v22 = vrot.slane %v1009_v25, %v6091_v40 }
 0x2b5   :  { %1670 = vmatprep.subr.mxu0 %v6844_v15  ;;  %1741 = vmatprep.subr.mxu1 %v6846_v29 }
 0x2b6   :  { %1671 = vmatpush2.msra.mxu0 %v6850_v19  ;;  %1742 = vmatpush2.msra.mxu1 %v6852_v27 }
 0x2b7   :  { %1848 = vmatprep.subr.mxu0 %v6066_v23  ;;  %1919 = vmatprep.subr.mxu1 %v6071_v24  ;;  %v1022_v23 = vrot.slane %v1009_v25, %v6087_v36 }
 0x315   :  { %v1097_v18 = vpop.f32.mrf.mxu0  ;;  %v1168_v27 = vpop.f32.mrf.mxu1 }
 0x316   :  { %v1098_v15 = vadd.f32 %v1097_v18, %v1014_v17  ;;  %v1169_v24 = vadd.f32 %v1168_v27, %v1022_v23  ;;  %v1173_v23 = vld [vmem:[#allocation3 + $0x2] sm:$0x3] }
 0x317   :  { %v1099_v16 = vpop.f32.mrf.mxu0  ;;  %v1170_v14 = vpop.f32.mrf.mxu1 }
 0x318   :  { %v4717_v29 = vmul.f32 -1.442695, %v1098_v15  ;;  %v1100_v21 = vadd.f32 %v1099_v16, %v1018_v20  ;;  %v4719_v13 = vmul.f32 -1.442695, %v1169_v24  ;;  %v1171_v26 = vadd.f32 %v1170_v14, %v1026_v22 }
 0x31a   :  { %4797 = vpow2.f32 %v4717_v29  ;;  %v4718_v19 = vmul.f32 -1.442695, %v1100_v21 }
 0x31c   :  { %4799 = vpow2.f32 %v4718_v19 }
 0x31d   :  { %4801 = vpow2.f32 %v4719_v13 }
 0x327   :  { %v4798_v12 = vpop.eup %4797 }
 0x328   :  { %v1183_v11 = vadd.f32 1.0, %v4798_v12 }
 0x329   :  { %v4800_v28 = vpop.eup %4799 }
 0x32a   :  { %4803 = vrcp.f32 %v1183_v11  ;;  %v1184_v18 = vadd.f32 1.0, %v4800_v28  ;;  %v4802_v15 = vpop.eup %4801  ;;  %v4721_v11 = vld [vmem:[%s9092_s0 + $0x10] sm:$0xff] }
 0x32b   :  { %4805 = vtanh.f32 %v1171_v26  ;;  %v1185_v25 = vadd.f32 1.0, %v4802_v15 }
 0x32c   :  { %4807 = vrcp.f32 %v1184_v18 }
 0x32d   :  { %4809 = vrcp.f32 %v1185_v25 }
 0x336   :  { %v1337_v16 = vpop.f32.mrf.mxu0  ;;  %v1408_v19 = vpop.f32.mrf.mxu1 }
 0x337   :  { %v4804_v20 = vpop.eup %4803 }
 0x338   :  { %v4806_v21 = vpop.eup %4805  ;;  %v1339_v29 = vpop.f32.mrf.mxu0 }
 0x339   :  { %v1410_v27 = vpop.f32.mrf.mxu1  ;;  %v4808_v17 = vpop.eup %4807  ;;  %v1417_v24 = vcombine.low %v1337_v16, %v1339_v29  ;;  %v1194_v12 = vmul.f32 %v4806_v21, %v4804_v20 }
 0x33a   :  { %v1418_v40 = vcombine.low %v1408_v19, %v1410_v27  ;;  %v1193_v14 = vmul.f32 %v4808_v17, %v1173_v23  ;;  %v4810_v16 = vpop.eup %4809 }
 0x33b   :  { %v1425_v13 = vrot.slane %v1417_v24, %v10005_v57  ;;  %v1436_v24 = vld [vmem:[#allocation3] sm:$0x3] }
 0x33c   :  { %v1432_v28 = vrot.slane %v1418_v40, %v10005_v57  ;;  %v1195_v26 = vadd.f32 %v1194_v12, %v1193_v14 }
 0x33e   :  { %v1433_v22 = vcombine.low %v1425_v13, %v1432_v28  ;;  %4811 = vtanh.f32 %v1195_v26  ;;  %1201 = vst [vmem:[#allocation3 + $0x2] sm:$0x3] %v1195_v26 }
 0x340   :  { %v1435_v18 = vadd.f32 %v4721_v11, %v1433_v22  ;;  %v10195_v22 = vld [vmem:[#allocation56_spill] sm:$0xff] }
 0x342   :  { %v4722_v15 = vmul.f32 -1.442695, %v1435_v18  ;;  %v1444_v21 = vrot.slane %v1435_v18, 6  ;;  %v10196_v18 = vld [vmem:[#allocation57_spill] sm:$0xff] }
 0x344   :  { %4813 = vpow2.f32 %v4722_v15  ;;  %v10197_v15 = vld [vmem:[#allocation58_spill] sm:$0xff] }
 0x34b   :  { %v4812_v19 = vpop.eup %4811 }
 0x34c   :  { %v1197_v29 = vmul.f32 %v4812_v19, %v4810_v16  ;;  %v10198_v16 = vld [vmem:[#allocation59_spill] sm:$0xff]  ;;  %v10199_v19 = vld [vmem:[#allocation60_spill] sm:$0xff] }
 0x34e   :  { %1200 = vst [vmem:[#allocation2 + $0x2] sm:$0x3] %v1197_v29  ;;  %4720 = vst [vmem:[%s9098_s6 + $0x2] sm:$0x3] %v1197_v29  ;;  %v10200_v29 = vld [vmem:[#allocation61_spill] sm:$0xff] }
 0x351   :  { %v4814_v40 = vpop.eup %4813 }
 0x352   :  { %v1440_v20 = vadd.f32 1.0, %v4814_v40  ;;  %v10201_v40 = vld [vmem:[#allocation62_spill] sm:$0xff] }
 0x354   :  { %4815 = vrcp.f32 %v1440_v20  ;;  %v10202_v20 = vld [vmem:[#allocation63_spill] sm:$0xff] }
 0x355   :  { %4817 = vtanh.f32 %v1444_v21  ;;  %v1457_v27 = vld [vmem:[#allocation2 + $0x2] sm:$0x3]  ;;  %v10203_v21 = vld [vmem:[#allocation64_spill] sm:$0xff] }
 0x356   :  { %1672 = vmatprep.mubr.f32.mxu0 %v1457_v27  ;;  %1743 = vmatprep.mubr.f32.mxu1 %v1457_v27  ;;  %v10204_v27 = vld [vmem:[#allocation65_spill] sm:$0xff] }
 0x361   :  { %v4816_v17 = vpop.eup %4815 }
 0x362   :  { %v1448_v25 = vrot.slane %v4816_v17, 2  ;;  %v4818_v23 = vpop.eup %4817  ;;  %v1454_v28 = vrot.slane %v4816_v17, 4 }
 0x363   :  { %v1451_v14 = vmul.f32 %v4818_v23, %v4816_v17  ;;  %v10205_v17 = vld [vmem:[#allocation66_spill] sm:$0xff]  ;;  %v10207_v23 = vld [vmem:[#allocation68_spill] sm:$0xff] }
 0x364   :  { %v1450_v12 = vmul.f32 %v1448_v25, %v1436_v24  ;;  %v10206_v25 = vld [vmem:[#allocation67_spill] sm:$0xff]  ;;  %v10208_v24 = vld [vmem:[#allocation69_spill] sm:$0xff] }
 0x366   :  { %v1452_v13 = vadd.f32 %v1451_v14, %v1450_v12  ;;  %v10209_v14 = vld [vmem:[#allocation70_spill] sm:$0xff]  ;;  %v10210_v12 = vld [vmem:[#allocation71_spill] sm:$0xff] }
 0x368   :  { %4819 = vtanh.f32 %v1452_v13  ;;  %1776 = vst [vmem:[#allocation3] sm:$0x3] %v1452_v13  ;;  %v10211_v13 = vld [vmem:[#allocation72_spill] sm:$0xff] }
 0x375   :  { %v4820_v26 = vpop.eup %4819 }
 0x376   :  { %v1456_v11 = vmul.f32 %v4820_v26, %v1454_v28  ;;  %v10212_v28 = vld [vmem:[#allocation73_spill] sm:$0xff]  ;;  %v10213_v26 = vld [vmem:[#allocation74_spill] sm:$0xff] }
 0x378   :  { %1673 = vmatmul.mubr.f32.vlgmr.msra.gmra.mxu0 %v1456_v11  ;;  %1775 = vst [vmem:[#allocation2] sm:$0x3] %v1456_v11  ;;  %1744 = vmatmul.mubr.f32.vlgmr.msra.gmra.mxu1 %v1456_v11  ;;  %v10214_v11 = vld [vmem:[#allocation75_spill] sm:$0xff] }
 0x379   :  { %1849 = vmatpush1.msra.mxu0 %v6105_v30  ;;  %1920 = vmatpush1.msra.mxu1 %v6110_v31  ;;  %v10154_v30 = vld [vmem:[#allocation16_spill] sm:$0xff]  ;;  %v10155_v31 = vld [vmem:[#allocation17_spill] sm:$0xff] }
 0x37a   :  { %1850 = vmatprep.subr.mxu0 %v6115_v32  ;;  %1921 = vmatprep.subr.mxu1 %v6120_v33  ;;  %v10156_v32 = vld [vmem:[#allocation18_spill] sm:$0xff]  ;;  %v10157_v33 = vld [vmem:[#allocation19_spill] sm:$0xff] }
 0x37b   :  { %1851 = vmatpush1.msra.mxu0 %v6125_v34  ;;  %1922 = vmatpush1.msra.mxu1 %v6130_v35  ;;  %v10158_v34 = vld [vmem:[#allocation20_spill] sm:$0xff]  ;;  %v10159_v35 = vld [vmem:[#allocation21_spill] sm:$0xff] }
 0x37c   :  { %1852 = vmatprep.subr.mxu0 %v6137_v37  ;;  %1923 = vmatprep.subr.mxu1 %v6142_v38  ;;  %v10160_v37 = vld [vmem:[#allocation22_spill] sm:$0xff]  ;;  %v10161_v38 = vld [vmem:[#allocation23_spill] sm:$0xff] }
 0x37d   :  { %1853 = vmatpush1.msra.mxu0 %v6149_v39  ;;  %1924 = vmatpush1.msra.mxu1 %v6154_v41  ;;  %v10162_v39 = vld [vmem:[#allocation24_spill] sm:$0xff]  ;;  %v10163_v41 = vld [vmem:[#allocation25_spill] sm:$0xff] }
 0x37e   :  { %1854 = vmatprep.subr.mxu0 %v6161_v42  ;;  %1925 = vmatprep.subr.mxu1 %v6166_v43  ;;  %v10164_v42 = vld [vmem:[#allocation26_spill] sm:$0xff]  ;;  %v10165_v43 = vld [vmem:[#allocation27_spill] sm:$0xff] }
 0x37f   :  { %1855 = vmatpush1.msra.mxu0 %v6173_v44  ;;  %1926 = vmatpush1.msra.mxu1 %v6178_v45  ;;  %v10166_v44 = vld [vmem:[#allocation28_spill] sm:$0xff]  ;;  %v10167_v45 = vld [vmem:[#allocation29_spill] sm:$0xff] }
 0x380   :  { %1856 = vmatprep.subr.mxu0 %v6185_v46  ;;  %1927 = vmatprep.subr.mxu1 %v6190_v47  ;;  %v10168_v46 = vld [vmem:[#allocation30_spill] sm:$0xff]  ;;  %v10169_v47 = vld [vmem:[#allocation31_spill] sm:$0xff] }
 0x381   :  { %1857 = vmatpush1.msra.mxu0 %v6197_v48  ;;  %1928 = vmatpush1.msra.mxu1 %v6202_v50  ;;  %v10170_v48 = vld [vmem:[#allocation32_spill] sm:$0xff]  ;;  %v10171_v50 = vld [vmem:[#allocation33_spill] sm:$0xff] }
 0x382   :  { %1858 = vmatprep.subr.mxu0 %v6209_v51  ;;  %1929 = vmatprep.subr.mxu1 %v6214_v52  ;;  %v10172_v51 = vld [vmem:[#allocation34_spill] sm:$0xff]  ;;  %v10173_v52 = vmov 0.0  }
 0x383   :  { %1859 = vmatpush1.msra.mxu0 %v6221_v59  ;;  %1930 = vmatpush1.msra.mxu1 %v6226_v63  ;;  %v10174_v59 = vld [vmem:[#allocation35_spill] sm:$0xff] }
 0x384   :  { %1860 = vmatprep.subr.mxu0 %v6233_v2  ;;  %1931 = vmatprep.subr.mxu1 %v6238_v0  ;;  %v1783_v63 = vld [vmem:[#allocation2] sm:$0x3]  ;;  %v10175_v2 = vld [vmem:[#allocation36_spill] sm:$0xff]  ;;  %v10176_v0 = vld [vmem:[#allocation37_spill] sm:$0xff] }
 0x385   :  { %1861 = vmatpush1.msra.mxu0 %v6245_v56  ;;  %1932 = vmatpush1.msra.mxu1 %v6250_v55  ;;  %v10177_v56 = vld [vmem:[#allocation38_spill] sm:$0xff]  ;;  %v10178_v55 = vld [vmem:[#allocation39_spill] sm:$0xff] }
 0x386   :  { %1862 = vmatprep.subr.mxu0 %v6257_v58  ;;  %1933 = vmatprep.subr.mxu1 %v6262_v61  ;;  %v10179_v58 = vld [vmem:[#allocation40_spill] sm:$0xff]  ;;  %v10180_v61 = vld [vmem:[#allocation41_spill] sm:$0xff] }
 0x387   :  { %1863 = vmatpush1.msra.mxu0 %v6269_v60  ;;  %1934 = vmatpush1.msra.mxu1 %v6274_v62  ;;  %v10181_v60 = vld [vmem:[#allocation42_spill] sm:$0xff]  ;;  %v10182_v62 = vld [vmem:[#allocation43_spill] sm:$0xff] }
 0x388   :  { %1864 = vmatprep.subr.mxu0 %v6281_v49  ;;  %1935 = vmatprep.subr.mxu1 %v6286_v54  ;;  %v10183_v49 = vld [vmem:[#allocation44_spill] sm:$0xff]  ;;  %v10184_v54 = vld [vmem:[#allocation45_spill] sm:$0xff] }
 0x389   :  { %1865 = vmatpush1.msra.mxu0 %v6293_v53  ;;  %1936 = vmatpush1.msra.mxu1 %v6298_v1  ;;  %v10185_v53 = vld [vmem:[#allocation46_spill] sm:$0xff]  ;;  %v10186_v1 = vld [vmem:[#allocation47_spill] sm:$0xff] }
 0x38a   :  { %1866 = vmatprep.subr.mxu0 %v6305_v3  ;;  %1937 = vmatprep.subr.mxu1 %v6310_v4  ;;  %v10187_v3 = vld [vmem:[#allocation48_spill] sm:$0xff]  ;;  %v10188_v4 = vld [vmem:[#allocation49_spill] sm:$0xff] }
 0x38b   :  { %1867 = vmatpush1.msra.mxu0 %v6317_v5  ;;  %1938 = vmatpush1.msra.mxu1 %v6322_v6  ;;  %v10189_v5 = vld [vmem:[#allocation50_spill] sm:$0xff]  ;;  %v10190_v6 = vld [vmem:[#allocation51_spill] sm:$0xff] }
 0x38c   :  { %1868 = vmatprep.subr.mxu0 %v6329_v7  ;;  %1939 = vmatprep.subr.mxu1 %v6334_v8  ;;  %v10191_v7 = vld [vmem:[#allocation52_spill] sm:$0xff]  ;;  %v10192_v8 = vld [vmem:[#allocation53_spill] sm:$0xff] }
 0x38d   :  { %1869 = vmatpush1.msra.mxu0 %v6341_v9  ;;  %1940 = vmatpush1.msra.mxu1 %v6346_v10  ;;  %v10193_v9 = vld [vmem:[#allocation54_spill] sm:$0xff]  ;;  %v10194_v10 = vld [vmem:[#allocation55_spill] sm:$0xff] }
 0x38e   :  { %1870 = vmatprep.subr.mxu0 %v10154_v30  ;;  %1941 = vmatprep.subr.mxu1 %v10155_v31  ;;  %v10215_v30 = vld [vmem:[#allocation76_spill] sm:$0xff]  ;;  %v10216_v31 = vld [vmem:[#allocation77_spill] sm:$0xff] }
 0x38f   :  { %1871 = vmatpush1.msra.mxu0 %v10156_v32  ;;  %1942 = vmatpush1.msra.mxu1 %v10157_v33  ;;  %v10217_v32 = vld [vmem:[#allocation78_spill] sm:$0xff]  ;;  %v10218_v33 = vld [vmem:[#allocation79_spill] sm:$0xff] }
 0x390   :  { %1872 = vmatprep.subr.mxu0 %v10158_v34  ;;  %1943 = vmatprep.subr.mxu1 %v10159_v35  ;;  %v10219_v34 = vld [vmem:[#allocation80_spill] sm:$0xff]  ;;  %v10220_v35 = vld [vmem:[#allocation81_spill] sm:$0xff] }
 0x391   :  { %1873 = vmatpush1.msra.mxu0 %v10160_v37  ;;  %1944 = vmatpush1.msra.mxu1 %v10161_v38  ;;  %v10221_v37 = vld [vmem:[#allocation82_spill] sm:$0xff]  ;;  %v10222_v38 = vld [vmem:[#allocation83_spill] sm:$0xff] }
 0x392   :  { %1874 = vmatprep.subr.mxu0 %v10162_v39  ;;  %1945 = vmatprep.subr.mxu1 %v10163_v41  ;;  %v10223_v39 = vld [vmem:[#allocation84_spill] sm:$0xff]  ;;  %v10224_v41 = vld [vmem:[#allocation85_spill] sm:$0xff] }
 0x393   :  { %1875 = vmatpush1.msra.mxu0 %v10164_v42  ;;  %1946 = vmatpush1.msra.mxu1 %v10165_v43  ;;  %v10225_v42 = vld [vmem:[#allocation86_spill] sm:$0xff]  ;;  %v10226_v43 = vld [vmem:[#allocation87_spill] sm:$0xff] }
 0x394   :  { %1876 = vmatprep.subr.mxu0 %v10166_v44  ;;  %1947 = vmatprep.subr.mxu1 %v10167_v45  ;;  %v10227_v44 = vld [vmem:[#allocation88_spill] sm:$0xff]  ;;  %v10228_v45 = vld [vmem:[#allocation89_spill] sm:$0xff] }
 0x395   :  { %1877 = vmatpush1.msra.mxu0 %v10168_v46  ;;  %1948 = vmatpush1.msra.mxu1 %v10169_v47  ;;  %v10229_v46 = vld [vmem:[#allocation90_spill] sm:$0xff]  ;;  %v10230_v47 = vld [vmem:[#allocation91_spill] sm:$0xff] }
 0x396   :  { %1878 = vmatprep.subr.mxu0 %v10170_v48  ;;  %1949 = vmatprep.subr.mxu1 %v10171_v50  ;;  %v10231_v48 = vld [vmem:[#allocation92_spill] sm:$0xff]  ;;  %v10232_v50 = vld [vmem:[#allocation93_spill] sm:$0xff] }
 0x397   :  { %1879 = vmatpush1.msra.mxu0 %v10172_v51  ;;  %1912 = vmatprep.mubr.f32.mxu0 %v10173_v52  ;;  %v10233_v51 = vld [vmem:[#allocation94_spill] sm:$0xff] }
 0x398   :  { %1950 = vmatpush1.msra.mxu1 %v10174_v59  ;;  %1983 = vmatprep.mubr.f32.mxu1 %v10173_v52  ;;  %v10234_v59 = vld [vmem:[#allocation95_spill] sm:$0xff] }
 0x399   :  { %1913 = vmatmul.mubr.f32.vlgmr.msra.gmra.mxu0 %v1783_v63  ;;  %1984 = vmatmul.mubr.f32.vlgmr.msra.gmra.mxu1 %v1783_v63  ;;  %v10235_v63 = vld [vmem:[#allocation96_spill] sm:$0xff] }
 0x39a   :  { %2185 = vmatprep.subr.mxu0 %v10175_v2  ;;  %2256 = vmatprep.subr.mxu1 %v10176_v0  ;;  %v10236_v2 = vld [vmem:[#allocation97_spill] sm:$0xff]  ;;  %v10237_v0 = vld [vmem:[#allocation98_spill] sm:$0xff] }
 0x39b   :  { %2186 = vmatpush1.msra.mxu0 %v10177_v56  ;;  %2257 = vmatpush1.msra.mxu1 %v10178_v55  ;;  %v10238_v56 = vld [vmem:[#allocation99_spill] sm:$0xff]  ;;  %v10239_v55 = vld [vmem:[#allocation100_spill] sm:$0xff] }
 0x39c   :  { %2187 = vmatprep.subr.mxu0 %v10179_v58  ;;  %2258 = vmatprep.subr.mxu1 %v10180_v61  ;;  %v10240_v58 = vld [vmem:[#allocation101_spill] sm:$0xff]  ;;  %v10241_v61 = vld [vmem:[#allocation102_spill] sm:$0xff] }
 0x39d   :  { %2188 = vmatpush1.msra.mxu0 %v10181_v60  ;;  %2259 = vmatpush1.msra.mxu1 %v10182_v62  ;;  %v10242_v60 = vld [vmem:[#allocation103_spill] sm:$0xff]  ;;  %v10243_v62 = vld [vmem:[#allocation104_spill] sm:$0xff] }
 0x39e   :  { %2189 = vmatprep.subr.mxu0 %v10183_v49  ;;  %2260 = vmatprep.subr.mxu1 %v10184_v54  ;;  %v10244_v49 = vld [vmem:[#allocation105_spill] sm:$0xff]  ;;  %v10245_v54 = vld [vmem:[#allocation106_spill] sm:$0xff] }
 0x39f   :  { %2190 = vmatpush1.msra.mxu0 %v10185_v53  ;;  %2261 = vmatpush1.msra.mxu1 %v10186_v1  ;;  %v10246_v53 = vld [vmem:[#allocation107_spill] sm:$0xff]  ;;  %v10247_v1 = vld [vmem:[#allocation108_spill] sm:$0xff] }
 0x3a0   :  { %2191 = vmatprep.subr.mxu0 %v10187_v3  ;;  %2262 = vmatprep.subr.mxu1 %v10188_v4  ;;  %v10248_v3 = vld [vmem:[#allocation109_spill] sm:$0xff]  ;;  %v10249_v4 = vld [vmem:[#allocation110_spill] sm:$0xff] }
 0x3a1   :  { %2192 = vmatpush1.msra.mxu0 %v10189_v5  ;;  %2263 = vmatpush1.msra.mxu1 %v10190_v6  ;;  %v10250_v5 = vld [vmem:[#allocation111_spill] sm:$0xff]  ;;  %v10251_v6 = vld [vmem:[#allocation112_spill] sm:$0xff] }
 0x3a2   :  { %2193 = vmatprep.subr.mxu0 %v10191_v7  ;;  %2264 = vmatprep.subr.mxu1 %v10192_v8  ;;  %v10252_v7 = vld [vmem:[#allocation113_spill] sm:$0xff]  ;;  %v10253_v8 = vld [vmem:[#allocation114_spill] sm:$0xff] }
 0x3a3   :  { %2194 = vmatpush1.msra.mxu0 %v10193_v9  ;;  %2265 = vmatpush1.msra.mxu1 %v10194_v10  ;;  %v10254_v9 = vld [vmem:[#allocation115_spill] sm:$0xff]  ;;  %v10255_v10 = vld [vmem:[#allocation116_spill] sm:$0xff] }
 0x3a4   :  { %2195 = vmatprep.subr.mxu0 %v10195_v22  ;;  %2266 = vmatprep.subr.mxu1 %v10196_v18  ;;  %v10256_v22 = vld [vmem:[#allocation117_spill] sm:$0xff]  ;;  %v10257_v18 = vld [vmem:[#allocation118_spill] sm:$0xff] }
 0x3a5   :  { %2196 = vmatpush1.msra.mxu0 %v10197_v15  ;;  %2267 = vmatpush1.msra.mxu1 %v10198_v16  ;;  %v10258_v15 = vld [vmem:[#allocation119_spill] sm:$0xff]  ;;  %v10259_v16 = vld [vmem:[#allocation120_spill] sm:$0xff] }
 0x3a6   :  { %2197 = vmatprep.subr.mxu0 %v10199_v19  ;;  %2268 = vmatprep.subr.mxu1 %v10200_v29  ;;  %v10260_v19 = vld [vmem:[#allocation121_spill] sm:$0xff]  ;;  %v10261_v29 = vld [vmem:[#allocation122_spill] sm:$0xff] }
 0x3a7   :  { %2198 = vmatpush1.msra.mxu0 %v10201_v40  ;;  %2269 = vmatpush1.msra.mxu1 %v10202_v20  ;;  %v10262_v40 = vld [vmem:[#allocation123_spill] sm:$0xff]  ;;  %v10263_v20 = vld [vmem:[#allocation124_spill] sm:$0xff] }
 0x3a8   :  { %2199 = vmatprep.subr.mxu0 %v10203_v21  ;;  %2270 = vmatprep.subr.mxu1 %v10204_v27  ;;  %v10264_v21 = vld [vmem:[#allocation125_spill] sm:$0xff]  ;;  %v10265_v27 = vld [vmem:[#allocation126_spill] sm:$0xff] }
 0x3a9   :  { %2200 = vmatpush1.msra.mxu0 %v10205_v17  ;;  %2271 = vmatpush1.msra.mxu1 %v10206_v25  ;;  %v10266_v17 = vld [vmem:[#allocation127_spill] sm:$0xff]  ;;  %v10267_v25 = vld [vmem:[#allocation128_spill] sm:$0xff] }
 0x3aa   :  { %2201 = vmatprep.subr.mxu0 %v10207_v23  ;;  %2272 = vmatprep.subr.mxu1 %v10208_v24  ;;  %v10268_v23 = vld [vmem:[#allocation129_spill] sm:$0xff]  ;;  %v10269_v24 = vld [vmem:[#allocation130_spill] sm:$0xff] }
 0x3ab   :  { %2202 = vmatpush1.msra.mxu0 %v10209_v14  ;;  %2273 = vmatpush1.msra.mxu1 %v10210_v12  ;;  %v10270_v14 = vld [vmem:[#allocation131_spill] sm:$0xff]  ;;  %v10271_v12 = vld [vmem:[#allocation132_spill] sm:$0xff] }
 0x3ac   :  { %2203 = vmatprep.subr.mxu0 %v10211_v13  ;;  %2274 = vmatprep.subr.mxu1 %v10212_v28  ;;  %v10272_v13 = vld [vmem:[#allocation133_spill] sm:$0xff]  ;;  %v10273_v28 = vld [vmem:[#allocation134_spill] sm:$0xff] }
 0x3ad   :  { %2204 = vmatpush1.msra.mxu0 %v10213_v26  ;;  %2275 = vmatpush1.msra.mxu1 %v10214_v11  ;;  %v10274_v26 = vld [vmem:[#allocation135_spill] sm:$0xff]  ;;  %v10275_v11 = vld [vmem:[#allocation136_spill] sm:$0xff] }
 0x3ae   :  { %2205 = vmatprep.subr.mxu0 %v10215_v30  ;;  %2276 = vmatprep.subr.mxu1 %v10216_v31  ;;  %v10276_v30 = vld [vmem:[#allocation137_spill] sm:$0xff]  ;;  %v10277_v31 = vld [vmem:[#allocation138_spill] sm:$0xff] }
 0x3af   :  { %2206 = vmatpush1.msra.mxu0 %v10217_v32  ;;  %2277 = vmatpush1.msra.mxu1 %v10218_v33  ;;  %v10278_v32 = vld [vmem:[#allocation139_spill] sm:$0xff]  ;;  %v10279_v33 = vld [vmem:[#allocation140_spill] sm:$0xff] }
 0x3b0   :  { %2207 = vmatprep.subr.mxu0 %v10219_v34  ;;  %2278 = vmatprep.subr.mxu1 %v10220_v35  ;;  %v10280_v34 = vld [vmem:[#allocation141_spill] sm:$0xff]  ;;  %v10281_v35 = vld [vmem:[#allocation142_spill] sm:$0xff] }
 0x3b1   :  { %2208 = vmatpush1.msra.mxu0 %v10221_v37  ;;  %2279 = vmatpush1.msra.mxu1 %v10222_v38  ;;  %v10282_v37 = vld [vmem:[#allocation143_spill] sm:$0xff]  ;;  %v10283_v38 = vld [vmem:[#allocation144_spill] sm:$0xff] }
 0x3b2   :  { %2209 = vmatprep.subr.mxu0 %v10223_v39  ;;  %2280 = vmatprep.subr.mxu1 %v10224_v41  ;;  %v10284_v39 = vld [vmem:[#allocation145_spill] sm:$0xff]  ;;  %v10285_v41 = vld [vmem:[#allocation146_spill] sm:$0xff] }
 0x3b3   :  { %2210 = vmatpush1.msra.mxu0 %v10225_v42  ;;  %2281 = vmatpush1.msra.mxu1 %v10226_v43  ;;  %v10286_v42 = vld [vmem:[#allocation147_spill] sm:$0xff]  ;;  %v10287_v43 = vld [vmem:[#allocation148_spill] sm:$0xff] }
 0x3b4   :  { %2211 = vmatprep.subr.mxu0 %v10227_v44  ;;  %2282 = vmatprep.subr.mxu1 %v10228_v45  ;;  %v10288_v44 = vld [vmem:[#allocation149_spill] sm:$0xff]  ;;  %v10289_v45 = vld [vmem:[#allocation150_spill] sm:$0xff] }
 0x3b5   :  { %2212 = vmatpush1.msra.mxu0 %v10229_v46  ;;  %2283 = vmatpush1.msra.mxu1 %v10230_v47  ;;  %v10290_v46 = vld [vmem:[#allocation151_spill] sm:$0xff]  ;;  %v10291_v47 = vld [vmem:[#allocation152_spill] sm:$0xff] }
 0x3b6   :  { %2213 = vmatprep.subr.mxu0 %v10231_v48  ;;  %2284 = vmatprep.subr.mxu1 %v10232_v50  ;;  %v10292_v48 = vld [vmem:[#allocation153_spill] sm:$0xff]  ;;  %v10293_v50 = vld [vmem:[#allocation154_spill] sm:$0xff] }
 0x3b7   :  { %2214 = vmatpush1.msra.mxu0 %v10233_v51  ;;  %2285 = vmatpush1.msra.mxu1 %v10234_v59  ;;  %v10294_v51 = vld [vmem:[#allocation155_spill] sm:$0xff]  ;;  %v10295_v59 = vld [vmem:[#allocation156_spill] sm:$0xff] }
 0x3b8   :  { %2215 = vmatprep.subr.mxu0 %v10235_v63  ;;  %2286 = vmatprep.subr.mxu1 %v10236_v2  ;;  %v10296_v63 = vld [vmem:[#allocation157_spill] sm:$0xff]  ;;  %v10297_v2 = vld [vmem:[#allocation158_spill] sm:$0xff] }
 0x3b9   :  { %2216 = vmatpush1.msra.mxu0 %v10237_v0  ;;  %2287 = vmatpush1.msra.mxu1 %v10238_v56  ;;  %v10298_v0 = vld [vmem:[#allocation159_spill] sm:$0xff]  ;;  %v10299_v56 = vld [vmem:[#allocation160_spill] sm:$0xff] }
 0x3ba   :  { %2217 = vmatprep.subr.mxu0 %v10239_v55  ;;  %2288 = vmatprep.subr.mxu1 %v10240_v58  ;;  %v10300_v55 = vld [vmem:[#allocation161_spill] sm:$0xff]  ;;  %v10301_v58 = vld [vmem:[#allocation162_spill] sm:$0xff] }
 0x3bb   :  { %2218 = vmatpush2.msra.mxu0 %v10241_v61  ;;  %2289 = vmatpush2.msra.mxu1 %v10242_v60  ;;  %v10302_v61 = vld [vmem:[#allocation163_spill] sm:$0xff]  ;;  %v7072_v60 = vld [vmem:[%s9093_s1 + $0x1e8] sm:$0xff] }
 0x3bc   :  { %2219 = vmatprep.subr.mxu0 %v10243_v62  ;;  %2290 = vmatprep.subr.mxu1 %v10244_v49  ;;  %v7077_v62 = vld [vmem:[%s9093_s1 + $0x1f8] sm:$0xff]  ;;  %v1586_v49 = vld [vmem:[%s9095_s3] sm:$0xf] }
 0x3bd   :  { %2220 = vmatpush2.msra.mxu0 %v10245_v54  ;;  %2291 = vmatpush2.msra.mxu1 %v10246_v53  ;;  %v10303_v54 = vld [vmem:[#allocation13_spill] sm:$0xff] }
 0x3be   :  { %2221 = vmatprep.subr.mxu0 %v10247_v1  ;;  %2292 = vmatprep.subr.mxu1 %v10248_v3  ;;  %v1591_v53 = vrot.slane %v1586_v49, %v10303_v54  ;;  %v10304_v1 = vld [vmem:[#allocation14_spill] sm:$0xff] }
 0x3bf   :  { %2222 = vmatpush2.msra.mxu0 %v10249_v4  ;;  %2293 = vmatpush2.msra.mxu1 %v10250_v5  ;;  %v1595_v3 = vrot.slane %v1586_v49, %v10304_v1 }
 0x3c0   :  { %2223 = vmatprep.subr.mxu0 %v10251_v6  ;;  %2294 = vmatprep.subr.mxu1 %v10252_v7 }
 0x3c1   :  { %2224 = vmatpush2.msra.mxu0 %v10253_v8  ;;  %2295 = vmatpush2.msra.mxu1 %v10254_v9 }
 0x3c2   :  { %2225 = vmatprep.subr.mxu0 %v10255_v10  ;;  %2296 = vmatprep.subr.mxu1 %v10256_v22  ;;  %v1599_v10 = vrot.slane %v1586_v49, %v6087_v36 }
 0x3c3   :  { %2226 = vmatpush2.msra.mxu0 %v10257_v18  ;;  %2297 = vmatpush2.msra.mxu1 %v10258_v15  ;;  %v10305_v15 = vld [vmem:[#allocation15_spill] sm:$0xff] }
 0x3c4   :  { %2227 = vmatprep.subr.mxu0 %v10259_v16  ;;  %2298 = vmatprep.subr.mxu1 %v10260_v19  ;;  %v1603_v16 = vrot.slane %v1586_v49, %v10305_v15 }
 0x3c5   :  { %2228 = vmatpush2.msra.mxu0 %v10261_v29  ;;  %2299 = vmatpush2.msra.mxu1 %v10262_v40 }
 0x3c6   :  { %2229 = vmatprep.subr.mxu0 %v10263_v20  ;;  %2300 = vmatprep.subr.mxu1 %v10264_v21 }
 0x3c7   :  { %2230 = vmatpush2.msra.mxu0 %v10265_v27  ;;  %2301 = vmatpush2.msra.mxu1 %v10266_v17 }
 0x3c8   :  { %2231 = vmatprep.subr.mxu0 %v10267_v25  ;;  %2302 = vmatprep.subr.mxu1 %v10268_v23 }
 0x3c9   :  { %2232 = vmatpush2.msra.mxu0 %v10269_v24  ;;  %2303 = vmatpush2.msra.mxu1 %v10270_v14 }
 0x3ca   :  { %2233 = vmatprep.subr.mxu0 %v10271_v12  ;;  %2304 = vmatprep.subr.mxu1 %v10272_v13 }
 0x3cb   :  { %2234 = vmatpush2.msra.mxu0 %v10273_v28  ;;  %2305 = vmatpush2.msra.mxu1 %v10274_v26 }
 0x3cc   :  { %2235 = vmatprep.subr.mxu0 %v10275_v11  ;;  %2306 = vmatprep.subr.mxu1 %v10276_v30  ;;  %v1750_v30 = vld [vmem:[#allocation3 + $0x2] sm:$0x3] }
 0x3cd   :  { %2236 = vmatpush2.msra.mxu0 %v10277_v31  ;;  %2307 = vmatpush2.msra.mxu1 %v10278_v32 }
 0x3ce   :  { %2237 = vmatprep.subr.mxu0 %v10279_v33  ;;  %2308 = vmatprep.subr.mxu1 %v10280_v34 }
 0x3cf   :  { %2238 = vmatpush2.msra.mxu0 %v10281_v35  ;;  %2309 = vmatpush2.msra.mxu1 %v10282_v37 }
 0x3d0   :  { %2239 = vmatprep.subr.mxu0 %v10283_v38  ;;  %2310 = vmatprep.subr.mxu1 %v10284_v39  ;;  %v4727_v39 = vld [vmem:[%s9092_s0 + $0x18] sm:$0xff] }
 0x3d1   :  { %2240 = vmatpush2.msra.mxu0 %v10285_v41  ;;  %2311 = vmatpush2.msra.mxu1 %v10286_v42 }
 0x3d2   :  { %2241 = vmatprep.subr.mxu0 %v10287_v43  ;;  %2312 = vmatprep.subr.mxu1 %v10288_v44 }
 0x3d3   :  { %2242 = vmatpush2.msra.mxu0 %v10289_v45  ;;  %2313 = vmatpush2.msra.mxu1 %v10290_v46 }
 0x3d4   :  { %2243 = vmatprep.subr.mxu0 %v10291_v47  ;;  %2314 = vmatprep.subr.mxu1 %v10292_v48 }
 0x3d5   :  { %2244 = vmatpush2.msra.mxu0 %v10293_v50  ;;  %2315 = vmatpush2.msra.mxu1 %v10294_v51 }
 0x3d6   :  { %2245 = vmatprep.subr.mxu0 %v10295_v59  ;;  %2316 = vmatprep.subr.mxu1 %v10296_v63 }
 0x3d7   :  { %2246 = vmatpush2.msra.mxu0 %v10297_v2  ;;  %2317 = vmatpush2.msra.mxu1 %v10298_v0  ;;  %v2013_v0 = vld [vmem:[#allocation3] sm:$0x3] }
 0x3d8   :  { %2247 = vmatprep.subr.mxu0 %v10299_v56  ;;  %2318 = vmatprep.subr.mxu1 %v10300_v55 }
 0x3d9   :  { %2248 = vmatpush2.msra.mxu0 %v10301_v58  ;;  %2319 = vmatpush2.msra.mxu1 %v10302_v61 }
 0x3da   :  { %2425 = vmatprep.subr.mxu0 %v7072_v60  ;;  %2496 = vmatprep.subr.mxu1 %v7077_v62 }
 0x438   :  { %v1674_v4 = vpop.f32.mrf.mxu0  ;;  %v1745_v22 = vpop.f32.mrf.mxu1 }
 0x439   :  { %v1675_v5 = vadd.f32 %v1674_v4, %v1591_v53  ;;  %v1746_v18 = vadd.f32 %v1745_v22, %v1599_v10  ;;  %v7104_v4 = vld [vmem:[%s9093_s1 + $0x1f0] sm:$0xff]  ;;  %v7136_v10 = vld [vmem:[%s9093_s1 + $0x1b8] sm:$0xff]  ;;  %v7143_v22 = vld [vmem:[%s9093_s1 + $0x1a0] sm:$0xff] }
 0x43a   :  { %v1676_v6 = vpop.f32.mrf.mxu0  ;;  %v1747_v19 = vpop.f32.mrf.mxu1 }
 0x43b   :  { %v4723_v7 = vmul.f32 -1.442695, %v1675_v5  ;;  %v1677_v8 = vadd.f32 %v1676_v6, %v1595_v3  ;;  %v4725_v29 = vmul.f32 -1.442695, %v1746_v18  ;;  %v1748_v20 = vadd.f32 %v1747_v19, %v1603_v16  ;;  %v7099_v3 = vld [vmem:[%s9093_s1 + $0x1e0] sm:$0xff]  ;;  %v7109_v5 = vld [vmem:[%s9093_s1 + $0x1c8] sm:$0xff] }
 0x43c   :  { %v7114_v6 = vld [vmem:[%s9093_s1 + $0x1d8] sm:$0xff]  ;;  %v7148_v18 = vld [vmem:[%s9093_s1 + $0x1b0] sm:$0xff]  ;;  %v7155_v16 = vld [vmem:[%s9093_s1 + $0x188] sm:$0xff] }
 0x43d   :  { %4821 = vpow2.f32 %v4723_v7  ;;  %v4724_v9 = vmul.f32 -1.442695, %v1677_v8  ;;  %v7119_v7 = vld [vmem:[%s9093_s1 + $0x1c0] sm:$0xff]  ;;  %v7124_v8 = vld [vmem:[%s9093_s1 + $0x1d0] sm:$0xff]  ;;  %v7160_v19 = vld [vmem:[%s9093_s1 + $0x198] sm:$0xff] }
 0x43f   :  { %4823 = vpow2.f32 %v4724_v9  ;;  %v7131_v9 = vld [vmem:[%s9093_s1 + $0x1a8] sm:$0xff] }
 0x440   :  { %4825 = vpow2.f32 %v4725_v29  ;;  %v7167_v29 = vld [vmem:[%s9093_s1 + $0x180] sm:$0xff] }
 0x44a   :  { %v4822_v40 = vpop.eup %4821 }
 0x44b   :  { %v1760_v21 = vadd.f32 1.0, %v4822_v40  ;;  %v7172_v40 = vld [vmem:[%s9093_s1 + $0x190] sm:$0xff] }
 0x44c   :  { %v4824_v27 = vpop.eup %4823 }
 0x44d   :  { %4827 = vrcp.f32 %v1760_v21  ;;  %v1761_v17 = vadd.f32 1.0, %v4824_v27  ;;  %v4826_v25 = vpop.eup %4825  ;;  %v7184_v21 = vld [vmem:[%s9093_s1 + $0x178] sm:$0xff]  ;;  %v7191_v27 = vld [vmem:[%s9093_s1 + $0x160] sm:$0xff] }
 0x44e   :  { %4829 = vtanh.f32 %v1748_v20  ;;  %v1762_v11 = vadd.f32 1.0, %v4826_v25  ;;  %v7179_v20 = vld [vmem:[%s9093_s1 + $0x168] sm:$0xff] }
 0x44f   :  { %4831 = vrcp.f32 %v1761_v17  ;;  %v7196_v17 = vld [vmem:[%s9093_s1 + $0x170] sm:$0xff]  ;;  %v7203_v25 = vld [vmem:[%s9093_s1 + $0x148] sm:$0xff] }
 0x450   :  { %4833 = vrcp.f32 %v1762_v11  ;;  %v7251_v11 = vld [vmem:[%s9093_s1 + $0x108] sm:$0xff] }
 0x459   :  { %v1914_v23 = vpop.f32.mrf.mxu0  ;;  %v1985_v24 = vpop.f32.mrf.mxu1 }
 0x45a   :  { %v4828_v14 = vpop.eup %4827 }
 0x45b   :  { %v4830_v12 = vpop.eup %4829  ;;  %v1916_v13 = vpop.f32.mrf.mxu0 }
 0x45c   :  { %v1987_v28 = vpop.f32.mrf.mxu1  ;;  %v4832_v26 = vpop.eup %4831  ;;  %v1994_v31 = vcombine.low %v1914_v23, %v1916_v13  ;;  %v1771_v34 = vmul.f32 %v4830_v12, %v4828_v14  ;;  %v7208_v23 = vld [vmem:[%s9093_s1 + $0x158] sm:$0xff]  ;;  %v7220_v14 = vld [vmem:[%s9093_s1 + $0x150] sm:$0xff]  ;;  %v7227_v12 = vld [vmem:[%s9093_s1 + $0x128] sm:$0xff] }
 0x45d   :  { %v1995_v32 = vcombine.low %v1985_v24, %v1987_v28  ;;  %v1770_v33 = vmul.f32 %v4832_v26, %v1750_v30  ;;  %v4834_v44 = vpop.eup %4833  ;;  %v7215_v24 = vld [vmem:[%s9093_s1 + $0x140] sm:$0xff]  ;;  %v7232_v13 = vld [vmem:[%s9093_s1 + $0x138] sm:$0xff]  ;;  %v7244_v26 = vld [vmem:[%s9093_s1 + $0x130] sm:$0xff] }
 0x45e   :  { %v2002_v35 = vrot.slane %v1994_v31, %v10005_v57  ;;  %v7239_v28 = vld [vmem:[%s9093_s1 + $0x120] sm:$0xff]  ;;  %v7256_v30 = vld [vmem:[%s9093_s1 + $0x118] sm:$0xff] }
 0x45f   :  { %v2009_v37 = vrot.slane %v1995_v32, %v10005_v57  ;;  %v1772_v38 = vadd.f32 %v1771_v34, %v1770_v33  ;;  %v7263_v31 = vld [vmem:[%s9093_s1 + $0x100] sm:$0xff]  ;;  %v7268_v32 = vld [vmem:[%s9093_s1 + $0x110] sm:$0xff]  ;;  %v7275_v33 = vld [vmem:[%s9093_s1 + $0xe8] sm:$0xff] }
 0x460   :  { %v7280_v34 = vld [vmem:[%s9093_s1 + $0xf8] sm:$0xff] }
 0x461   :  { %v2010_v41 = vcombine.low %v2002_v35, %v2009_v37  ;;  %4835 = vtanh.f32 %v1772_v38  ;;  %1778 = vst [vmem:[#allocation3 + $0x2] sm:$0x3] %v1772_v38  ;;  %v7287_v35 = vld [vmem:[%s9093_s1 + $0xe0] sm:$0xff]  ;;  %v7292_v37 = vld [vmem:[%s9093_s1 + $0xf0] sm:$0xff]  ;;  %v7299_v38 = vld [vmem:[%s9093_s1 + $0xc8] sm:$0xff] }
 0x463   :  { %v2012_v42 = vadd.f32 %v4727_v39, %v2010_v41  ;;  %v7304_v39 = vld [vmem:[%s9093_s1 + $0xd8] sm:$0xff]  ;;  %v7311_v41 = vld [vmem:[%s9093_s1 + $0xc0] sm:$0xff] }
 0x465   :  { %v4728_v43 = vmul.f32 -1.442695, %v2012_v42  ;;  %v2021_v50 = vrot.slane %v2012_v42, 6  ;;  %v7316_v42 = vld [vmem:[%s9093_s1 + $0xd0] sm:$0xff] }
 0x467   :  { %4837 = vpow2.f32 %v4728_v43  ;;  %v7323_v43 = vld [vmem:[%s9093_s1 + $0xa8] sm:$0xff] }
 0x46e   :  { %v4836_v45 = vpop.eup %4835 }
 0x46f   :  { %v1774_v46 = vmul.f32 %v4836_v45, %v4834_v44  ;;  %v7328_v44 = vld [vmem:[%s9093_s1 + $0xb8] sm:$0xff]  ;;  %v7335_v45 = vld [vmem:[%s9093_s1 + $0xa0] sm:$0xff] }
 0x471   :  { %4726 = vst [vmem:[%s9098_s6 + $0x4] sm:$0x3] %v1774_v46  ;;  %1777 = vst [vmem:[#allocation2 + $0x2] sm:$0x3] %v1774_v46  ;;  %v7340_v46 = vld [vmem:[%s9093_s1 + $0xb0] sm:$0xff] }
 0x474   :  { %v4838_v47 = vpop.eup %4837 }
 0x475   :  { %v2017_v48 = vadd.f32 1.0, %v4838_v47  ;;  %v7347_v47 = vld [vmem:[%s9093_s1 + $0x88] sm:$0xff] }
 0x476   :  { %10306 = vst [vmem:[#allocation16_spill] sm:$0xff] %v7347_v47 }
 0x477   :  { %4839 = vrcp.f32 %v2017_v48  ;;  %v7352_v48 = vld [vmem:[%s9093_s1 + $0x98] sm:$0xff] }
 0x478   :  { %4841 = vtanh.f32 %v2021_v50  ;;  %v2034_v51 = vld [vmem:[#allocation2 + $0x2] sm:$0x3]  ;;  %10307 = vst [vmem:[#allocation17_spill] sm:$0xff] %v7352_v48 }
 0x479   :  { %2249 = vmatprep.mubr.f32.mxu0 %v2034_v51  ;;  %2320 = vmatprep.mubr.f32.mxu1 %v2034_v51  ;;  %v7359_v50 = vld [vmem:[%s9093_s1 + $0x80] sm:$0xff]  ;;  %v7364_v51 = vld [vmem:[%s9093_s1 + $0x90] sm:$0xff] }
 0x47a   :  { %10308 = vst [vmem:[#allocation18_spill] sm:$0xff] %v7359_v50  ;;  %10309 = vst [vmem:[#allocation19_spill] sm:$0xff] %v7364_v51 }
 0x484   :  { %v4840_v59 = vpop.eup %4839 }
 0x485   :  { %v2025_v63 = vrot.slane %v4840_v59, 2  ;;  %v4842_v2 = vpop.eup %4841  ;;  %v2031_v61 = vrot.slane %v4840_v59, 4 }
 0x486   :  { %v2028_v56 = vmul.f32 %v4842_v2, %v4840_v59  ;;  %v7371_v59 = vld [vmem:[%s9093_s1 + $0x68] sm:$0xff]  ;;  %v7383_v2 = vld [vmem:[%s9093_s1 + $0x60] sm:$0xff] }
 0x487   :  { %v2027_v55 = vmul.f32 %v2025_v63, %v2013_v0  ;;  %10310 = vst [vmem:[#allocation20_spill] sm:$0xff] %v7371_v59  ;;  %v7376_v63 = vld [vmem:[%s9093_s1 + $0x78] sm:$0xff]  ;;  %10312 = vst [vmem:[#allocation22_spill] sm:$0xff] %v7383_v2  ;;  %v7388_v0 = vld [vmem:[%s9093_s1 + $0x70] sm:$0xff] }
 0x488   :  { %10311 = vst [vmem:[#allocation21_spill] sm:$0xff] %v7376_v63  ;;  %10313 = vst [vmem:[#allocation23_spill] sm:$0xff] %v7388_v0 }
 0x489   :  { %v2029_v58 = vadd.f32 %v2028_v56, %v2027_v55  ;;  %v7395_v56 = vld [vmem:[%s9093_s1 + $0x48] sm:$0xff]  ;;  %v7400_v55 = vld [vmem:[%s9093_s1 + $0x58] sm:$0xff] }
 0x48a   :  { %10314 = vst [vmem:[#allocation24_spill] sm:$0xff] %v7395_v56  ;;  %10315 = vst [vmem:[#allocation25_spill] sm:$0xff] %v7400_v55 }
 0x48b   :  { %4843 = vtanh.f32 %v2029_v58  ;;  %2353 = vst [vmem:[#allocation3] sm:$0x3] %v2029_v58  ;;  %v7407_v58 = vld [vmem:[%s9093_s1 + $0x40] sm:$0xff] }
 0x48c   :  { %10316 = vst [vmem:[#allocation26_spill] sm:$0xff] %v7407_v58 }
 0x498   :  { %v4844_v49 = vpop.eup %4843 }
 0x499   :  { %v2033_v53 = vmul.f32 %v4844_v49, %v2031_v61  ;;  %v7412_v61 = vld [vmem:[%s9093_s1 + $0x50] sm:$0xff]  ;;  %v7419_v49 = vld [vmem:[%s9093_s1 + $0x28] sm:$0xff] }
 0x49a   :  { %10317 = vst [vmem:[#allocation27_spill] sm:$0xff] %v7412_v61  ;;  %10318 = vst [vmem:[#allocation28_spill] sm:$0xff] %v7419_v49 }
 0x49b   :  { %2250 = vmatmul.mubr.f32.vlgmr.msra.gmra.mxu0 %v2033_v53  ;;  %2352 = vst [vmem:[#allocation2] sm:$0x3] %v2033_v53  ;;  %2321 = vmatmul.mubr.f32.vlgmr.msra.gmra.mxu1 %v2033_v53  ;;  %v7424_v53 = vld [vmem:[%s9093_s1 + $0x38] sm:$0xff] }
 0x49c   :  { %2426 = vmatpush1.msra.mxu0 %v7099_v3  ;;  %2497 = vmatpush1.msra.mxu1 %v7104_v4  ;;  %10319 = vst [vmem:[#allocation29_spill] sm:$0xff] %v7424_v53 }
 0x49d   :  { %2427 = vmatprep.subr.mxu0 %v7109_v5  ;;  %2498 = vmatprep.subr.mxu1 %v7114_v6 }
 0x49e   :  { %2428 = vmatpush1.msra.mxu0 %v7119_v7  ;;  %2499 = vmatpush1.msra.mxu1 %v7124_v8 }
 0x49f   :  { %2429 = vmatprep.subr.mxu0 %v7131_v9  ;;  %2500 = vmatprep.subr.mxu1 %v7136_v10 }
 0x4a0   :  { %2430 = vmatpush1.msra.mxu0 %v7143_v22  ;;  %2501 = vmatpush1.msra.mxu1 %v7148_v18 }
 0x4a1   :  { %2431 = vmatprep.subr.mxu0 %v7155_v16  ;;  %2502 = vmatprep.subr.mxu1 %v7160_v19 }
 0x4a2   :  { %2432 = vmatpush1.msra.mxu0 %v7167_v29  ;;  %2503 = vmatpush1.msra.mxu1 %v7172_v40 }
 0x4a3   :  { %2433 = vmatprep.subr.mxu0 %v7179_v20  ;;  %2504 = vmatprep.subr.mxu1 %v7184_v21 }
 0x4a4   :  { %2434 = vmatpush1.msra.mxu0 %v7191_v27  ;;  %2505 = vmatpush1.msra.mxu1 %v7196_v17 }
 0x4a5   :  { %2435 = vmatprep.subr.mxu0 %v7203_v25  ;;  %2506 = vmatprep.subr.mxu1 %v7208_v23 }
 0x4a6   :  { %2436 = vmatpush1.msra.mxu0 %v7215_v24  ;;  %2507 = vmatpush1.msra.mxu1 %v7220_v14 }
 0x4a7   :  { %2437 = vmatprep.subr.mxu0 %v7227_v12  ;;  %2508 = vmatprep.subr.mxu1 %v7232_v13 }
 0x4a8   :  { %2438 = vmatpush1.msra.mxu0 %v7239_v28  ;;  %2509 = vmatpush1.msra.mxu1 %v7244_v26 }
 0x4a9   :  { %2439 = vmatprep.subr.mxu0 %v7251_v11  ;;  %2510 = vmatprep.subr.mxu1 %v7256_v30 }
 0x4aa   :  { %2440 = vmatpush1.msra.mxu0 %v7263_v31  ;;  %2511 = vmatpush1.msra.mxu1 %v7268_v32 }
 0x4ab   :  { %2441 = vmatprep.subr.mxu0 %v7275_v33  ;;  %2512 = vmatprep.subr.mxu1 %v7280_v34 }
 0x4ac   :  { %2442 = vmatpush1.msra.mxu0 %v7287_v35  ;;  %2513 = vmatpush1.msra.mxu1 %v7292_v37 }
 0x4ad   :  { %2443 = vmatprep.subr.mxu0 %v7299_v38  ;;  %2514 = vmatprep.subr.mxu1 %v7304_v39 }
 0x4ae   :  { %2444 = vmatpush1.msra.mxu0 %v7311_v41  ;;  %2515 = vmatpush1.msra.mxu1 %v7316_v42 }
 0x4af   :  { %2445 = vmatprep.subr.mxu0 %v7323_v43  ;;  %2516 = vmatprep.subr.mxu1 %v7328_v44 }
 0x4b0   :  { %2446 = vmatpush1.msra.mxu0 %v7335_v45  ;;  %2517 = vmatpush1.msra.mxu1 %v7340_v46 }
 0x4b1   :  { %2447 = vmatprep.subr.mxu0 %v7347_v47  ;;  %2518 = vmatprep.subr.mxu1 %v7352_v48 }
 0x4b2   :  { %2448 = vmatpush1.msra.mxu0 %v7359_v50  ;;  %2519 = vmatpush1.msra.mxu1 %v7364_v51 }
 0x4b3   :  { %2449 = vmatprep.subr.mxu0 %v7371_v59  ;;  %2520 = vmatprep.subr.mxu1 %v7376_v63  ;;  %v7756_v63 = vld [vmem:[#allocation4 + $0x2f8] sm:$0xff]  ;;  %v7772_v59 = vld [vmem:[#allocation4 + $0x2c0] sm:$0xff] }
 0x4b4   :  { %2450 = vmatpush1.msra.mxu0 %v7383_v2  ;;  %2521 = vmatpush1.msra.mxu1 %v7388_v0  ;;  %v7431_v2 = vld [vmem:[%s9093_s1 + $0x20] sm:$0xff]  ;;  %v7436_v0 = vld [vmem:[%s9093_s1 + $0x30] sm:$0xff]  ;;  %10423 = vst [vmem:[#allocation133_spill] sm:$0xff] %v7756_v63  ;;  %10428 = vst [vmem:[#allocation138_spill] sm:$0xff] %v7772_v59 }
 0x4b5   :  { %2451 = vmatprep.subr.mxu0 %v7395_v56  ;;  %2522 = vmatprep.subr.mxu1 %v7400_v55  ;;  %10320 = vst [vmem:[#allocation30_spill] sm:$0xff] %v7431_v2  ;;  %10321 = vst [vmem:[#allocation31_spill] sm:$0xff] %v7436_v0  ;;  %v7443_v56 = vld [vmem:[%s9093_s1 + $0x8] sm:$0xff]  ;;  %v7448_v55 = vld [vmem:[%s9093_s1 + $0x18] sm:$0xff] }
 0x4b6   :  { %2452 = vmatpush1.msra.mxu0 %v7407_v58  ;;  %2523 = vmatpush1.msra.mxu1 %v7412_v61  ;;  %10322 = vst [vmem:[#allocation32_spill] sm:$0xff] %v7443_v56  ;;  %10323 = vst [vmem:[#allocation33_spill] sm:$0xff] %v7448_v55  ;;  %v7455_v58 = vld [vmem:[%s9093_s1] sm:$0xff]  ;;  %v7462_v61 = vld [vmem:[%s9093_s1 + $0x10] sm:$0xff] }
 0x4b7   :  { %2453 = vmatprep.subr.mxu0 %v7419_v49  ;;  %2524 = vmatprep.subr.mxu1 %v7424_v53  ;;  %10324 = vst [vmem:[#allocation34_spill] sm:$0xff] %v7455_v58  ;;  %10325 = vst [vmem:[#allocation35_spill] sm:$0xff] %v7462_v61  ;;  %v7472_v53 = vld [vmem:[#allocation4 + $0x1f8] sm:$0xff]  ;;  %v7748_v49 = vld [vmem:[#allocation4 + $0x300] sm:$0xff] }
 0x4b8   :  { %2454 = vmatpush1.msra.mxu0 %v7431_v2  ;;  %2525 = vmatpush1.msra.mxu1 %v7436_v0  ;;  %v2360_v2 = vld [vmem:[#allocation2] sm:$0x3]  ;;  %v7470_v0 = vld [vmem:[#allocation4 + $0x1e8] sm:$0xff]  ;;  %10327 = vst [vmem:[#allocation37_spill] sm:$0xff] %v7472_v53  ;;  %10420 = vst [vmem:[#allocation130_spill] sm:$0xff] %v7748_v49 }
 0x4b9   :  { %2455 = vmatprep.subr.mxu0 %v7443_v56  ;;  %2526 = vmatprep.subr.mxu1 %v7448_v55  ;;  %10326 = vst [vmem:[#allocation36_spill] sm:$0xff] %v7470_v0  ;;  %v7476_v55 = vld [vmem:[#allocation4 + $0x1e0] sm:$0xff]  ;;  %v7740_v56 = vld [vmem:[#allocation4 + $0x330] sm:$0xff] }
 0x4ba   :  { %2456 = vmatpush1.msra.mxu0 %v7455_v58  ;;  %2489 = vmatprep.mubr.f32.mxu0 %v10173_v52  ;;  %10328 = vst [vmem:[#allocation38_spill] sm:$0xff] %v7476_v55  ;;  %v7478_v58 = vld [vmem:[#allocation4 + $0x1f0] sm:$0xff]  ;;  %10417 = vst [vmem:[#allocation127_spill] sm:$0xff] %v7740_v56 }
 0x4bb   :  { %2527 = vmatpush1.msra.mxu1 %v7462_v61  ;;  %2560 = vmatprep.mubr.f32.mxu1 %v10173_v52  ;;  %10329 = vst [vmem:[#allocation39_spill] sm:$0xff] %v7478_v58  ;;  %v7482_v61 = vld [vmem:[#allocation4 + $0x1c8] sm:$0xff]  ;;  %v7484_v52 = vld [vmem:[#allocation4 + $0x1d8] sm:$0xff] }
 0x4bc   :  { %2490 = vmatmul.mubr.f32.vlgmr.msra.gmra.mxu0 %v2360_v2  ;;  %2561 = vmatmul.mubr.f32.vlgmr.msra.gmra.mxu1 %v2360_v2  ;;  %10330 = vst [vmem:[#allocation40_spill] sm:$0xff] %v7482_v61  ;;  %10331 = vst [vmem:[#allocation41_spill] sm:$0xff] %v7484_v52  ;;  %v7488_v2 = vld [vmem:[#allocation4 + $0x1c0] sm:$0xff] }
 0x4bd   :  { %2762 = vmatprep.subr.mxu0 %v7470_v0  ;;  %2833 = vmatprep.subr.mxu1 %v7472_v53  ;;  %10332 = vst [vmem:[#allocation42_spill] sm:$0xff] %v7488_v2  ;;  %v7490_v0 = vld [vmem:[#allocation4 + $0x1d0] sm:$0xff]  ;;  %v7494_v53 = vld [vmem:[#allocation4 + $0x1a8] sm:$0xff] }
 0x4be   :  { %2763 = vmatpush1.msra.mxu0 %v7476_v55  ;;  %2834 = vmatpush1.msra.mxu1 %v7478_v58  ;;  %10333 = vst [vmem:[#allocation43_spill] sm:$0xff] %v7490_v0  ;;  %10334 = vst [vmem:[#allocation44_spill] sm:$0xff] %v7494_v53  ;;  %v7496_v55 = vld [vmem:[#allocation4 + $0x1b8] sm:$0xff]  ;;  %v7500_v58 = vld [vmem:[#allocation4 + $0x1a0] sm:$0xff] }
 0x4bf   :  { %2764 = vmatprep.subr.mxu0 %v7482_v61  ;;  %2835 = vmatprep.subr.mxu1 %v7484_v52  ;;  %10335 = vst [vmem:[#allocation45_spill] sm:$0xff] %v7496_v55  ;;  %10336 = vst [vmem:[#allocation46_spill] sm:$0xff] %v7500_v58  ;;  %v7502_v61 = vld [vmem:[#allocation4 + $0x1b0] sm:$0xff]  ;;  %v7506_v52 = vld [vmem:[#allocation4 + $0x188] sm:$0xff] }
 0x4c0   :  { %2765 = vmatpush1.msra.mxu0 %v7488_v2  ;;  %2836 = vmatpush1.msra.mxu1 %v7490_v0  ;;  %10337 = vst [vmem:[#allocation47_spill] sm:$0xff] %v7502_v61  ;;  %10338 = vst [vmem:[#allocation48_spill] sm:$0xff] %v7506_v52  ;;  %v7508_v2 = vld [vmem:[#allocation4 + $0x198] sm:$0xff]  ;;  %v7512_v0 = vld [vmem:[#allocation4 + $0x180] sm:$0xff] }
 0x4c1   :  { %2766 = vmatprep.subr.mxu0 %v7494_v53  ;;  %2837 = vmatprep.subr.mxu1 %v7496_v55  ;;  %10339 = vst [vmem:[#allocation49_spill] sm:$0xff] %v7508_v2  ;;  %10340 = vst [vmem:[#allocation50_spill] sm:$0xff] %v7512_v0  ;;  %v7514_v53 = vld [vmem:[#allocation4 + $0x190] sm:$0xff]  ;;  %v7518_v55 = vld [vmem:[#allocation4 + $0x168] sm:$0xff] }
 0x4c2   :  { %2767 = vmatpush1.msra.mxu0 %v7500_v58  ;;  %2838 = vmatpush1.msra.mxu1 %v7502_v61  ;;  %10341 = vst [vmem:[#allocation51_spill] sm:$0xff] %v7514_v53  ;;  %10342 = vst [vmem:[#allocation52_spill] sm:$0xff] %v7518_v55  ;;  %v7520_v58 = vld [vmem:[#allocation4 + $0x178] sm:$0xff]  ;;  %v7524_v61 = vld [vmem:[#allocation4 + $0x160] sm:$0xff] }
 0x4c3   :  { %2768 = vmatprep.subr.mxu0 %v7506_v52  ;;  %2839 = vmatprep.subr.mxu1 %v7508_v2  ;;  %10343 = vst [vmem:[#allocation53_spill] sm:$0xff] %v7520_v58  ;;  %10344 = vst [vmem:[#allocation54_spill] sm:$0xff] %v7524_v61  ;;  %v7526_v52 = vld [vmem:[#allocation4 + $0x170] sm:$0xff]  ;;  %v7530_v2 = vld [vmem:[#allocation4 + $0x148] sm:$0xff] }
 0x4c4   :  { %2769 = vmatpush1.msra.mxu0 %v7512_v0  ;;  %2840 = vmatpush1.msra.mxu1 %v7514_v53  ;;  %10345 = vst [vmem:[#allocation55_spill] sm:$0xff] %v7526_v52  ;;  %10346 = vst [vmem:[#allocation56_spill] sm:$0xff] %v7530_v2  ;;  %v7532_v0 = vld [vmem:[#allocation4 + $0x158] sm:$0xff]  ;;  %v7536_v53 = vld [vmem:[#allocation4 + $0x140] sm:$0xff] }
 0x4c5   :  { %2770 = vmatprep.subr.mxu0 %v7518_v55  ;;  %2841 = vmatprep.subr.mxu1 %v7520_v58  ;;  %10347 = vst [vmem:[#allocation57_spill] sm:$0xff] %v7532_v0  ;;  %10348 = vst [vmem:[#allocation58_spill] sm:$0xff] %v7536_v53  ;;  %v7538_v55 = vld [vmem:[#allocation4 + $0x150] sm:$0xff]  ;;  %v7542_v58 = vld [vmem:[#allocation4 + $0x128] sm:$0xff] }
 0x4c6   :  { %2771 = vmatpush1.msra.mxu0 %v7524_v61  ;;  %2842 = vmatpush1.msra.mxu1 %v7526_v52  ;;  %10349 = vst [vmem:[#allocation59_spill] sm:$0xff] %v7538_v55  ;;  %10350 = vst [vmem:[#allocation60_spill] sm:$0xff] %v7542_v58  ;;  %v7544_v61 = vld [vmem:[#allocation4 + $0x138] sm:$0xff]  ;;  %v7548_v52 = vld [vmem:[#allocation4 + $0x120] sm:$0xff] }
 0x4c7   :  { %2772 = vmatprep.subr.mxu0 %v7530_v2  ;;  %2843 = vmatprep.subr.mxu1 %v7532_v0  ;;  %10351 = vst [vmem:[#allocation61_spill] sm:$0xff] %v7544_v61  ;;  %10352 = vst [vmem:[#allocation62_spill] sm:$0xff] %v7548_v52  ;;  %v7550_v2 = vld [vmem:[#allocation4 + $0x130] sm:$0xff]  ;;  %v7554_v0 = vld [vmem:[#allocation4 + $0x108] sm:$0xff] }
 0x4c8   :  { %2773 = vmatpush1.msra.mxu0 %v7536_v53  ;;  %2844 = vmatpush1.msra.mxu1 %v7538_v55  ;;  %10353 = vst [vmem:[#allocation63_spill] sm:$0xff] %v7550_v2  ;;  %10354 = vst [vmem:[#allocation64_spill] sm:$0xff] %v7554_v0  ;;  %v7556_v53 = vld [vmem:[#allocation4 + $0x118] sm:$0xff]  ;;  %v7560_v55 = vld [vmem:[#allocation4 + $0x100] sm:$0xff] }
 0x4c9   :  { %2774 = vmatprep.subr.mxu0 %v7542_v58  ;;  %2845 = vmatprep.subr.mxu1 %v7544_v61  ;;  %10355 = vst [vmem:[#allocation65_spill] sm:$0xff] %v7556_v53  ;;  %10356 = vst [vmem:[#allocation66_spill] sm:$0xff] %v7560_v55  ;;  %v7562_v58 = vld [vmem:[#allocation4 + $0x110] sm:$0xff]  ;;  %v7566_v61 = vld [vmem:[#allocation4 + $0xe8] sm:$0xff] }
 0x4ca   :  { %2775 = vmatpush1.msra.mxu0 %v7548_v52  ;;  %2846 = vmatpush1.msra.mxu1 %v7550_v2  ;;  %10357 = vst [vmem:[#allocation67_spill] sm:$0xff] %v7562_v58  ;;  %10358 = vst [vmem:[#allocation68_spill] sm:$0xff] %v7566_v61  ;;  %v7568_v52 = vld [vmem:[#allocation4 + $0xf8] sm:$0xff]  ;;  %v7572_v2 = vld [vmem:[#allocation4 + $0xe0] sm:$0xff] }
 0x4cb   :  { %2776 = vmatprep.subr.mxu0 %v7554_v0  ;;  %2847 = vmatprep.subr.mxu1 %v7556_v53  ;;  %10359 = vst [vmem:[#allocation69_spill] sm:$0xff] %v7568_v52  ;;  %10360 = vst [vmem:[#allocation70_spill] sm:$0xff] %v7572_v2  ;;  %v7574_v0 = vld [vmem:[#allocation4 + $0xf0] sm:$0xff]  ;;  %v7578_v53 = vld [vmem:[#allocation4 + $0xc8] sm:$0xff] }
 0x4cc   :  { %2777 = vmatpush1.msra.mxu0 %v7560_v55  ;;  %2848 = vmatpush1.msra.mxu1 %v7562_v58  ;;  %10361 = vst [vmem:[#allocation71_spill] sm:$0xff] %v7574_v0  ;;  %10362 = vst [vmem:[#allocation72_spill] sm:$0xff] %v7578_v53  ;;  %v7580_v55 = vld [vmem:[#allocation4 + $0xd8] sm:$0xff]  ;;  %v7584_v58 = vld [vmem:[#allocation4 + $0xc0] sm:$0xff] }
 0x4cd   :  { %2778 = vmatprep.subr.mxu0 %v7566_v61  ;;  %2849 = vmatprep.subr.mxu1 %v7568_v52  ;;  %10363 = vst [vmem:[#allocation73_spill] sm:$0xff] %v7580_v55  ;;  %10364 = vst [vmem:[#allocation74_spill] sm:$0xff] %v7584_v58  ;;  %v7586_v61 = vld [vmem:[#allocation4 + $0xd0] sm:$0xff]  ;;  %v7590_v52 = vld [vmem:[#allocation4 + $0xa8] sm:$0xff] }
 0x4ce   :  { %2779 = vmatpush1.msra.mxu0 %v7572_v2  ;;  %2850 = vmatpush1.msra.mxu1 %v7574_v0  ;;  %10365 = vst [vmem:[#allocation75_spill] sm:$0xff] %v7586_v61  ;;  %10366 = vst [vmem:[#allocation76_spill] sm:$0xff] %v7590_v52  ;;  %v7592_v2 = vld [vmem:[#allocation4 + $0xb8] sm:$0xff]  ;;  %v7596_v0 = vld [vmem:[#allocation4 + $0xa0] sm:$0xff] }
 0x4cf   :  { %2780 = vmatprep.subr.mxu0 %v7578_v53  ;;  %2851 = vmatprep.subr.mxu1 %v7580_v55  ;;  %10367 = vst [vmem:[#allocation77_spill] sm:$0xff] %v7592_v2  ;;  %10368 = vst [vmem:[#allocation78_spill] sm:$0xff] %v7596_v0  ;;  %v7598_v53 = vld [vmem:[#allocation4 + $0xb0] sm:$0xff]  ;;  %v7602_v55 = vld [vmem:[#allocation4 + $0x88] sm:$0xff] }
 0x4d0   :  { %2781 = vmatpush1.msra.mxu0 %v7584_v58  ;;  %2852 = vmatpush1.msra.mxu1 %v7586_v61  ;;  %10369 = vst [vmem:[#allocation79_spill] sm:$0xff] %v7598_v53  ;;  %10370 = vst [vmem:[#allocation80_spill] sm:$0xff] %v7602_v55  ;;  %v7604_v58 = vld [vmem:[#allocation4 + $0x98] sm:$0xff]  ;;  %v7608_v61 = vld [vmem:[#allocation4 + $0x80] sm:$0xff] }
 0x4d1   :  { %2782 = vmatprep.subr.mxu0 %v7590_v52  ;;  %2853 = vmatprep.subr.mxu1 %v7592_v2  ;;  %10371 = vst [vmem:[#allocation81_spill] sm:$0xff] %v7604_v58  ;;  %10372 = vst [vmem:[#allocation82_spill] sm:$0xff] %v7608_v61  ;;  %v7610_v52 = vld [vmem:[#allocation4 + $0x90] sm:$0xff]  ;;  %v7614_v2 = vld [vmem:[#allocation4 + $0x68] sm:$0xff] }
 0x4d2   :  { %2783 = vmatpush1.msra.mxu0 %v7596_v0  ;;  %2854 = vmatpush1.msra.mxu1 %v7598_v53  ;;  %10373 = vst [vmem:[#allocation83_spill] sm:$0xff] %v7610_v52  ;;  %10374 = vst [vmem:[#allocation84_spill] sm:$0xff] %v7614_v2  ;;  %v7616_v0 = vld [vmem:[#allocation4 + $0x78] sm:$0xff]  ;;  %v7620_v53 = vld [vmem:[#allocation4 + $0x60] sm:$0xff] }
 0x4d3   :  { %2784 = vmatprep.subr.mxu0 %v7602_v55  ;;  %2855 = vmatprep.subr.mxu1 %v7604_v58  ;;  %10375 = vst [vmem:[#allocation85_spill] sm:$0xff] %v7616_v0  ;;  %10376 = vst [vmem:[#allocation86_spill] sm:$0xff] %v7620_v53  ;;  %v7622_v55 = vld [vmem:[#allocation4 + $0x70] sm:$0xff]  ;;  %v7626_v58 = vld [vmem:[#allocation4 + $0x48] sm:$0xff] }
 0x4d4   :  { %2785 = vmatpush1.msra.mxu0 %v7608_v61  ;;  %2856 = vmatpush1.msra.mxu1 %v7610_v52  ;;  %10377 = vst [vmem:[#allocation87_spill] sm:$0xff] %v7622_v55  ;;  %10378 = vst [vmem:[#allocation88_spill] sm:$0xff] %v7626_v58  ;;  %v7628_v61 = vld [vmem:[#allocation4 + $0x58] sm:$0xff]  ;;  %v7632_v52 = vld [vmem:[#allocation4 + $0x40] sm:$0xff] }
 0x4d5   :  { %2786 = vmatprep.subr.mxu0 %v7614_v2  ;;  %2857 = vmatprep.subr.mxu1 %v7616_v0  ;;  %10379 = vst [vmem:[#allocation89_spill] sm:$0xff] %v7628_v61  ;;  %10380 = vst [vmem:[#allocation90_spill] sm:$0xff] %v7632_v52  ;;  %v7634_v2 = vld [vmem:[#allocation4 + $0x50] sm:$0xff]  ;;  %v7638_v0 = vld [vmem:[#allocation4 + $0x28] sm:$0xff] }
 0x4d6   :  { %2787 = vmatpush1.msra.mxu0 %v7620_v53  ;;  %2858 = vmatpush1.msra.mxu1 %v7622_v55  ;;  %10381 = vst [vmem:[#allocation91_spill] sm:$0xff] %v7634_v2  ;;  %10382 = vst [vmem:[#allocation92_spill] sm:$0xff] %v7638_v0  ;;  %v7640_v53 = vld [vmem:[#allocation4 + $0x38] sm:$0xff]  ;;  %v7644_v55 = vld [vmem:[#allocation4 + $0x20] sm:$0xff] }
 0x4d7   :  { %2788 = vmatprep.subr.mxu0 %v7626_v58  ;;  %2859 = vmatprep.subr.mxu1 %v7628_v61  ;;  %10383 = vst [vmem:[#allocation93_spill] sm:$0xff] %v7640_v53  ;;  %10384 = vst [vmem:[#allocation94_spill] sm:$0xff] %v7644_v55  ;;  %v7646_v58 = vld [vmem:[#allocation4 + $0x30] sm:$0xff]  ;;  %v7650_v61 = vld [vmem:[#allocation4 + $0x8] sm:$0xff] }
 0x4d8   :  { %2789 = vmatpush1.msra.mxu0 %v7632_v52  ;;  %2860 = vmatpush1.msra.mxu1 %v7634_v2  ;;  %10385 = vst [vmem:[#allocation95_spill] sm:$0xff] %v7646_v58  ;;  %10386 = vst [vmem:[#allocation96_spill] sm:$0xff] %v7650_v61  ;;  %v7652_v52 = vld [vmem:[#allocation4 + $0x18] sm:$0xff]  ;;  %v7656_v2 = vld [vmem:[#allocation4] sm:$0xff] }
 0x4d9   :  { %2790 = vmatprep.subr.mxu0 %v7638_v0  ;;  %2861 = vmatprep.subr.mxu1 %v7640_v53  ;;  %10387 = vst [vmem:[#allocation97_spill] sm:$0xff] %v7652_v52  ;;  %10388 = vst [vmem:[#allocation98_spill] sm:$0xff] %v7656_v2  ;;  %v7658_v0 = vld [vmem:[#allocation4 + $0x10] sm:$0xff]  ;;  %v7662_v53 = vld [vmem:[#allocation4 + $0x3e8] sm:$0xff] }
 0x4da   :  { %2791 = vmatpush1.msra.mxu0 %v7644_v55  ;;  %2862 = vmatpush1.msra.mxu1 %v7646_v58  ;;  %10389 = vst [vmem:[#allocation99_spill] sm:$0xff] %v7658_v0  ;;  %10390 = vst [vmem:[#allocation100_spill] sm:$0xff] %v7662_v53  ;;  %v7664_v55 = vld [vmem:[#allocation4 + $0x3f8] sm:$0xff]  ;;  %v7668_v58 = vld [vmem:[#allocation4 + $0x3e0] sm:$0xff] }
 0x4db   :  { %2792 = vmatprep.subr.mxu0 %v7650_v61  ;;  %2863 = vmatprep.subr.mxu1 %v7652_v52  ;;  %10391 = vst [vmem:[#allocation101_spill] sm:$0xff] %v7664_v55  ;;  %10392 = vst [vmem:[#allocation102_spill] sm:$0xff] %v7668_v58  ;;  %v7670_v61 = vld [vmem:[#allocation4 + $0x3f0] sm:$0xff]  ;;  %v7674_v52 = vld [vmem:[#allocation4 + $0x3c8] sm:$0xff] }
 0x4dc   :  { %2793 = vmatpush1.msra.mxu0 %v7656_v2  ;;  %2864 = vmatpush1.msra.mxu1 %v7658_v0  ;;  %10393 = vst [vmem:[#allocation103_spill] sm:$0xff] %v7670_v61  ;;  %10394 = vst [vmem:[#allocation104_spill] sm:$0xff] %v7674_v52  ;;  %v7676_v2 = vld [vmem:[#allocation4 + $0x3d8] sm:$0xff]  ;;  %v7680_v0 = vld [vmem:[#allocation4 + $0x3c0] sm:$0xff] }
 0x4dd   :  { %2794 = vmatprep.subr.mxu0 %v7662_v53  ;;  %2865 = vmatprep.subr.mxu1 %v7664_v55  ;;  %10395 = vst [vmem:[#allocation105_spill] sm:$0xff] %v7676_v2  ;;  %10396 = vst [vmem:[#allocation106_spill] sm:$0xff] %v7680_v0  ;;  %v7682_v53 = vld [vmem:[#allocation4 + $0x3d0] sm:$0xff]  ;;  %v7686_v55 = vld [vmem:[#allocation4 + $0x3a8] sm:$0xff] }
 0x4de   :  { %2795 = vmatpush2.msra.mxu0 %v7668_v58  ;;  %2866 = vmatpush2.msra.mxu1 %v7670_v61  ;;  %10397 = vst [vmem:[#allocation107_spill] sm:$0xff] %v7682_v53  ;;  %10398 = vst [vmem:[#allocation108_spill] sm:$0xff] %v7686_v55  ;;  %v7688_v58 = vld [vmem:[#allocation4 + $0x3b8] sm:$0xff]  ;;  %v7692_v61 = vld [vmem:[#allocation4 + $0x3a0] sm:$0xff] }
 0x4df   :  { %2796 = vmatprep.subr.mxu0 %v7674_v52  ;;  %2867 = vmatprep.subr.mxu1 %v7676_v2  ;;  %10399 = vst [vmem:[#allocation109_spill] sm:$0xff] %v7688_v58  ;;  %10400 = vst [vmem:[#allocation110_spill] sm:$0xff] %v7692_v61  ;;  %v7694_v52 = vld [vmem:[#allocation4 + $0x3b0] sm:$0xff]  ;;  %v7698_v2 = vld [vmem:[#allocation4 + $0x388] sm:$0xff] }
 0x4e0   :  { %2797 = vmatpush2.msra.mxu0 %v7680_v0  ;;  %2868 = vmatpush2.msra.mxu1 %v7682_v53  ;;  %10401 = vst [vmem:[#allocation111_spill] sm:$0xff] %v7694_v52  ;;  %10402 = vst [vmem:[#allocation112_spill] sm:$0xff] %v7698_v2  ;;  %v7700_v0 = vld [vmem:[#allocation4 + $0x398] sm:$0xff]  ;;  %v7704_v53 = vld [vmem:[#allocation4 + $0x380] sm:$0xff] }
 0x4e1   :  { %2798 = vmatprep.subr.mxu0 %v7686_v55  ;;  %2869 = vmatprep.subr.mxu1 %v7688_v58  ;;  %10403 = vst [vmem:[#allocation113_spill] sm:$0xff] %v7700_v0  ;;  %10404 = vst [vmem:[#allocation114_spill] sm:$0xff] %v7704_v53  ;;  %v7706_v55 = vld [vmem:[#allocation4 + $0x390] sm:$0xff]  ;;  %v7710_v58 = vld [vmem:[#allocation4 + $0x368] sm:$0xff] }
 0x4e2   :  { %2799 = vmatpush2.msra.mxu0 %v7692_v61  ;;  %2870 = vmatpush2.msra.mxu1 %v7694_v52  ;;  %10405 = vst [vmem:[#allocation115_spill] sm:$0xff] %v7706_v55  ;;  %10406 = vst [vmem:[#allocation116_spill] sm:$0xff] %v7710_v58  ;;  %v7712_v61 = vld [vmem:[#allocation4 + $0x378] sm:$0xff]  ;;  %v7716_v52 = vld [vmem:[#allocation4 + $0x360] sm:$0xff] }
 0x4e3   :  { %2800 = vmatprep.subr.mxu0 %v7698_v2  ;;  %2871 = vmatprep.subr.mxu1 %v7700_v0  ;;  %10407 = vst [vmem:[#allocation117_spill] sm:$0xff] %v7712_v61  ;;  %10408 = vst [vmem:[#allocation118_spill] sm:$0xff] %v7716_v52  ;;  %v7718_v2 = vld [vmem:[#allocation4 + $0x370] sm:$0xff]  ;;  %v7722_v0 = vld [vmem:[#allocation4 + $0x348] sm:$0xff] }
 0x4e4   :  { %2801 = vmatpush2.msra.mxu0 %v7704_v53  ;;  %2872 = vmatpush2.msra.mxu1 %v7706_v55  ;;  %10409 = vst [vmem:[#allocation119_spill] sm:$0xff] %v7718_v2  ;;  %10410 = vst [vmem:[#allocation120_spill] sm:$0xff] %v7722_v0  ;;  %v7724_v53 = vld [vmem:[#allocation4 + $0x358] sm:$0xff]  ;;  %v7728_v55 = vld [vmem:[#allocation4 + $0x340] sm:$0xff] }
 0x4e5   :  { %2802 = vmatprep.subr.mxu0 %v7710_v58  ;;  %2873 = vmatprep.subr.mxu1 %v7712_v61  ;;  %10411 = vst [vmem:[#allocation121_spill] sm:$0xff] %v7724_v53  ;;  %10412 = vst [vmem:[#allocation122_spill] sm:$0xff] %v7728_v55  ;;  %v7730_v58 = vld [vmem:[#allocation4 + $0x350] sm:$0xff]  ;;  %v7732_v61 = vld [vmem:[#allocation4 + $0x328] sm:$0xff] }
 0x4e6   :  { %2803 = vmatpush2.msra.mxu0 %v7716_v52  ;;  %2874 = vmatpush2.msra.mxu1 %v7718_v2  ;;  %10413 = vst [vmem:[#allocation123_spill] sm:$0xff] %v7730_v58  ;;  %10414 = vst [vmem:[#allocation124_spill] sm:$0xff] %v7732_v61  ;;  %v7736_v52 = vld [vmem:[#allocation4 + $0x338] sm:$0xff]  ;;  %v7738_v2 = vld [vmem:[#allocation4 + $0x320] sm:$0xff] }
 0x4e7   :  { %2804 = vmatprep.subr.mxu0 %v7722_v0  ;;  %2875 = vmatprep.subr.mxu1 %v7724_v53  ;;  %10415 = vst [vmem:[#allocation125_spill] sm:$0xff] %v7736_v52  ;;  %10416 = vst [vmem:[#allocation126_spill] sm:$0xff] %v7738_v2  ;;  %v7744_v53 = vld [vmem:[#allocation4 + $0x308] sm:$0xff]  ;;  %v7746_v0 = vld [vmem:[#allocation4 + $0x318] sm:$0xff] }
 0x4e8   :  { %2805 = vmatpush2.msra.mxu0 %v7728_v55  ;;  %2876 = vmatpush2.msra.mxu1 %v7730_v58  ;;  %10418 = vst [vmem:[#allocation128_spill] sm:$0xff] %v7744_v53  ;;  %10419 = vst [vmem:[#allocation129_spill] sm:$0xff] %v7746_v0  ;;  %v7752_v58 = vld [vmem:[#allocation4 + $0x310] sm:$0xff]  ;;  %v7754_v55 = vld [vmem:[#allocation4 + $0x2e8] sm:$0xff] }
 0x4e9   :  { %2806 = vmatprep.subr.mxu0 %v7732_v61  ;;  %2877 = vmatprep.subr.mxu1 %v7736_v52  ;;  %10421 = vst [vmem:[#allocation131_spill] sm:$0xff] %v7752_v58  ;;  %10422 = vst [vmem:[#allocation132_spill] sm:$0xff] %v7754_v55  ;;  %v7760_v52 = vld [vmem:[#allocation4 + $0x2e0] sm:$0xff]  ;;  %v7762_v61 = vld [vmem:[#allocation4 + $0x2f0] sm:$0xff] }
 0x4ea   :  { %2807 = vmatpush2.msra.mxu0 %v7738_v2  ;;  %2878 = vmatpush2.msra.mxu1 %v7740_v56  ;;  %10424 = vst [vmem:[#allocation134_spill] sm:$0xff] %v7760_v52  ;;  %10425 = vst [vmem:[#allocation135_spill] sm:$0xff] %v7762_v61  ;;  %v7766_v2 = vld [vmem:[#allocation4 + $0x2c8] sm:$0xff]  ;;  %v7768_v56 = vld [vmem:[#allocation4 + $0x2d8] sm:$0xff] }
 0x4eb   :  { %2808 = vmatprep.subr.mxu0 %v7744_v53  ;;  %2879 = vmatprep.subr.mxu1 %v7746_v0  ;;  %10426 = vst [vmem:[#allocation136_spill] sm:$0xff] %v7766_v2  ;;  %10427 = vst [vmem:[#allocation137_spill] sm:$0xff] %v7768_v56  ;;  %v7774_v53 = vld [vmem:[#allocation4 + $0x2d0] sm:$0xff]  ;;  %v7778_v0 = vld [vmem:[#allocation4 + $0x2a8] sm:$0xff] }
 0x4ec   :  { %2809 = vmatpush2.msra.mxu0 %v7748_v49  ;;  %2880 = vmatpush2.msra.mxu1 %v7752_v58  ;;  %10429 = vst [vmem:[#allocation139_spill] sm:$0xff] %v7774_v53  ;;  %10430 = vst [vmem:[#allocation140_spill] sm:$0xff] %v7778_v0  ;;  %v7780_v49 = vld [vmem:[#allocation4 + $0x2b8] sm:$0xff]  ;;  %v7784_v58 = vld [vmem:[#allocation4 + $0x2a0] sm:$0xff] }
 0x4ed   :  { %2810 = vmatprep.subr.mxu0 %v7754_v55  ;;  %2881 = vmatprep.subr.mxu1 %v7756_v63  ;;  %10431 = vst [vmem:[#allocation141_spill] sm:$0xff] %v7780_v49  ;;  %10432 = vst [vmem:[#allocation142_spill] sm:$0xff] %v7784_v58  ;;  %v7786_v55 = vld [vmem:[#allocation4 + $0x2b0] sm:$0xff]  ;;  %v7790_v63 = vld [vmem:[#allocation4 + $0x288] sm:$0xff] }
 0x4ee   :  { %2811 = vmatpush2.msra.mxu0 %v7760_v52  ;;  %2882 = vmatpush2.msra.mxu1 %v7762_v61  ;;  %10433 = vst [vmem:[#allocation143_spill] sm:$0xff] %v7786_v55  ;;  %10434 = vst [vmem:[#allocation144_spill] sm:$0xff] %v7790_v63  ;;  %v7792_v52 = vld [vmem:[#allocation4 + $0x298] sm:$0xff]  ;;  %v7796_v61 = vld [vmem:[#allocation4 + $0x280] sm:$0xff] }
 0x4ef   :  { %2812 = vmatprep.subr.mxu0 %v7766_v2  ;;  %2883 = vmatprep.subr.mxu1 %v7768_v56  ;;  %10435 = vst [vmem:[#allocation145_spill] sm:$0xff] %v7792_v52  ;;  %10436 = vst [vmem:[#allocation146_spill] sm:$0xff] %v7796_v61  ;;  %v7798_v2 = vld [vmem:[#allocation4 + $0x290] sm:$0xff]  ;;  %v7802_v56 = vld [vmem:[#allocation4 + $0x268] sm:$0xff] }
 0x4f0   :  { %2813 = vmatpush2.msra.mxu0 %v7772_v59  ;;  %2884 = vmatpush2.msra.mxu1 %v7774_v53  ;;  %10437 = vst [vmem:[#allocation147_spill] sm:$0xff] %v7798_v2  ;;  %10438 = vst [vmem:[#allocation148_spill] sm:$0xff] %v7802_v56  ;;  %v7804_v59 = vld [vmem:[#allocation4 + $0x278] sm:$0xff]  ;;  %v7808_v53 = vld [vmem:[#allocation4 + $0x260] sm:$0xff] }
 0x4f1   :  { %2814 = vmatprep.subr.mxu0 %v7778_v0  ;;  %2885 = vmatprep.subr.mxu1 %v7780_v49  ;;  %10439 = vst [vmem:[#allocation149_spill] sm:$0xff] %v7804_v59  ;;  %10440 = vst [vmem:[#allocation150_spill] sm:$0xff] %v7808_v53  ;;  %v7810_v0 = vld [vmem:[#allocation4 + $0x270] sm:$0xff]  ;;  %v7814_v49 = vld [vmem:[#allocation4 + $0x248] sm:$0xff] }
 0x4f2   :  { %2815 = vmatpush2.msra.mxu0 %v7784_v58  ;;  %2886 = vmatpush2.msra.mxu1 %v7786_v55  ;;  %10441 = vst [vmem:[#allocation151_spill] sm:$0xff] %v7810_v0  ;;  %10442 = vst [vmem:[#allocation152_spill] sm:$0xff] %v7814_v49  ;;  %v7816_v58 = vld [vmem:[#allocation4 + $0x258] sm:$0xff]  ;;  %v7820_v55 = vld [vmem:[#allocation4 + $0x240] sm:$0xff] }
 0x4f3   :  { %2816 = vmatprep.subr.mxu0 %v7790_v63  ;;  %2887 = vmatprep.subr.mxu1 %v7792_v52  ;;  %10443 = vst [vmem:[#allocation153_spill] sm:$0xff] %v7816_v58  ;;  %10444 = vst [vmem:[#allocation154_spill] sm:$0xff] %v7820_v55  ;;  %v7822_v63 = vld [vmem:[#allocation4 + $0x250] sm:$0xff]  ;;  %v7826_v52 = vld [vmem:[#allocation4 + $0x228] sm:$0xff] }
 0x4f4   :  { %2817 = vmatpush2.msra.mxu0 %v7796_v61  ;;  %2888 = vmatpush2.msra.mxu1 %v7798_v2  ;;  %10445 = vst [vmem:[#allocation155_spill] sm:$0xff] %v7822_v63  ;;  %10446 = vst [vmem:[#allocation156_spill] sm:$0xff] %v7826_v52  ;;  %v7828_v61 = vld [vmem:[#allocation4 + $0x238] sm:$0xff]  ;;  %v7832_v2 = vld [vmem:[#allocation4 + $0x220] sm:$0xff] }
 0x4f5   :  { %2818 = vmatprep.subr.mxu0 %v7802_v56  ;;  %2889 = vmatprep.subr.mxu1 %v7804_v59  ;;  %10447 = vst [vmem:[#allocation157_spill] sm:$0xff] %v7828_v61  ;;  %10448 = vst [vmem:[#allocation158_spill] sm:$0xff] %v7832_v2  ;;  %v7834_v56 = vld [vmem:[#allocation4 + $0x230] sm:$0xff]  ;;  %v7838_v59 = vld [vmem:[#allocation4 + $0x208] sm:$0xff] }
 0x4f6   :  { %2819 = vmatpush2.msra.mxu0 %v7808_v53  ;;  %2890 = vmatpush2.msra.mxu1 %v7810_v0  ;;  %10449 = vst [vmem:[#allocation159_spill] sm:$0xff] %v7834_v56  ;;  %10450 = vst [vmem:[#allocation160_spill] sm:$0xff] %v7838_v59  ;;  %v7840_v53 = vld [vmem:[#allocation4 + $0x218] sm:$0xff]  ;;  %v7844_v0 = vld [vmem:[#allocation4 + $0x200] sm:$0xff] }
 0x4f7   :  { %2820 = vmatprep.subr.mxu0 %v7814_v49  ;;  %2891 = vmatprep.subr.mxu1 %v7816_v58  ;;  %10451 = vst [vmem:[#allocation161_spill] sm:$0xff] %v7840_v53  ;;  %10452 = vst [vmem:[#allocation162_spill] sm:$0xff] %v7844_v0  ;;  %v7846_v49 = vld [vmem:[#allocation4 + $0x210] sm:$0xff] }
 0x4f8   :  { %2821 = vmatpush2.msra.mxu0 %v7820_v55  ;;  %2892 = vmatpush2.msra.mxu1 %v7822_v63  ;;  %10453 = vst [vmem:[#allocation163_spill] sm:$0xff] %v7846_v49 }
 0x4f9   :  { %2822 = vmatprep.subr.mxu0 %v7826_v52  ;;  %2893 = vmatprep.subr.mxu1 %v7828_v61  ;;  %v2163_v61 = vld [vmem:[%s9095_s3] sm:$0xf] }
 0x4fa   :  { %2823 = vmatpush2.msra.mxu0 %v7832_v2  ;;  %2894 = vmatpush2.msra.mxu1 %v7834_v56  ;;  %v2168_v2 = vrot.slane %v2163_v61, %v10303_v54  ;;  %v2172_v56 = vrot.slane %v2163_v61, %v10304_v1  ;;  %v2180_v58 = vrot.slane %v2163_v61, %v10305_v15 }
 0x4fb   :  { %2824 = vmatprep.subr.mxu0 %v7838_v59  ;;  %2895 = vmatprep.subr.mxu1 %v7840_v53 }
 0x4fc   :  { %2825 = vmatpush2.msra.mxu0 %v7844_v0  ;;  %2896 = vmatpush2.msra.mxu1 %v7846_v49 }
 0x4fd   :  { %3002 = vmatprep.subr.mxu0 %v7072_v60  ;;  %3073 = vmatprep.subr.mxu1 %v7077_v62  ;;  %v2176_v60 = vrot.slane %v2163_v61, %v6087_v36 }
 0x55b   :  { %v2251_v52 = vpop.f32.mrf.mxu0  ;;  %v2322_v49 = vpop.f32.mrf.mxu1 }
 0x55c   :  { %v2252_v59 = vadd.f32 %v2251_v52, %v2168_v2  ;;  %v2323_v62 = vadd.f32 %v2322_v49, %v2176_v60  ;;  %v2327_v60 = vld [vmem:[#allocation3 + $0x2] sm:$0x3] }
 0x55d   :  { %v2253_v63 = vpop.f32.mrf.mxu0  ;;  %v2324_v51 = vpop.f32.mrf.mxu1 }
 0x55e   :  { %v4729_v53 = vmul.f32 -1.442695, %v2252_v59  ;;  %v2254_v55 = vadd.f32 %v2253_v63, %v2172_v56  ;;  %v4731_v50 = vmul.f32 -1.442695, %v2323_v62  ;;  %v2325_v54 = vadd.f32 %v2324_v51, %v2180_v58 }
 0x560   :  { %4845 = vpow2.f32 %v4729_v53  ;;  %v4730_v0 = vmul.f32 -1.442695, %v2254_v55 }
 0x562   :  { %4847 = vpow2.f32 %v4730_v0 }
 0x563   :  { %4849 = vpow2.f32 %v4731_v50 }
 0x56d   :  { %v4846_v48 = vpop.eup %4845 }
 0x56e   :  { %v2337_v47 = vadd.f32 1.0, %v4846_v48 }
 0x56f   :  { %v4848_v1 = vpop.eup %4847 }
 0x570   :  { %4851 = vrcp.f32 %v2337_v47  ;;  %v2338_v52 = vadd.f32 1.0, %v4848_v1  ;;  %v4850_v59 = vpop.eup %4849  ;;  %v4733_v47 = vld [vmem:[%s9092_s0 + $0x20] sm:$0xff] }
 0x571   :  { %4853 = vtanh.f32 %v2325_v54  ;;  %v2339_v61 = vadd.f32 1.0, %v4850_v59 }
 0x572   :  { %4855 = vrcp.f32 %v2338_v52 }
 0x573   :  { %4857 = vrcp.f32 %v2339_v61 }
 0x57c   :  { %v2491_v63 = vpop.f32.mrf.mxu0  ;;  %v2562_v0 = vpop.f32.mrf.mxu1 }
 0x57d   :  { %v4852_v56 = vpop.eup %4851 }
 0x57e   :  { %v4854_v55 = vpop.eup %4853  ;;  %v2493_v53 = vpop.f32.mrf.mxu0 }
 0x57f   :  { %v2564_v49 = vpop.f32.mrf.mxu1  ;;  %v4856_v2 = vpop.eup %4855  ;;  %v2571_v62 = vcombine.low %v2491_v63, %v2493_v53  ;;  %v2348_v48 = vmul.f32 %v4854_v55, %v4852_v56 }
 0x580   :  { %v2572_v15 = vcombine.low %v2562_v0, %v2564_v49  ;;  %v2347_v51 = vmul.f32 %v4856_v2, %v2327_v60  ;;  %v4858_v63 = vpop.eup %4857 }
 0x581   :  { %v2579_v50 = vrot.slane %v2571_v62, %v10005_v57  ;;  %v2590_v62 = vld [vmem:[#allocation3] sm:$0x3] }
 0x582   :  { %v2586_v1 = vrot.slane %v2572_v15, %v10005_v57  ;;  %v2349_v54 = vadd.f32 %v2348_v48, %v2347_v51 }
 0x584   :  { %v2587_v58 = vcombine.low %v2579_v50, %v2586_v1  ;;  %4859 = vtanh.f32 %v2349_v54  ;;  %2355 = vst [vmem:[#allocation3 + $0x2] sm:$0x3] %v2349_v54 }
 0x586   :  { %v2589_v52 = vadd.f32 %v4733_v47, %v2587_v58  ;;  %v10495_v58 = vld [vmem:[#allocation56_spill] sm:$0xff] }
 0x588   :  { %v4734_v59 = vmul.f32 -1.442695, %v2589_v52  ;;  %v2598_v55 = vrot.slane %v2589_v52, 6  ;;  %v10496_v52 = vld [vmem:[#allocation57_spill] sm:$0xff] }
 0x58a   :  { %4861 = vpow2.f32 %v4734_v59  ;;  %v10497_v59 = vld [vmem:[#allocation58_spill] sm:$0xff] }
 0x591   :  { %v4860_v0 = vpop.eup %4859 }
 0x592   :  { %v2351_v53 = vmul.f32 %v4860_v0, %v4858_v63  ;;  %v10498_v63 = vld [vmem:[#allocation59_spill] sm:$0xff]  ;;  %v10499_v0 = vld [vmem:[#allocation60_spill] sm:$0xff] }
 0x594   :  { %4732 = vst [vmem:[%s9098_s6 + $0x6] sm:$0x3] %v2351_v53  ;;  %2354 = vst [vmem:[#allocation2 + $0x2] sm:$0x3] %v2351_v53  ;;  %v10500_v53 = vld [vmem:[#allocation61_spill] sm:$0xff] }
 0x597   :  { %v4862_v15 = vpop.eup %4861 }
 0x598   :  { %v2594_v56 = vadd.f32 1.0, %v4862_v15  ;;  %v10501_v15 = vld [vmem:[#allocation62_spill] sm:$0xff] }
 0x59a   :  { %4863 = vrcp.f32 %v2594_v56  ;;  %v10502_v56 = vld [vmem:[#allocation63_spill] sm:$0xff] }
 0x59b   :  { %4865 = vtanh.f32 %v2598_v55  ;;  %v2611_v49 = vld [vmem:[#allocation2 + $0x2] sm:$0x3]  ;;  %v10503_v55 = vld [vmem:[#allocation64_spill] sm:$0xff] }
 0x59c   :  { %2826 = vmatprep.mubr.f32.mxu0 %v2611_v49  ;;  %2897 = vmatprep.mubr.f32.mxu1 %v2611_v49  ;;  %v10504_v49 = vld [vmem:[#allocation65_spill] sm:$0xff] }
 0x5a7   :  { %v4864_v2 = vpop.eup %4863 }
 0x5a8   :  { %v2602_v61 = vrot.slane %v4864_v2, 2  ;;  %v4866_v60 = vpop.eup %4865  ;;  %v2608_v1 = vrot.slane %v4864_v2, 4 }
 0x5a9   :  { %v2605_v51 = vmul.f32 %v4866_v60, %v4864_v2  ;;  %v10505_v2 = vld [vmem:[#allocation66_spill] sm:$0xff]  ;;  %v10507_v60 = vld [vmem:[#allocation68_spill] sm:$0xff] }
 0x5aa   :  { %v2604_v48 = vmul.f32 %v2602_v61, %v2590_v62  ;;  %v10506_v61 = vld [vmem:[#allocation67_spill] sm:$0xff]  ;;  %v10508_v62 = vld [vmem:[#allocation69_spill] sm:$0xff] }
 0x5ac   :  { %v2606_v50 = vadd.f32 %v2605_v51, %v2604_v48  ;;  %v10509_v51 = vld [vmem:[#allocation70_spill] sm:$0xff]  ;;  %v10510_v48 = vld [vmem:[#allocation71_spill] sm:$0xff] }
 0x5ae   :  { %4867 = vtanh.f32 %v2606_v50  ;;  %2930 = vst [vmem:[#allocation3] sm:$0x3] %v2606_v50  ;;  %v10511_v50 = vld [vmem:[#allocation72_spill] sm:$0xff] }
 0x5bb   :  { %v4868_v54 = vpop.eup %4867 }
 0x5bc   :  { %v2610_v47 = vmul.f32 %v4868_v54, %v2608_v1  ;;  %v10512_v1 = vld [vmem:[#allocation73_spill] sm:$0xff]  ;;  %v10513_v54 = vld [vmem:[#allocation74_spill] sm:$0xff] }
 0x5be   :  { %2827 = vmatmul.mubr.f32.vlgmr.msra.gmra.mxu0 %v2610_v47  ;;  %2929 = vst [vmem:[#allocation2] sm:$0x3] %v2610_v47  ;;  %2898 = vmatmul.mubr.f32.vlgmr.msra.gmra.mxu1 %v2610_v47  ;;  %v10514_v47 = vld [vmem:[#allocation75_spill] sm:$0xff] }
 0x5bf   :  { %3003 = vmatpush1.msra.mxu0 %v7099_v3  ;;  %3074 = vmatpush1.msra.mxu1 %v7104_v4  ;;  %v10454_v3 = vld [vmem:[#allocation16_spill] sm:$0xff]  ;;  %v10455_v4 = vld [vmem:[#allocation17_spill] sm:$0xff] }
 0x5c0   :  { %3004 = vmatprep.subr.mxu0 %v7109_v5  ;;  %3075 = vmatprep.subr.mxu1 %v7114_v6  ;;  %v10456_v5 = vld [vmem:[#allocation18_spill] sm:$0xff]  ;;  %v10457_v6 = vld [vmem:[#allocation19_spill] sm:$0xff] }
 0x5c1   :  { %3005 = vmatpush1.msra.mxu0 %v7119_v7  ;;  %3076 = vmatpush1.msra.mxu1 %v7124_v8  ;;  %v10458_v7 = vld [vmem:[#allocation20_spill] sm:$0xff]  ;;  %v10459_v8 = vld [vmem:[#allocation21_spill] sm:$0xff] }
 0x5c2   :  { %3006 = vmatprep.subr.mxu0 %v7131_v9  ;;  %3077 = vmatprep.subr.mxu1 %v7136_v10  ;;  %v10460_v9 = vld [vmem:[#allocation22_spill] sm:$0xff]  ;;  %v10461_v10 = vld [vmem:[#allocation23_spill] sm:$0xff] }
 0x5c3   :  { %3007 = vmatpush1.msra.mxu0 %v7143_v22  ;;  %3078 = vmatpush1.msra.mxu1 %v7148_v18  ;;  %v10462_v22 = vld [vmem:[#allocation24_spill] sm:$0xff]  ;;  %v10463_v18 = vld [vmem:[#allocation25_spill] sm:$0xff] }
 0x5c4   :  { %3008 = vmatprep.subr.mxu0 %v7155_v16  ;;  %3079 = vmatprep.subr.mxu1 %v7160_v19  ;;  %v10464_v16 = vld [vmem:[#allocation26_spill] sm:$0xff]  ;;  %v10465_v19 = vld [vmem:[#allocation27_spill] sm:$0xff] }
 0x5c5   :  { %3009 = vmatpush1.msra.mxu0 %v7167_v29  ;;  %3080 = vmatpush1.msra.mxu1 %v7172_v40  ;;  %v10466_v29 = vld [vmem:[#allocation28_spill] sm:$0xff]  ;;  %v10467_v40 = vld [vmem:[#allocation29_spill] sm:$0xff] }
 0x5c6   :  { %3010 = vmatprep.subr.mxu0 %v7179_v20  ;;  %3081 = vmatprep.subr.mxu1 %v7184_v21  ;;  %v10468_v20 = vld [vmem:[#allocation30_spill] sm:$0xff]  ;;  %v10469_v21 = vld [vmem:[#allocation31_spill] sm:$0xff] }
 0x5c7   :  { %3011 = vmatpush1.msra.mxu0 %v7191_v27  ;;  %3082 = vmatpush1.msra.mxu1 %v7196_v17  ;;  %v10470_v27 = vld [vmem:[#allocation32_spill] sm:$0xff]  ;;  %v10471_v17 = vld [vmem:[#allocation33_spill] sm:$0xff] }
 0x5c8   :  { %3012 = vmatprep.subr.mxu0 %v7203_v25  ;;  %3083 = vmatprep.subr.mxu1 %v7208_v23  ;;  %v10472_v25 = vld [vmem:[#allocation34_spill] sm:$0xff]  ;;  %v10473_v23 = vmov 0.0  }
 0x5c9   :  { %3013 = vmatpush1.msra.mxu0 %v7215_v24  ;;  %3084 = vmatpush1.msra.mxu1 %v7220_v14  ;;  %v10474_v24 = vld [vmem:[#allocation35_spill] sm:$0xff] }
 0x5ca   :  { %3014 = vmatprep.subr.mxu0 %v7227_v12  ;;  %3085 = vmatprep.subr.mxu1 %v7232_v13  ;;  %v2937_v14 = vld [vmem:[#allocation2] sm:$0x3]  ;;  %v10475_v12 = vld [vmem:[#allocation36_spill] sm:$0xff]  ;;  %v10476_v13 = vld [vmem:[#allocation37_spill] sm:$0xff] }
 0x5cb   :  { %3015 = vmatpush1.msra.mxu0 %v7239_v28  ;;  %3086 = vmatpush1.msra.mxu1 %v7244_v26  ;;  %v10477_v28 = vld [vmem:[#allocation38_spill] sm:$0xff]  ;;  %v10478_v26 = vld [vmem:[#allocation39_spill] sm:$0xff] }
 0x5cc   :  { %3016 = vmatprep.subr.mxu0 %v7251_v11  ;;  %3087 = vmatprep.subr.mxu1 %v7256_v30  ;;  %v10479_v11 = vld [vmem:[#allocation40_spill] sm:$0xff]  ;;  %v10480_v30 = vld [vmem:[#allocation41_spill] sm:$0xff] }
 0x5cd   :  { %3017 = vmatpush1.msra.mxu0 %v7263_v31  ;;  %3088 = vmatpush1.msra.mxu1 %v7268_v32  ;;  %v10481_v31 = vld [vmem:[#allocation42_spill] sm:$0xff]  ;;  %v10482_v32 = vld [vmem:[#allocation43_spill] sm:$0xff] }
 0x5ce   :  { %3018 = vmatprep.subr.mxu0 %v7275_v33  ;;  %3089 = vmatprep.subr.mxu1 %v7280_v34  ;;  %v10483_v33 = vld [vmem:[#allocation44_spill] sm:$0xff]  ;;  %v10484_v34 = vld [vmem:[#allocation45_spill] sm:$0xff] }
 0x5cf   :  { %3019 = vmatpush1.msra.mxu0 %v7287_v35  ;;  %3090 = vmatpush1.msra.mxu1 %v7292_v37  ;;  %v10485_v35 = vld [vmem:[#allocation46_spill] sm:$0xff]  ;;  %v10486_v37 = vld [vmem:[#allocation47_spill] sm:$0xff] }
 0x5d0   :  { %3020 = vmatprep.subr.mxu0 %v7299_v38  ;;  %3091 = vmatprep.subr.mxu1 %v7304_v39  ;;  %v10487_v38 = vld [vmem:[#allocation48_spill] sm:$0xff]  ;;  %v10488_v39 = vld [vmem:[#allocation49_spill] sm:$0xff] }
 0x5d1   :  { %3021 = vmatpush1.msra.mxu0 %v7311_v41  ;;  %3092 = vmatpush1.msra.mxu1 %v7316_v42  ;;  %v10489_v41 = vld [vmem:[#allocation50_spill] sm:$0xff]  ;;  %v10490_v42 = vld [vmem:[#allocation51_spill] sm:$0xff] }
 0x5d2   :  { %3022 = vmatprep.subr.mxu0 %v7323_v43  ;;  %3093 = vmatprep.subr.mxu1 %v7328_v44  ;;  %v10491_v43 = vld [vmem:[#allocation52_spill] sm:$0xff]  ;;  %v10492_v44 = vld [vmem:[#allocation53_spill] sm:$0xff] }
 0x5d3   :  { %3023 = vmatpush1.msra.mxu0 %v7335_v45  ;;  %3094 = vmatpush1.msra.mxu1 %v7340_v46  ;;  %v10493_v45 = vld [vmem:[#allocation54_spill] sm:$0xff]  ;;  %v10494_v46 = vld [vmem:[#allocation55_spill] sm:$0xff] }
 0x5d4   :  { %3024 = vmatprep.subr.mxu0 %v10454_v3  ;;  %3095 = vmatprep.subr.mxu1 %v10455_v4  ;;  %v10515_v3 = vld [vmem:[#allocation76_spill] sm:$0xff]  ;;  %v10516_v4 = vld [vmem:[#allocation77_spill] sm:$0xff] }
 0x5d5   :  { %3025 = vmatpush1.msra.mxu0 %v10456_v5  ;;  %3096 = vmatpush1.msra.mxu1 %v10457_v6  ;;  %v10517_v5 = vld [vmem:[#allocation78_spill] sm:$0xff]  ;;  %v10518_v6 = vld [vmem:[#allocation79_spill] sm:$0xff] }
 0x5d6   :  { %3026 = vmatprep.subr.mxu0 %v10458_v7  ;;  %3097 = vmatprep.subr.mxu1 %v10459_v8  ;;  %v10519_v7 = vld [vmem:[#allocation80_spill] sm:$0xff]  ;;  %v10520_v8 = vld [vmem:[#allocation81_spill] sm:$0xff] }
 0x5d7   :  { %3027 = vmatpush1.msra.mxu0 %v10460_v9  ;;  %3098 = vmatpush1.msra.mxu1 %v10461_v10  ;;  %v10521_v9 = vld [vmem:[#allocation82_spill] sm:$0xff]  ;;  %v10522_v10 = vld [vmem:[#allocation83_spill] sm:$0xff] }
 0x5d8   :  { %3028 = vmatprep.subr.mxu0 %v10462_v22  ;;  %3099 = vmatprep.subr.mxu1 %v10463_v18  ;;  %v10523_v22 = vld [vmem:[#allocation84_spill] sm:$0xff]  ;;  %v10524_v18 = vld [vmem:[#allocation85_spill] sm:$0xff] }
 0x5d9   :  { %3029 = vmatpush1.msra.mxu0 %v10464_v16  ;;  %3100 = vmatpush1.msra.mxu1 %v10465_v19  ;;  %v10525_v16 = vld [vmem:[#allocation86_spill] sm:$0xff]  ;;  %v10526_v19 = vld [vmem:[#allocation87_spill] sm:$0xff] }
 0x5da   :  { %3030 = vmatprep.subr.mxu0 %v10466_v29  ;;  %3101 = vmatprep.subr.mxu1 %v10467_v40  ;;  %v10527_v29 = vld [vmem:[#allocation88_spill] sm:$0xff]  ;;  %v10528_v40 = vld [vmem:[#allocation89_spill] sm:$0xff] }
 0x5db   :  { %3031 = vmatpush1.msra.mxu0 %v10468_v20  ;;  %3102 = vmatpush1.msra.mxu1 %v10469_v21  ;;  %v10529_v20 = vld [vmem:[#allocation90_spill] sm:$0xff]  ;;  %v10530_v21 = vld [vmem:[#allocation91_spill] sm:$0xff] }
 0x5dc   :  { %3032 = vmatprep.subr.mxu0 %v10470_v27  ;;  %3103 = vmatprep.subr.mxu1 %v10471_v17  ;;  %v10531_v27 = vld [vmem:[#allocation92_spill] sm:$0xff]  ;;  %v10532_v17 = vld [vmem:[#allocation93_spill] sm:$0xff] }
 0x5dd   :  { %3033 = vmatpush1.msra.mxu0 %v10472_v25  ;;  %3066 = vmatprep.mubr.f32.mxu0 %v10473_v23  ;;  %v10533_v25 = vld [vmem:[#allocation94_spill] sm:$0xff] }
 0x5de   :  { %3104 = vmatpush1.msra.mxu1 %v10474_v24  ;;  %3137 = vmatprep.mubr.f32.mxu1 %v10473_v23  ;;  %v10534_v24 = vld [vmem:[#allocation95_spill] sm:$0xff] }
 0x5df   :  { %3067 = vmatmul.mubr.f32.vlgmr.msra.gmra.mxu0 %v2937_v14  ;;  %3138 = vmatmul.mubr.f32.vlgmr.msra.gmra.mxu1 %v2937_v14  ;;  %v10535_v14 = vld [vmem:[#allocation96_spill] sm:$0xff] }
 0x5e0   :  { %3339 = vmatprep.subr.mxu0 %v10475_v12  ;;  %3410 = vmatprep.subr.mxu1 %v10476_v13  ;;  %v10536_v12 = vld [vmem:[#allocation97_spill] sm:$0xff]  ;;  %v10537_v13 = vld [vmem:[#allocation98_spill] sm:$0xff] }
 0x5e1   :  { %3340 = vmatpush1.msra.mxu0 %v10477_v28  ;;  %3411 = vmatpush1.msra.mxu1 %v10478_v26  ;;  %v10538_v28 = vld [vmem:[#allocation99_spill] sm:$0xff]  ;;  %v10539_v26 = vld [vmem:[#allocation100_spill] sm:$0xff] }
 0x5e2   :  { %3341 = vmatprep.subr.mxu0 %v10479_v11  ;;  %3412 = vmatprep.subr.mxu1 %v10480_v30  ;;  %v10540_v11 = vld [vmem:[#allocation101_spill] sm:$0xff]  ;;  %v10541_v30 = vld [vmem:[#allocation102_spill] sm:$0xff] }
 0x5e3   :  { %3342 = vmatpush1.msra.mxu0 %v10481_v31  ;;  %3413 = vmatpush1.msra.mxu1 %v10482_v32  ;;  %v10542_v31 = vld [vmem:[#allocation103_spill] sm:$0xff]  ;;  %v10543_v32 = vld [vmem:[#allocation104_spill] sm:$0xff] }
 0x5e4   :  { %3343 = vmatprep.subr.mxu0 %v10483_v33  ;;  %3414 = vmatprep.subr.mxu1 %v10484_v34  ;;  %v10544_v33 = vld [vmem:[#allocation105_spill] sm:$0xff]  ;;  %v10545_v34 = vld [vmem:[#allocation106_spill] sm:$0xff] }
 0x5e5   :  { %3344 = vmatpush1.msra.mxu0 %v10485_v35  ;;  %3415 = vmatpush1.msra.mxu1 %v10486_v37  ;;  %v10546_v35 = vld [vmem:[#allocation107_spill] sm:$0xff]  ;;  %v10547_v37 = vld [vmem:[#allocation108_spill] sm:$0xff] }
 0x5e6   :  { %3345 = vmatprep.subr.mxu0 %v10487_v38  ;;  %3416 = vmatprep.subr.mxu1 %v10488_v39  ;;  %v10548_v38 = vld [vmem:[#allocation109_spill] sm:$0xff]  ;;  %v10549_v39 = vld [vmem:[#allocation110_spill] sm:$0xff] }
 0x5e7   :  { %3346 = vmatpush1.msra.mxu0 %v10489_v41  ;;  %3417 = vmatpush1.msra.mxu1 %v10490_v42  ;;  %v10550_v41 = vld [vmem:[#allocation111_spill] sm:$0xff]  ;;  %v10551_v42 = vld [vmem:[#allocation112_spill] sm:$0xff] }
 0x5e8   :  { %3347 = vmatprep.subr.mxu0 %v10491_v43  ;;  %3418 = vmatprep.subr.mxu1 %v10492_v44  ;;  %v10552_v43 = vld [vmem:[#allocation113_spill] sm:$0xff]  ;;  %v10553_v44 = vld [vmem:[#allocation114_spill] sm:$0xff] }
 0x5e9   :  { %3348 = vmatpush1.msra.mxu0 %v10493_v45  ;;  %3419 = vmatpush1.msra.mxu1 %v10494_v46  ;;  %v10554_v45 = vld [vmem:[#allocation115_spill] sm:$0xff]  ;;  %v10555_v46 = vld [vmem:[#allocation116_spill] sm:$0xff] }
 0x5ea   :  { %3349 = vmatprep.subr.mxu0 %v10495_v58  ;;  %3420 = vmatprep.subr.mxu1 %v10496_v52  ;;  %v10556_v58 = vld [vmem:[#allocation117_spill] sm:$0xff]  ;;  %v10557_v52 = vld [vmem:[#allocation118_spill] sm:$0xff] }
 0x5eb   :  { %3350 = vmatpush1.msra.mxu0 %v10497_v59  ;;  %3421 = vmatpush1.msra.mxu1 %v10498_v63  ;;  %v10558_v59 = vld [vmem:[#allocation119_spill] sm:$0xff]  ;;  %v10559_v63 = vld [vmem:[#allocation120_spill] sm:$0xff] }
 0x5ec   :  { %3351 = vmatprep.subr.mxu0 %v10499_v0  ;;  %3422 = vmatprep.subr.mxu1 %v10500_v53  ;;  %v10560_v0 = vld [vmem:[#allocation121_spill] sm:$0xff]  ;;  %v10561_v53 = vld [vmem:[#allocation122_spill] sm:$0xff] }
 0x5ed   :  { %3352 = vmatpush1.msra.mxu0 %v10501_v15  ;;  %3423 = vmatpush1.msra.mxu1 %v10502_v56  ;;  %v10562_v15 = vld [vmem:[#allocation123_spill] sm:$0xff]  ;;  %v10563_v56 = vld [vmem:[#allocation124_spill] sm:$0xff] }
 0x5ee   :  { %3353 = vmatprep.subr.mxu0 %v10503_v55  ;;  %3424 = vmatprep.subr.mxu1 %v10504_v49  ;;  %v10564_v55 = vld [vmem:[#allocation125_spill] sm:$0xff]  ;;  %v10565_v49 = vld [vmem:[#allocation126_spill] sm:$0xff] }
 0x5ef   :  { %3354 = vmatpush1.msra.mxu0 %v10505_v2  ;;  %3425 = vmatpush1.msra.mxu1 %v10506_v61  ;;  %v10566_v2 = vld [vmem:[#allocation127_spill] sm:$0xff]  ;;  %v10567_v61 = vld [vmem:[#allocation128_spill] sm:$0xff] }
 0x5f0   :  { %3355 = vmatprep.subr.mxu0 %v10507_v60  ;;  %3426 = vmatprep.subr.mxu1 %v10508_v62  ;;  %v10568_v60 = vld [vmem:[#allocation129_spill] sm:$0xff]  ;;  %v10569_v62 = vld [vmem:[#allocation130_spill] sm:$0xff] }
 0x5f1   :  { %3356 = vmatpush1.msra.mxu0 %v10509_v51  ;;  %3427 = vmatpush1.msra.mxu1 %v10510_v48  ;;  %v10570_v51 = vld [vmem:[#allocation131_spill] sm:$0xff]  ;;  %v10571_v48 = vld [vmem:[#allocation132_spill] sm:$0xff] }
 0x5f2   :  { %3357 = vmatprep.subr.mxu0 %v10511_v50  ;;  %3428 = vmatprep.subr.mxu1 %v10512_v1  ;;  %v10572_v50 = vld [vmem:[#allocation133_spill] sm:$0xff]  ;;  %v10573_v1 = vld [vmem:[#allocation134_spill] sm:$0xff] }
 0x5f3   :  { %3358 = vmatpush1.msra.mxu0 %v10513_v54  ;;  %3429 = vmatpush1.msra.mxu1 %v10514_v47  ;;  %v10574_v54 = vld [vmem:[#allocation135_spill] sm:$0xff]  ;;  %v10575_v47 = vld [vmem:[#allocation136_spill] sm:$0xff] }
 0x5f4   :  { %3359 = vmatprep.subr.mxu0 %v10515_v3  ;;  %3430 = vmatprep.subr.mxu1 %v10516_v4  ;;  %v10576_v3 = vld [vmem:[#allocation137_spill] sm:$0xff]  ;;  %v10577_v4 = vld [vmem:[#allocation138_spill] sm:$0xff] }
 0x5f5   :  { %3360 = vmatpush1.msra.mxu0 %v10517_v5  ;;  %3431 = vmatpush1.msra.mxu1 %v10518_v6  ;;  %v10578_v5 = vld [vmem:[#allocation139_spill] sm:$0xff]  ;;  %v10579_v6 = vld [vmem:[#allocation140_spill] sm:$0xff] }
 0x5f6   :  { %3361 = vmatprep.subr.mxu0 %v10519_v7  ;;  %3432 = vmatprep.subr.mxu1 %v10520_v8  ;;  %v10580_v7 = vld [vmem:[#allocation141_spill] sm:$0xff]  ;;  %v10581_v8 = vld [vmem:[#allocation142_spill] sm:$0xff] }
 0x5f7   :  { %3362 = vmatpush1.msra.mxu0 %v10521_v9  ;;  %3433 = vmatpush1.msra.mxu1 %v10522_v10  ;;  %v10582_v9 = vld [vmem:[#allocation143_spill] sm:$0xff]  ;;  %v10583_v10 = vld [vmem:[#allocation144_spill] sm:$0xff] }
 0x5f8   :  { %3363 = vmatprep.subr.mxu0 %v10523_v22  ;;  %3434 = vmatprep.subr.mxu1 %v10524_v18  ;;  %v10584_v22 = vld [vmem:[#allocation145_spill] sm:$0xff]  ;;  %v10585_v18 = vld [vmem:[#allocation146_spill] sm:$0xff] }
 0x5f9   :  { %3364 = vmatpush1.msra.mxu0 %v10525_v16  ;;  %3435 = vmatpush1.msra.mxu1 %v10526_v19  ;;  %v10586_v16 = vld [vmem:[#allocation147_spill] sm:$0xff]  ;;  %v10587_v19 = vld [vmem:[#allocation148_spill] sm:$0xff] }
 0x5fa   :  { %3365 = vmatprep.subr.mxu0 %v10527_v29  ;;  %3436 = vmatprep.subr.mxu1 %v10528_v40  ;;  %v10588_v29 = vld [vmem:[#allocation149_spill] sm:$0xff]  ;;  %v10589_v40 = vld [vmem:[#allocation150_spill] sm:$0xff] }
 0x5fb   :  { %3366 = vmatpush1.msra.mxu0 %v10529_v20  ;;  %3437 = vmatpush1.msra.mxu1 %v10530_v21  ;;  %v10590_v20 = vld [vmem:[#allocation151_spill] sm:$0xff]  ;;  %v10591_v21 = vld [vmem:[#allocation152_spill] sm:$0xff] }
 0x5fc   :  { %3367 = vmatprep.subr.mxu0 %v10531_v27  ;;  %3438 = vmatprep.subr.mxu1 %v10532_v17  ;;  %v10592_v27 = vld [vmem:[#allocation153_spill] sm:$0xff]  ;;  %v10593_v17 = vld [vmem:[#allocation154_spill] sm:$0xff] }
 0x5fd   :  { %3368 = vmatpush1.msra.mxu0 %v10533_v25  ;;  %3439 = vmatpush1.msra.mxu1 %v10534_v24  ;;  %v10594_v25 = vld [vmem:[#allocation155_spill] sm:$0xff]  ;;  %v10595_v24 = vld [vmem:[#allocation156_spill] sm:$0xff] }
 0x5fe   :  { %3369 = vmatprep.subr.mxu0 %v10535_v14  ;;  %3440 = vmatprep.subr.mxu1 %v10536_v12  ;;  %v10596_v14 = vld [vmem:[#allocation157_spill] sm:$0xff]  ;;  %v10597_v12 = vld [vmem:[#allocation158_spill] sm:$0xff] }
 0x5ff   :  { %3370 = vmatpush1.msra.mxu0 %v10537_v13  ;;  %3441 = vmatpush1.msra.mxu1 %v10538_v28  ;;  %v10598_v13 = vld [vmem:[#allocation159_spill] sm:$0xff]  ;;  %v10599_v28 = vld [vmem:[#allocation160_spill] sm:$0xff] }
 0x600   :  { %3371 = vmatprep.subr.mxu0 %v10539_v26  ;;  %3442 = vmatprep.subr.mxu1 %v10540_v11  ;;  %v10600_v26 = vld [vmem:[#allocation161_spill] sm:$0xff]  ;;  %v10601_v11 = vld [vmem:[#allocation162_spill] sm:$0xff] }
 0x601   :  { %3372 = vmatpush2.msra.mxu0 %v10541_v30  ;;  %3443 = vmatpush2.msra.mxu1 %v10542_v31  ;;  %v10602_v30 = vld [vmem:[#allocation163_spill] sm:$0xff]  ;;  %v8066_v31 = vld [vmem:[%s9093_s1 + $0x1e8] sm:$0xff] }
 0x602   :  { %3373 = vmatprep.subr.mxu0 %v10543_v32  ;;  %3444 = vmatprep.subr.mxu1 %v10544_v33  ;;  %v8071_v32 = vld [vmem:[%s9093_s1 + $0x1f8] sm:$0xff]  ;;  %v2740_v33 = vld [vmem:[%s9095_s3] sm:$0xf] }
 0x603   :  { %3374 = vmatpush2.msra.mxu0 %v10545_v34  ;;  %3445 = vmatpush2.msra.mxu1 %v10546_v35  ;;  %v10603_v34 = vld [vmem:[#allocation13_spill] sm:$0xff] }
 0x604   :  { %3375 = vmatprep.subr.mxu0 %v10547_v37  ;;  %3446 = vmatprep.subr.mxu1 %v10548_v38  ;;  %v2745_v35 = vrot.slane %v2740_v33, %v10603_v34  ;;  %v10604_v37 = vld [vmem:[#allocation14_spill] sm:$0xff] }
 0x605   :  { %3376 = vmatpush2.msra.mxu0 %v10549_v39  ;;  %3447 = vmatpush2.msra.mxu1 %v10550_v41  ;;  %v2749_v38 = vrot.slane %v2740_v33, %v10604_v37 }
 0x606   :  { %3377 = vmatprep.subr.mxu0 %v10551_v42  ;;  %3448 = vmatprep.subr.mxu1 %v10552_v43 }
 0x607   :  { %3378 = vmatpush2.msra.mxu0 %v10553_v44  ;;  %3449 = vmatpush2.msra.mxu1 %v10554_v45 }
 0x608   :  { %3379 = vmatprep.subr.mxu0 %v10555_v46  ;;  %3450 = vmatprep.subr.mxu1 %v10556_v58  ;;  %v2753_v46 = vrot.slane %v2740_v33, %v6087_v36 }
 0x609   :  { %3380 = vmatpush2.msra.mxu0 %v10557_v52  ;;  %3451 = vmatpush2.msra.mxu1 %v10558_v59  ;;  %v10605_v59 = vld [vmem:[#allocation15_spill] sm:$0xff] }
 0x60a   :  { %3381 = vmatprep.subr.mxu0 %v10559_v63  ;;  %3452 = vmatprep.subr.mxu1 %v10560_v0  ;;  %v2757_v63 = vrot.slane %v2740_v33, %v10605_v59 }
 0x60b   :  { %3382 = vmatpush2.msra.mxu0 %v10561_v53  ;;  %3453 = vmatpush2.msra.mxu1 %v10562_v15 }
 0x60c   :  { %3383 = vmatprep.subr.mxu0 %v10563_v56  ;;  %3454 = vmatprep.subr.mxu1 %v10564_v55 }
 0x60d   :  { %3384 = vmatpush2.msra.mxu0 %v10565_v49  ;;  %3455 = vmatpush2.msra.mxu1 %v10566_v2 }
 0x60e   :  { %3385 = vmatprep.subr.mxu0 %v10567_v61  ;;  %3456 = vmatprep.subr.mxu1 %v10568_v60 }
 0x60f   :  { %3386 = vmatpush2.msra.mxu0 %v10569_v62  ;;  %3457 = vmatpush2.msra.mxu1 %v10570_v51 }
 0x610   :  { %3387 = vmatprep.subr.mxu0 %v10571_v48  ;;  %3458 = vmatprep.subr.mxu1 %v10572_v50 }
 0x611   :  { %3388 = vmatpush2.msra.mxu0 %v10573_v1  ;;  %3459 = vmatpush2.msra.mxu1 %v10574_v54 }
 0x612   :  { %3389 = vmatprep.subr.mxu0 %v10575_v47  ;;  %3460 = vmatprep.subr.mxu1 %v10576_v3  ;;  %v2904_v3 = vld [vmem:[#allocation3 + $0x2] sm:$0x3] }
 0x613   :  { %3390 = vmatpush2.msra.mxu0 %v10577_v4  ;;  %3461 = vmatpush2.msra.mxu1 %v10578_v5 }
 0x614   :  { %3391 = vmatprep.subr.mxu0 %v10579_v6  ;;  %3462 = vmatprep.subr.mxu1 %v10580_v7 }
 0x615   :  { %3392 = vmatpush2.msra.mxu0 %v10581_v8  ;;  %3463 = vmatpush2.msra.mxu1 %v10582_v9 }
 0x616   :  { %3393 = vmatprep.subr.mxu0 %v10583_v10  ;;  %3464 = vmatprep.subr.mxu1 %v10584_v22  ;;  %v4739_v22 = vld [vmem:[%s9092_s0 + $0x28] sm:$0xff] }
 0x617   :  { %3394 = vmatpush2.msra.mxu0 %v10585_v18  ;;  %3465 = vmatpush2.msra.mxu1 %v10586_v16 }
 0x618   :  { %3395 = vmatprep.subr.mxu0 %v10587_v19  ;;  %3466 = vmatprep.subr.mxu1 %v10588_v29 }
 0x619   :  { %3396 = vmatpush2.msra.mxu0 %v10589_v40  ;;  %3467 = vmatpush2.msra.mxu1 %v10590_v20 }
 0x61a   :  { %3397 = vmatprep.subr.mxu0 %v10591_v21  ;;  %3468 = vmatprep.subr.mxu1 %v10592_v27 }
 0x61b   :  { %3398 = vmatpush2.msra.mxu0 %v10593_v17  ;;  %3469 = vmatpush2.msra.mxu1 %v10594_v25 }
 0x61c   :  { %3399 = vmatprep.subr.mxu0 %v10595_v24  ;;  %3470 = vmatprep.subr.mxu1 %v10596_v14 }
 0x61d   :  { %3400 = vmatpush2.msra.mxu0 %v10597_v12  ;;  %3471 = vmatpush2.msra.mxu1 %v10598_v13  ;;  %v3167_v13 = vld [vmem:[#allocation3] sm:$0x3] }
 0x61e   :  { %3401 = vmatprep.subr.mxu0 %v10599_v28  ;;  %3472 = vmatprep.subr.mxu1 %v10600_v26 }
 0x61f   :  { %3402 = vmatpush2.msra.mxu0 %v10601_v11  ;;  %3473 = vmatpush2.msra.mxu1 %v10602_v30 }
 0x620   :  { %3579 = vmatprep.subr.mxu0 %v8066_v31  ;;  %3650 = vmatprep.subr.mxu1 %v8071_v32 }
 0x67e   :  { %v2828_v39 = vpop.f32.mrf.mxu0  ;;  %v2899_v58 = vpop.f32.mrf.mxu1 }
 0x67f   :  { %v2829_v41 = vadd.f32 %v2828_v39, %v2745_v35  ;;  %v2900_v52 = vadd.f32 %v2899_v58, %v2753_v46  ;;  %v8098_v39 = vld [vmem:[%s9093_s1 + $0x1f0] sm:$0xff]  ;;  %v8130_v46 = vld [vmem:[%s9093_s1 + $0x1b8] sm:$0xff]  ;;  %v8137_v58 = vld [vmem:[%s9093_s1 + $0x1a0] sm:$0xff] }
 0x680   :  { %v2830_v42 = vpop.f32.mrf.mxu0  ;;  %v2901_v0 = vpop.f32.mrf.mxu1 }
 0x681   :  { %v4735_v43 = vmul.f32 -1.442695, %v2829_v41  ;;  %v2831_v44 = vadd.f32 %v2830_v42, %v2749_v38  ;;  %v4737_v53 = vmul.f32 -1.442695, %v2900_v52  ;;  %v2902_v56 = vadd.f32 %v2901_v0, %v2757_v63  ;;  %v8093_v38 = vld [vmem:[%s9093_s1 + $0x1e0] sm:$0xff]  ;;  %v8103_v41 = vld [vmem:[%s9093_s1 + $0x1c8] sm:$0xff] }
 0x682   :  { %v8108_v42 = vld [vmem:[%s9093_s1 + $0x1d8] sm:$0xff]  ;;  %v8142_v52 = vld [vmem:[%s9093_s1 + $0x1b0] sm:$0xff]  ;;  %v8149_v63 = vld [vmem:[%s9093_s1 + $0x188] sm:$0xff] }
 0x683   :  { %4869 = vpow2.f32 %v4735_v43  ;;  %v4736_v45 = vmul.f32 -1.442695, %v2831_v44  ;;  %v8113_v43 = vld [vmem:[%s9093_s1 + $0x1c0] sm:$0xff]  ;;  %v8118_v44 = vld [vmem:[%s9093_s1 + $0x1d0] sm:$0xff]  ;;  %v8154_v0 = vld [vmem:[%s9093_s1 + $0x198] sm:$0xff] }
 0x685   :  { %4871 = vpow2.f32 %v4736_v45  ;;  %v8125_v45 = vld [vmem:[%s9093_s1 + $0x1a8] sm:$0xff] }
 0x686   :  { %4873 = vpow2.f32 %v4737_v53  ;;  %v8161_v53 = vld [vmem:[%s9093_s1 + $0x180] sm:$0xff] }
 0x690   :  { %v4870_v15 = vpop.eup %4869 }
 0x691   :  { %v2914_v55 = vadd.f32 1.0, %v4870_v15  ;;  %v8166_v15 = vld [vmem:[%s9093_s1 + $0x190] sm:$0xff] }
 0x692   :  { %v4872_v49 = vpop.eup %4871 }
 0x693   :  { %4875 = vrcp.f32 %v2914_v55  ;;  %v2915_v2 = vadd.f32 1.0, %v4872_v49  ;;  %v4874_v61 = vpop.eup %4873  ;;  %v8178_v55 = vld [vmem:[%s9093_s1 + $0x178] sm:$0xff]  ;;  %v8185_v49 = vld [vmem:[%s9093_s1 + $0x160] sm:$0xff] }
 0x694   :  { %4877 = vtanh.f32 %v2902_v56  ;;  %v2916_v47 = vadd.f32 1.0, %v4874_v61  ;;  %v8173_v56 = vld [vmem:[%s9093_s1 + $0x168] sm:$0xff] }
 0x695   :  { %4879 = vrcp.f32 %v2915_v2  ;;  %v8190_v2 = vld [vmem:[%s9093_s1 + $0x170] sm:$0xff]  ;;  %v8197_v61 = vld [vmem:[%s9093_s1 + $0x148] sm:$0xff] }
 0x696   :  { %4881 = vrcp.f32 %v2916_v47  ;;  %v8245_v47 = vld [vmem:[%s9093_s1 + $0x108] sm:$0xff] }
 0x69f   :  { %v3068_v60 = vpop.f32.mrf.mxu0  ;;  %v3139_v62 = vpop.f32.mrf.mxu1 }
 0x6a0   :  { %v4876_v51 = vpop.eup %4875 }
 0x6a1   :  { %v4878_v48 = vpop.eup %4877  ;;  %v3070_v50 = vpop.f32.mrf.mxu0 }
 0x6a2   :  { %v3141_v1 = vpop.f32.mrf.mxu1  ;;  %v4880_v54 = vpop.eup %4879  ;;  %v3148_v4 = vcombine.low %v3068_v60, %v3070_v50  ;;  %v2925_v7 = vmul.f32 %v4878_v48, %v4876_v51  ;;  %v8202_v60 = vld [vmem:[%s9093_s1 + $0x158] sm:$0xff]  ;;  %v8214_v51 = vld [vmem:[%s9093_s1 + $0x150] sm:$0xff]  ;;  %v8221_v48 = vld [vmem:[%s9093_s1 + $0x128] sm:$0xff] }
 0x6a3   :  { %v3149_v5 = vcombine.low %v3139_v62, %v3141_v1  ;;  %v2924_v6 = vmul.f32 %v4880_v54, %v2904_v3  ;;  %v4882_v29 = vpop.eup %4881  ;;  %v8209_v62 = vld [vmem:[%s9093_s1 + $0x140] sm:$0xff]  ;;  %v8226_v50 = vld [vmem:[%s9093_s1 + $0x138] sm:$0xff]  ;;  %v8238_v54 = vld [vmem:[%s9093_s1 + $0x130] sm:$0xff] }
 0x6a4   :  { %v3156_v8 = vrot.slane %v3148_v4, %v10005_v57  ;;  %v8233_v1 = vld [vmem:[%s9093_s1 + $0x120] sm:$0xff]  ;;  %v8250_v3 = vld [vmem:[%s9093_s1 + $0x118] sm:$0xff] }
 0x6a5   :  { %v3163_v9 = vrot.slane %v3149_v5, %v10005_v57  ;;  %v2926_v10 = vadd.f32 %v2925_v7, %v2924_v6  ;;  %v8257_v4 = vld [vmem:[%s9093_s1 + $0x100] sm:$0xff]  ;;  %v8262_v5 = vld [vmem:[%s9093_s1 + $0x110] sm:$0xff]  ;;  %v8269_v6 = vld [vmem:[%s9093_s1 + $0xe8] sm:$0xff] }
 0x6a6   :  { %v8274_v7 = vld [vmem:[%s9093_s1 + $0xf8] sm:$0xff] }
 0x6a7   :  { %v3164_v18 = vcombine.low %v3156_v8, %v3163_v9  ;;  %4883 = vtanh.f32 %v2926_v10  ;;  %2932 = vst [vmem:[#allocation3 + $0x2] sm:$0x3] %v2926_v10  ;;  %v8281_v8 = vld [vmem:[%s9093_s1 + $0xe0] sm:$0xff]  ;;  %v8286_v9 = vld [vmem:[%s9093_s1 + $0xf0] sm:$0xff]  ;;  %v8293_v10 = vld [vmem:[%s9093_s1 + $0xc8] sm:$0xff] }
 0x6a9   :  { %v3166_v16 = vadd.f32 %v4739_v22, %v3164_v18  ;;  %v8298_v22 = vld [vmem:[%s9093_s1 + $0xd8] sm:$0xff]  ;;  %v8305_v18 = vld [vmem:[%s9093_s1 + $0xc0] sm:$0xff] }
 0x6ab   :  { %v4740_v19 = vmul.f32 -1.442695, %v3166_v16  ;;  %v3175_v17 = vrot.slane %v3166_v16, 6  ;;  %v8310_v16 = vld [vmem:[%s9093_s1 + $0xd0] sm:$0xff] }
 0x6ad   :  { %4885 = vpow2.f32 %v4740_v19  ;;  %v8317_v19 = vld [vmem:[%s9093_s1 + $0xa8] sm:$0xff] }
 0x6b4   :  { %v4884_v40 = vpop.eup %4883 }
 0x6b5   :  { %v2928_v20 = vmul.f32 %v4884_v40, %v4882_v29  ;;  %v8322_v29 = vld [vmem:[%s9093_s1 + $0xb8] sm:$0xff]  ;;  %v8329_v40 = vld [vmem:[%s9093_s1 + $0xa0] sm:$0xff] }
 0x6b7   :  { %4738 = vst [vmem:[%s9098_s6 + $0x8] sm:$0x3] %v2928_v20  ;;  %2931 = vst [vmem:[#allocation2 + $0x2] sm:$0x3] %v2928_v20  ;;  %v8334_v20 = vld [vmem:[%s9093_s1 + $0xb0] sm:$0xff] }
 0x6ba   :  { %v4886_v21 = vpop.eup %4885 }
 0x6bb   :  { %v3171_v27 = vadd.f32 1.0, %v4886_v21  ;;  %v8341_v21 = vld [vmem:[%s9093_s1 + $0x88] sm:$0xff] }
 0x6bc   :  { %10606 = vst [vmem:[#allocation16_spill] sm:$0xff] %v8341_v21 }
 0x6bd   :  { %4887 = vrcp.f32 %v3171_v27  ;;  %v8346_v27 = vld [vmem:[%s9093_s1 + $0x98] sm:$0xff] }
 0x6be   :  { %4889 = vtanh.f32 %v3175_v17  ;;  %v3188_v25 = vld [vmem:[#allocation2 + $0x2] sm:$0x3]  ;;  %10607 = vst [vmem:[#allocation17_spill] sm:$0xff] %v8346_v27 }
 0x6bf   :  { %3403 = vmatprep.mubr.f32.mxu0 %v3188_v25  ;;  %3474 = vmatprep.mubr.f32.mxu1 %v3188_v25  ;;  %v8353_v17 = vld [vmem:[%s9093_s1 + $0x80] sm:$0xff]  ;;  %v8358_v25 = vld [vmem:[%s9093_s1 + $0x90] sm:$0xff] }
 0x6c0   :  { %10608 = vst [vmem:[#allocation18_spill] sm:$0xff] %v8353_v17  ;;  %10609 = vst [vmem:[#allocation19_spill] sm:$0xff] %v8358_v25 }
 0x6ca   :  { %v4888_v24 = vpop.eup %4887 }
 0x6cb   :  { %v3179_v14 = vrot.slane %v4888_v24, 2  ;;  %v4890_v12 = vpop.eup %4889  ;;  %v3185_v30 = vrot.slane %v4888_v24, 4 }
 0x6cc   :  { %v3182_v28 = vmul.f32 %v4890_v12, %v4888_v24  ;;  %v8365_v24 = vld [vmem:[%s9093_s1 + $0x68] sm:$0xff]  ;;  %v8377_v12 = vld [vmem:[%s9093_s1 + $0x60] sm:$0xff] }
 0x6cd   :  { %v3181_v26 = vmul.f32 %v3179_v14, %v3167_v13  ;;  %10610 = vst [vmem:[#allocation20_spill] sm:$0xff] %v8365_v24  ;;  %v8370_v14 = vld [vmem:[%s9093_s1 + $0x78] sm:$0xff]  ;;  %10612 = vst [vmem:[#allocation22_spill] sm:$0xff] %v8377_v12  ;;  %v8382_v13 = vld [vmem:[%s9093_s1 + $0x70] sm:$0xff] }
 0x6ce   :  { %10611 = vst [vmem:[#allocation21_spill] sm:$0xff] %v8370_v14  ;;  %10613 = vst [vmem:[#allocation23_spill] sm:$0xff] %v8382_v13 }
 0x6cf   :  { %v3183_v11 = vadd.f32 %v3182_v28, %v3181_v26  ;;  %v8389_v28 = vld [vmem:[%s9093_s1 + $0x48] sm:$0xff]  ;;  %v8394_v26 = vld [vmem:[%s9093_s1 + $0x58] sm:$0xff] }
 0x6d0   :  { %10614 = vst [vmem:[#allocation24_spill] sm:$0xff] %v8389_v28  ;;  %10615 = vst [vmem:[#allocation25_spill] sm:$0xff] %v8394_v26 }
 0x6d1   :  { %4891 = vtanh.f32 %v3183_v11  ;;  %3507 = vst [vmem:[#allocation3] sm:$0x3] %v3183_v11  ;;  %v8401_v11 = vld [vmem:[%s9093_s1 + $0x40] sm:$0xff] }
 0x6d2   :  { %10616 = vst [vmem:[#allocation26_spill] sm:$0xff] %v8401_v11 }
 0x6de   :  { %v4892_v33 = vpop.eup %4891 }
 0x6df   :  { %v3187_v35 = vmul.f32 %v4892_v33, %v3185_v30  ;;  %v8406_v30 = vld [vmem:[%s9093_s1 + $0x50] sm:$0xff]  ;;  %v8413_v33 = vld [vmem:[%s9093_s1 + $0x28] sm:$0xff] }
 0x6e0   :  { %10617 = vst [vmem:[#allocation27_spill] sm:$0xff] %v8406_v30  ;;  %10618 = vst [vmem:[#allocation28_spill] sm:$0xff] %v8413_v33 }
 0x6e1   :  { %3404 = vmatmul.mubr.f32.vlgmr.msra.gmra.mxu0 %v3187_v35  ;;  %3506 = vst [vmem:[#allocation2] sm:$0x3] %v3187_v35  ;;  %3475 = vmatmul.mubr.f32.vlgmr.msra.gmra.mxu1 %v3187_v35  ;;  %v8418_v35 = vld [vmem:[%s9093_s1 + $0x38] sm:$0xff] }
 0x6e2   :  { %3580 = vmatpush1.msra.mxu0 %v8093_v38  ;;  %3651 = vmatpush1.msra.mxu1 %v8098_v39  ;;  %10619 = vst [vmem:[#allocation29_spill] sm:$0xff] %v8418_v35 }
 0x6e3   :  { %3581 = vmatprep.subr.mxu0 %v8103_v41  ;;  %3652 = vmatprep.subr.mxu1 %v8108_v42 }
 0x6e4   :  { %3582 = vmatpush1.msra.mxu0 %v8113_v43  ;;  %3653 = vmatpush1.msra.mxu1 %v8118_v44 }
 0x6e5   :  { %3583 = vmatprep.subr.mxu0 %v8125_v45  ;;  %3654 = vmatprep.subr.mxu1 %v8130_v46 }
 0x6e6   :  { %3584 = vmatpush1.msra.mxu0 %v8137_v58  ;;  %3655 = vmatpush1.msra.mxu1 %v8142_v52 }
 0x6e7   :  { %3585 = vmatprep.subr.mxu0 %v8149_v63  ;;  %3656 = vmatprep.subr.mxu1 %v8154_v0 }
 0x6e8   :  { %3586 = vmatpush1.msra.mxu0 %v8161_v53  ;;  %3657 = vmatpush1.msra.mxu1 %v8166_v15 }
 0x6e9   :  { %3587 = vmatprep.subr.mxu0 %v8173_v56  ;;  %3658 = vmatprep.subr.mxu1 %v8178_v55 }
 0x6ea   :  { %3588 = vmatpush1.msra.mxu0 %v8185_v49  ;;  %3659 = vmatpush1.msra.mxu1 %v8190_v2 }
 0x6eb   :  { %3589 = vmatprep.subr.mxu0 %v8197_v61  ;;  %3660 = vmatprep.subr.mxu1 %v8202_v60 }
 0x6ec   :  { %3590 = vmatpush1.msra.mxu0 %v8209_v62  ;;  %3661 = vmatpush1.msra.mxu1 %v8214_v51 }
 0x6ed   :  { %3591 = vmatprep.subr.mxu0 %v8221_v48  ;;  %3662 = vmatprep.subr.mxu1 %v8226_v50 }
 0x6ee   :  { %3592 = vmatpush1.msra.mxu0 %v8233_v1  ;;  %3663 = vmatpush1.msra.mxu1 %v8238_v54 }
 0x6ef   :  { %3593 = vmatprep.subr.mxu0 %v8245_v47  ;;  %3664 = vmatprep.subr.mxu1 %v8250_v3 }
 0x6f0   :  { %3594 = vmatpush1.msra.mxu0 %v8257_v4  ;;  %3665 = vmatpush1.msra.mxu1 %v8262_v5 }
 0x6f1   :  { %3595 = vmatprep.subr.mxu0 %v8269_v6  ;;  %3666 = vmatprep.subr.mxu1 %v8274_v7 }
 0x6f2   :  { %3596 = vmatpush1.msra.mxu0 %v8281_v8  ;;  %3667 = vmatpush1.msra.mxu1 %v8286_v9 }
 0x6f3   :  { %3597 = vmatprep.subr.mxu0 %v8293_v10  ;;  %3668 = vmatprep.subr.mxu1 %v8298_v22 }
 0x6f4   :  { %3598 = vmatpush1.msra.mxu0 %v8305_v18  ;;  %3669 = vmatpush1.msra.mxu1 %v8310_v16 }
 0x6f5   :  { %3599 = vmatprep.subr.mxu0 %v8317_v19  ;;  %3670 = vmatprep.subr.mxu1 %v8322_v29 }
 0x6f6   :  { %3600 = vmatpush1.msra.mxu0 %v8329_v40  ;;  %3671 = vmatpush1.msra.mxu1 %v8334_v20 }
 0x6f7   :  { %3601 = vmatprep.subr.mxu0 %v8341_v21  ;;  %3672 = vmatprep.subr.mxu1 %v8346_v27 }
 0x6f8   :  { %3602 = vmatpush1.msra.mxu0 %v8353_v17  ;;  %3673 = vmatpush1.msra.mxu1 %v8358_v25 }
 0x6f9   :  { %3603 = vmatprep.subr.mxu0 %v8365_v24  ;;  %3674 = vmatprep.subr.mxu1 %v8370_v14  ;;  %v8750_v14 = vld [vmem:[#allocation4 + $0x2f8] sm:$0xff]  ;;  %v8766_v24 = vld [vmem:[#allocation4 + $0x2c0] sm:$0xff] }
 0x6fa   :  { %3604 = vmatpush1.msra.mxu0 %v8377_v12  ;;  %3675 = vmatpush1.msra.mxu1 %v8382_v13  ;;  %v8425_v12 = vld [vmem:[%s9093_s1 + $0x20] sm:$0xff]  ;;  %v8430_v13 = vld [vmem:[%s9093_s1 + $0x30] sm:$0xff]  ;;  %10723 = vst [vmem:[#allocation133_spill] sm:$0xff] %v8750_v14  ;;  %10728 = vst [vmem:[#allocation138_spill] sm:$0xff] %v8766_v24 }
 0x6fb   :  { %3605 = vmatprep.subr.mxu0 %v8389_v28  ;;  %3676 = vmatprep.subr.mxu1 %v8394_v26  ;;  %10620 = vst [vmem:[#allocation30_spill] sm:$0xff] %v8425_v12  ;;  %10621 = vst [vmem:[#allocation31_spill] sm:$0xff] %v8430_v13  ;;  %v8437_v28 = vld [vmem:[%s9093_s1 + $0x8] sm:$0xff]  ;;  %v8442_v26 = vld [vmem:[%s9093_s1 + $0x18] sm:$0xff] }
 0x6fc   :  { %3606 = vmatpush1.msra.mxu0 %v8401_v11  ;;  %3677 = vmatpush1.msra.mxu1 %v8406_v30  ;;  %10622 = vst [vmem:[#allocation32_spill] sm:$0xff] %v8437_v28  ;;  %10623 = vst [vmem:[#allocation33_spill] sm:$0xff] %v8442_v26  ;;  %v8449_v11 = vld [vmem:[%s9093_s1] sm:$0xff]  ;;  %v8456_v30 = vld [vmem:[%s9093_s1 + $0x10] sm:$0xff] }
 0x6fd   :  { %3607 = vmatprep.subr.mxu0 %v8413_v33  ;;  %3678 = vmatprep.subr.mxu1 %v8418_v35  ;;  %10624 = vst [vmem:[#allocation34_spill] sm:$0xff] %v8449_v11  ;;  %10625 = vst [vmem:[#allocation35_spill] sm:$0xff] %v8456_v30  ;;  %v8466_v35 = vld [vmem:[#allocation4 + $0x1f8] sm:$0xff]  ;;  %v8742_v33 = vld [vmem:[#allocation4 + $0x300] sm:$0xff] }
 0x6fe   :  { %3608 = vmatpush1.msra.mxu0 %v8425_v12  ;;  %3679 = vmatpush1.msra.mxu1 %v8430_v13  ;;  %v3514_v12 = vld [vmem:[#allocation2] sm:$0x3]  ;;  %v8464_v13 = vld [vmem:[#allocation4 + $0x1e8] sm:$0xff]  ;;  %10627 = vst [vmem:[#allocation37_spill] sm:$0xff] %v8466_v35  ;;  %10720 = vst [vmem:[#allocation130_spill] sm:$0xff] %v8742_v33 }
 0x6ff   :  { %3609 = vmatprep.subr.mxu0 %v8437_v28  ;;  %3680 = vmatprep.subr.mxu1 %v8442_v26  ;;  %10626 = vst [vmem:[#allocation36_spill] sm:$0xff] %v8464_v13  ;;  %v8470_v26 = vld [vmem:[#allocation4 + $0x1e0] sm:$0xff]  ;;  %v8734_v28 = vld [vmem:[#allocation4 + $0x330] sm:$0xff] }
 0x700   :  { %3610 = vmatpush1.msra.mxu0 %v8449_v11  ;;  %3643 = vmatprep.mubr.f32.mxu0 %v10473_v23  ;;  %10628 = vst [vmem:[#allocation38_spill] sm:$0xff] %v8470_v26  ;;  %v8472_v11 = vld [vmem:[#allocation4 + $0x1f0] sm:$0xff]  ;;  %10717 = vst [vmem:[#allocation127_spill] sm:$0xff] %v8734_v28 }
 0x701   :  { %3681 = vmatpush1.msra.mxu1 %v8456_v30  ;;  %3714 = vmatprep.mubr.f32.mxu1 %v10473_v23  ;;  %10629 = vst [vmem:[#allocation39_spill] sm:$0xff] %v8472_v11  ;;  %v8476_v30 = vld [vmem:[#allocation4 + $0x1c8] sm:$0xff]  ;;  %v8478_v23 = vld [vmem:[#allocation4 + $0x1d8] sm:$0xff] }
 0x702   :  { %3644 = vmatmul.mubr.f32.vlgmr.msra.gmra.mxu0 %v3514_v12  ;;  %3715 = vmatmul.mubr.f32.vlgmr.msra.gmra.mxu1 %v3514_v12  ;;  %10630 = vst [vmem:[#allocation40_spill] sm:$0xff] %v8476_v30  ;;  %10631 = vst [vmem:[#allocation41_spill] sm:$0xff] %v8478_v23  ;;  %v8482_v12 = vld [vmem:[#allocation4 + $0x1c0] sm:$0xff] }
 0x703   :  { %3916 = vmatprep.subr.mxu0 %v8464_v13  ;;  %3987 = vmatprep.subr.mxu1 %v8466_v35  ;;  %10632 = vst [vmem:[#allocation42_spill] sm:$0xff] %v8482_v12  ;;  %v8484_v13 = vld [vmem:[#allocation4 + $0x1d0] sm:$0xff]  ;;  %v8488_v35 = vld [vmem:[#allocation4 + $0x1a8] sm:$0xff] }
 0x704   :  { %3917 = vmatpush1.msra.mxu0 %v8470_v26  ;;  %3988 = vmatpush1.msra.mxu1 %v8472_v11  ;;  %10633 = vst [vmem:[#allocation43_spill] sm:$0xff] %v8484_v13  ;;  %10634 = vst [vmem:[#allocation44_spill] sm:$0xff] %v8488_v35  ;;  %v8490_v26 = vld [vmem:[#allocation4 + $0x1b8] sm:$0xff]  ;;  %v8494_v11 = vld [vmem:[#allocation4 + $0x1a0] sm:$0xff] }
 0x705   :  { %3918 = vmatprep.subr.mxu0 %v8476_v30  ;;  %3989 = vmatprep.subr.mxu1 %v8478_v23  ;;  %10635 = vst [vmem:[#allocation45_spill] sm:$0xff] %v8490_v26  ;;  %10636 = vst [vmem:[#allocation46_spill] sm:$0xff] %v8494_v11  ;;  %v8496_v30 = vld [vmem:[#allocation4 + $0x1b0] sm:$0xff]  ;;  %v8500_v23 = vld [vmem:[#allocation4 + $0x188] sm:$0xff] }
 0x706   :  { %3919 = vmatpush1.msra.mxu0 %v8482_v12  ;;  %3990 = vmatpush1.msra.mxu1 %v8484_v13  ;;  %10637 = vst [vmem:[#allocation47_spill] sm:$0xff] %v8496_v30  ;;  %10638 = vst [vmem:[#allocation48_spill] sm:$0xff] %v8500_v23  ;;  %v8502_v12 = vld [vmem:[#allocation4 + $0x198] sm:$0xff]  ;;  %v8506_v13 = vld [vmem:[#allocation4 + $0x180] sm:$0xff] }
 0x707   :  { %3920 = vmatprep.subr.mxu0 %v8488_v35  ;;  %3991 = vmatprep.subr.mxu1 %v8490_v26  ;;  %10639 = vst [vmem:[#allocation49_spill] sm:$0xff] %v8502_v12  ;;  %10640 = vst [vmem:[#allocation50_spill] sm:$0xff] %v8506_v13  ;;  %v8508_v35 = vld [vmem:[#allocation4 + $0x190] sm:$0xff]  ;;  %v8512_v26 = vld [vmem:[#allocation4 + $0x168] sm:$0xff] }
 0x708   :  { %3921 = vmatpush1.msra.mxu0 %v8494_v11  ;;  %3992 = vmatpush1.msra.mxu1 %v8496_v30  ;;  %10641 = vst [vmem:[#allocation51_spill] sm:$0xff] %v8508_v35  ;;  %10642 = vst [vmem:[#allocation52_spill] sm:$0xff] %v8512_v26  ;;  %v8514_v11 = vld [vmem:[#allocation4 + $0x178] sm:$0xff]  ;;  %v8518_v30 = vld [vmem:[#allocation4 + $0x160] sm:$0xff] }
 0x709   :  { %3922 = vmatprep.subr.mxu0 %v8500_v23  ;;  %3993 = vmatprep.subr.mxu1 %v8502_v12  ;;  %10643 = vst [vmem:[#allocation53_spill] sm:$0xff] %v8514_v11  ;;  %10644 = vst [vmem:[#allocation54_spill] sm:$0xff] %v8518_v30  ;;  %v8520_v23 = vld [vmem:[#allocation4 + $0x170] sm:$0xff]  ;;  %v8524_v12 = vld [vmem:[#allocation4 + $0x148] sm:$0xff] }
 0x70a   :  { %3923 = vmatpush1.msra.mxu0 %v8506_v13  ;;  %3994 = vmatpush1.msra.mxu1 %v8508_v35  ;;  %10645 = vst [vmem:[#allocation55_spill] sm:$0xff] %v8520_v23  ;;  %10646 = vst [vmem:[#allocation56_spill] sm:$0xff] %v8524_v12  ;;  %v8526_v13 = vld [vmem:[#allocation4 + $0x158] sm:$0xff]  ;;  %v8530_v35 = vld [vmem:[#allocation4 + $0x140] sm:$0xff] }
 0x70b   :  { %3924 = vmatprep.subr.mxu0 %v8512_v26  ;;  %3995 = vmatprep.subr.mxu1 %v8514_v11  ;;  %10647 = vst [vmem:[#allocation57_spill] sm:$0xff] %v8526_v13  ;;  %10648 = vst [vmem:[#allocation58_spill] sm:$0xff] %v8530_v35  ;;  %v8532_v26 = vld [vmem:[#allocation4 + $0x150] sm:$0xff]  ;;  %v8536_v11 = vld [vmem:[#allocation4 + $0x128] sm:$0xff] }
 0x70c   :  { %3925 = vmatpush1.msra.mxu0 %v8518_v30  ;;  %3996 = vmatpush1.msra.mxu1 %v8520_v23  ;;  %10649 = vst [vmem:[#allocation59_spill] sm:$0xff] %v8532_v26  ;;  %10650 = vst [vmem:[#allocation60_spill] sm:$0xff] %v8536_v11  ;;  %v8538_v30 = vld [vmem:[#allocation4 + $0x138] sm:$0xff]  ;;  %v8542_v23 = vld [vmem:[#allocation4 + $0x120] sm:$0xff] }
 0x70d   :  { %3926 = vmatprep.subr.mxu0 %v8524_v12  ;;  %3997 = vmatprep.subr.mxu1 %v8526_v13  ;;  %10651 = vst [vmem:[#allocation61_spill] sm:$0xff] %v8538_v30  ;;  %10652 = vst [vmem:[#allocation62_spill] sm:$0xff] %v8542_v23  ;;  %v8544_v12 = vld [vmem:[#allocation4 + $0x130] sm:$0xff]  ;;  %v8548_v13 = vld [vmem:[#allocation4 + $0x108] sm:$0xff] }
 0x70e   :  { %3927 = vmatpush1.msra.mxu0 %v8530_v35  ;;  %3998 = vmatpush1.msra.mxu1 %v8532_v26  ;;  %10653 = vst [vmem:[#allocation63_spill] sm:$0xff] %v8544_v12  ;;  %10654 = vst [vmem:[#allocation64_spill] sm:$0xff] %v8548_v13  ;;  %v8550_v35 = vld [vmem:[#allocation4 + $0x118] sm:$0xff]  ;;  %v8554_v26 = vld [vmem:[#allocation4 + $0x100] sm:$0xff] }
 0x70f   :  { %3928 = vmatprep.subr.mxu0 %v8536_v11  ;;  %3999 = vmatprep.subr.mxu1 %v8538_v30  ;;  %10655 = vst [vmem:[#allocation65_spill] sm:$0xff] %v8550_v35  ;;  %10656 = vst [vmem:[#allocation66_spill] sm:$0xff] %v8554_v26  ;;  %v8556_v11 = vld [vmem:[#allocation4 + $0x110] sm:$0xff]  ;;  %v8560_v30 = vld [vmem:[#allocation4 + $0xe8] sm:$0xff] }
 0x710   :  { %3929 = vmatpush1.msra.mxu0 %v8542_v23  ;;  %4000 = vmatpush1.msra.mxu1 %v8544_v12  ;;  %10657 = vst [vmem:[#allocation67_spill] sm:$0xff] %v8556_v11  ;;  %10658 = vst [vmem:[#allocation68_spill] sm:$0xff] %v8560_v30  ;;  %v8562_v23 = vld [vmem:[#allocation4 + $0xf8] sm:$0xff]  ;;  %v8566_v12 = vld [vmem:[#allocation4 + $0xe0] sm:$0xff] }
 0x711   :  { %3930 = vmatprep.subr.mxu0 %v8548_v13  ;;  %4001 = vmatprep.subr.mxu1 %v8550_v35  ;;  %10659 = vst [vmem:[#allocation69_spill] sm:$0xff] %v8562_v23  ;;  %10660 = vst [vmem:[#allocation70_spill] sm:$0xff] %v8566_v12  ;;  %v8568_v13 = vld [vmem:[#allocation4 + $0xf0] sm:$0xff]  ;;  %v8572_v35 = vld [vmem:[#allocation4 + $0xc8] sm:$0xff] }
 0x712   :  { %3931 = vmatpush1.msra.mxu0 %v8554_v26  ;;  %4002 = vmatpush1.msra.mxu1 %v8556_v11  ;;  %10661 = vst [vmem:[#allocation71_spill] sm:$0xff] %v8568_v13  ;;  %10662 = vst [vmem:[#allocation72_spill] sm:$0xff] %v8572_v35  ;;  %v8574_v26 = vld [vmem:[#allocation4 + $0xd8] sm:$0xff]  ;;  %v8578_v11 = vld [vmem:[#allocation4 + $0xc0] sm:$0xff] }
 0x713   :  { %3932 = vmatprep.subr.mxu0 %v8560_v30  ;;  %4003 = vmatprep.subr.mxu1 %v8562_v23  ;;  %10663 = vst [vmem:[#allocation73_spill] sm:$0xff] %v8574_v26  ;;  %10664 = vst [vmem:[#allocation74_spill] sm:$0xff] %v8578_v11  ;;  %v8580_v30 = vld [vmem:[#allocation4 + $0xd0] sm:$0xff]  ;;  %v8584_v23 = vld [vmem:[#allocation4 + $0xa8] sm:$0xff] }
 0x714   :  { %3933 = vmatpush1.msra.mxu0 %v8566_v12  ;;  %4004 = vmatpush1.msra.mxu1 %v8568_v13  ;;  %10665 = vst [vmem:[#allocation75_spill] sm:$0xff] %v8580_v30  ;;  %10666 = vst [vmem:[#allocation76_spill] sm:$0xff] %v8584_v23  ;;  %v8586_v12 = vld [vmem:[#allocation4 + $0xb8] sm:$0xff]  ;;  %v8590_v13 = vld [vmem:[#allocation4 + $0xa0] sm:$0xff] }
 0x715   :  { %3934 = vmatprep.subr.mxu0 %v8572_v35  ;;  %4005 = vmatprep.subr.mxu1 %v8574_v26  ;;  %10667 = vst [vmem:[#allocation77_spill] sm:$0xff] %v8586_v12  ;;  %10668 = vst [vmem:[#allocation78_spill] sm:$0xff] %v8590_v13  ;;  %v8592_v35 = vld [vmem:[#allocation4 + $0xb0] sm:$0xff]  ;;  %v8596_v26 = vld [vmem:[#allocation4 + $0x88] sm:$0xff] }
 0x716   :  { %3935 = vmatpush1.msra.mxu0 %v8578_v11  ;;  %4006 = vmatpush1.msra.mxu1 %v8580_v30  ;;  %10669 = vst [vmem:[#allocation79_spill] sm:$0xff] %v8592_v35  ;;  %10670 = vst [vmem:[#allocation80_spill] sm:$0xff] %v8596_v26  ;;  %v8598_v11 = vld [vmem:[#allocation4 + $0x98] sm:$0xff]  ;;  %v8602_v30 = vld [vmem:[#allocation4 + $0x80] sm:$0xff] }
 0x717   :  { %3936 = vmatprep.subr.mxu0 %v8584_v23  ;;  %4007 = vmatprep.subr.mxu1 %v8586_v12  ;;  %10671 = vst [vmem:[#allocation81_spill] sm:$0xff] %v8598_v11  ;;  %10672 = vst [vmem:[#allocation82_spill] sm:$0xff] %v8602_v30  ;;  %v8604_v23 = vld [vmem:[#allocation4 + $0x90] sm:$0xff]  ;;  %v8608_v12 = vld [vmem:[#allocation4 + $0x68] sm:$0xff] }
 0x718   :  { %3937 = vmatpush1.msra.mxu0 %v8590_v13  ;;  %4008 = vmatpush1.msra.mxu1 %v8592_v35  ;;  %10673 = vst [vmem:[#allocation83_spill] sm:$0xff] %v8604_v23  ;;  %10674 = vst [vmem:[#allocation84_spill] sm:$0xff] %v8608_v12  ;;  %v8610_v13 = vld [vmem:[#allocation4 + $0x78] sm:$0xff]  ;;  %v8614_v35 = vld [vmem:[#allocation4 + $0x60] sm:$0xff] }
 0x719   :  { %3938 = vmatprep.subr.mxu0 %v8596_v26  ;;  %4009 = vmatprep.subr.mxu1 %v8598_v11  ;;  %10675 = vst [vmem:[#allocation85_spill] sm:$0xff] %v8610_v13  ;;  %10676 = vst [vmem:[#allocation86_spill] sm:$0xff] %v8614_v35  ;;  %v8616_v26 = vld [vmem:[#allocation4 + $0x70] sm:$0xff]  ;;  %v8620_v11 = vld [vmem:[#allocation4 + $0x48] sm:$0xff] }
 0x71a   :  { %3939 = vmatpush1.msra.mxu0 %v8602_v30  ;;  %4010 = vmatpush1.msra.mxu1 %v8604_v23  ;;  %10677 = vst [vmem:[#allocation87_spill] sm:$0xff] %v8616_v26  ;;  %10678 = vst [vmem:[#allocation88_spill] sm:$0xff] %v8620_v11  ;;  %v8622_v30 = vld [vmem:[#allocation4 + $0x58] sm:$0xff]  ;;  %v8626_v23 = vld [vmem:[#allocation4 + $0x40] sm:$0xff] }
 0x71b   :  { %3940 = vmatprep.subr.mxu0 %v8608_v12  ;;  %4011 = vmatprep.subr.mxu1 %v8610_v13  ;;  %10679 = vst [vmem:[#allocation89_spill] sm:$0xff] %v8622_v30  ;;  %10680 = vst [vmem:[#allocation90_spill] sm:$0xff] %v8626_v23  ;;  %v8628_v12 = vld [vmem:[#allocation4 + $0x50] sm:$0xff]  ;;  %v8632_v13 = vld [vmem:[#allocation4 + $0x28] sm:$0xff] }
 0x71c   :  { %3941 = vmatpush1.msra.mxu0 %v8614_v35  ;;  %4012 = vmatpush1.msra.mxu1 %v8616_v26  ;;  %10681 = vst [vmem:[#allocation91_spill] sm:$0xff] %v8628_v12  ;;  %10682 = vst [vmem:[#allocation92_spill] sm:$0xff] %v8632_v13  ;;  %v8634_v35 = vld [vmem:[#allocation4 + $0x38] sm:$0xff]  ;;  %v8638_v26 = vld [vmem:[#allocation4 + $0x20] sm:$0xff] }
 0x71d   :  { %3942 = vmatprep.subr.mxu0 %v8620_v11  ;;  %4013 = vmatprep.subr.mxu1 %v8622_v30  ;;  %10683 = vst [vmem:[#allocation93_spill] sm:$0xff] %v8634_v35  ;;  %10684 = vst [vmem:[#allocation94_spill] sm:$0xff] %v8638_v26  ;;  %v8640_v11 = vld [vmem:[#allocation4 + $0x30] sm:$0xff]  ;;  %v8644_v30 = vld [vmem:[#allocation4 + $0x8] sm:$0xff] }
 0x71e   :  { %3943 = vmatpush1.msra.mxu0 %v8626_v23  ;;  %4014 = vmatpush1.msra.mxu1 %v8628_v12  ;;  %10685 = vst [vmem:[#allocation95_spill] sm:$0xff] %v8640_v11  ;;  %10686 = vst [vmem:[#allocation96_spill] sm:$0xff] %v8644_v30  ;;  %v8646_v23 = vld [vmem:[#allocation4 + $0x18] sm:$0xff]  ;;  %v8650_v12 = vld [vmem:[#allocation4] sm:$0xff] }
 0x71f   :  { %3944 = vmatprep.subr.mxu0 %v8632_v13  ;;  %4015 = vmatprep.subr.mxu1 %v8634_v35  ;;  %10687 = vst [vmem:[#allocation97_spill] sm:$0xff] %v8646_v23  ;;  %10688 = vst [vmem:[#allocation98_spill] sm:$0xff] %v8650_v12  ;;  %v8652_v13 = vld [vmem:[#allocation4 + $0x10] sm:$0xff]  ;;  %v8656_v35 = vld [vmem:[#allocation4 + $0x3e8] sm:$0xff] }
 0x720   :  { %3945 = vmatpush1.msra.mxu0 %v8638_v26  ;;  %4016 = vmatpush1.msra.mxu1 %v8640_v11  ;;  %10689 = vst [vmem:[#allocation99_spill] sm:$0xff] %v8652_v13  ;;  %10690 = vst [vmem:[#allocation100_spill] sm:$0xff] %v8656_v35  ;;  %v8658_v26 = vld [vmem:[#allocation4 + $0x3f8] sm:$0xff]  ;;  %v8662_v11 = vld [vmem:[#allocation4 + $0x3e0] sm:$0xff] }
 0x721   :  { %3946 = vmatprep.subr.mxu0 %v8644_v30  ;;  %4017 = vmatprep.subr.mxu1 %v8646_v23  ;;  %10691 = vst [vmem:[#allocation101_spill] sm:$0xff] %v8658_v26  ;;  %10692 = vst [vmem:[#allocation102_spill] sm:$0xff] %v8662_v11  ;;  %v8664_v30 = vld [vmem:[#allocation4 + $0x3f0] sm:$0xff]  ;;  %v8668_v23 = vld [vmem:[#allocation4 + $0x3c8] sm:$0xff] }
 0x722   :  { %3947 = vmatpush1.msra.mxu0 %v8650_v12  ;;  %4018 = vmatpush1.msra.mxu1 %v8652_v13  ;;  %10693 = vst [vmem:[#allocation103_spill] sm:$0xff] %v8664_v30  ;;  %10694 = vst [vmem:[#allocation104_spill] sm:$0xff] %v8668_v23  ;;  %v8670_v12 = vld [vmem:[#allocation4 + $0x3d8] sm:$0xff]  ;;  %v8674_v13 = vld [vmem:[#allocation4 + $0x3c0] sm:$0xff] }
 0x723   :  { %3948 = vmatprep.subr.mxu0 %v8656_v35  ;;  %4019 = vmatprep.subr.mxu1 %v8658_v26  ;;  %10695 = vst [vmem:[#allocation105_spill] sm:$0xff] %v8670_v12  ;;  %10696 = vst [vmem:[#allocation106_spill] sm:$0xff] %v8674_v13  ;;  %v8676_v35 = vld [vmem:[#allocation4 + $0x3d0] sm:$0xff]  ;;  %v8680_v26 = vld [vmem:[#allocation4 + $0x3a8] sm:$0xff] }
 0x724   :  { %3949 = vmatpush2.msra.mxu0 %v8662_v11  ;;  %4020 = vmatpush2.msra.mxu1 %v8664_v30  ;;  %10697 = vst [vmem:[#allocation107_spill] sm:$0xff] %v8676_v35  ;;  %10698 = vst [vmem:[#allocation108_spill] sm:$0xff] %v8680_v26  ;;  %v8682_v11 = vld [vmem:[#allocation4 + $0x3b8] sm:$0xff]  ;;  %v8686_v30 = vld [vmem:[#allocation4 + $0x3a0] sm:$0xff] }
 0x725   :  { %3950 = vmatprep.subr.mxu0 %v8668_v23  ;;  %4021 = vmatprep.subr.mxu1 %v8670_v12  ;;  %10699 = vst [vmem:[#allocation109_spill] sm:$0xff] %v8682_v11  ;;  %10700 = vst [vmem:[#allocation110_spill] sm:$0xff] %v8686_v30  ;;  %v8688_v23 = vld [vmem:[#allocation4 + $0x3b0] sm:$0xff]  ;;  %v8692_v12 = vld [vmem:[#allocation4 + $0x388] sm:$0xff] }
 0x726   :  { %3951 = vmatpush2.msra.mxu0 %v8674_v13  ;;  %4022 = vmatpush2.msra.mxu1 %v8676_v35  ;;  %10701 = vst [vmem:[#allocation111_spill] sm:$0xff] %v8688_v23  ;;  %10702 = vst [vmem:[#allocation112_spill] sm:$0xff] %v8692_v12  ;;  %v8694_v13 = vld [vmem:[#allocation4 + $0x398] sm:$0xff]  ;;  %v8698_v35 = vld [vmem:[#allocation4 + $0x380] sm:$0xff] }
 0x727   :  { %3952 = vmatprep.subr.mxu0 %v8680_v26  ;;  %4023 = vmatprep.subr.mxu1 %v8682_v11  ;;  %10703 = vst [vmem:[#allocation113_spill] sm:$0xff] %v8694_v13  ;;  %10704 = vst [vmem:[#allocation114_spill] sm:$0xff] %v8698_v35  ;;  %v8700_v26 = vld [vmem:[#allocation4 + $0x390] sm:$0xff]  ;;  %v8704_v11 = vld [vmem:[#allocation4 + $0x368] sm:$0xff] }
 0x728   :  { %3953 = vmatpush2.msra.mxu0 %v8686_v30  ;;  %4024 = vmatpush2.msra.mxu1 %v8688_v23  ;;  %10705 = vst [vmem:[#allocation115_spill] sm:$0xff] %v8700_v26  ;;  %10706 = vst [vmem:[#allocation116_spill] sm:$0xff] %v8704_v11  ;;  %v8706_v30 = vld [vmem:[#allocation4 + $0x378] sm:$0xff]  ;;  %v8710_v23 = vld [vmem:[#allocation4 + $0x360] sm:$0xff] }
 0x729   :  { %3954 = vmatprep.subr.mxu0 %v8692_v12  ;;  %4025 = vmatprep.subr.mxu1 %v8694_v13  ;;  %10707 = vst [vmem:[#allocation117_spill] sm:$0xff] %v8706_v30  ;;  %10708 = vst [vmem:[#allocation118_spill] sm:$0xff] %v8710_v23  ;;  %v8712_v12 = vld [vmem:[#allocation4 + $0x370] sm:$0xff]  ;;  %v8716_v13 = vld [vmem:[#allocation4 + $0x348] sm:$0xff] }
 0x72a   :  { %3955 = vmatpush2.msra.mxu0 %v8698_v35  ;;  %4026 = vmatpush2.msra.mxu1 %v8700_v26  ;;  %10709 = vst [vmem:[#allocation119_spill] sm:$0xff] %v8712_v12  ;;  %10710 = vst [vmem:[#allocation120_spill] sm:$0xff] %v8716_v13  ;;  %v8718_v35 = vld [vmem:[#allocation4 + $0x358] sm:$0xff]  ;;  %v8722_v26 = vld [vmem:[#allocation4 + $0x340] sm:$0xff] }
 0x72b   :  { %3956 = vmatprep.subr.mxu0 %v8704_v11  ;;  %4027 = vmatprep.subr.mxu1 %v8706_v30  ;;  %10711 = vst [vmem:[#allocation121_spill] sm:$0xff] %v8718_v35  ;;  %10712 = vst [vmem:[#allocation122_spill] sm:$0xff] %v8722_v26  ;;  %v8724_v11 = vld [vmem:[#allocation4 + $0x350] sm:$0xff]  ;;  %v8726_v30 = vld [vmem:[#allocation4 + $0x328] sm:$0xff] }
 0x72c   :  { %3957 = vmatpush2.msra.mxu0 %v8710_v23  ;;  %4028 = vmatpush2.msra.mxu1 %v8712_v12  ;;  %10713 = vst [vmem:[#allocation123_spill] sm:$0xff] %v8724_v11  ;;  %10714 = vst [vmem:[#allocation124_spill] sm:$0xff] %v8726_v30  ;;  %v8730_v23 = vld [vmem:[#allocation4 + $0x338] sm:$0xff]  ;;  %v8732_v12 = vld [vmem:[#allocation4 + $0x320] sm:$0xff] }
 0x72d   :  { %3958 = vmatprep.subr.mxu0 %v8716_v13  ;;  %4029 = vmatprep.subr.mxu1 %v8718_v35  ;;  %10715 = vst [vmem:[#allocation125_spill] sm:$0xff] %v8730_v23  ;;  %10716 = vst [vmem:[#allocation126_spill] sm:$0xff] %v8732_v12  ;;  %v8738_v35 = vld [vmem:[#allocation4 + $0x308] sm:$0xff]  ;;  %v8740_v13 = vld [vmem:[#allocation4 + $0x318] sm:$0xff] }
 0x72e   :  { %3959 = vmatpush2.msra.mxu0 %v8722_v26  ;;  %4030 = vmatpush2.msra.mxu1 %v8724_v11  ;;  %10718 = vst [vmem:[#allocation128_spill] sm:$0xff] %v8738_v35  ;;  %10719 = vst [vmem:[#allocation129_spill] sm:$0xff] %v8740_v13  ;;  %v8746_v11 = vld [vmem:[#allocation4 + $0x310] sm:$0xff]  ;;  %v8748_v26 = vld [vmem:[#allocation4 + $0x2e8] sm:$0xff] }
 0x72f   :  { %3960 = vmatprep.subr.mxu0 %v8726_v30  ;;  %4031 = vmatprep.subr.mxu1 %v8730_v23  ;;  %10721 = vst [vmem:[#allocation131_spill] sm:$0xff] %v8746_v11  ;;  %10722 = vst [vmem:[#allocation132_spill] sm:$0xff] %v8748_v26  ;;  %v8754_v23 = vld [vmem:[#allocation4 + $0x2e0] sm:$0xff]  ;;  %v8756_v30 = vld [vmem:[#allocation4 + $0x2f0] sm:$0xff] }
 0x730   :  { %3961 = vmatpush2.msra.mxu0 %v8732_v12  ;;  %4032 = vmatpush2.msra.mxu1 %v8734_v28  ;;  %10724 = vst [vmem:[#allocation134_spill] sm:$0xff] %v8754_v23  ;;  %10725 = vst [vmem:[#allocation135_spill] sm:$0xff] %v8756_v30  ;;  %v8760_v12 = vld [vmem:[#allocation4 + $0x2c8] sm:$0xff]  ;;  %v8762_v28 = vld [vmem:[#allocation4 + $0x2d8] sm:$0xff] }
 0x731   :  { %3962 = vmatprep.subr.mxu0 %v8738_v35  ;;  %4033 = vmatprep.subr.mxu1 %v8740_v13  ;;  %10726 = vst [vmem:[#allocation136_spill] sm:$0xff] %v8760_v12  ;;  %10727 = vst [vmem:[#allocation137_spill] sm:$0xff] %v8762_v28  ;;  %v8768_v35 = vld [vmem:[#allocation4 + $0x2d0] sm:$0xff]  ;;  %v8772_v13 = vld [vmem:[#allocation4 + $0x2a8] sm:$0xff] }
 0x732   :  { %3963 = vmatpush2.msra.mxu0 %v8742_v33  ;;  %4034 = vmatpush2.msra.mxu1 %v8746_v11  ;;  %10729 = vst [vmem:[#allocation139_spill] sm:$0xff] %v8768_v35  ;;  %10730 = vst [vmem:[#allocation140_spill] sm:$0xff] %v8772_v13  ;;  %v8774_v33 = vld [vmem:[#allocation4 + $0x2b8] sm:$0xff]  ;;  %v8778_v11 = vld [vmem:[#allocation4 + $0x2a0] sm:$0xff] }
 0x733   :  { %3964 = vmatprep.subr.mxu0 %v8748_v26  ;;  %4035 = vmatprep.subr.mxu1 %v8750_v14  ;;  %10731 = vst [vmem:[#allocation141_spill] sm:$0xff] %v8774_v33  ;;  %10732 = vst [vmem:[#allocation142_spill] sm:$0xff] %v8778_v11  ;;  %v8780_v26 = vld [vmem:[#allocation4 + $0x2b0] sm:$0xff]  ;;  %v8784_v14 = vld [vmem:[#allocation4 + $0x288] sm:$0xff] }
 0x734   :  { %3965 = vmatpush2.msra.mxu0 %v8754_v23  ;;  %4036 = vmatpush2.msra.mxu1 %v8756_v30  ;;  %10733 = vst [vmem:[#allocation143_spill] sm:$0xff] %v8780_v26  ;;  %10734 = vst [vmem:[#allocation144_spill] sm:$0xff] %v8784_v14  ;;  %v8786_v23 = vld [vmem:[#allocation4 + $0x298] sm:$0xff]  ;;  %v8790_v30 = vld [vmem:[#allocation4 + $0x280] sm:$0xff] }
 0x735   :  { %3966 = vmatprep.subr.mxu0 %v8760_v12  ;;  %4037 = vmatprep.subr.mxu1 %v8762_v28  ;;  %10735 = vst [vmem:[#allocation145_spill] sm:$0xff] %v8786_v23  ;;  %10736 = vst [vmem:[#allocation146_spill] sm:$0xff] %v8790_v30  ;;  %v8792_v12 = vld [vmem:[#allocation4 + $0x290] sm:$0xff]  ;;  %v8796_v28 = vld [vmem:[#allocation4 + $0x268] sm:$0xff] }
 0x736   :  { %3967 = vmatpush2.msra.mxu0 %v8766_v24  ;;  %4038 = vmatpush2.msra.mxu1 %v8768_v35  ;;  %10737 = vst [vmem:[#allocation147_spill] sm:$0xff] %v8792_v12  ;;  %10738 = vst [vmem:[#allocation148_spill] sm:$0xff] %v8796_v28  ;;  %v8798_v24 = vld [vmem:[#allocation4 + $0x278] sm:$0xff]  ;;  %v8802_v35 = vld [vmem:[#allocation4 + $0x260] sm:$0xff] }
 0x737   :  { %3968 = vmatprep.subr.mxu0 %v8772_v13  ;;  %4039 = vmatprep.subr.mxu1 %v8774_v33  ;;  %10739 = vst [vmem:[#allocation149_spill] sm:$0xff] %v8798_v24  ;;  %10740 = vst [vmem:[#allocation150_spill] sm:$0xff] %v8802_v35  ;;  %v8804_v13 = vld [vmem:[#allocation4 + $0x270] sm:$0xff]  ;;  %v8808_v33 = vld [vmem:[#allocation4 + $0x248] sm:$0xff] }
 0x738   :  { %3969 = vmatpush2.msra.mxu0 %v8778_v11  ;;  %4040 = vmatpush2.msra.mxu1 %v8780_v26  ;;  %10741 = vst [vmem:[#allocation151_spill] sm:$0xff] %v8804_v13  ;;  %10742 = vst [vmem:[#allocation152_spill] sm:$0xff] %v8808_v33  ;;  %v8810_v11 = vld [vmem:[#allocation4 + $0x258] sm:$0xff]  ;;  %v8814_v26 = vld [vmem:[#allocation4 + $0x240] sm:$0xff] }
 0x739   :  { %3970 = vmatprep.subr.mxu0 %v8784_v14  ;;  %4041 = vmatprep.subr.mxu1 %v8786_v23  ;;  %10743 = vst [vmem:[#allocation153_spill] sm:$0xff] %v8810_v11  ;;  %10744 = vst [vmem:[#allocation154_spill] sm:$0xff] %v8814_v26  ;;  %v8816_v14 = vld [vmem:[#allocation4 + $0x250] sm:$0xff]  ;;  %v8820_v23 = vld [vmem:[#allocation4 + $0x228] sm:$0xff] }
 0x73a   :  { %3971 = vmatpush2.msra.mxu0 %v8790_v30  ;;  %4042 = vmatpush2.msra.mxu1 %v8792_v12  ;;  %10745 = vst [vmem:[#allocation155_spill] sm:$0xff] %v8816_v14  ;;  %10746 = vst [vmem:[#allocation156_spill] sm:$0xff] %v8820_v23  ;;  %v8822_v30 = vld [vmem:[#allocation4 + $0x238] sm:$0xff]  ;;  %v8826_v12 = vld [vmem:[#allocation4 + $0x220] sm:$0xff] }
 0x73b   :  { %3972 = vmatprep.subr.mxu0 %v8796_v28  ;;  %4043 = vmatprep.subr.mxu1 %v8798_v24  ;;  %10747 = vst [vmem:[#allocation157_spill] sm:$0xff] %v8822_v30  ;;  %10748 = vst [vmem:[#allocation158_spill] sm:$0xff] %v8826_v12  ;;  %v8828_v28 = vld [vmem:[#allocation4 + $0x230] sm:$0xff]  ;;  %v8832_v24 = vld [vmem:[#allocation4 + $0x208] sm:$0xff] }
 0x73c   :  { %3973 = vmatpush2.msra.mxu0 %v8802_v35  ;;  %4044 = vmatpush2.msra.mxu1 %v8804_v13  ;;  %10749 = vst [vmem:[#allocation159_spill] sm:$0xff] %v8828_v28  ;;  %10750 = vst [vmem:[#allocation160_spill] sm:$0xff] %v8832_v24  ;;  %v8834_v35 = vld [vmem:[#allocation4 + $0x218] sm:$0xff]  ;;  %v8838_v13 = vld [vmem:[#allocation4 + $0x200] sm:$0xff] }
 0x73d   :  { %3974 = vmatprep.subr.mxu0 %v8808_v33  ;;  %4045 = vmatprep.subr.mxu1 %v8810_v11  ;;  %10751 = vst [vmem:[#allocation161_spill] sm:$0xff] %v8834_v35  ;;  %10752 = vst [vmem:[#allocation162_spill] sm:$0xff] %v8838_v13  ;;  %v8840_v33 = vld [vmem:[#allocation4 + $0x210] sm:$0xff] }
 0x73e   :  { %3975 = vmatpush2.msra.mxu0 %v8814_v26  ;;  %4046 = vmatpush2.msra.mxu1 %v8816_v14  ;;  %10753 = vst [vmem:[#allocation163_spill] sm:$0xff] %v8840_v33 }
 0x73f   :  { %3976 = vmatprep.subr.mxu0 %v8820_v23  ;;  %4047 = vmatprep.subr.mxu1 %v8822_v30  ;;  %v3317_v30 = vld [vmem:[%s9095_s3] sm:$0xf] }
 0x740   :  { %3977 = vmatpush2.msra.mxu0 %v8826_v12  ;;  %4048 = vmatpush2.msra.mxu1 %v8828_v28  ;;  %v3322_v12 = vrot.slane %v3317_v30, %v10603_v34  ;;  %v3326_v28 = vrot.slane %v3317_v30, %v10604_v37  ;;  %v3334_v11 = vrot.slane %v3317_v30, %v10605_v59 }
 0x741   :  { %3978 = vmatprep.subr.mxu0 %v8832_v24  ;;  %4049 = vmatprep.subr.mxu1 %v8834_v35 }
 0x742   :  { %3979 = vmatpush2.msra.mxu0 %v8838_v13  ;;  %4050 = vmatpush2.msra.mxu1 %v8840_v33 }
 0x743   :  { %4156 = vmatprep.subr.mxu0 %v8066_v31  ;;  %4227 = vmatprep.subr.mxu1 %v8071_v32  ;;  %v3330_v31 = vrot.slane %v3317_v30, %v6087_v36 }
 0x7a1   :  { %v3405_v23 = vpop.f32.mrf.mxu0  ;;  %v3476_v33 = vpop.f32.mrf.mxu1 }
 0x7a2   :  { %v3406_v24 = vadd.f32 %v3405_v23, %v3322_v12  ;;  %v3477_v32 = vadd.f32 %v3476_v33, %v3330_v31  ;;  %v3481_v31 = vld [vmem:[#allocation3 + $0x2] sm:$0x3] }
 0x7a3   :  { %v3407_v14 = vpop.f32.mrf.mxu0  ;;  %v3478_v25 = vpop.f32.mrf.mxu1 }
 0x7a4   :  { %v4741_v35 = vmul.f32 -1.442695, %v3406_v24  ;;  %v3408_v26 = vadd.f32 %v3407_v14, %v3326_v28  ;;  %v4743_v17 = vmul.f32 -1.442695, %v3477_v32  ;;  %v3479_v34 = vadd.f32 %v3478_v25, %v3334_v11 }
 0x7a6   :  { %4893 = vpow2.f32 %v4741_v35  ;;  %v4742_v13 = vmul.f32 -1.442695, %v3408_v26 }
 0x7a8   :  { %4895 = vpow2.f32 %v4742_v13 }
 0x7a9   :  { %4897 = vpow2.f32 %v4743_v17 }
 0x7b3   :  { %v4894_v27 = vpop.eup %4893 }
 0x7b4   :  { %v3491_v21 = vadd.f32 1.0, %v4894_v27 }
 0x7b5   :  { %v4896_v37 = vpop.eup %4895 }
 0x7b6   :  { %4899 = vrcp.f32 %v3491_v21  ;;  %v3492_v23 = vadd.f32 1.0, %v4896_v37  ;;  %v4898_v24 = vpop.eup %4897  ;;  %v4745_v21 = vld [vmem:[%s9092_s0 + $0x30] sm:$0xff] }
 0x7b7   :  { %4901 = vtanh.f32 %v3479_v34  ;;  %v3493_v30 = vadd.f32 1.0, %v4898_v24 }
 0x7b8   :  { %4903 = vrcp.f32 %v3492_v23 }
 0x7b9   :  { %4905 = vrcp.f32 %v3493_v30 }
 0x7c2   :  { %v3645_v14 = vpop.f32.mrf.mxu0  ;;  %v3716_v13 = vpop.f32.mrf.mxu1 }
 0x7c3   :  { %v4900_v28 = vpop.eup %4899 }
 0x7c4   :  { %v4902_v26 = vpop.eup %4901  ;;  %v3647_v35 = vpop.f32.mrf.mxu0 }
 0x7c5   :  { %v3718_v33 = vpop.f32.mrf.mxu1  ;;  %v4904_v12 = vpop.eup %4903  ;;  %v3725_v32 = vcombine.low %v3645_v14, %v3647_v35  ;;  %v3502_v27 = vmul.f32 %v4902_v26, %v4900_v28 }
 0x7c6   :  { %v3726_v59 = vcombine.low %v3716_v13, %v3718_v33  ;;  %v3501_v25 = vmul.f32 %v4904_v12, %v3481_v31  ;;  %v4906_v14 = vpop.eup %4905 }
 0x7c7   :  { %v3733_v17 = vrot.slane %v3725_v32, %v10005_v57  ;;  %v3744_v32 = vld [vmem:[#allocation3] sm:$0x3] }
 0x7c8   :  { %v3740_v37 = vrot.slane %v3726_v59, %v10005_v57  ;;  %v3503_v34 = vadd.f32 %v3502_v27, %v3501_v25 }
 0x7ca   :  { %v3741_v11 = vcombine.low %v3733_v17, %v3740_v37  ;;  %4907 = vtanh.f32 %v3503_v34  ;;  %3509 = vst [vmem:[#allocation3 + $0x2] sm:$0x3] %v3503_v34 }
 0x7cc   :  { %v3743_v23 = vadd.f32 %v4745_v21, %v3741_v11  ;;  %v10795_v11 = vld [vmem:[#allocation56_spill] sm:$0xff] }
 0x7ce   :  { %v4746_v24 = vmul.f32 -1.442695, %v3743_v23  ;;  %v3752_v26 = vrot.slane %v3743_v23, 6  ;;  %v10796_v23 = vld [vmem:[#allocation57_spill] sm:$0xff] }
 0x7d0   :  { %4909 = vpow2.f32 %v4746_v24  ;;  %v10797_v24 = vld [vmem:[#allocation58_spill] sm:$0xff] }
 0x7d7   :  { %v4908_v13 = vpop.eup %4907 }
 0x7d8   :  { %v3505_v35 = vmul.f32 %v4908_v13, %v4906_v14  ;;  %v10798_v14 = vld [vmem:[#allocation59_spill] sm:$0xff]  ;;  %v10799_v13 = vld [vmem:[#allocation60_spill] sm:$0xff] }
 0x7da   :  { %4744 = vst [vmem:[%s9098_s6 + $0xa] sm:$0x3] %v3505_v35  ;;  %3508 = vst [vmem:[#allocation2 + $0x2] sm:$0x3] %v3505_v35  ;;  %v10800_v35 = vld [vmem:[#allocation61_spill] sm:$0xff] }
 0x7dd   :  { %v4910_v59 = vpop.eup %4909 }
 0x7de   :  { %v3748_v28 = vadd.f32 1.0, %v4910_v59  ;;  %v10801_v59 = vld [vmem:[#allocation62_spill] sm:$0xff] }
 0x7e0   :  { %4911 = vrcp.f32 %v3748_v28  ;;  %v10802_v28 = vld [vmem:[#allocation63_spill] sm:$0xff] }
 0x7e1   :  { %4913 = vtanh.f32 %v3752_v26  ;;  %v3765_v33 = vld [vmem:[#allocation2 + $0x2] sm:$0x3]  ;;  %v10803_v26 = vld [vmem:[#allocation64_spill] sm:$0xff] }
 0x7e2   :  { %3980 = vmatprep.mubr.f32.mxu0 %v3765_v33  ;;  %4051 = vmatprep.mubr.f32.mxu1 %v3765_v33  ;;  %v10804_v33 = vld [vmem:[#allocation65_spill] sm:$0xff] }
 0x7ed   :  { %v4912_v12 = vpop.eup %4911 }
 0x7ee   :  { %v3756_v30 = vrot.slane %v4912_v12, 2  ;;  %v4914_v31 = vpop.eup %4913  ;;  %v3762_v37 = vrot.slane %v4912_v12, 4 }
 0x7ef   :  { %v3759_v25 = vmul.f32 %v4914_v31, %v4912_v12  ;;  %v10805_v12 = vld [vmem:[#allocation66_spill] sm:$0xff]  ;;  %v10807_v31 = vld [vmem:[#allocation68_spill] sm:$0xff] }
 0x7f0   :  { %v3758_v27 = vmul.f32 %v3756_v30, %v3744_v32  ;;  %v10806_v30 = vld [vmem:[#allocation67_spill] sm:$0xff]  ;;  %v10808_v32 = vld [vmem:[#allocation69_spill] sm:$0xff] }
 0x7f2   :  { %v3760_v17 = vadd.f32 %v3759_v25, %v3758_v27  ;;  %v10809_v25 = vld [vmem:[#allocation70_spill] sm:$0xff]  ;;  %v10810_v27 = vld [vmem:[#allocation71_spill] sm:$0xff] }
 0x7f4   :  { %4915 = vtanh.f32 %v3760_v17  ;;  %4084 = vst [vmem:[#allocation3] sm:$0x3] %v3760_v17  ;;  %v10811_v17 = vld [vmem:[#allocation72_spill] sm:$0xff] }
 0x801   :  { %v4916_v34 = vpop.eup %4915 }
 0x802   :  { %v3764_v21 = vmul.f32 %v4916_v34, %v3762_v37  ;;  %v10812_v37 = vld [vmem:[#allocation73_spill] sm:$0xff]  ;;  %v10813_v34 = vld [vmem:[#allocation74_spill] sm:$0xff] }
 0x804   :  { %3981 = vmatmul.mubr.f32.vlgmr.msra.gmra.mxu0 %v3764_v21  ;;  %4083 = vst [vmem:[#allocation2] sm:$0x3] %v3764_v21  ;;  %4052 = vmatmul.mubr.f32.vlgmr.msra.gmra.mxu1 %v3764_v21  ;;  %v10814_v21 = vld [vmem:[#allocation75_spill] sm:$0xff] }
 0x805   :  { %4157 = vmatpush1.msra.mxu0 %v8093_v38  ;;  %4228 = vmatpush1.msra.mxu1 %v8098_v39  ;;  %v10754_v38 = vld [vmem:[#allocation16_spill] sm:$0xff]  ;;  %v10755_v39 = vld [vmem:[#allocation17_spill] sm:$0xff] }
 0x806   :  { %4158 = vmatprep.subr.mxu0 %v8103_v41  ;;  %4229 = vmatprep.subr.mxu1 %v8108_v42  ;;  %v10756_v41 = vld [vmem:[#allocation18_spill] sm:$0xff]  ;;  %v10757_v42 = vld [vmem:[#allocation19_spill] sm:$0xff] }
 0x807   :  { %4159 = vmatpush1.msra.mxu0 %v8113_v43  ;;  %4230 = vmatpush1.msra.mxu1 %v8118_v44  ;;  %v10758_v43 = vld [vmem:[#allocation20_spill] sm:$0xff]  ;;  %v10759_v44 = vld [vmem:[#allocation21_spill] sm:$0xff] }
 0x808   :  { %4160 = vmatprep.subr.mxu0 %v8125_v45  ;;  %4231 = vmatprep.subr.mxu1 %v8130_v46  ;;  %v10760_v45 = vld [vmem:[#allocation22_spill] sm:$0xff]  ;;  %v10761_v46 = vld [vmem:[#allocation23_spill] sm:$0xff] }
 0x809   :  { %4161 = vmatpush1.msra.mxu0 %v8137_v58  ;;  %4232 = vmatpush1.msra.mxu1 %v8142_v52  ;;  %v10762_v58 = vld [vmem:[#allocation24_spill] sm:$0xff]  ;;  %v10763_v52 = vld [vmem:[#allocation25_spill] sm:$0xff] }
 0x80a   :  { %4162 = vmatprep.subr.mxu0 %v8149_v63  ;;  %4233 = vmatprep.subr.mxu1 %v8154_v0  ;;  %v10764_v63 = vld [vmem:[#allocation26_spill] sm:$0xff]  ;;  %v10765_v0 = vld [vmem:[#allocation27_spill] sm:$0xff] }
 0x80b   :  { %4163 = vmatpush1.msra.mxu0 %v8161_v53  ;;  %4234 = vmatpush1.msra.mxu1 %v8166_v15  ;;  %v10766_v53 = vld [vmem:[#allocation28_spill] sm:$0xff]  ;;  %v10767_v15 = vld [vmem:[#allocation29_spill] sm:$0xff] }
 0x80c   :  { %4164 = vmatprep.subr.mxu0 %v8173_v56  ;;  %4235 = vmatprep.subr.mxu1 %v8178_v55  ;;  %v10768_v56 = vld [vmem:[#allocation30_spill] sm:$0xff]  ;;  %v10769_v55 = vld [vmem:[#allocation31_spill] sm:$0xff] }
 0x80d   :  { %4165 = vmatpush1.msra.mxu0 %v8185_v49  ;;  %4236 = vmatpush1.msra.mxu1 %v8190_v2  ;;  %v10770_v49 = vld [vmem:[#allocation32_spill] sm:$0xff]  ;;  %v10771_v2 = vld [vmem:[#allocation33_spill] sm:$0xff] }
 0x80e   :  { %4166 = vmatprep.subr.mxu0 %v8197_v61  ;;  %4237 = vmatprep.subr.mxu1 %v8202_v60  ;;  %v10772_v61 = vld [vmem:[#allocation34_spill] sm:$0xff]  ;;  %v10773_v60 = vmov 0.0  }
 0x80f   :  { %4167 = vmatpush1.msra.mxu0 %v8209_v62  ;;  %4238 = vmatpush1.msra.mxu1 %v8214_v51  ;;  %v10774_v62 = vld [vmem:[#allocation35_spill] sm:$0xff] }
 0x810   :  { %4168 = vmatprep.subr.mxu0 %v8221_v48  ;;  %4239 = vmatprep.subr.mxu1 %v8226_v50  ;;  %v4091_v51 = vld [vmem:[#allocation2] sm:$0x3]  ;;  %v10775_v48 = vld [vmem:[#allocation36_spill] sm:$0xff]  ;;  %v10776_v50 = vld [vmem:[#allocation37_spill] sm:$0xff] }
 0x811   :  { %4169 = vmatpush1.msra.mxu0 %v8233_v1  ;;  %4240 = vmatpush1.msra.mxu1 %v8238_v54  ;;  %v10777_v1 = vld [vmem:[#allocation38_spill] sm:$0xff]  ;;  %v10778_v54 = vld [vmem:[#allocation39_spill] sm:$0xff] }
 0x812   :  { %4170 = vmatprep.subr.mxu0 %v8245_v47  ;;  %4241 = vmatprep.subr.mxu1 %v8250_v3  ;;  %v10779_v47 = vld [vmem:[#allocation40_spill] sm:$0xff]  ;;  %v10780_v3 = vld [vmem:[#allocation41_spill] sm:$0xff] }
 0x813   :  { %4171 = vmatpush1.msra.mxu0 %v8257_v4  ;;  %4242 = vmatpush1.msra.mxu1 %v8262_v5  ;;  %v10781_v4 = vld [vmem:[#allocation42_spill] sm:$0xff]  ;;  %v10782_v5 = vld [vmem:[#allocation43_spill] sm:$0xff] }
 0x814   :  { %4172 = vmatprep.subr.mxu0 %v8269_v6  ;;  %4243 = vmatprep.subr.mxu1 %v8274_v7  ;;  %v10783_v6 = vld [vmem:[#allocation44_spill] sm:$0xff]  ;;  %v10784_v7 = vld [vmem:[#allocation45_spill] sm:$0xff] }
 0x815   :  { %4173 = vmatpush1.msra.mxu0 %v8281_v8  ;;  %4244 = vmatpush1.msra.mxu1 %v8286_v9  ;;  %v10785_v8 = vld [vmem:[#allocation46_spill] sm:$0xff]  ;;  %v10786_v9 = vld [vmem:[#allocation47_spill] sm:$0xff] }
 0x816   :  { %4174 = vmatprep.subr.mxu0 %v8293_v10  ;;  %4245 = vmatprep.subr.mxu1 %v8298_v22  ;;  %v10787_v10 = vld [vmem:[#allocation48_spill] sm:$0xff]  ;;  %v10788_v22 = vld [vmem:[#allocation49_spill] sm:$0xff] }
 0x817   :  { %4175 = vmatpush1.msra.mxu0 %v8305_v18  ;;  %4246 = vmatpush1.msra.mxu1 %v8310_v16  ;;  %v10789_v18 = vld [vmem:[#allocation50_spill] sm:$0xff]  ;;  %v10790_v16 = vld [vmem:[#allocation51_spill] sm:$0xff] }
 0x818   :  { %4176 = vmatprep.subr.mxu0 %v8317_v19  ;;  %4247 = vmatprep.subr.mxu1 %v8322_v29  ;;  %v10791_v19 = vld [vmem:[#allocation52_spill] sm:$0xff]  ;;  %v10792_v29 = vld [vmem:[#allocation53_spill] sm:$0xff] }
 0x819   :  { %4177 = vmatpush1.msra.mxu0 %v8329_v40  ;;  %4248 = vmatpush1.msra.mxu1 %v8334_v20  ;;  %v10793_v40 = vld [vmem:[#allocation54_spill] sm:$0xff]  ;;  %v10794_v20 = vld [vmem:[#allocation55_spill] sm:$0xff] }
 0x81a   :  { %4178 = vmatprep.subr.mxu0 %v10754_v38  ;;  %4249 = vmatprep.subr.mxu1 %v10755_v39  ;;  %v10815_v38 = vld [vmem:[#allocation76_spill] sm:$0xff]  ;;  %v10816_v39 = vld [vmem:[#allocation77_spill] sm:$0xff] }
 0x81b   :  { %4179 = vmatpush1.msra.mxu0 %v10756_v41  ;;  %4250 = vmatpush1.msra.mxu1 %v10757_v42  ;;  %v10817_v41 = vld [vmem:[#allocation78_spill] sm:$0xff]  ;;  %v10818_v42 = vld [vmem:[#allocation79_spill] sm:$0xff] }
 0x81c   :  { %4180 = vmatprep.subr.mxu0 %v10758_v43  ;;  %4251 = vmatprep.subr.mxu1 %v10759_v44  ;;  %v10819_v43 = vld [vmem:[#allocation80_spill] sm:$0xff]  ;;  %v10820_v44 = vld [vmem:[#allocation81_spill] sm:$0xff] }
 0x81d   :  { %4181 = vmatpush1.msra.mxu0 %v10760_v45  ;;  %4252 = vmatpush1.msra.mxu1 %v10761_v46  ;;  %v10821_v45 = vld [vmem:[#allocation82_spill] sm:$0xff]  ;;  %v10822_v46 = vld [vmem:[#allocation83_spill] sm:$0xff] }
 0x81e   :  { %4182 = vmatprep.subr.mxu0 %v10762_v58  ;;  %4253 = vmatprep.subr.mxu1 %v10763_v52  ;;  %v10823_v58 = vld [vmem:[#allocation84_spill] sm:$0xff]  ;;  %v10824_v52 = vld [vmem:[#allocation85_spill] sm:$0xff] }
 0x81f   :  { %4183 = vmatpush1.msra.mxu0 %v10764_v63  ;;  %4254 = vmatpush1.msra.mxu1 %v10765_v0  ;;  %v10825_v63 = vld [vmem:[#allocation86_spill] sm:$0xff]  ;;  %v10826_v0 = vld [vmem:[#allocation87_spill] sm:$0xff] }
 0x820   :  { %4184 = vmatprep.subr.mxu0 %v10766_v53  ;;  %4255 = vmatprep.subr.mxu1 %v10767_v15  ;;  %v10827_v53 = vld [vmem:[#allocation88_spill] sm:$0xff]  ;;  %v10828_v15 = vld [vmem:[#allocation89_spill] sm:$0xff] }
 0x821   :  { %4185 = vmatpush1.msra.mxu0 %v10768_v56  ;;  %4256 = vmatpush1.msra.mxu1 %v10769_v55  ;;  %v10829_v56 = vld [vmem:[#allocation90_spill] sm:$0xff]  ;;  %v10830_v55 = vld [vmem:[#allocation91_spill] sm:$0xff] }
 0x822   :  { %4186 = vmatprep.subr.mxu0 %v10770_v49  ;;  %4257 = vmatprep.subr.mxu1 %v10771_v2  ;;  %v10831_v49 = vld [vmem:[#allocation92_spill] sm:$0xff]  ;;  %v10832_v2 = vld [vmem:[#allocation93_spill] sm:$0xff] }
 0x823   :  { %4187 = vmatpush1.msra.mxu0 %v10772_v61  ;;  %4220 = vmatprep.mubr.f32.mxu0 %v10773_v60  ;;  %v10833_v61 = vld [vmem:[#allocation94_spill] sm:$0xff] }
 0x824   :  { %4258 = vmatpush1.msra.mxu1 %v10774_v62  ;;  %4291 = vmatprep.mubr.f32.mxu1 %v10773_v60  ;;  %v10834_v60 = vld [vmem:[#allocation95_spill] sm:$0xff]  ;;  %v10835_v62 = vld [vmem:[#allocation96_spill] sm:$0xff] }
 0x825   :  { %4221 = vmatmul.mubr.f32.vlgmr.msra.gmra.mxu0 %v4091_v51  ;;  %4292 = vmatmul.mubr.f32.vlgmr.msra.gmra.mxu1 %v4091_v51  ;;  %v10836_v51 = vld [vmem:[#allocation97_spill] sm:$0xff] }
 0x826   :  { %4493 = vmatprep.subr.mxu0 %v10775_v48  ;;  %4564 = vmatprep.subr.mxu1 %v10776_v50  ;;  %v10837_v48 = vld [vmem:[#allocation98_spill] sm:$0xff]  ;;  %v10838_v50 = vld [vmem:[#allocation99_spill] sm:$0xff] }
 0x827   :  { %4494 = vmatpush1.msra.mxu0 %v10777_v1  ;;  %4565 = vmatpush1.msra.mxu1 %v10778_v54  ;;  %v10839_v1 = vld [vmem:[#allocation100_spill] sm:$0xff]  ;;  %v10840_v54 = vld [vmem:[#allocation101_spill] sm:$0xff] }
 0x828   :  { %4495 = vmatprep.subr.mxu0 %v10779_v47  ;;  %4566 = vmatprep.subr.mxu1 %v10780_v3  ;;  %v10841_v47 = vld [vmem:[#allocation102_spill] sm:$0xff]  ;;  %v10842_v3 = vld [vmem:[#allocation103_spill] sm:$0xff] }
 0x829   :  { %4496 = vmatpush1.msra.mxu0 %v10781_v4  ;;  %4567 = vmatpush1.msra.mxu1 %v10782_v5  ;;  %v10843_v4 = vld [vmem:[#allocation104_spill] sm:$0xff]  ;;  %v10844_v5 = vld [vmem:[#allocation105_spill] sm:$0xff] }
 0x82a   :  { %4497 = vmatprep.subr.mxu0 %v10783_v6  ;;  %4568 = vmatprep.subr.mxu1 %v10784_v7  ;;  %v10845_v6 = vld [vmem:[#allocation106_spill] sm:$0xff]  ;;  %v10846_v7 = vld [vmem:[#allocation107_spill] sm:$0xff] }
 0x82b   :  { %4498 = vmatpush1.msra.mxu0 %v10785_v8  ;;  %4569 = vmatpush1.msra.mxu1 %v10786_v9  ;;  %v10847_v8 = vld [vmem:[#allocation108_spill] sm:$0xff]  ;;  %v10848_v9 = vld [vmem:[#allocation109_spill] sm:$0xff] }
 0x82c   :  { %4499 = vmatprep.subr.mxu0 %v10787_v10  ;;  %4570 = vmatprep.subr.mxu1 %v10788_v22  ;;  %v10849_v10 = vld [vmem:[#allocation110_spill] sm:$0xff]  ;;  %v10850_v22 = vld [vmem:[#allocation111_spill] sm:$0xff] }
 0x82d   :  { %4500 = vmatpush1.msra.mxu0 %v10789_v18  ;;  %4571 = vmatpush1.msra.mxu1 %v10790_v16  ;;  %v10851_v18 = vld [vmem:[#allocation112_spill] sm:$0xff]  ;;  %v10852_v16 = vld [vmem:[#allocation113_spill] sm:$0xff] }
 0x82e   :  { %4501 = vmatprep.subr.mxu0 %v10791_v19  ;;  %4572 = vmatprep.subr.mxu1 %v10792_v29  ;;  %v10853_v19 = vld [vmem:[#allocation114_spill] sm:$0xff]  ;;  %v10854_v29 = vld [vmem:[#allocation115_spill] sm:$0xff] }
 0x82f   :  { %4502 = vmatpush1.msra.mxu0 %v10793_v40  ;;  %4573 = vmatpush1.msra.mxu1 %v10794_v20  ;;  %v10855_v40 = vld [vmem:[#allocation116_spill] sm:$0xff]  ;;  %v10856_v20 = vld [vmem:[#allocation117_spill] sm:$0xff] }
 0x830   :  { %4503 = vmatprep.subr.mxu0 %v10795_v11  ;;  %4574 = vmatprep.subr.mxu1 %v10796_v23  ;;  %v10857_v11 = vld [vmem:[#allocation118_spill] sm:$0xff]  ;;  %v10858_v23 = vld [vmem:[#allocation119_spill] sm:$0xff] }
 0x831   :  { %4504 = vmatpush1.msra.mxu0 %v10797_v24  ;;  %4575 = vmatpush1.msra.mxu1 %v10798_v14  ;;  %v10859_v24 = vld [vmem:[#allocation120_spill] sm:$0xff]  ;;  %v10860_v14 = vld [vmem:[#allocation121_spill] sm:$0xff] }
 0x832   :  { %4505 = vmatprep.subr.mxu0 %v10799_v13  ;;  %4576 = vmatprep.subr.mxu1 %v10800_v35  ;;  %v10861_v13 = vld [vmem:[#allocation122_spill] sm:$0xff]  ;;  %v10862_v35 = vld [vmem:[#allocation123_spill] sm:$0xff] }
 0x833   :  { %4506 = vmatpush1.msra.mxu0 %v10801_v59  ;;  %4577 = vmatpush1.msra.mxu1 %v10802_v28  ;;  %v10863_v59 = vld [vmem:[#allocation124_spill] sm:$0xff]  ;;  %v10864_v28 = vld [vmem:[#allocation125_spill] sm:$0xff] }
 0x834   :  { %4507 = vmatprep.subr.mxu0 %v10803_v26  ;;  %4578 = vmatprep.subr.mxu1 %v10804_v33  ;;  %v10865_v26 = vld [vmem:[#allocation126_spill] sm:$0xff]  ;;  %v10866_v33 = vld [vmem:[#allocation127_spill] sm:$0xff] }
 0x835   :  { %4508 = vmatpush1.msra.mxu0 %v10805_v12  ;;  %4579 = vmatpush1.msra.mxu1 %v10806_v30  ;;  %v10867_v12 = vld [vmem:[#allocation128_spill] sm:$0xff]  ;;  %v10868_v30 = vld [vmem:[#allocation129_spill] sm:$0xff] }
 0x836   :  { %4509 = vmatprep.subr.mxu0 %v10807_v31  ;;  %4580 = vmatprep.subr.mxu1 %v10808_v32  ;;  %v10869_v31 = vld [vmem:[#allocation130_spill] sm:$0xff]  ;;  %v10870_v32 = vld [vmem:[#allocation131_spill] sm:$0xff] }
 0x837   :  { %4510 = vmatpush1.msra.mxu0 %v10809_v25  ;;  %4581 = vmatpush1.msra.mxu1 %v10810_v27  ;;  %v10871_v25 = vld [vmem:[#allocation132_spill] sm:$0xff]  ;;  %v10872_v27 = vld [vmem:[#allocation133_spill] sm:$0xff] }
 0x838   :  { %4511 = vmatprep.subr.mxu0 %v10811_v17  ;;  %4582 = vmatprep.subr.mxu1 %v10812_v37  ;;  %v10873_v17 = vld [vmem:[#allocation134_spill] sm:$0xff]  ;;  %v10874_v37 = vld [vmem:[#allocation135_spill] sm:$0xff] }
 0x839   :  { %4512 = vmatpush1.msra.mxu0 %v10813_v34  ;;  %4583 = vmatpush1.msra.mxu1 %v10814_v21  ;;  %v10875_v34 = vld [vmem:[#allocation136_spill] sm:$0xff]  ;;  %v10876_v21 = vld [vmem:[#allocation137_spill] sm:$0xff] }
 0x83a   :  { %4513 = vmatprep.subr.mxu0 %v10815_v38  ;;  %4584 = vmatprep.subr.mxu1 %v10816_v39  ;;  %v10877_v38 = vld [vmem:[#allocation138_spill] sm:$0xff]  ;;  %v10878_v39 = vld [vmem:[#allocation139_spill] sm:$0xff] }
 0x83b   :  { %4514 = vmatpush1.msra.mxu0 %v10817_v41  ;;  %4585 = vmatpush1.msra.mxu1 %v10818_v42  ;;  %v10879_v41 = vld [vmem:[#allocation140_spill] sm:$0xff]  ;;  %v10880_v42 = vld [vmem:[#allocation141_spill] sm:$0xff] }
 0x83c   :  { %4515 = vmatprep.subr.mxu0 %v10819_v43  ;;  %4586 = vmatprep.subr.mxu1 %v10820_v44  ;;  %v10881_v43 = vld [vmem:[#allocation142_spill] sm:$0xff]  ;;  %v10882_v44 = vld [vmem:[#allocation143_spill] sm:$0xff] }
 0x83d   :  { %4516 = vmatpush1.msra.mxu0 %v10821_v45  ;;  %4587 = vmatpush1.msra.mxu1 %v10822_v46  ;;  %v10883_v45 = vld [vmem:[#allocation144_spill] sm:$0xff]  ;;  %v10884_v46 = vld [vmem:[#allocation145_spill] sm:$0xff] }
 0x83e   :  { %4517 = vmatprep.subr.mxu0 %v10823_v58  ;;  %4588 = vmatprep.subr.mxu1 %v10824_v52  ;;  %v10885_v58 = vld [vmem:[#allocation146_spill] sm:$0xff]  ;;  %v10886_v52 = vld [vmem:[#allocation147_spill] sm:$0xff] }
 0x83f   :  { %4518 = vmatpush1.msra.mxu0 %v10825_v63  ;;  %4589 = vmatpush1.msra.mxu1 %v10826_v0  ;;  %v10887_v63 = vld [vmem:[#allocation148_spill] sm:$0xff]  ;;  %v10888_v0 = vld [vmem:[#allocation149_spill] sm:$0xff] }
 0x840   :  { %4519 = vmatprep.subr.mxu0 %v10827_v53  ;;  %4590 = vmatprep.subr.mxu1 %v10828_v15  ;;  %v10889_v53 = vld [vmem:[#allocation150_spill] sm:$0xff]  ;;  %v10890_v15 = vld [vmem:[#allocation151_spill] sm:$0xff] }
 0x841   :  { %4520 = vmatpush1.msra.mxu0 %v10829_v56  ;;  %4591 = vmatpush1.msra.mxu1 %v10830_v55  ;;  %v10891_v56 = vld [vmem:[#allocation152_spill] sm:$0xff]  ;;  %v10892_v55 = vld [vmem:[#allocation153_spill] sm:$0xff] }
 0x842   :  { %4521 = vmatprep.subr.mxu0 %v10831_v49  ;;  %4592 = vmatprep.subr.mxu1 %v10832_v2  ;;  %v10893_v49 = vld [vmem:[#allocation154_spill] sm:$0xff]  ;;  %v10894_v2 = vld [vmem:[#allocation155_spill] sm:$0xff] }
 0x843   :  { %4522 = vmatpush1.msra.mxu0 %v10833_v61  ;;  %4593 = vmatpush1.msra.mxu1 %v10834_v60  ;;  %v10895_v61 = vld [vmem:[#allocation156_spill] sm:$0xff]  ;;  %v10896_v60 = vld [vmem:[#allocation157_spill] sm:$0xff] }
 0x844   :  { %4523 = vmatprep.subr.mxu0 %v10835_v62  ;;  %4594 = vmatprep.subr.mxu1 %v10836_v51  ;;  %v10897_v62 = vld [vmem:[#allocation158_spill] sm:$0xff]  ;;  %v10898_v51 = vld [vmem:[#allocation159_spill] sm:$0xff] }
 0x845   :  { %4524 = vmatpush1.msra.mxu0 %v10837_v48  ;;  %4595 = vmatpush1.msra.mxu1 %v10838_v50  ;;  %v10899_v48 = vld [vmem:[#allocation160_spill] sm:$0xff]  ;;  %v10900_v50 = vld [vmem:[#allocation161_spill] sm:$0xff] }
 0x846   :  { %4525 = vmatprep.subr.mxu0 %v10839_v1  ;;  %4596 = vmatprep.subr.mxu1 %v10840_v54  ;;  %v10901_v1 = vld [vmem:[#allocation162_spill] sm:$0xff]  ;;  %v10902_v54 = vld [vmem:[#allocation163_spill] sm:$0xff] }
 0x847   :  { %4526 = vmatpush2.msra.mxu0 %v10841_v47  ;;  %4597 = vmatpush2.msra.mxu1 %v10842_v3  ;;  %v3894_v47 = vld [vmem:[%s9095_s3] sm:$0xf]  ;;  %v10903_v3 = vld [vmem:[#allocation13_spill] sm:$0xff] }
 0x848   :  { %4527 = vmatprep.subr.mxu0 %v10843_v4  ;;  %4598 = vmatprep.subr.mxu1 %v10844_v5  ;;  %v3899_v4 = vrot.slane %v3894_v47, %v10903_v3  ;;  %v10904_v5 = vld [vmem:[#allocation14_spill] sm:$0xff] }
 0x849   :  { %4528 = vmatpush2.msra.mxu0 %v10845_v6  ;;  %4599 = vmatpush2.msra.mxu1 %v10846_v7  ;;  %v3903_v6 = vrot.slane %v3894_v47, %v10904_v5 }
 0x84a   :  { %4529 = vmatprep.subr.mxu0 %v10847_v8  ;;  %4600 = vmatprep.subr.mxu1 %v10848_v9 }
 0x84b   :  { %4530 = vmatpush2.msra.mxu0 %v10849_v10  ;;  %4601 = vmatpush2.msra.mxu1 %v10850_v22 }
 0x84c   :  { %4531 = vmatprep.subr.mxu0 %v10851_v18  ;;  %4602 = vmatprep.subr.mxu1 %v10852_v16  ;;  %v3907_v16 = vrot.slane %v3894_v47, %v6087_v36 }
 0x84d   :  { %4532 = vmatpush2.msra.mxu0 %v10853_v19  ;;  %4603 = vmatpush2.msra.mxu1 %v10854_v29 }
 0x84e   :  { %4533 = vmatprep.subr.mxu0 %v10855_v40  ;;  %4604 = vmatprep.subr.mxu1 %v10856_v20  ;;  %v10905_v40 = vld [vmem:[#allocation15_spill] sm:$0xff] }
 0x84f   :  { %4534 = vmatpush2.msra.mxu0 %v10857_v11  ;;  %4605 = vmatpush2.msra.mxu1 %v10858_v23  ;;  %v3911_v20 = vrot.slane %v3894_v47, %v10905_v40 }
 0x850   :  { %4535 = vmatprep.subr.mxu0 %v10859_v24  ;;  %4606 = vmatprep.subr.mxu1 %v10860_v14 }
 0x851   :  { %4536 = vmatpush2.msra.mxu0 %v10861_v13  ;;  %4607 = vmatpush2.msra.mxu1 %v10862_v35 }
 0x852   :  { %4537 = vmatprep.subr.mxu0 %v10863_v59  ;;  %4608 = vmatprep.subr.mxu1 %v10864_v28 }
 0x853   :  { %4538 = vmatpush2.msra.mxu0 %v10865_v26  ;;  %4609 = vmatpush2.msra.mxu1 %v10866_v33 }
 0x854   :  { %4539 = vmatprep.subr.mxu0 %v10867_v12  ;;  %4610 = vmatprep.subr.mxu1 %v10868_v30 }
 0x855   :  { %4540 = vmatpush2.msra.mxu0 %v10869_v31  ;;  %4611 = vmatpush2.msra.mxu1 %v10870_v32 }
 0x856   :  { %4541 = vmatprep.subr.mxu0 %v10871_v25  ;;  %4612 = vmatprep.subr.mxu1 %v10872_v27 }
 0x857   :  { %4542 = vmatpush2.msra.mxu0 %v10873_v17  ;;  %4613 = vmatpush2.msra.mxu1 %v10874_v37  ;;  %v4058_v17 = vld [vmem:[#allocation3 + $0x2] sm:$0x3] }
 0x858   :  { %4543 = vmatprep.subr.mxu0 %v10875_v34  ;;  %4614 = vmatprep.subr.mxu1 %v10876_v21 }
 0x859   :  { %4544 = vmatpush2.msra.mxu0 %v10877_v38  ;;  %4615 = vmatpush2.msra.mxu1 %v10878_v39 }
 0x85a   :  { %4545 = vmatprep.subr.mxu0 %v10879_v41  ;;  %4616 = vmatprep.subr.mxu1 %v10880_v42 }
 0x85b   :  { %4546 = vmatpush2.msra.mxu0 %v10881_v43  ;;  %4617 = vmatpush2.msra.mxu1 %v10882_v44  ;;  %v4751_v43 = vld [vmem:[%s9092_s0 + $0x38] sm:$0xff] }
 0x85c   :  { %4547 = vmatprep.subr.mxu0 %v10883_v45  ;;  %4618 = vmatprep.subr.mxu1 %v10884_v46 }
 0x85d   :  { %4548 = vmatpush2.msra.mxu0 %v10885_v58  ;;  %4619 = vmatpush2.msra.mxu1 %v10886_v52 }
 0x85e   :  { %4549 = vmatprep.subr.mxu0 %v10887_v63  ;;  %4620 = vmatprep.subr.mxu1 %v10888_v0 }
 0x85f   :  { %4550 = vmatpush2.msra.mxu0 %v10889_v53  ;;  %4621 = vmatpush2.msra.mxu1 %v10890_v15 }
 0x860   :  { %4551 = vmatprep.subr.mxu0 %v10891_v56  ;;  %4622 = vmatprep.subr.mxu1 %v10892_v55 }
 0x861   :  { %4552 = vmatpush2.msra.mxu0 %v10893_v49  ;;  %4623 = vmatpush2.msra.mxu1 %v10894_v2  ;;  %v4321_v2 = vld [vmem:[#allocation3] sm:$0x3] }
 0x862   :  { %4553 = vmatprep.subr.mxu0 %v10895_v61  ;;  %4624 = vmatprep.subr.mxu1 %v10896_v60 }
 0x863   :  { %4554 = vmatpush2.msra.mxu0 %v10897_v62  ;;  %4625 = vmatpush2.msra.mxu1 %v10898_v51 }
 0x864   :  { %4555 = vmatprep.subr.mxu0 %v10899_v48  ;;  %4626 = vmatprep.subr.mxu1 %v10900_v50 }
 0x865   :  { %4556 = vmatpush2.msra.mxu0 %v10901_v1  ;;  %4627 = vmatpush2.msra.mxu1 %v10902_v54  ;;  %v4471_v1 = vld [vmem:[%s9095_s3] sm:$0xf]  ;;  %s5028_s3 = smov [#allocation8]  }
 0x866   :  { %v4476_v54 = vrot.slane %v4471_v1, %v10903_v3  ;;  %v4480_v47 = vrot.slane %v4471_v1, %v10904_v5  ;;  %s4693_s10 = sshll.u32 %s5028_s3, 4  ;;  %s4694_s10 = int_to_ptr.vmem [resolvable:$true] %s4693_s10 }
 0x867   :  { %s4977_s11 = scalar_lea.vmem %s4694_s10, 64  ;;  %p4982_p6 = scmp.lt.s32.totalorder %s4694_s10, %s4694_s10 }
 0x868   :  { %p4978_p5 = scmp.ne.s32.totalorder %s4694_s10, %s4977_s11  ;;  %p4983_p7 = scmp.lt.s32.totalorder %s4977_s11, %s4977_s11 }
 0x86a   :  { %p4984_p8 = por %p4983_p7, %p4982_p6 }
 0x86c   :  { %p4985_p9 = pnand %p4984_p8, %p4978_p5 }
 0x8c4   :  { %v3982_v7 = vpop.f32.mrf.mxu0  ;;  %v4053_v19 = vpop.f32.mrf.mxu1 }
 0x8c5   :  { %v3983_v8 = vadd.f32 %v3982_v7, %v3899_v4  ;;  %v4054_v29 = vadd.f32 %v4053_v19, %v3907_v16  ;;  %v4488_v19 = vrot.slane %v4471_v1, %v10905_v40 }
 0x8c6   :  { %v3984_v9 = vpop.f32.mrf.mxu0  ;;  %v4055_v11 = vpop.f32.mrf.mxu1 }
 0x8c7   :  { %v4747_v10 = vmul.f32 -1.442695, %v3983_v8  ;;  %v3985_v22 = vadd.f32 %v3984_v9, %v3903_v6  ;;  %v4749_v23 = vmul.f32 -1.442695, %v4054_v29  ;;  %v4056_v14 = vadd.f32 %v4055_v11, %v3911_v20 }
 0x8c9   :  { %4917 = vpow2.f32 %v4747_v10  ;;  %v4748_v18 = vmul.f32 -1.442695, %v3985_v22  ;;  %v4484_v22 = vrot.slane %v4471_v1, %v6087_v36 }
 0x8cb   :  { %4919 = vpow2.f32 %v4748_v18 }
 0x8cc   :  { %4921 = vpow2.f32 %v4749_v23 }
 0x8d6   :  { %v4918_v24 = vpop.eup %4917 }
 0x8d7   :  { %v4068_v13 = vadd.f32 1.0, %v4918_v24 }
 0x8d8   :  { %v4920_v35 = vpop.eup %4919 }
 0x8d9   :  { %4923 = vrcp.f32 %v4068_v13  ;;  %v4069_v59 = vadd.f32 1.0, %v4920_v35  ;;  %v4922_v28 = vpop.eup %4921 }
 0x8da   :  { %4925 = vtanh.f32 %v4056_v14  ;;  %v4070_v27 = vadd.f32 1.0, %v4922_v28 }
 0x8db   :  { %4927 = vrcp.f32 %v4069_v59 }
 0x8dc   :  { %4929 = vrcp.f32 %v4070_v27 }
 0x8e5   :  { %v4222_v26 = vpop.f32.mrf.mxu0  ;;  %v4293_v33 = vpop.f32.mrf.mxu1 }
 0x8e6   :  { %v4924_v12 = vpop.eup %4923 }
 0x8e7   :  { %v4926_v30 = vpop.eup %4925  ;;  %v4224_v31 = vpop.f32.mrf.mxu0 }
 0x8e8   :  { %v4295_v32 = vpop.f32.mrf.mxu1  ;;  %v4928_v25 = vpop.eup %4927  ;;  %v4302_v37 = vcombine.low %v4222_v26, %v4224_v31  ;;  %v4079_v38 = vmul.f32 %v4926_v30, %v4924_v12 }
 0x8e9   :  { %v4303_v34 = vcombine.low %v4293_v33, %v4295_v32  ;;  %v4078_v21 = vmul.f32 %v4928_v25, %v4058_v17  ;;  %v4930_v58 = vpop.eup %4929 }
 0x8ea   :  { %v4310_v39 = vrot.slane %v4302_v37, %v10005_v57 }
 0x8eb   :  { %v4317_v41 = vrot.slane %v4303_v34, %v10005_v57  ;;  %v4080_v42 = vadd.f32 %v4079_v38, %v4078_v21 }
 0x8ed   :  { %v4318_v44 = vcombine.low %v4310_v39, %v4317_v41  ;;  %4931 = vtanh.f32 %v4080_v42  ;;  %4086 = vst [vmem:[#allocation3 + $0x2] sm:$0x3] %v4080_v42 }
 0x8ef   :  { %v4320_v45 = vadd.f32 %v4751_v43, %v4318_v44 }
 0x8f1   :  { %v4752_v46 = vmul.f32 -1.442695, %v4320_v45  ;;  %v4329_v53 = vrot.slane %v4320_v45, 6 }
 0x8f3   :  { %4933 = vpow2.f32 %v4752_v46 }
 0x8f4   :  { %v4635_v28 = vld [vmem:[#allocation3 + $0x2] sm:$0x3] }
 0x8fa   :  { %v4932_v52 = vpop.eup %4931 }
 0x8fb   :  { %v4082_v63 = vmul.f32 %v4932_v52, %v4930_v58 }
 0x8fd   :  { %4750 = vst [vmem:[%s9098_s6 + $0xc] sm:$0x3] %v4082_v63  ;;  %4085 = vst [vmem:[#allocation2 + $0x2] sm:$0x3] %v4082_v63 }
 0x900   :  { %v4934_v57 = vpop.eup %4933 }
 0x901   :  { %v4325_v0 = vadd.f32 1.0, %v4934_v57 }
 0x903   :  { %4935 = vrcp.f32 %v4325_v0 }
 0x904   :  { %4937 = vtanh.f32 %v4329_v53  ;;  %v4342_v15 = vld [vmem:[#allocation2 + $0x2] sm:$0x3] }
 0x905   :  { %4557 = vmatprep.mubr.f32.mxu0 %v4342_v15  ;;  %4628 = vmatprep.mubr.f32.mxu1 %v4342_v15 }
 0x910   :  { %v4936_v56 = vpop.eup %4935 }
 0x911   :  { %v4333_v55 = vrot.slane %v4936_v56, 2  ;;  %v4938_v49 = vpop.eup %4937  ;;  %v4339_v51 = vrot.slane %v4936_v56, 4 }
 0x912   :  { %v4336_v61 = vmul.f32 %v4938_v49, %v4936_v56 }
 0x913   :  { %v4335_v60 = vmul.f32 %v4333_v55, %v4321_v2 }
 0x915   :  { %v4337_v62 = vadd.f32 %v4336_v61, %v4335_v60 }
 0x917   :  { %4939 = vtanh.f32 %v4337_v62  ;;  %4661 = vst [vmem:[#allocation3] sm:$0x3] %v4337_v62 }
 0x924   :  { %v4940_v48 = vpop.eup %4939 }
 0x925   :  { %v4341_v50 = vmul.f32 %v4940_v48, %v4339_v51 }
 0x927   :  { %4558 = vmatmul.mubr.f32.vlgmr.msra.gmra.mxu0 %v4341_v50  ;;  %4660 = vst [vmem:[#allocation2] sm:$0x3] %v4341_v50  ;;  %4629 = vmatmul.mubr.f32.vlgmr.msra.gmra.mxu1 %v4341_v50 }
 0x9e7   :  { %v4559_v4 = vpop.f32.mrf.mxu0  ;;  %v4630_v18 = vpop.f32.mrf.mxu1 }
 0x9e8   :  { %v4560_v6 = vadd.f32 %v4559_v4, %v4476_v54  ;;  %v4631_v16 = vadd.f32 %v4630_v18, %v4484_v22 }
 0x9e9   :  { %v4561_v7 = vpop.f32.mrf.mxu0  ;;  %v4632_v29 = vpop.f32.mrf.mxu1 }
 0x9ea   :  { %v4753_v8 = vmul.f32 -1.442695, %v4560_v6  ;;  %v4562_v9 = vadd.f32 %v4561_v7, %v4480_v47  ;;  %v4755_v20 = vmul.f32 -1.442695, %v4631_v16  ;;  %v4633_v3 = vadd.f32 %v4632_v29, %v4488_v19 }
 0x9ec   :  { %4941 = vpow2.f32 %v4753_v8  ;;  %v4754_v10 = vmul.f32 -1.442695, %v4562_v9 }
 0x9ee   :  { %4943 = vpow2.f32 %v4754_v10 }
 0x9ef   :  { %4945 = vpow2.f32 %v4755_v20 }
 0x9f9   :  { %v4942_v11 = vpop.eup %4941 }
 0x9fa   :  { %v4645_v23 = vadd.f32 1.0, %v4942_v11 }
 0x9fb   :  { %v4944_v5 = vpop.eup %4943 }
 0x9fc   :  { %4947 = vrcp.f32 %v4645_v23  ;;  %v4646_v24 = vadd.f32 1.0, %v4944_v5  ;;  %v4946_v14 = vpop.eup %4945 }
 0x9fd   :  { %4949 = vtanh.f32 %v4633_v3  ;;  %v4647_v36 = vadd.f32 1.0, %v4946_v14 }
 0x9fe   :  { %4951 = vrcp.f32 %v4646_v24 }
 0x9ff   :  { %4953 = vrcp.f32 %v4647_v36 }
 0xa09   :  { %v4948_v13 = vpop.eup %4947 }
 0xa0a   :  { %v4950_v35 = vpop.eup %4949 }
 0xa0b   :  { %v4952_v59 = vpop.eup %4951  ;;  %v4656_v33 = vmul.f32 %v4950_v35, %v4948_v13 }
 0xa0c   :  { %v4655_v26 = vmul.f32 %v4952_v59, %v4635_v28 }
 0xa0e   :  { %v4657_v40 = vadd.f32 %v4656_v33, %v4655_v26 }
 0xa10   :  { %4955 = vtanh.f32 %v4657_v40  ;;  %4663 = vst [vmem:[#allocation3 + $0x2] sm:$0x3] %v4657_v40 }
 0xa17   :  { %v4670_v12 = vld [vmem:[#allocation3] sm:$0xf]  }
 0xa18   :  { %4672 = vst [vmem:[#allocation8] sm:$0xf] %v4670_v12  }
 0xa19   :  { %4988 = shalt.err (!%p4985_p9)
}
 0xa1a   :  { %s5029_s5 = smov 2   ;;  %v4954_v30 = vpop.eup %4953  ;;  %s5030_s15 = smov [#allocation7]  }
 0xa1b   :  { %4699 = dma.vmem_to_hbm [thread:$0]  %s4694_s10, 64, %s9100_s8, [#allocation9], %s5025_s9, %s5025_s9, %s5029_s5  }
 0xa1c   :  { %s4681_s16 = sshll.u32 %s5030_s15, 4  ;;  %s4682_s16 = int_to_ptr.vmem [resolvable:$true] %s4681_s16 }
 0xa1d   :  { %v4956_v31 = vpop.eup %4955  ;;  %s4997_s17 = scalar_lea.vmem %s4682_s16, 64  ;;  %p5002_p11 = scmp.lt.s32.totalorder %s4682_s16, %s4682_s16 }
 0xa1e   :  { %v4659_v32 = vmul.f32 %v4956_v31, %v4954_v30  ;;  %p4998_p10 = scmp.ne.s32.totalorder %s4682_s16, %s4997_s17  ;;  %p5003_p12 = scmp.lt.s32.totalorder %s4997_s17, %s4997_s17 }
 0xa20   :  { %4756 = vst [vmem:[%s9098_s6 + $0xe] sm:$0x3] %v4659_v32  ;;  %4662 = vst [vmem:[#allocation2 + $0x2] sm:$0x3] %v4659_v32  ;;  %p5004_p13 = por %p5003_p12, %p5002_p11 }
 0xa22   :  { %p5005_p0 = pnand %p5004_p13, %p4998_p10 }
 0xa27   :  { %v4666_v25 = vld [vmem:[#allocation2] sm:$0xf]  }
 0xa28   :  { %4668 = vst [vmem:[#allocation7] sm:$0xf] %v4666_v25  }
 0xa29   :  { %5008 = shalt.err (!%p5005_p0)
}
 0xa2a   :  { %4687 = dma.vmem_to_hbm [thread:$0]  %s4682_s16, 64, %s9099_s7, [#allocation6], %s5025_s9, %s5025_s9, %s5029_s5  }
 0xa2b   :  { %5019 = dma.done.wait [#allocation6], 64  }
 0xa2c   :  { %5020 = vsyncadd [#allocation6], 4294967232 }
 0xa2d   :  { %5021 = dma.done.wait [#allocation9], 64  }
 0xa2e   :  { %5022 = vsyncadd [#allocation9], 4294967232 }
 0xa2f   :  { %4708 = vsyncpa [#allocation5], 1 }
 0xa30   :  { %4709 = vsyncpa [#allocation6], 1 }
 0xa31   :  { %4710 = vsyncpa [#allocation9], 1 }

</bundles_post_ra>
